<compile_context>
chip_gen: v7x
topology: tpu7x:2x2x1
jax: 0.10.0
libtpu: 0.0.40
codegen_flags: <defaults>
</compile_context>

<pallas_src>
import math

import jax
import jax.numpy as jnp
from jax.experimental import pallas as pl
from jax.experimental.pallas import tpu as pltpu

BN_EPS = 1e-3
TM_MLP = 512     # row-tile cap for the plain fused MLP kernels
TM_POOL = 1024   # row-tile cap (over points) for the pooled SetConv kernels


# ---------------------------------------------------------------------------
# small shape helpers (static Python ints only -> jit-safe)
# ---------------------------------------------------------------------------
def _round_up(x, m):
    return ((x + m - 1) // m) * m


def _pad_axis(x, axis, mult):
    size = x.shape[axis]
    pad = (-size) % mult
    if pad == 0:
        return x
    widths = [(0, 0)] * x.ndim
    widths[axis] = (0, pad)
    return jnp.pad(x, widths)


def _pick_tm(P, cap, min_steps):
    """Row tile: big enough to amortize per-step overhead, small enough to
    give >= min_steps grid steps so v7x's 2 TensorCores both get work."""
    tm = _round_up(max(8, -(-P // min_steps)), 16)
    return int(max(16, min(cap, tm)))


def _prep_stack(ws, bs, cin_p):
    """Pad first-layer input rows to the padded Cin and the *last* layer's
    output channels to a multiple of 128 (lane-dense stores); cast weights to
    bf16, biases to f32 row vectors."""
    nl = len(ws)
    wl, bl = [], []
    for i, (w, b) in enumerate(zip(ws, bs)):
        if i == 0 and w.shape[0] != cin_p:
            w = jnp.pad(w, ((0, cin_p - w.shape[0]), (0, 0)))
        if i == nl - 1:
            cpad = (-w.shape[1]) % 128
            if cpad:
                w = jnp.pad(w, ((0, 0), (0, cpad)))
                b = jnp.pad(b, ((0, cpad),))
        wl.append(w.astype(jnp.bfloat16))
        bl.append(b.astype(jnp.float32).reshape(1, -1))
    return wl, bl


# ---------------------------------------------------------------------------
# Pallas kernel 1: fused MLP stack (1x1 conv + folded BN + ReLU chained)
# ---------------------------------------------------------------------------
def _make_fused_mlp_kernel(num_layers, relu_flags):
    def kernel(*refs):
        x_ref = refs[0]
        w_refs = refs[1:1 + num_layers]
        b_refs = refs[1 + num_layers:1 + 2 * num_layers]
        o_ref = refs[1 + 2 * num_layers]

        h = x_ref[...]                                    # bf16 (tm, Cin_p)
        for li in range(num_layers):
            acc = jnp.dot(h, w_refs[li][...],
                          preferred_element_type=jnp.float32)
            acc = acc + b_refs[li][...]
            if relu_flags[li]:
                acc = jnp.maximum(acc, 0.0)
            # re-cast to bf16 between layers (halves spill traffic, and the
            # next MXU matmul needs bf16 operands anyway)
            h = acc.astype(jnp.bfloat16) if li + 1 < num_layers else acc
        o_ref[...] = h.astype(o_ref.dtype)

    return kernel


def fused_mlp(rows, ws, bs, relu_flags, out_dtype=jnp.bfloat16,
              tm_cap=TM_MLP, min_steps=4):
    """rows: (P, Cin).  Runs the whole conv/bn/relu stack in one pallas_call.
    Returns (P, Cout) in out_dtype."""
    P, Cin = rows.shape
    nl = len(ws)
    tm = _pick_tm(P, tm_cap, min_steps)

    rows_p = _pad_axis(_pad_axis(rows.astype(jnp.bfloat16), 1, 8), 0, tm)
    Pp, Cin_p = rows_p.shape
    wl, bl = _prep_stack(ws, bs, Cin_p)
    Cout = ws[-1].shape[1]
    Cout_p = wl[-1].shape[1]

    in_specs = [pl.BlockSpec((tm, Cin_p), lambda i: (i, 0))]
    for w in wl:
        in_specs.append(pl.BlockSpec(w.shape, lambda i: (0, 0)))   # VMEM-resident
    for b in bl:
        in_specs.append(pl.BlockSpec(b.shape, lambda i: (0, 0)))

    kern = _make_fused_mlp_kernel(nl, tuple(relu_flags))
    out = pl.pallas_call(
        kern,
        out_shape=jax.ShapeDtypeStruct((Pp, Cout_p), out_dtype),
        grid=(Pp // tm,),
        in_specs=in_specs,
        out_specs=pl.BlockSpec((tm, Cout_p), lambda i: (i, 0)),
        compiler_params=pltpu.CompilerParams(dimension_semantics=("parallel",)),
    )(rows_p, *wl, *bl)
    return out[:P, :Cout]


# ---------------------------------------------------------------------------
# Pallas kernel 2: fused MLP + max-over-k pool.  Input is laid out (k, P, Cin)
# and k is an extra 'arbitrary' grid axis; the pool is a VPU max-accumulate
# into a VMEM f32 scratch (no sublane-crossing reshape/reduce).
# ---------------------------------------------------------------------------
def _make_fused_mlp_pool_kernel(num_layers, relu_flags):
    def kernel(*refs):
        x_ref = refs[0]
        w_refs = refs[1:1 + num_layers]
        b_refs = refs[1 + num_layers:1 + 2 * num_layers]
        o_ref = refs[1 + 2 * num_layers]
        acc_ref = refs[2 + 2 * num_layers]

        h = x_ref[0]                                      # bf16 (tm, Cin_p)
        for li in range(num_layers):
            a = jnp.dot(h, w_refs[li][...],
                        preferred_element_type=jnp.float32)
            a = a + b_refs[li][...]
            if relu_flags[li]:
                a = jnp.maximum(a, 0.0)
            h = a.astype(jnp.bfloat16) if li + 1 < num_layers else a

        j = pl.program_id(1)

        @pl.when(j == 0)
        def _():
            acc_ref[...] = h

        @pl.when(j > 0)
        def _():
            acc_ref[...] = jnp.maximum(acc_ref[...], h)

        @pl.when(j == pl.num_programs(1) - 1)
        def _():
            o_ref[...] = acc_ref[...].astype(o_ref.dtype)

    return kernel


def fused_mlp_pool(rows3, ws, bs, tm_cap=TM_POOL, min_steps=2):
    """rows3: (k, P, Cin).  Returns the max-over-k of the stack output,
    (P, Cout) bf16."""
    k, P, Cin = rows3.shape
    nl = len(ws)
    tm = _pick_tm(P, tm_cap, min_steps)

    rows_p = _pad_axis(_pad_axis(rows3.astype(jnp.bfloat16), 2, 8), 1, tm)
    _, Pp, Cin_p = rows_p.shape
    wl, bl = _prep_stack(ws, bs, Cin_p)
    Cout = ws[-1].shape[1]
    Cout_p = wl[-1].shape[1]

    in_specs = [pl.BlockSpec((1, tm, Cin_p), lambda i, j: (j, i, 0))]
    for w in wl:
        in_specs.append(pl.BlockSpec(w.shape, lambda i, j: (0, 0)))
    for b in bl:
        in_specs.append(pl.BlockSpec(b.shape, lambda i, j: (0, 0)))

    kern = _make_fused_mlp_pool_kernel(nl, (True,) * nl)
    out = pl.pallas_call(
        kern,
        out_shape=jax.ShapeDtypeStruct((Pp, Cout_p), jnp.bfloat16),
        grid=(Pp // tm, k),
        in_specs=in_specs,
        out_specs=pl.BlockSpec((tm, Cout_p), lambda i, j: (i, 0)),
        scratch_shapes=[pltpu.VMEM((tm, Cout_p), jnp.float32)],
        compiler_params=pltpu.CompilerParams(
            dimension_semantics=("parallel", "arbitrary")),
    )(rows_p, *wl, *bl)
    return out[:P, :Cout]


# ---------------------------------------------------------------------------
# Pallas kernel 3: pairwise *squared* Euclidean distance, tiled over queries.
# RHS pre-transposed to (D, Nb) (lane-dense, MXU-natural); row norms of the
# source set are computed once and streamed in.
# ---------------------------------------------------------------------------
def _sqdist_kernel(a_ref, bt_ref, bb_ref, o_ref):
    a = a_ref[0]                                          # (ta, Dp)
    bt = bt_ref[0]                                        # (Dp, Nbp)
    bb = bb_ref[0]                                        # (1, Nbp)
    aa = jnp.sum(a * a, axis=1, keepdims=True)            # (ta, 1)
    inner = jax.lax.dot_general(
        a, bt, (((1,), (0,)), ((), ())), preferred_element_type=jnp.float32)
    o_ref[0] = jnp.maximum(aa + bb - 2.0 * inner, 0.0)


def pairwise_sqdist(a, b):
    """a: (B, Na, D), b: (B, Nb, D) -> squared distances (B, Na, Nb)."""
    B, Na, _ = a.shape
    Nb = b.shape[1]
    ap = _pad_axis(a.astype(jnp.float32), 2, 8)
    bt = _pad_axis(jnp.transpose(b.astype(jnp.float32), (0, 2, 1)), 1, 8)
    bt = _pad_axis(bt, 2, 128)                            # lane-dense Nb
    Dp = ap.shape[2]
    Nbp = bt.shape[2]
    bb = jnp.sum(bt * bt, axis=1, keepdims=True)          # (B, 1, Nbp), hoisted

    ta = min(256, _round_up(Na, 8))
    ap = _pad_axis(ap, 1, ta)
    Nap = ap.shape[1]

    out = pl.pallas_call(
        _sqdist_kernel,
        out_shape=jax.ShapeDtypeStruct((B, Nap, Nbp), jnp.float32),
        grid=(B, Nap // ta),
        in_specs=[
            pl.BlockSpec((1, ta, Dp), lambda i, j: (i, j, 0)),
            pl.BlockSpec((1, Dp, Nbp), lambda i, j: (i, 0, 0)),
            pl.BlockSpec((1, 1, Nbp), lambda i, j: (i, 0, 0)),
        ],
        out_specs=pl.BlockSpec((1, ta, Nbp), lambda i, j: (i, j, 0)),
        compiler_params=pltpu.CompilerParams(
            dimension_semantics=("parallel", "parallel")),
    )(ap, bt, bb)
    return out[:, :Na, :Nb]


# ---------------------------------------------------------------------------
# graph / interpolation glue (gathers and top-k stay in plain JAX)
# TODO(synk): streaming in-kernel top-k + scalar-prefetched DMA gather would
# avoid materializing (B,N,N) distances and the (B,N,k,C) gathered rows.
# ---------------------------------------------------------------------------
def knn_idx(points, k):
    pt = jnp.transpose(points, (0, 2, 1))                 # (B, N, 3)
    d2 = pairwise_sqdist(pt, pt)
    _, idx = jax.lax.top_k(-d2, k)                        # k nearest (self first)
    return idx


def get_graph_feature(points, k):
    B, C, N = points.shape
    idx = knn_idx(points, k)                              # (B, N, k)
    xt = jnp.transpose(points, (0, 2, 1))                 # (B, N, C)
    nbr = jax.vmap(lambda f, i: f[i])(xt, idx)            # (B, N, k, C)
    ctr = jnp.broadcast_to(xt[:, :, None, :], nbr.shape)
    return jnp.concatenate([nbr - ctr, ctr], axis=-1)     # (B, N, k, 2C)


def knn_interpolate(q_pts_t, s_pts_t, s_feats_t, k):
    """Inverse-distance weighted k-NN interpolation (shared by FE/UpConv/FP)."""
    d2 = pairwise_sqdist(q_pts_t, s_pts_t)                # (B, Nq, Ns) squared
    neg_v, ind = jax.lax.top_k(-d2, k)                    # smallest sq-distances
    dk = jnp.sqrt(jnp.maximum(-neg_v, 0.0))               # sqrt only on k values
    inv = 1.0 / (dk + 1e-10)
    w = inv / jnp.sum(inv, axis=-1, keepdims=True)
    g = jax.vmap(lambda f, i: f[i])(s_feats_t, ind)       # (B, Nq, k, C)
    return jnp.sum(g.astype(jnp.float32) * w[..., None], axis=2)


# ---------------------------------------------------------------------------
# module forwards
# ---------------------------------------------------------------------------
def set_conv_forward(stack, num_points, k, points, features):
    # `features` is unused, exactly like the reference SetConv.forward.
    del features
    B, C, N = points.shape
    # literal reference: randperm over the *channel* axis (size 3); identity draw.
    fps_idx = jnp.arange(C)[:num_points]
    new_points = points[:, fps_idx, :]
    graph = get_graph_feature(points, k)                  # (B, N, k, 2C)
    # lay rows out as (k, B*N, 2C) so the max-over-k is a grid reduction axis.
    rows3 = jnp.transpose(graph, (2, 0, 1, 3)).reshape(k, B * N, 2 * C)
    pooled = fused_mlp_pool(rows3.astype(jnp.bfloat16), stack["ws"], stack["bs"])
    feat = pooled.reshape(B, N, -1)
    return new_points, jnp.transpose(feat, (0, 2, 1))     # (B, Cout, N) bf16


def _mlp_on_features(stack, feats_bnc, relu_last=True, out_dtype=jnp.bfloat16):
    B, N2, C = feats_bnc.shape
    rows = feats_bnc.reshape(B * N2, C).astype(jnp.bfloat16)
    nl = len(stack["ws"])
    relu_flags = (True,) * (nl - 1) + (relu_last,)
    y = fused_mlp(rows, stack["ws"], stack["bs"], relu_flags, out_dtype=out_dtype)
    return jnp.transpose(y.reshape(B, N2, -1), (0, 2, 1))


def flow_embedding_forward(stack, k, points1, points2, features1, features2):
    p2t = jnp.transpose(points2, (0, 2, 1))
    p1t = jnp.transpose(points1, (0, 2, 1))
    f1t = jnp.transpose(features1, (0, 2, 1))
    interp = knn_interpolate(p2t, p1t, f1t, k).astype(jnp.bfloat16)
    new = jnp.concatenate(
        [interp, jnp.transpose(features2, (0, 2, 1)).astype(jnp.bfloat16)], axis=-1)
    return _mlp_on_features(stack, new)


def set_upconv_forward(stack, k, points1, points2, features1, features2,
                       skip_features=None):
    p2t = jnp.transpose(points2, (0, 2, 1))
    p1t = jnp.transpose(points1, (0, 2, 1))
    f1t = jnp.transpose(features1, (0, 2, 1))
    interp = knn_interpolate(p2t, p1t, f1t, k).astype(jnp.bfloat16)
    parts = [interp, jnp.transpose(features2, (0, 2, 1)).astype(jnp.bfloat16)]
    if skip_features is not None:
        parts.append(jnp.transpose(skip_features, (0, 2, 1)).astype(jnp.bfloat16))
    new = jnp.concatenate(parts, axis=-1)
    return _mlp_on_features(stack, new)


def feature_propagation_forward(stack, points1, points2, features1, features2):
    # `features2` unused, exactly like the reference FeaturePropagation.forward.
    del features2
    p2t = jnp.transpose(points2, (0, 2, 1))
    p1t = jnp.transpose(points1, (0, 2, 1))
    f1t = jnp.transpose(features1, (0, 2, 1))
    interp = knn_interpolate(p2t, p1t, f1t, 3).astype(jnp.bfloat16)
    # final layer has no BN/ReLU; keep the flow output in f32.
    return _mlp_on_features(stack, interp, relu_last=False, out_dtype=jnp.float32)


# ---------------------------------------------------------------------------
# parameter init (deterministic, synthetic weights).  BatchNorm (eval mode,
# default running stats) is folded here, OUTSIDE the jit, so the param pytree
# contains only arrays (fixes the TracerBoolConversionError).
# ---------------------------------------------------------------------------
def init_layers(key, in_ch, out_chs, final_out=None):
    bn_scale = 1.0 / math.sqrt(1.0 + BN_EPS)
    ws, bs = [], []
    for oc in out_chs:
        key, kw, kb = jax.random.split(key, 3)
        w = jax.random.normal(kw, (in_ch, oc), jnp.float32) / math.sqrt(in_ch)
        b = jax.random.normal(kb, (oc,), jnp.float32) * 0.01
        ws.append(w * bn_scale)
        bs.append(b * bn_scale)
        in_ch = oc
    if final_out is not None:
        key, kw, kb = jax.random.split(key, 3)
        ws.append(jax.random.normal(kw, (in_ch, final_out), jnp.float32)
                  / math.sqrt(in_ch))
        bs.append(jax.random.normal(kb, (final_out,), jnp.float32) * 0.01)
    return key, {"ws": ws, "bs": bs}


def flownet3d_init(key):
    p = {}
    # in_channels derived from the actual forward data flow (see NOTE above).
    key, p["sc1"] = init_layers(key, 6, [32, 32, 64])
    key, p["sc2"] = init_layers(key, 6, [64, 64, 128])
    key, p["fe"] = init_layers(key, 128 + 128, [128, 128, 128])
    key, p["sc3"] = init_layers(key, 6, [128, 128, 256])
    key, p["sc4"] = init_layers(key, 6, [256, 256, 512])
    key, p["up1"] = init_layers(key, 512 + 256, [256, 256])
    key, p["up2"] = init_layers(key, 256 + 128 + 256, [256])
    key, p["up3"] = init_layers(key, 256 + 64 + 128, [256])
    key, p["fp"] = init_layers(key, 256, [256, 256], final_out=3)
    return p


# ---------------------------------------------------------------------------
# FlowNet3D forward (mirrors the reference call graph exactly)
# ---------------------------------------------------------------------------
def flownet3d_forward(p, points1, points2):
    points1_1, features1_1 = set_conv_forward(p["sc1"], 1024, 16, points1, points1)
    points1_2, features1_2 = set_conv_forward(p["sc2"], 256, 16, points1_1, features1_1)
    points2_1, features2_1 = set_conv_forward(p["sc1"], 1024, 16, points2, points2)
    points2_2, features2_2 = set_conv_forward(p["sc2"], 256, 16, points2_1, features2_1)

    flow_embed = flow_embedding_forward(
        p["fe"], 64, points1_2, points2_2, features1_2, features2_2)

    points2_3, features2_3 = set_conv_forward(p["sc3"], 64, 8, points2_2, flow_embed)
    points2_4, features2_4 = set_conv_forward(p["sc4"], 16, 8, points2_3, features2_3)

    up_features1 = set_upconv_forward(
        p["up1"], 8, points2_3, points2_4, features2_4, features2_3, None)
    up_features2 = set_upconv_forward(
        p["up2"], 8, points2_2, points2_3, up_features1, features2_2, features2_3)
    up_features3 = set_upconv_forward(
        p["up3"], 8, points2_1, points2_2, up_features2, features2_1, features2_2)

    flow = feature_propagation_forward(
        p["fp"], points1, points2_1, up_features3, features2_1)
    return flow


if __name__ == "__main__":
    key = jax.random.PRNGKey(0)
    kp, k1, k2 = jax.random.split(key, 3)
    params = flownet3d_init(kp)

    B, N = 2, 128  # small but >= the largest knn k (64) used in the network
    points1 = jax.random.normal(k1, (B, 3, N), jnp.float32)
    points2 = jax.random.normal(k2, (B, 3, N), jnp.float32)

    fwd = jax.jit(flownet3d_forward)
    flow = fwd(params, points1, points2)
    flow = jax.block_until_ready(flow)

    assert flow.shape == (B, 3, N), flow.shape
    assert bool(jnp.all(jnp.isfinite(flow)))
    print("KERNEL_OK")
</pallas_src>

<mosaic_0001>
module attributes {stable_mosaic.version = 11 : i64} {
  func.func @_sqdist_kernel(%arg0: i32, %arg1: i32, %arg2: memref<1x128x8xf32, #tpu.memory_space<vmem>>, %arg3: memref<1x8x128xf32, #tpu.memory_space<vmem>>, %arg4: memref<1x1x128xf32, #tpu.memory_space<vmem>>, %arg5: memref<1x128x128xf32, #tpu.memory_space<vmem>>) attributes {dimension_semantics = [#tpu.dimension_semantics<parallel>, #tpu.dimension_semantics<parallel>], iteration_bounds = array<i64: 2, 1>, scalar_prefetch = 0 : i64, scratch_operands = 0 : i64, tpu.core_type = #tpu.core_type<tc>, window_params = [{transform_indices = @transform_0, window_bounds = array<i64: 1, 128, 8>}, {transform_indices = @transform_1, window_bounds = array<i64: 1, 8, 128>}, {transform_indices = @transform_2, window_bounds = array<i64: 1, 1, 128>}, {transform_indices = @transform_3, window_bounds = array<i64: 1, 128, 128>}]} {
    %c0 = arith.constant 0 : index
    %c0_0 = arith.constant 0 : index
    %c0_1 = arith.constant 0 : index
    %0 = vector.load %arg2[%c0, %c0_0, %c0_1] : memref<1x128x8xf32, #tpu.memory_space<vmem>>, vector<1x128x8xf32>
    %1 = vector.shape_cast %0 : vector<1x128x8xf32> to vector<128x8xf32>
    %c0_2 = arith.constant 0 : index
    %c0_3 = arith.constant 0 : index
    %c0_4 = arith.constant 0 : index
    %2 = vector.load %arg3[%c0_2, %c0_3, %c0_4] : memref<1x8x128xf32, #tpu.memory_space<vmem>>, vector<1x8x128xf32>
    %3 = vector.shape_cast %2 : vector<1x8x128xf32> to vector<8x128xf32>
    %c0_5 = arith.constant 0 : index
    %c0_6 = arith.constant 0 : index
    %c0_7 = arith.constant 0 : index
    %4 = vector.load %arg4[%c0_5, %c0_6, %c0_7] : memref<1x1x128xf32, #tpu.memory_space<vmem>>, vector<1x1x128xf32>
    %5 = vector.shape_cast %4 : vector<1x1x128xf32> to vector<1x128xf32>
    %6 = arith.mulf %1, %1 : vector<128x8xf32>
    %cst = arith.constant dense<0.000000e+00> : vector<128xf32>
    %7 = vector.multi_reduction <add>, %6, %cst [1] : vector<128x8xf32> to vector<128xf32>
    %8 = vector.shape_cast %7 : vector<128xf32> to vector<128x1xf32>
    %cst_8 = arith.constant dense<0.000000e+00> : vector<128x128xf32>
    %9 = tpu.matmul %1, %3, %cst_8 {dimension_numbers = #tpu.dot_dimension_numbers<[1], [0], [0], [1], [0, 0, 1, 1], [], []>} : vector<128x8xf32>, vector<8x128xf32>, vector<128x128xf32> -> vector<128x128xf32>
    %10 = vector.broadcast %8 : vector<128x1xf32> to vector<128x128xf32>
    %11 = vector.broadcast %5 : vector<1x128xf32> to vector<128x128xf32>
    %12 = arith.addf %10, %11 : vector<128x128xf32>
    %cst_9 = arith.constant 2.000000e+00 : f32
    %13 = vector.broadcast %cst_9 : f32 to vector<128x128xf32>
    %14 = arith.mulf %13, %9 : vector<128x128xf32>
    %15 = arith.subf %12, %14 : vector<128x128xf32>
    %cst_10 = arith.constant 0.000000e+00 : f32
    %16 = vector.broadcast %cst_10 : f32 to vector<128x128xf32>
    %17 = arith.maximumf %15, %16 : vector<128x128xf32>
    %c0_11 = arith.constant 0 : index
    %c0_12 = arith.constant 0 : index
    %c0_13 = arith.constant 0 : index
    %18 = vector.load %arg5[%c0_11, %c0_12, %c0_13] : memref<1x128x128xf32, #tpu.memory_space<vmem>>, vector<1x128x128xf32>
    %19 = vector.shape_cast %18 : vector<1x128x128xf32> to vector<128x128xf32>
    %20 = vector.shape_cast %17 : vector<128x128xf32> to vector<1x128x128xf32>
    tpu.vector_store %arg5[%c0_11, %c0_12, %c0_13], %20 {strides = array<i32>} : memref<1x128x128xf32, #tpu.memory_space<vmem>>, vector<1x128x128xf32>,
    return
  }
  func.func @transform_0(%arg0: i32, %arg1: i32) -> (i32, i32, i32) {
    %c0_i32 = arith.constant 0 : i32
    %c0_i32_0 = arith.constant 0 : i32
    return %arg0, %arg1, %c0_i32 : i32, i32, i32
  }
  func.func @transform_1(%arg0: i32, %arg1: i32) -> (i32, i32, i32) {
    %c0_i32 = arith.constant 0 : i32
    %c0_i32_0 = arith.constant 0 : i32
    %c0_i32_1 = arith.constant 0 : i32
    return %arg0, %c0_i32, %c0_i32_0 : i32, i32, i32
  }
  func.func @transform_2(%arg0: i32, %arg1: i32) -> (i32, i32, i32) {
    %c0_i32 = arith.constant 0 : i32
    %c0_i32_0 = arith.constant 0 : i32
    %c0_i32_1 = arith.constant 0 : i32
    return %arg0, %c0_i32, %c0_i32_0 : i32, i32, i32
  }
  func.func @transform_3(%arg0: i32, %arg1: i32) -> (i32, i32, i32) {
    %c0_i32 = arith.constant 0 : i32
    %c0_i32_0 = arith.constant 0 : i32
    return %arg0, %arg1, %c0_i32 : i32, i32, i32
  }
}

module attributes {stable_mosaic.version = 11 : i64} {
  func.func @kernel(%arg0: i32, %arg1: i32, %arg2: memref<1x128x8xbf16, #tpu.memory_space<vmem>>, %arg3: memref<8x256xbf16, #tpu.memory_space<vmem>>, %arg4: memref<256x256xbf16, #tpu.memory_space<vmem>>, %arg5: memref<256x512xbf16, #tpu.memory_space<vmem>>, %arg6: memref<1x256xf32, #tpu.memory_space<vmem>>, %arg7: memref<1x256xf32, #tpu.memory_space<vmem>>, %arg8: memref<1x512xf32, #tpu.memory_space<vmem>>, %arg9: memref<128x512xbf16, #tpu.memory_space<vmem>>, %arg10: memref<128x512xf32, #tpu.memory_space<vmem>>) attributes {dimension_semantics = [#tpu.dimension_semantics<parallel>, #tpu.dimension_semantics<arbitrary>], iteration_bounds = array<i64: 2, 8>, scalar_prefetch = 0 : i64, scratch_operands = 1 : i64, tpu.core_type = #tpu.core_type<tc>, window_params = [{transform_indices = @transform_0, window_bounds = array<i64: 1, 128, 8>}, {pipeline_mode = #tpu.pipeline_mode<synchronous>, transform_indices = @transform_1, window_bounds = array<i64: 8, 256>}, {pipeline_mode = #tpu.pipeline_mode<synchronous>, transform_indices = @transform_2, window_bounds = array<i64: 256, 256>}, {pipeline_mode = #tpu.pipeline_mode<synchronous>, transform_indices = @transform_3, window_bounds = array<i64: 256, 512>}, {pipeline_mode = #tpu.pipeline_mode<synchronous>, transform_indices = @transform_4, window_bounds = array<i64: 1, 256>}, {pipeline_mode = #tpu.pipeline_mode<synchronous>, transform_indices = @transform_5, window_bounds = array<i64: 1, 256>}, {pipeline_mode = #tpu.pipeline_mode<synchronous>, transform_indices = @transform_6, window_bounds = array<i64: 1, 512>}, {transform_indices = @transform_7, window_bounds = array<i64: 128, 512>}]} {
    %c0 = arith.constant 0 : index
    %c0_0 = arith.constant 0 : index
    %c0_1 = arith.constant 0 : index
    %0 = vector.load %arg2[%c0, %c0_0, %c0_1] : memref<1x128x8xbf16, #tpu.memory_space<vmem>>, vector<1x128x8xbf16>
    %1 = vector.shape_cast %0 : vector<1x128x8xbf16> to vector<128x8xbf16>
    %c0_2 = arith.constant 0 : index
    %c0_3 = arith.constant 0 : index
    %2 = vector.load %arg3[%c0_2, %c0_3] : memref<8x256xbf16, #tpu.memory_space<vmem>>, vector<8x256xbf16>
    %cst = arith.constant dense<0.000000e+00> : vector<128x256xf32>
    %3 = tpu.matmul %1, %2, %cst {dimension_numbers = #tpu.dot_dimension_numbers<[1], [0], [0], [1], [0, 0, 1, 1], [], []>} : vector<128x8xbf16>, vector<8x256xbf16>, vector<128x256xf32> -> vector<128x256xf32>
    %c0_4 = arith.constant 0 : index
    %c0_5 = arith.constant 0 : index
    %4 = vector.load %arg6[%c0_4, %c0_5] : memref<1x256xf32, #tpu.memory_space<vmem>>, vector<1x256xf32>
    %5 = vector.broadcast %4 : vector<1x256xf32> to vector<128x256xf32>
    %6 = arith.addf %3, %5 : vector<128x256xf32>
    %cst_6 = arith.constant 0.000000e+00 : f32
    %7 = vector.broadcast %cst_6 : f32 to vector<128x256xf32>
    %8 = arith.maximumf %6, %7 : vector<128x256xf32>
    %9 = arith.truncf %8 : vector<128x256xf32> to vector<128x256xbf16>
    %c0_7 = arith.constant 0 : index
    %c0_8 = arith.constant 0 : index
    %10 = vector.load %arg4[%c0_7, %c0_8] : memref<256x256xbf16, #tpu.memory_space<vmem>>, vector<256x256xbf16>
    %cst_9 = arith.constant dense<0.000000e+00> : vector<128x256xf32>
    %11 = tpu.matmul %9, %10, %cst_9 {dimension_numbers = #tpu.dot_dimension_numbers<[1], [0], [0], [1], [0, 0, 1, 1], [], []>} : vector<128x256xbf16>, vector<256x256xbf16>, vector<128x256xf32> -> vector<128x256xf32>
    %c0_10 = arith.constant 0 : index
    %c0_11 = arith.constant 0 : index
    %12 = vector.load %arg7[%c0_10, %c0_11] : memref<1x256xf32, #tpu.memory_space<vmem>>, vector<1x256xf32>
    %13 = vector.broadcast %12 : vector<1x256xf32> to vector<128x256xf32>
    %14 = arith.addf %11, %13 : vector<128x256xf32>
    %cst_12 = arith.constant 0.000000e+00 : f32
    %15 = vector.broadcast %cst_12 : f32 to vector<128x256xf32>
    %16 = arith.maximumf %14, %15 : vector<128x256xf32>
    %17 = arith.truncf %16 : vector<128x256xf32> to vector<128x256xbf16>
    %c0_13 = arith.constant 0 : index
    %c0_14 = arith.constant 0 : index
    %18 = vector.load %arg5[%c0_13, %c0_14] : memref<256x512xbf16, #tpu.memory_space<vmem>>, vector<256x512xbf16>
    %cst_15 = arith.constant dense<0.000000e+00> : vector<128x512xf32>
    %19 = tpu.matmul %17, %18, %cst_15 {dimension_numbers = #tpu.dot_dimension_numbers<[1], [0], [0], [1], [0, 0, 1, 1], [], []>} : vector<128x256xbf16>, vector<256x512xbf16>, vector<128x512xf32> -> vector<128x512xf32>
    %c0_16 = arith.constant 0 : index
    %c0_17 = arith.constant 0 : index
    %20 = vector.load %arg8[%c0_16, %c0_17] : memref<1x512xf32, #tpu.memory_space<vmem>>, vector<1x512xf32>
    %21 = vector.broadcast %20 : vector<1x512xf32> to vector<128x512xf32>
    %22 = arith.addf %19, %21 : vector<128x512xf32>
    %cst_18 = arith.constant 0.000000e+00 : f32
    %23 = vector.broadcast %cst_18 : f32 to vector<128x512xf32>
    %24 = arith.maximumf %22, %23 : vector<128x512xf32>
    %c0_i32 = arith.constant 0 : i32
    %25 = arith.cmpi eq, %arg1, %c0_i32 : i32
    %26 = arith.extui %25 : i1 to i32
    %c0_i32_19 = arith.constant 0 : i32
    %27 = arith.cmpi ne, %26, %c0_i32_19 : i32
    scf.if %27 {
      %c0_23 = arith.constant 0 : index
      %c0_24 = arith.constant 0 : index
      %34 = vector.load %arg10[%c0_23, %c0_24] : memref<128x512xf32, #tpu.memory_space<vmem>>, vector<128x512xf32>
      tpu.vector_store %arg10[%c0_23, %c0_24], %24 {strides = array<i32>} : memref<128x512xf32, #tpu.memory_space<vmem>>, vector<128x512xf32>,
    } else {
    }
    %c0_i32_20 = arith.constant 0 : i32
    %28 = arith.cmpi sgt, %arg1, %c0_i32_20 : i32
    %29 = arith.extui %28 : i1 to i32
    %c0_i32_21 = arith.constant 0 : i32
    %30 = arith.cmpi ne, %29, %c0_i32_21 : i32
    scf.if %30 {
      %c0_23 = arith.constant 0 : index
      %c0_24 = arith.constant 0 : index
      %34 = vector.load %arg10[%c0_23, %c0_24] : memref<128x512xf32, #tpu.memory_space<vmem>>, vector<128x512xf32>
      %35 = arith.maximumf %34, %24 : vector<128x512xf32>
      %c0_25 = arith.constant 0 : index
      %c0_26 = arith.constant 0 : index
      %36 = vector.load %arg10[%c0_25, %c0_26] : memref<128x512xf32, #tpu.memory_space<vmem>>, vector<128x512xf32>
      tpu.vector_store %arg10[%c0_25, %c0_26], %35 {strides = array<i32>} : memref<128x512xf32, #tpu.memory_space<vmem>>, vector<128x512xf32>,
    } else {
    }
    %c7_i32 = arith.constant 7 : i32
    %31 = arith.cmpi eq, %arg1, %c7_i32 : i32
    %32 = arith.extui %31 : i1 to i32
    %c0_i32_22 = arith.constant 0 : i32
    %33 = arith.cmpi ne, %32, %c0_i32_22 : i32
    scf.if %33 {
      %c0_23 = arith.constant 0 : index
      %c0_24 = arith.constant 0 : index
      %34 = vector.load %arg10[%c0_23, %c0_24] : memref<128x512xf32, #tpu.memory_space<vmem>>, vector<128x512xf32>
      %35 = arith.truncf %34 : vector<128x512xf32> to vector<128x512xbf16>
      %c0_25 = arith.constant 0 : index
      %c0_26 = arith.constant 0 : index
      %36 = vector.load %arg9[%c0_25, %c0_26] : memref<128x512xbf16, #tpu.memory_space<vmem>>, vector<128x512xbf16>
      tpu.vector_store %arg9[%c0_25, %c0_26], %35 {strides = array<i32>} : memref<128x512xbf16, #tpu.memory_space<vmem>>, vector<128x512xbf16>,
    } else {
    }
    return
  }
  func.func @transform_0(%arg0: i32, %arg1: i32) -> (i32, i32, i32) {
    %c0_i32 = arith.constant 0 : i32
    %c0_i32_0 = arith.constant 0 : i32
    return %arg1, %arg0, %c0_i32 : i32, i32, i32
  }
  func.func @transform_1(%arg0: i32, %arg1: i32) -> (i32, i32) {
    %c0_i32 = arith.constant 0 : i32
    %c0_i32_0 = arith.constant 0 : i32
    %c0_i32_1 = arith.constant 0 : i32
    return %c0_i32, %c0_i32_0 : i32, i32
  }
  func.func @transform_2(%arg0: i32, %arg1: i32) -> (i32, i32) {
    %c0_i32 = arith.constant 0 : i32
    %c0_i32_0 = arith.constant 0 : i32
    %c0_i32_1 = arith.constant 0 : i32
    return %c0_i32, %c0_i32_0 : i32, i32
  }
  func.func @transform_3(%arg0: i32, %arg1: i32) -> (i32, i32) {
    %c0_i32 = arith.constant 0 : i32
    %c0_i32_0 = arith.constant 0 : i32
    %c0_i32_1 = arith.constant 0 : i32
    return %c0_i32, %c0_i32_0 : i32, i32
  }
  func.func @transform_4(%arg0: i32, %arg1: i32) -> (i32, i32) {
    %c0_i32 = arith.constant 0 : i32
    %c0_i32_0 = arith.constant 0 : i32
    %c0_i32_1 = arith.constant 0 : i32
    return %c0_i32, %c0_i32_0 : i32, i32
  }
  func.func @transform_5(%arg0: i32, %arg1: i32) -> (i32, i32) {
    %c0_i32 = arith.constant 0 : i32
    %c0_i32_0 = arith.constant 0 : i32
    %c0_i32_1 = arith.constant 0 : i32
    return %c0_i32, %c0_i32_0 : i32, i32
  }
  func.func @transform_6(%arg0: i32, %arg1: i32) -> (i32, i32) {
    %c0_i32 = arith.constant 0 : i32
    %c0_i32_0 = arith.constant 0 : i32
    %c0_i32_1 = arith.constant 0 : i32
    return %c0_i32, %c0_i32_0 : i32, i32
  }
  func.func @transform_7(%arg0: i32, %arg1: i32) -> (i32, i32) {
    %c0_i32 = arith.constant 0 : i32
    %c0_i32_0 = arith.constant 0 : i32
    return %arg0, %c0_i32 : i32, i32
  }
}

module attributes {stable_mosaic.version = 11 : i64} {
  func.func @kernel(%arg0: i32, %arg1: i32, %arg2: memref<1x128x8xbf16, #tpu.memory_space<vmem>>, %arg3: memref<8x128xbf16, #tpu.memory_space<vmem>>, %arg4: memref<128x128xbf16, #tpu.memory_space<vmem>>, %arg5: memref<128x256xbf16, #tpu.memory_space<vmem>>, %arg6: memref<1x128xf32, #tpu.memory_space<vmem>>, %arg7: memref<1x128xf32, #tpu.memory_space<vmem>>, %arg8: memref<1x256xf32, #tpu.memory_space<vmem>>, %arg9: memref<128x256xbf16, #tpu.memory_space<vmem>>, %arg10: memref<128x256xf32, #tpu.memory_space<vmem>>) attributes {dimension_semantics = [#tpu.dimension_semantics<parallel>, #tpu.dimension_semantics<arbitrary>], iteration_bounds = array<i64: 2, 8>, scalar_prefetch = 0 : i64, scratch_operands = 1 : i64, tpu.core_type = #tpu.core_type<tc>, window_params = [{transform_indices = @transform_0, window_bounds = array<i64: 1, 128, 8>}, {pipeline_mode = #tpu.pipeline_mode<synchronous>, transform_indices = @transform_1, window_bounds = array<i64: 8, 128>}, {pipeline_mode = #tpu.pipeline_mode<synchronous>, transform_indices = @transform_2, window_bounds = array<i64: 128, 128>}, {pipeline_mode = #tpu.pipeline_mode<synchronous>, transform_indices = @transform_3, window_bounds = array<i64: 128, 256>}, {pipeline_mode = #tpu.pipeline_mode<synchronous>, transform_indices = @transform_4, window_bounds = array<i64: 1, 128>}, {pipeline_mode = #tpu.pipeline_mode<synchronous>, transform_indices = @transform_5, window_bounds = array<i64: 1, 128>}, {pipeline_mode = #tpu.pipeline_mode<synchronous>, transform_indices = @transform_6, window_bounds = array<i64: 1, 256>}, {transform_indices = @transform_7, window_bounds = array<i64: 128, 256>}]} {
    %c0 = arith.constant 0 : index
    %c0_0 = arith.constant 0 : index
    %c0_1 = arith.constant 0 : index
    %0 = vector.load %arg2[%c0, %c0_0, %c0_1] : memref<1x128x8xbf16, #tpu.memory_space<vmem>>, vector<1x128x8xbf16>
    %1 = vector.shape_cast %0 : vector<1x128x8xbf16> to vector<128x8xbf16>
    %c0_2 = arith.constant 0 : index
    %c0_3 = arith.constant 0 : index
    %2 = vector.load %arg3[%c0_2, %c0_3] : memref<8x128xbf16, #tpu.memory_space<vmem>>, vector<8x128xbf16>
    %cst = arith.constant dense<0.000000e+00> : vector<128x128xf32>
    %3 = tpu.matmul %1, %2, %cst {dimension_numbers = #tpu.dot_dimension_numbers<[1], [0], [0], [1], [0, 0, 1, 1], [], []>} : vector<128x8xbf16>, vector<8x128xbf16>, vector<128x128xf32> -> vector<128x128xf32>
    %c0_4 = arith.constant 0 : index
    %c0_5 = arith.constant 0 : index
    %4 = vector.load %arg6[%c0_4, %c0_5] : memref<1x128xf32, #tpu.memory_space<vmem>>, vector<1x128xf32>
    %5 = vector.broadcast %4 : vector<1x128xf32> to vector<128x128xf32>
    %6 = arith.addf %3, %5 : vector<128x128xf32>
    %cst_6 = arith.constant 0.000000e+00 : f32
    %7 = vector.broadcast %cst_6 : f32 to vector<128x128xf32>
    %8 = arith.maximumf %6, %7 : vector<128x128xf32>
    %9 = arith.truncf %8 : vector<128x128xf32> to vector<128x128xbf16>
    %c0_7 = arith.constant 0 : index
    %c0_8 = arith.constant 0 : index
    %10 = vector.load %arg4[%c0_7, %c0_8] : memref<128x128xbf16, #tpu.memory_space<vmem>>, vector<128x128xbf16>
    %cst_9 = arith.constant dense<0.000000e+00> : vector<128x128xf32>
    %11 = tpu.matmul %9, %10, %cst_9 {dimension_numbers = #tpu.dot_dimension_numbers<[1], [0], [0], [1], [0, 0, 1, 1], [], []>} : vector<128x128xbf16>, vector<128x128xbf16>, vector<128x128xf32> -> vector<128x128xf32>
    %c0_10 = arith.constant 0 : index
    %c0_11 = arith.constant 0 : index
    %12 = vector.load %arg7[%c0_10, %c0_11] : memref<1x128xf32, #tpu.memory_space<vmem>>, vector<1x128xf32>
    %13 = vector.broadcast %12 : vector<1x128xf32> to vector<128x128xf32>
    %14 = arith.addf %11, %13 : vector<128x128xf32>
    %cst_12 = arith.constant 0.000000e+00 : f32
    %15 = vector.broadcast %cst_12 : f32 to vector<128x128xf32>
    %16 = arith.maximumf %14, %15 : vector<128x128xf32>
    %17 = arith.truncf %16 : vector<128x128xf32> to vector<128x128xbf16>
    %c0_13 = arith.constant 0 : index
    %c0_14 = arith.constant 0 : index
    %18 = vector.load %arg5[%c0_13, %c0_14] : memref<128x256xbf16, #tpu.memory_space<vmem>>, vector<128x256xbf16>
    %cst_15 = arith.constant dense<0.000000e+00> : vector<128x256xf32>
    %19 = tpu.matmul %17, %18, %cst_15 {dimension_numbers = #tpu.dot_dimension_numbers<[1], [0], [0], [1], [0, 0, 1, 1], [], []>} : vector<128x128xbf16>, vector<128x256xbf16>, vector<128x256xf32> -> vector<128x256xf32>
    %c0_16 = arith.constant 0 : index
    %c0_17 = arith.constant 0 : index
    %20 = vector.load %arg8[%c0_16, %c0_17] : memref<1x256xf32, #tpu.memory_space<vmem>>, vector<1x256xf32>
    %21 = vector.broadcast %20 : vector<1x256xf32> to vector<128x256xf32>
    %22 = arith.addf %19, %21 : vector<128x256xf32>
    %cst_18 = arith.constant 0.000000e+00 : f32
    %23 = vector.broadcast %cst_18 : f32 to vector<128x256xf32>
    %24 = arith.maximumf %22, %23 : vector<128x256xf32>
    %c0_i32 = arith.constant 0 : i32
    %25 = arith.cmpi eq, %arg1, %c0_i32 : i32
    %26 = arith.extui %25 : i1 to i32
    %c0_i32_19 = arith.constant 0 : i32
    %27 = arith.cmpi ne, %26, %c0_i32_19 : i32
    scf.if %27 {
      %c0_23 = arith.constant 0 : index
      %c0_24 = arith.constant 0 : index
      %34 = vector.load %arg10[%c0_23, %c0_24] : memref<128x256xf32, #tpu.memory_space<vmem>>, vector<128x256xf32>
      tpu.vector_store %arg10[%c0_23, %c0_24], %24 {strides = array<i32>} : memref<128x256xf32, #tpu.memory_space<vmem>>, vector<128x256xf32>,
    } else {
    }
    %c0_i32_20 = arith.constant 0 : i32
    %28 = arith.cmpi sgt, %arg1, %c0_i32_20 : i32
    %29 = arith.extui %28 : i1 to i32
    %c0_i32_21 = arith.constant 0 : i32
    %30 = arith.cmpi ne, %29, %c0_i32_21 : i32
    scf.if %30 {
      %c0_23 = arith.constant 0 : index
      %c0_24 = arith.constant 0 : index
      %34 = vector.load %arg10[%c0_23, %c0_24] : memref<128x256xf32, #tpu.memory_space<vmem>>, vector<128x256xf32>
      %35 = arith.maximumf %34, %24 : vector<128x256xf32>
      %c0_25 = arith.constant 0 : index
      %c0_26 = arith.constant 0 : index
      %36 = vector.load %arg10[%c0_25, %c0_26] : memref<128x256xf32, #tpu.memory_space<vmem>>, vector<128x256xf32>
      tpu.vector_store %arg10[%c0_25, %c0_26], %35 {strides = array<i32>} : memref<128x256xf32, #tpu.memory_space<vmem>>, vector<128x256xf32>,
    } else {
    }
    %c7_i32 = arith.constant 7 : i32
    %31 = arith.cmpi eq, %arg1, %c7_i32 : i32
    %32 = arith.extui %31 : i1 to i32
    %c0_i32_22 = arith.constant 0 : i32
    %33 = arith.cmpi ne, %32, %c0_i32_22 : i32
    scf.if %33 {
      %c0_23 = arith.constant 0 : index
      %c0_24 = arith.constant 0 : index
      %34 = vector.load %arg10[%c0_23, %c0_24] : memref<128x256xf32, #tpu.memory_space<vmem>>, vector<128x256xf32>
      %35 = arith.truncf %34 : vector<128x256xf32> to vector<128x256xbf16>
      %c0_25 = arith.constant 0 : index
      %c0_26 = arith.constant 0 : index
      %36 = vector.load %arg9[%c0_25, %c0_26] : memref<128x256xbf16, #tpu.memory_space<vmem>>, vector<128x256xbf16>
      tpu.vector_store %arg9[%c0_25, %c0_26], %35 {strides = array<i32>} : memref<128x256xbf16, #tpu.memory_space<vmem>>, vector<128x256xbf16>,
    } else {
    }
    return
  }
  func.func @transform_0(%arg0: i32, %arg1: i32) -> (i32, i32, i32) {
    %c0_i32 = arith.constant 0 : i32
    %c0_i32_0 = arith.constant 0 : i32
    return %arg1, %arg0, %c0_i32 : i32, i32, i32
  }
  func.func @transform_1(%arg0: i32, %arg1: i32) -> (i32, i32) {
    %c0_i32 = arith.constant 0 : i32
    %c0_i32_0 = arith.constant 0 : i32
    %c0_i32_1 = arith.constant 0 : i32
    return %c0_i32, %c0_i32_0 : i32, i32
  }
  func.func @transform_2(%arg0: i32, %arg1: i32) -> (i32, i32) {
    %c0_i32 = arith.constant 0 : i32
    %c0_i32_0 = arith.constant 0 : i32
    %c0_i32_1 = arith.constant 0 : i32
    return %c0_i32, %c0_i32_0 : i32, i32
  }
  func.func @transform_3(%arg0: i32, %arg1: i32) -> (i32, i32) {
    %c0_i32 = arith.constant 0 : i32
    %c0_i32_0 = arith.constant 0 : i32
    %c0_i32_1 = arith.constant 0 : i32
    return %c0_i32, %c0_i32_0 : i32, i32
  }
  func.func @transform_4(%arg0: i32, %arg1: i32) -> (i32, i32) {
    %c0_i32 = arith.constant 0 : i32
    %c0_i32_0 = arith.constant 0 : i32
    %c0_i32_1 = arith.constant 0 : i32
    return %c0_i32, %c0_i32_0 : i32, i32
  }
  func.func @transform_5(%arg0: i32, %arg1: i32) -> (i32, i32) {
    %c0_i32 = arith.constant 0 : i32
    %c0_i32_0 = arith.constant 0 : i32
    %c0_i32_1 = arith.constant 0 : i32
    return %c0_i32, %c0_i32_0 : i32, i32
  }
  func.func @transform_6(%arg0: i32, %arg1: i32) -> (i32, i32) {
    %c0_i32 = arith.constant 0 : i32
    %c0_i32_0 = arith.constant 0 : i32
    %c0_i32_1 = arith.constant 0 : i32
    return %c0_i32, %c0_i32_0 : i32, i32
  }
  func.func @transform_7(%arg0: i32, %arg1: i32) -> (i32, i32) {
    %c0_i32 = arith.constant 0 : i32
    %c0_i32_0 = arith.constant 0 : i32
    return %arg0, %c0_i32 : i32, i32
  }
}

module attributes {stable_mosaic.version = 11 : i64} {
  func.func @kernel(%arg0: i32, %arg1: memref<64x768xbf16, #tpu.memory_space<vmem>>, %arg2: memref<768x256xbf16, #tpu.memory_space<vmem>>, %arg3: memref<256x256xbf16, #tpu.memory_space<vmem>>, %arg4: memref<1x256xf32, #tpu.memory_space<vmem>>, %arg5: memref<1x256xf32, #tpu.memory_space<vmem>>, %arg6: memref<64x256xbf16, #tpu.memory_space<vmem>>) attributes {dimension_semantics = [#tpu.dimension_semantics<parallel>], iteration_bounds = array<i64: 4>, scalar_prefetch = 0 : i64, scratch_operands = 0 : i64, tpu.core_type = #tpu.core_type<tc>, window_params = [{transform_indices = @transform_0, window_bounds = array<i64: 64, 768>}, {pipeline_mode = #tpu.pipeline_mode<synchronous>, transform_indices = @transform_1, window_bounds = array<i64: 768, 256>}, {pipeline_mode = #tpu.pipeline_mode<synchronous>, transform_indices = @transform_2, window_bounds = array<i64: 256, 256>}, {pipeline_mode = #tpu.pipeline_mode<synchronous>, transform_indices = @transform_3, window_bounds = array<i64: 1, 256>}, {pipeline_mode = #tpu.pipeline_mode<synchronous>, transform_indices = @transform_4, window_bounds = array<i64: 1, 256>}, {transform_indices = @transform_5, window_bounds = array<i64: 64, 256>}]} {
    %c0 = arith.constant 0 : index
    %c0_0 = arith.constant 0 : index
    %0 = vector.load %arg1[%c0, %c0_0] : memref<64x768xbf16, #tpu.memory_space<vmem>>, vector<64x768xbf16>
    %c0_1 = arith.constant 0 : index
    %c0_2 = arith.constant 0 : index
    %1 = vector.load %arg2[%c0_1, %c0_2] : memref<768x256xbf16, #tpu.memory_space<vmem>>, vector<768x256xbf16>
    %cst = arith.constant dense<0.000000e+00> : vector<64x256xf32>
    %2 = tpu.matmul %0, %1, %cst {dimension_numbers = #tpu.dot_dimension_numbers<[1], [0], [0], [1], [0, 0, 1, 1], [], []>} : vector<64x768xbf16>, vector<768x256xbf16>, vector<64x256xf32> -> vector<64x256xf32>
    %c0_3 = arith.constant 0 : index
    %c0_4 = arith.constant 0 : index
    %3 = vector.load %arg4[%c0_3, %c0_4] : memref<1x256xf32, #tpu.memory_space<vmem>>, vector<1x256xf32>
    %4 = vector.broadcast %3 : vector<1x256xf32> to vector<64x256xf32>
    %5 = arith.addf %2, %4 : vector<64x256xf32>
    %cst_5 = arith.constant 0.000000e+00 : f32
    %6 = vector.broadcast %cst_5 : f32 to vector<64x256xf32>
    %7 = arith.maximumf %5, %6 : vector<64x256xf32>
    %8 = arith.truncf %7 : vector<64x256xf32> to vector<64x256xbf16>
    %c0_6 = arith.constant 0 : index
    %c0_7 = arith.constant 0 : index
    %9 = vector.load %arg3[%c0_6, %c0_7] : memref<256x256xbf16, #tpu.memory_space<vmem>>, vector<256x256xbf16>
    %cst_8 = arith.constant dense<0.000000e+00> : vector<64x256xf32>
    %10 = tpu.matmul %8, %9, %cst_8 {dimension_numbers = #tpu.dot_dimension_numbers<[1], [0], [0], [1], [0, 0, 1, 1], [], []>} : vector<64x256xbf16>, vector<256x256xbf16>, vector<64x256xf32> -> vector<64x256xf32>
    %c0_9 = arith.constant 0 : index
    %c0_10 = arith.constant 0 : index
    %11 = vector.load %arg5[%c0_9, %c0_10] : memref<1x256xf32, #tpu.memory_space<vmem>>, vector<1x256xf32>
    %12 = vector.broadcast %11 : vector<1x256xf32> to vector<64x256xf32>
    %13 = arith.addf %10, %12 : vector<64x256xf32>
    %cst_11 = arith.constant 0.000000e+00 : f32
    %14 = vector.broadcast %cst_11 : f32 to vector<64x256xf32>
    %15 = arith.maximumf %13, %14 : vector<64x256xf32>
    %16 = arith.truncf %15 : vector<64x256xf32> to vector<64x256xbf16>
    %c0_12 = arith.constant 0 : index
    %c0_13 = arith.constant 0 : index
    %17 = vector.load %arg6[%c0_12, %c0_13] : memref<64x256xbf16, #tpu.memory_space<vmem>>, vector<64x256xbf16>
    tpu.vector_store %arg6[%c0_12, %c0_13], %16 {strides = array<i32>} : memref<64x256xbf16, #tpu.memory_space<vmem>>, vector<64x256xbf16>,
    return
  }
  func.func @transform_0(%arg0: i32) -> (i32, i32) {
    %c0_i32 = arith.constant 0 : i32
    %c0_i32_0 = arith.constant 0 : i32
    return %arg0, %c0_i32 : i32, i32
  }
  func.func @transform_1(%arg0: i32) -> (i32, i32) {
    %c0_i32 = arith.constant 0 : i32
    %c0_i32_0 = arith.constant 0 : i32
    %c0_i32_1 = arith.constant 0 : i32
    return %c0_i32, %c0_i32_0 : i32, i32
  }
  func.func @transform_2(%arg0: i32) -> (i32, i32) {
    %c0_i32 = arith.constant 0 : i32
    %c0_i32_0 = arith.constant 0 : i32
    %c0_i32_1 = arith.constant 0 : i32
    return %c0_i32, %c0_i32_0 : i32, i32
  }
  func.func @transform_3(%arg0: i32) -> (i32, i32) {
    %c0_i32 = arith.constant 0 : i32
    %c0_i32_0 = arith.constant 0 : i32
    %c0_i32_1 = arith.constant 0 : i32
    return %c0_i32, %c0_i32_0 : i32, i32
  }
  func.func @transform_4(%arg0: i32) -> (i32, i32) {
    %c0_i32 = arith.constant 0 : i32
    %c0_i32_0 = arith.constant 0 : i32
    %c0_i32_1 = arith.constant 0 : i32
    return %c0_i32, %c0_i32_0 : i32, i32
  }
  func.func @transform_5(%arg0: i32) -> (i32, i32) {
    %c0_i32 = arith.constant 0 : i32
    %c0_i32_0 = arith.constant 0 : i32
    return %arg0, %c0_i32 : i32, i32
  }
}

module attributes {stable_mosaic.version = 11 : i64} {
  func.func @kernel(%arg0: i32, %arg1: i32, %arg2: memref<1x128x8xbf16, #tpu.memory_space<vmem>>, %arg3: memref<8x64xbf16, #tpu.memory_space<vmem>>, %arg4: memref<64x64xbf16, #tpu.memory_space<vmem>>, %arg5: memref<64x128xbf16, #tpu.memory_space<vmem>>, %arg6: memref<1x64xf32, #tpu.memory_space<vmem>>, %arg7: memref<1x64xf32, #tpu.memory_space<vmem>>, %arg8: memref<1x128xf32, #tpu.memory_space<vmem>>, %arg9: memref<128x128xbf16, #tpu.memory_space<vmem>>, %arg10: memref<128x128xf32, #tpu.memory_space<vmem>>) attributes {dimension_semantics = [#tpu.dimension_semantics<parallel>, #tpu.dimension_semantics<arbitrary>], iteration_bounds = array<i64: 2, 16>, scalar_prefetch = 0 : i64, scratch_operands = 1 : i64, tpu.core_type = #tpu.core_type<tc>, window_params = [{transform_indices = @transform_0, window_bounds = array<i64: 1, 128, 8>}, {pipeline_mode = #tpu.pipeline_mode<synchronous>, transform_indices = @transform_1, window_bounds = array<i64: 8, 64>}, {pipeline_mode = #tpu.pipeline_mode<synchronous>, transform_indices = @transform_2, window_bounds = array<i64: 64, 64>}, {pipeline_mode = #tpu.pipeline_mode<synchronous>, transform_indices = @transform_3, window_bounds = array<i64: 64, 128>}, {pipeline_mode = #tpu.pipeline_mode<synchronous>, transform_indices = @transform_4, window_bounds = array<i64: 1, 64>}, {pipeline_mode = #tpu.pipeline_mode<synchronous>, transform_indices = @transform_5, window_bounds = array<i64: 1, 64>}, {pipeline_mode = #tpu.pipeline_mode<synchronous>, transform_indices = @transform_6, window_bounds = array<i64: 1, 128>}, {transform_indices = @transform_7, window_bounds = array<i64: 128, 128>}]} {
    %c0 = arith.constant 0 : index
    %c0_0 = arith.constant 0 : index
    %c0_1 = arith.constant 0 : index
    %0 = vector.load %arg2[%c0, %c0_0, %c0_1] : memref<1x128x8xbf16, #tpu.memory_space<vmem>>, vector<1x128x8xbf16>
    %1 = vector.shape_cast %0 : vector<1x128x8xbf16> to vector<128x8xbf16>
    %c0_2 = arith.constant 0 : index
    %c0_3 = arith.constant 0 : index
    %2 = vector.load %arg3[%c0_2, %c0_3] : memref<8x64xbf16, #tpu.memory_space<vmem>>, vector<8x64xbf16>
    %cst = arith.constant dense<0.000000e+00> : vector<128x64xf32>
    %3 = tpu.matmul %1, %2, %cst {dimension_numbers = #tpu.dot_dimension_numbers<[1], [0], [0], [1], [0, 0, 1, 1], [], []>} : vector<128x8xbf16>, vector<8x64xbf16>, vector<128x64xf32> -> vector<128x64xf32>
    %c0_4 = arith.constant 0 : index
    %c0_5 = arith.constant 0 : index
    %4 = vector.load %arg6[%c0_4, %c0_5] : memref<1x64xf32, #tpu.memory_space<vmem>>, vector<1x64xf32>
    %5 = vector.broadcast %4 : vector<1x64xf32> to vector<128x64xf32>
    %6 = arith.addf %3, %5 : vector<128x64xf32>
    %cst_6 = arith.constant 0.000000e+00 : f32
    %7 = vector.broadcast %cst_6 : f32 to vector<128x64xf32>
    %8 = arith.maximumf %6, %7 : vector<128x64xf32>
    %9 = arith.truncf %8 : vector<128x64xf32> to vector<128x64xbf16>
    %c0_7 = arith.constant 0 : index
    %c0_8 = arith.constant 0 : index
    %10 = vector.load %arg4[%c0_7, %c0_8] : memref<64x64xbf16, #tpu.memory_space<vmem>>, vector<64x64xbf16>
    %cst_9 = arith.constant dense<0.000000e+00> : vector<128x64xf32>
    %11 = tpu.matmul %9, %10, %cst_9 {dimension_numbers = #tpu.dot_dimension_numbers<[1], [0], [0], [1], [0, 0, 1, 1], [], []>} : vector<128x64xbf16>, vector<64x64xbf16>, vector<128x64xf32> -> vector<128x64xf32>
    %c0_10 = arith.constant 0 : index
    %c0_11 = arith.constant 0 : index
    %12 = vector.load %arg7[%c0_10, %c0_11] : memref<1x64xf32, #tpu.memory_space<vmem>>, vector<1x64xf32>
    %13 = vector.broadcast %12 : vector<1x64xf32> to vector<128x64xf32>
    %14 = arith.addf %11, %13 : vector<128x64xf32>
    %cst_12 = arith.constant 0.000000e+00 : f32
    %15 = vector.broadcast %cst_12 : f32 to vector<128x64xf32>
    %16 = arith.maximumf %14, %15 : vector<128x64xf32>
    %17 = arith.truncf %16 : vector<128x64xf32> to vector<128x64xbf16>
    %c0_13 = arith.constant 0 : index
    %c0_14 = arith.constant 0 : index
    %18 = vector.load %arg5[%c0_13, %c0_14] : memref<64x128xbf16, #tpu.memory_space<vmem>>, vector<64x128xbf16>
    %cst_15 = arith.constant dense<0.000000e+00> : vector<128x128xf32>
    %19 = tpu.matmul %17, %18, %cst_15 {dimension_numbers = #tpu.dot_dimension_numbers<[1], [0], [0], [1], [0, 0, 1, 1], [], []>} : vector<128x64xbf16>, vector<64x128xbf16>, vector<128x128xf32> -> vector<128x128xf32>
    %c0_16 = arith.constant 0 : index
    %c0_17 = arith.constant 0 : index
    %20 = vector.load %arg8[%c0_16, %c0_17] : memref<1x128xf32, #tpu.memory_space<vmem>>, vector<1x128xf32>
    %21 = vector.broadcast %20 : vector<1x128xf32> to vector<128x128xf32>
    %22 = arith.addf %19, %21 : vector<128x128xf32>
    %cst_18 = arith.constant 0.000000e+00 : f32
    %23 = vector.broadcast %cst_18 : f32 to vector<128x128xf32>
    %24 = arith.maximumf %22, %23 : vector<128x128xf32>
    %c0_i32 = arith.constant 0 : i32
    %25 = arith.cmpi eq, %arg1, %c0_i32 : i32
    %26 = arith.extui %25 : i1 to i32
    %c0_i32_19 = arith.constant 0 : i32
    %27 = arith.cmpi ne, %26, %c0_i32_19 : i32
    scf.if %27 {
      %c0_23 = arith.constant 0 : index
      %c0_24 = arith.constant 0 : index
      %34 = vector.load %arg10[%c0_23, %c0_24] : memref<128x128xf32, #tpu.memory_space<vmem>>, vector<128x128xf32>
      tpu.vector_store %arg10[%c0_23, %c0_24], %24 {strides = array<i32>} : memref<128x128xf32, #tpu.memory_space<vmem>>, vector<128x128xf32>,
    } else {
    }
    %c0_i32_20 = arith.constant 0 : i32
    %28 = arith.cmpi sgt, %arg1, %c0_i32_20 : i32
    %29 = arith.extui %28 : i1 to i32
    %c0_i32_21 = arith.constant 0 : i32
    %30 = arith.cmpi ne, %29, %c0_i32_21 : i32
    scf.if %30 {
      %c0_23 = arith.constant 0 : index
      %c0_24 = arith.constant 0 : index
      %34 = vector.load %arg10[%c0_23, %c0_24] : memref<128x128xf32, #tpu.memory_space<vmem>>, vector<128x128xf32>
      %35 = arith.maximumf %34, %24 : vector<128x128xf32>
      %c0_25 = arith.constant 0 : index
      %c0_26 = arith.constant 0 : index
      %36 = vector.load %arg10[%c0_25, %c0_26] : memref<128x128xf32, #tpu.memory_space<vmem>>, vector<128x128xf32>
      tpu.vector_store %arg10[%c0_25, %c0_26], %35 {strides = array<i32>} : memref<128x128xf32, #tpu.memory_space<vmem>>, vector<128x128xf32>,
    } else {
    }
    %c15_i32 = arith.constant 15 : i32
    %31 = arith.cmpi eq, %arg1, %c15_i32 : i32
    %32 = arith.extui %31 : i1 to i32
    %c0_i32_22 = arith.constant 0 : i32
    %33 = arith.cmpi ne, %32, %c0_i32_22 : i32
    scf.if %33 {
      %c0_23 = arith.constant 0 : index
      %c0_24 = arith.constant 0 : index
      %34 = vector.load %arg10[%c0_23, %c0_24] : memref<128x128xf32, #tpu.memory_space<vmem>>, vector<128x128xf32>
      %35 = arith.truncf %34 : vector<128x128xf32> to vector<128x128xbf16>
      %c0_25 = arith.constant 0 : index
      %c0_26 = arith.constant 0 : index
      %36 = vector.load %arg9[%c0_25, %c0_26] : memref<128x128xbf16, #tpu.memory_space<vmem>>, vector<128x128xbf16>
      tpu.vector_store %arg9[%c0_25, %c0_26], %35 {strides = array<i32>} : memref<128x128xbf16, #tpu.memory_space<vmem>>, vector<128x128xbf16>,
    } else {
    }
    return
  }
  func.func @transform_0(%arg0: i32, %arg1: i32) -> (i32, i32, i32) {
    %c0_i32 = arith.constant 0 : i32
    %c0_i32_0 = arith.constant 0 : i32
    return %arg1, %arg0, %c0_i32 : i32, i32, i32
  }
  func.func @transform_1(%arg0: i32, %arg1: i32) -> (i32, i32) {
    %c0_i32 = arith.constant 0 : i32
    %c0_i32_0 = arith.constant 0 : i32
    %c0_i32_1 = arith.constant 0 : i32
    return %c0_i32, %c0_i32_0 : i32, i32
  }
  func.func @transform_2(%arg0: i32, %arg1: i32) -> (i32, i32) {
    %c0_i32 = arith.constant 0 : i32
    %c0_i32_0 = arith.constant 0 : i32
    %c0_i32_1 = arith.constant 0 : i32
    return %c0_i32, %c0_i32_0 : i32, i32
  }
  func.func @transform_3(%arg0: i32, %arg1: i32) -> (i32, i32) {
    %c0_i32 = arith.constant 0 : i32
    %c0_i32_0 = arith.constant 0 : i32
    %c0_i32_1 = arith.constant 0 : i32
    return %c0_i32, %c0_i32_0 : i32, i32
  }
  func.func @transform_4(%arg0: i32, %arg1: i32) -> (i32, i32) {
    %c0_i32 = arith.constant 0 : i32
    %c0_i32_0 = arith.constant 0 : i32
    %c0_i32_1 = arith.constant 0 : i32
    return %c0_i32, %c0_i32_0 : i32, i32
  }
  func.func @transform_5(%arg0: i32, %arg1: i32) -> (i32, i32) {
    %c0_i32 = arith.constant 0 : i32
    %c0_i32_0 = arith.constant 0 : i32
    %c0_i32_1 = arith.constant 0 : i32
    return %c0_i32, %c0_i32_0 : i32, i32
  }
  func.func @transform_6(%arg0: i32, %arg1: i32) -> (i32, i32) {
    %c0_i32 = arith.constant 0 : i32
    %c0_i32_0 = arith.constant 0 : i32
    %c0_i32_1 = arith.constant 0 : i32
    return %c0_i32, %c0_i32_0 : i32, i32
  }
  func.func @transform_7(%arg0: i32, %arg1: i32) -> (i32, i32) {
    %c0_i32 = arith.constant 0 : i32
    %c0_i32_0 = arith.constant 0 : i32
    return %arg0, %c0_i32 : i32, i32
  }
}

module attributes {stable_mosaic.version = 11 : i64} {
  func.func @kernel(%arg0: i32, %arg1: memref<64x640xbf16, #tpu.memory_space<vmem>>, %arg2: memref<640x256xbf16, #tpu.memory_space<vmem>>, %arg3: memref<1x256xf32, #tpu.memory_space<vmem>>, %arg4: memref<64x256xbf16, #tpu.memory_space<vmem>>) attributes {dimension_semantics = [#tpu.dimension_semantics<parallel>], iteration_bounds = array<i64: 4>, scalar_prefetch = 0 : i64, scratch_operands = 0 : i64, tpu.core_type = #tpu.core_type<tc>, window_params = [{transform_indices = @transform_0, window_bounds = array<i64: 64, 640>}, {pipeline_mode = #tpu.pipeline_mode<synchronous>, transform_indices = @transform_1, window_bounds = array<i64: 640, 256>}, {pipeline_mode = #tpu.pipeline_mode<synchronous>, transform_indices = @transform_2, window_bounds = array<i64: 1, 256>}, {transform_indices = @transform_3, window_bounds = array<i64: 64, 256>}]} {
    %c0 = arith.constant 0 : index
    %c0_0 = arith.constant 0 : index
    %0 = vector.load %arg1[%c0, %c0_0] : memref<64x640xbf16, #tpu.memory_space<vmem>>, vector<64x640xbf16>
    %c0_1 = arith.constant 0 : index
    %c0_2 = arith.constant 0 : index
    %1 = vector.load %arg2[%c0_1, %c0_2] : memref<640x256xbf16, #tpu.memory_space<vmem>>, vector<640x256xbf16>
    %cst = arith.constant dense<0.000000e+00> : vector<64x256xf32>
    %2 = tpu.matmul %0, %1, %cst {dimension_numbers = #tpu.dot_dimension_numbers<[1], [0], [0], [1], [0, 0, 1, 1], [], []>} : vector<64x640xbf16>, vector<640x256xbf16>, vector<64x256xf32> -> vector<64x256xf32>
    %c0_3 = arith.constant 0 : index
    %c0_4 = arith.constant 0 : index
    %3 = vector.load %arg3[%c0_3, %c0_4] : memref<1x256xf32, #tpu.memory_space<vmem>>, vector<1x256xf32>
    %4 = vector.broadcast %3 : vector<1x256xf32> to vector<64x256xf32>
    %5 = arith.addf %2, %4 : vector<64x256xf32>
    %cst_5 = arith.constant 0.000000e+00 : f32
    %6 = vector.broadcast %cst_5 : f32 to vector<64x256xf32>
    %7 = arith.maximumf %5, %6 : vector<64x256xf32>
    %8 = arith.truncf %7 : vector<64x256xf32> to vector<64x256xbf16>
    %c0_6 = arith.constant 0 : index
    %c0_7 = arith.constant 0 : index
    %9 = vector.load %arg4[%c0_6, %c0_7] : memref<64x256xbf16, #tpu.memory_space<vmem>>, vector<64x256xbf16>
    tpu.vector_store %arg4[%c0_6, %c0_7], %8 {strides = array<i32>} : memref<64x256xbf16, #tpu.memory_space<vmem>>, vector<64x256xbf16>,
    return
  }
  func.func @transform_0(%arg0: i32) -> (i32, i32) {
    %c0_i32 = arith.constant 0 : i32
    %c0_i32_0 = arith.constant 0 : i32
    return %arg0, %c0_i32 : i32, i32
  }
  func.func @transform_1(%arg0: i32) -> (i32, i32) {
    %c0_i32 = arith.constant 0 : i32
    %c0_i32_0 = arith.constant 0 : i32
    %c0_i32_1 = arith.constant 0 : i32
    return %c0_i32, %c0_i32_0 : i32, i32
  }
  func.func @transform_2(%arg0: i32) -> (i32, i32) {
    %c0_i32 = arith.constant 0 : i32
    %c0_i32_0 = arith.constant 0 : i32
    %c0_i32_1 = arith.constant 0 : i32
    return %c0_i32, %c0_i32_0 : i32, i32
  }
  func.func @transform_3(%arg0: i32) -> (i32, i32) {
    %c0_i32 = arith.constant 0 : i32
    %c0_i32_0 = arith.constant 0 : i32
    return %arg0, %c0_i32 : i32, i32
  }
}

module attributes {stable_mosaic.version = 11 : i64} {
  func.func @kernel(%arg0: i32, %arg1: i32, %arg2: memref<1x128x8xbf16, #tpu.memory_space<vmem>>, %arg3: memref<8x32xbf16, #tpu.memory_space<vmem>>, %arg4: memref<32x32xbf16, #tpu.memory_space<vmem>>, %arg5: memref<32x128xbf16, #tpu.memory_space<vmem>>, %arg6: memref<1x32xf32, #tpu.memory_space<vmem>>, %arg7: memref<1x32xf32, #tpu.memory_space<vmem>>, %arg8: memref<1x128xf32, #tpu.memory_space<vmem>>, %arg9: memref<128x128xbf16, #tpu.memory_space<vmem>>, %arg10: memref<128x128xf32, #tpu.memory_space<vmem>>) attributes {dimension_semantics = [#tpu.dimension_semantics<parallel>, #tpu.dimension_semantics<arbitrary>], iteration_bounds = array<i64: 2, 16>, scalar_prefetch = 0 : i64, scratch_operands = 1 : i64, tpu.core_type = #tpu.core_type<tc>, window_params = [{transform_indices = @transform_0, window_bounds = array<i64: 1, 128, 8>}, {pipeline_mode = #tpu.pipeline_mode<synchronous>, transform_indices = @transform_1, window_bounds = array<i64: 8, 32>}, {pipeline_mode = #tpu.pipeline_mode<synchronous>, transform_indices = @transform_2, window_bounds = array<i64: 32, 32>}, {pipeline_mode = #tpu.pipeline_mode<synchronous>, transform_indices = @transform_3, window_bounds = array<i64: 32, 128>}, {pipeline_mode = #tpu.pipeline_mode<synchronous>, transform_indices = @transform_4, window_bounds = array<i64: 1, 32>}, {pipeline_mode = #tpu.pipeline_mode<synchronous>, transform_indices = @transform_5, window_bounds = array<i64: 1, 32>}, {pipeline_mode = #tpu.pipeline_mode<synchronous>, transform_indices = @transform_6, window_bounds = array<i64: 1, 128>}, {transform_indices = @transform_7, window_bounds = array<i64: 128, 128>}]} {
    %c0 = arith.constant 0 : index
    %c0_0 = arith.constant 0 : index
    %c0_1 = arith.constant 0 : index
    %0 = vector.load %arg2[%c0, %c0_0, %c0_1] : memref<1x128x8xbf16, #tpu.memory_space<vmem>>, vector<1x128x8xbf16>
    %1 = vector.shape_cast %0 : vector<1x128x8xbf16> to vector<128x8xbf16>
    %c0_2 = arith.constant 0 : index
    %c0_3 = arith.constant 0 : index
    %2 = vector.load %arg3[%c0_2, %c0_3] : memref<8x32xbf16, #tpu.memory_space<vmem>>, vector<8x32xbf16>
    %cst = arith.constant dense<0.000000e+00> : vector<128x32xf32>
    %3 = tpu.matmul %1, %2, %cst {dimension_numbers = #tpu.dot_dimension_numbers<[1], [0], [0], [1], [0, 0, 1, 1], [], []>} : vector<128x8xbf16>, vector<8x32xbf16>, vector<128x32xf32> -> vector<128x32xf32>
    %c0_4 = arith.constant 0 : index
    %c0_5 = arith.constant 0 : index
    %4 = vector.load %arg6[%c0_4, %c0_5] : memref<1x32xf32, #tpu.memory_space<vmem>>, vector<1x32xf32>
    %5 = vector.broadcast %4 : vector<1x32xf32> to vector<128x32xf32>
    %6 = arith.addf %3, %5 : vector<128x32xf32>
    %cst_6 = arith.constant 0.000000e+00 : f32
    %7 = vector.broadcast %cst_6 : f32 to vector<128x32xf32>
    %8 = arith.maximumf %6, %7 : vector<128x32xf32>
    %9 = arith.truncf %8 : vector<128x32xf32> to vector<128x32xbf16>
    %c0_7 = arith.constant 0 : index
    %c0_8 = arith.constant 0 : index
    %10 = vector.load %arg4[%c0_7, %c0_8] : memref<32x32xbf16, #tpu.memory_space<vmem>>, vector<32x32xbf16>
    %cst_9 = arith.constant dense<0.000000e+00> : vector<128x32xf32>
    %11 = tpu.matmul %9, %10, %cst_9 {dimension_numbers = #tpu.dot_dimension_numbers<[1], [0], [0], [1], [0, 0, 1, 1], [], []>} : vector<128x32xbf16>, vector<32x32xbf16>, vector<128x32xf32> -> vector<128x32xf32>
    %c0_10 = arith.constant 0 : index
    %c0_11 = arith.constant 0 : index
    %12 = vector.load %arg7[%c0_10, %c0_11] : memref<1x32xf32, #tpu.memory_space<vmem>>, vector<1x32xf32>
    %13 = vector.broadcast %12 : vector<1x32xf32> to vector<128x32xf32>
    %14 = arith.addf %11, %13 : vector<128x32xf32>
    %cst_12 = arith.constant 0.000000e+00 : f32
    %15 = vector.broadcast %cst_12 : f32 to vector<128x32xf32>
    %16 = arith.maximumf %14, %15 : vector<128x32xf32>
    %17 = arith.truncf %16 : vector<128x32xf32> to vector<128x32xbf16>
    %c0_13 = arith.constant 0 : index
    %c0_14 = arith.constant 0 : index
    %18 = vector.load %arg5[%c0_13, %c0_14] : memref<32x128xbf16, #tpu.memory_space<vmem>>, vector<32x128xbf16>
    %cst_15 = arith.constant dense<0.000000e+00> : vector<128x128xf32>
    %19 = tpu.matmul %17, %18, %cst_15 {dimension_numbers = #tpu.dot_dimension_numbers<[1], [0], [0], [1], [0, 0, 1, 1], [], []>} : vector<128x32xbf16>, vector<32x128xbf16>, vector<128x128xf32> -> vector<128x128xf32>
    %c0_16 = arith.constant 0 : index
    %c0_17 = arith.constant 0 : index
    %20 = vector.load %arg8[%c0_16, %c0_17] : memref<1x128xf32, #tpu.memory_space<vmem>>, vector<1x128xf32>
    %21 = vector.broadcast %20 : vector<1x128xf32> to vector<128x128xf32>
    %22 = arith.addf %19, %21 : vector<128x128xf32>
    %cst_18 = arith.constant 0.000000e+00 : f32
    %23 = vector.broadcast %cst_18 : f32 to vector<128x128xf32>
    %24 = arith.maximumf %22, %23 : vector<128x128xf32>
    %c0_i32 = arith.constant 0 : i32
    %25 = arith.cmpi eq, %arg1, %c0_i32 : i32
    %26 = arith.extui %25 : i1 to i32
    %c0_i32_19 = arith.constant 0 : i32
    %27 = arith.cmpi ne, %26, %c0_i32_19 : i32
    scf.if %27 {
      %c0_23 = arith.constant 0 : index
      %c0_24 = arith.constant 0 : index
      %34 = vector.load %arg10[%c0_23, %c0_24] : memref<128x128xf32, #tpu.memory_space<vmem>>, vector<128x128xf32>
      tpu.vector_store %arg10[%c0_23, %c0_24], %24 {strides = array<i32>} : memref<128x128xf32, #tpu.memory_space<vmem>>, vector<128x128xf32>,
    } else {
    }
    %c0_i32_20 = arith.constant 0 : i32
    %28 = arith.cmpi sgt, %arg1, %c0_i32_20 : i32
    %29 = arith.extui %28 : i1 to i32
    %c0_i32_21 = arith.constant 0 : i32
    %30 = arith.cmpi ne, %29, %c0_i32_21 : i32
    scf.if %30 {
      %c0_23 = arith.constant 0 : index
      %c0_24 = arith.constant 0 : index
      %34 = vector.load %arg10[%c0_23, %c0_24] : memref<128x128xf32, #tpu.memory_space<vmem>>, vector<128x128xf32>
      %35 = arith.maximumf %34, %24 : vector<128x128xf32>
      %c0_25 = arith.constant 0 : index
      %c0_26 = arith.constant 0 : index
      %36 = vector.load %arg10[%c0_25, %c0_26] : memref<128x128xf32, #tpu.memory_space<vmem>>, vector<128x128xf32>
      tpu.vector_store %arg10[%c0_25, %c0_26], %35 {strides = array<i32>} : memref<128x128xf32, #tpu.memory_space<vmem>>, vector<128x128xf32>,
    } else {
    }
    %c15_i32 = arith.constant 15 : i32
    %31 = arith.cmpi eq, %arg1, %c15_i32 : i32
    %32 = arith.extui %31 : i1 to i32
    %c0_i32_22 = arith.constant 0 : i32
    %33 = arith.cmpi ne, %32, %c0_i32_22 : i32
    scf.if %33 {
      %c0_23 = arith.constant 0 : index
      %c0_24 = arith.constant 0 : index
      %34 = vector.load %arg10[%c0_23, %c0_24] : memref<128x128xf32, #tpu.memory_space<vmem>>, vector<128x128xf32>
      %35 = arith.truncf %34 : vector<128x128xf32> to vector<128x128xbf16>
      %c0_25 = arith.constant 0 : index
      %c0_26 = arith.constant 0 : index
      %36 = vector.load %arg9[%c0_25, %c0_26] : memref<128x128xbf16, #tpu.memory_space<vmem>>, vector<128x128xbf16>
      tpu.vector_store %arg9[%c0_25, %c0_26], %35 {strides = array<i32>} : memref<128x128xbf16, #tpu.memory_space<vmem>>, vector<128x128xbf16>,
    } else {
    }
    return
  }
  func.func @transform_0(%arg0: i32, %arg1: i32) -> (i32, i32, i32) {
    %c0_i32 = arith.constant 0 : i32
    %c0_i32_0 = arith.constant 0 : i32
    return %arg1, %arg0, %c0_i32 : i32, i32, i32
  }
  func.func @transform_1(%arg0: i32, %arg1: i32) -> (i32, i32) {
    %c0_i32 = arith.constant 0 : i32
    %c0_i32_0 = arith.constant 0 : i32
    %c0_i32_1 = arith.constant 0 : i32
    return %c0_i32, %c0_i32_0 : i32, i32
  }
  func.func @transform_2(%arg0: i32, %arg1: i32) -> (i32, i32) {
    %c0_i32 = arith.constant 0 : i32
    %c0_i32_0 = arith.constant 0 : i32
    %c0_i32_1 = arith.constant 0 : i32
    return %c0_i32, %c0_i32_0 : i32, i32
  }
  func.func @transform_3(%arg0: i32, %arg1: i32) -> (i32, i32) {
    %c0_i32 = arith.constant 0 : i32
    %c0_i32_0 = arith.constant 0 : i32
    %c0_i32_1 = arith.constant 0 : i32
    return %c0_i32, %c0_i32_0 : i32, i32
  }
  func.func @transform_4(%arg0: i32, %arg1: i32) -> (i32, i32) {
    %c0_i32 = arith.constant 0 : i32
    %c0_i32_0 = arith.constant 0 : i32
    %c0_i32_1 = arith.constant 0 : i32
    return %c0_i32, %c0_i32_0 : i32, i32
  }
  func.func @transform_5(%arg0: i32, %arg1: i32) -> (i32, i32) {
    %c0_i32 = arith.constant 0 : i32
    %c0_i32_0 = arith.constant 0 : i32
    %c0_i32_1 = arith.constant 0 : i32
    return %c0_i32, %c0_i32_0 : i32, i32
  }
  func.func @transform_6(%arg0: i32, %arg1: i32) -> (i32, i32) {
    %c0_i32 = arith.constant 0 : i32
    %c0_i32_0 = arith.constant 0 : i32
    %c0_i32_1 = arith.constant 0 : i32
    return %c0_i32, %c0_i32_0 : i32, i32
  }
  func.func @transform_7(%arg0: i32, %arg1: i32) -> (i32, i32) {
    %c0_i32 = arith.constant 0 : i32
    %c0_i32_0 = arith.constant 0 : i32
    return %arg0, %c0_i32 : i32, i32
  }
}

module attributes {stable_mosaic.version = 11 : i64} {
  func.func @kernel(%arg0: i32, %arg1: memref<64x448xbf16, #tpu.memory_space<vmem>>, %arg2: memref<448x256xbf16, #tpu.memory_space<vmem>>, %arg3: memref<1x256xf32, #tpu.memory_space<vmem>>, %arg4: memref<64x256xbf16, #tpu.memory_space<vmem>>) attributes {dimension_semantics = [#tpu.dimension_semantics<parallel>], iteration_bounds = array<i64: 4>, scalar_prefetch = 0 : i64, scratch_operands = 0 : i64, tpu.core_type = #tpu.core_type<tc>, window_params = [{transform_indices = @transform_0, window_bounds = array<i64: 64, 448>}, {pipeline_mode = #tpu.pipeline_mode<synchronous>, transform_indices = @transform_1, window_bounds = array<i64: 448, 256>}, {pipeline_mode = #tpu.pipeline_mode<synchronous>, transform_indices = @transform_2, window_bounds = array<i64: 1, 256>}, {transform_indices = @transform_3, window_bounds = array<i64: 64, 256>}]} {
    %c0 = arith.constant 0 : index
    %c0_0 = arith.constant 0 : index
    %0 = vector.load %arg1[%c0, %c0_0] : memref<64x448xbf16, #tpu.memory_space<vmem>>, vector<64x448xbf16>
    %c0_1 = arith.constant 0 : index
    %c0_2 = arith.constant 0 : index
    %1 = vector.load %arg2[%c0_1, %c0_2] : memref<448x256xbf16, #tpu.memory_space<vmem>>, vector<448x256xbf16>
    %cst = arith.constant dense<0.000000e+00> : vector<64x256xf32>
    %2 = tpu.matmul %0, %1, %cst {dimension_numbers = #tpu.dot_dimension_numbers<[1], [0], [0], [1], [0, 0, 1, 1], [], []>} : vector<64x448xbf16>, vector<448x256xbf16>, vector<64x256xf32> -> vector<64x256xf32>
    %c0_3 = arith.constant 0 : index
    %c0_4 = arith.constant 0 : index
    %3 = vector.load %arg3[%c0_3, %c0_4] : memref<1x256xf32, #tpu.memory_space<vmem>>, vector<1x256xf32>
    %4 = vector.broadcast %3 : vector<1x256xf32> to vector<64x256xf32>
    %5 = arith.addf %2, %4 : vector<64x256xf32>
    %cst_5 = arith.constant 0.000000e+00 : f32
    %6 = vector.broadcast %cst_5 : f32 to vector<64x256xf32>
    %7 = arith.maximumf %5, %6 : vector<64x256xf32>
    %8 = arith.truncf %7 : vector<64x256xf32> to vector<64x256xbf16>
    %c0_6 = arith.constant 0 : index
    %c0_7 = arith.constant 0 : index
    %9 = vector.load %arg4[%c0_6, %c0_7] : memref<64x256xbf16, #tpu.memory_space<vmem>>, vector<64x256xbf16>
    tpu.vector_store %arg4[%c0_6, %c0_7], %8 {strides = array<i32>} : memref<64x256xbf16, #tpu.memory_space<vmem>>, vector<64x256xbf16>,
    return
  }
  func.func @transform_0(%arg0: i32) -> (i32, i32) {
    %c0_i32 = arith.constant 0 : i32
    %c0_i32_0 = arith.constant 0 : i32
    return %arg0, %c0_i32 : i32, i32
  }
  func.func @transform_1(%arg0: i32) -> (i32, i32) {
    %c0_i32 = arith.constant 0 : i32
    %c0_i32_0 = arith.constant 0 : i32
    %c0_i32_1 = arith.constant 0 : i32
    return %c0_i32, %c0_i32_0 : i32, i32
  }
  func.func @transform_2(%arg0: i32) -> (i32, i32) {
    %c0_i32 = arith.constant 0 : i32
    %c0_i32_0 = arith.constant 0 : i32
    %c0_i32_1 = arith.constant 0 : i32
    return %c0_i32, %c0_i32_0 : i32, i32
  }
  func.func @transform_3(%arg0: i32) -> (i32, i32) {
    %c0_i32 = arith.constant 0 : i32
    %c0_i32_0 = arith.constant 0 : i32
    return %arg0, %c0_i32 : i32, i32
  }
}

module attributes {stable_mosaic.version = 11 : i64} {
  func.func @kernel(%arg0: i32, %arg1: memref<64x256xbf16, #tpu.memory_space<vmem>>, %arg2: memref<256x256xbf16, #tpu.memory_space<vmem>>, %arg3: memref<256x256xbf16, #tpu.memory_space<vmem>>, %arg4: memref<256x128xbf16, #tpu.memory_space<vmem>>, %arg5: memref<1x256xf32, #tpu.memory_space<vmem>>, %arg6: memref<1x256xf32, #tpu.memory_space<vmem>>, %arg7: memref<1x128xf32, #tpu.memory_space<vmem>>, %arg8: memref<64x128xf32, #tpu.memory_space<vmem>>) attributes {dimension_semantics = [#tpu.dimension_semantics<parallel>], iteration_bounds = array<i64: 4>, scalar_prefetch = 0 : i64, scratch_operands = 0 : i64, tpu.core_type = #tpu.core_type<tc>, window_params = [{transform_indices = @transform_0, window_bounds = array<i64: 64, 256>}, {pipeline_mode = #tpu.pipeline_mode<synchronous>, transform_indices = @transform_1, window_bounds = array<i64: 256, 256>}, {pipeline_mode = #tpu.pipeline_mode<synchronous>, transform_indices = @transform_2, window_bounds = array<i64: 256, 256>}, {pipeline_mode = #tpu.pipeline_mode<synchronous>, transform_indices = @transform_3, window_bounds = array<i64: 256, 128>}, {pipeline_mode = #tpu.pipeline_mode<synchronous>, transform_indices = @transform_4, window_bounds = array<i64: 1, 256>}, {pipeline_mode = #tpu.pipeline_mode<synchronous>, transform_indices = @transform_5, window_bounds = array<i64: 1, 256>}, {pipeline_mode = #tpu.pipeline_mode<synchronous>, transform_indices = @transform_6, window_bounds = array<i64: 1, 128>}, {transform_indices = @transform_7, window_bounds = array<i64: 64, 128>}]} {
    %c0 = arith.constant 0 : index
    %c0_0 = arith.constant 0 : index
    %0 = vector.load %arg1[%c0, %c0_0] : memref<64x256xbf16, #tpu.memory_space<vmem>>, vector<64x256xbf16>
    %c0_1 = arith.constant 0 : index
    %c0_2 = arith.constant 0 : index
    %1 = vector.load %arg2[%c0_1, %c0_2] : memref<256x256xbf16, #tpu.memory_space<vmem>>, vector<256x256xbf16>
    %cst = arith.constant dense<0.000000e+00> : vector<64x256xf32>
    %2 = tpu.matmul %0, %1, %cst {dimension_numbers = #tpu.dot_dimension_numbers<[1], [0], [0], [1], [0, 0, 1, 1], [], []>} : vector<64x256xbf16>, vector<256x256xbf16>, vector<64x256xf32> -> vector<64x256xf32>
    %c0_3 = arith.constant 0 : index
    %c0_4 = arith.constant 0 : index
    %3 = vector.load %arg5[%c0_3, %c0_4] : memref<1x256xf32, #tpu.memory_space<vmem>>, vector<1x256xf32>
    %4 = vector.broadcast %3 : vector<1x256xf32> to vector<64x256xf32>
    %5 = arith.addf %2, %4 : vector<64x256xf32>
    %cst_5 = arith.constant 0.000000e+00 : f32
    %6 = vector.broadcast %cst_5 : f32 to vector<64x256xf32>
    %7 = arith.maximumf %5, %6 : vector<64x256xf32>
    %8 = arith.truncf %7 : vector<64x256xf32> to vector<64x256xbf16>
    %c0_6 = arith.constant 0 : index
    %c0_7 = arith.constant 0 : index
    %9 = vector.load %arg3[%c0_6, %c0_7] : memref<256x256xbf16, #tpu.memory_space<vmem>>, vector<256x256xbf16>
    %cst_8 = arith.constant dense<0.000000e+00> : vector<64x256xf32>
    %10 = tpu.matmul %8, %9, %cst_8 {dimension_numbers = #tpu.dot_dimension_numbers<[1], [0], [0], [1], [0, 0, 1, 1], [], []>} : vector<64x256xbf16>, vector<256x256xbf16>, vector<64x256xf32> -> vector<64x256xf32>
    %c0_9 = arith.constant 0 : index
    %c0_10 = arith.constant 0 : index
    %11 = vector.load %arg6[%c0_9, %c0_10] : memref<1x256xf32, #tpu.memory_space<vmem>>, vector<1x256xf32>
    %12 = vector.broadcast %11 : vector<1x256xf32> to vector<64x256xf32>
    %13 = arith.addf %10, %12 : vector<64x256xf32>
    %cst_11 = arith.constant 0.000000e+00 : f32
    %14 = vector.broadcast %cst_11 : f32 to vector<64x256xf32>
    %15 = arith.maximumf %13, %14 : vector<64x256xf32>
    %16 = arith.truncf %15 : vector<64x256xf32> to vector<64x256xbf16>
    %c0_12 = arith.constant 0 : index
    %c0_13 = arith.constant 0 : index
    %17 = vector.load %arg4[%c0_12, %c0_13] : memref<256x128xbf16, #tpu.memory_space<vmem>>, vector<256x128xbf16>
    %cst_14 = arith.constant dense<0.000000e+00> : vector<64x128xf32>
    %18 = tpu.matmul %16, %17, %cst_14 {dimension_numbers = #tpu.dot_dimension_numbers<[1], [0], [0], [1], [0, 0, 1, 1], [], []>} : vector<64x256xbf16>, vector<256x128xbf16>, vector<64x128xf32> -> vector<64x128xf32>
    %c0_15 = arith.constant 0 : index
    %c0_16 = arith.constant 0 : index
    %19 = vector.load %arg7[%c0_15, %c0_16] : memref<1x128xf32, #tpu.memory_space<vmem>>, vector<1x128xf32>
    %20 = vector.broadcast %19 : vector<1x128xf32> to vector<64x128xf32>
    %21 = arith.addf %18, %20 : vector<64x128xf32>
    %c0_17 = arith.constant 0 : index
    %c0_18 = arith.constant 0 : index
    %22 = vector.load %arg8[%c0_17, %c0_18] : memref<64x128xf32, #tpu.memory_space<vmem>>, vector<64x128xf32>
    tpu.vector_store %arg8[%c0_17, %c0_18], %21 {strides = array<i32>} : memref<64x128xf32, #tpu.memory_space<vmem>>, vector<64x128xf32>,
    return
  }
  func.func @transform_0(%arg0: i32) -> (i32, i32) {
    %c0_i32 = arith.constant 0 : i32
    %c0_i32_0 = arith.constant 0 : i32
    return %arg0, %c0_i32 : i32, i32
  }
  func.func @transform_1(%arg0: i32) -> (i32, i32) {
    %c0_i32 = arith.constant 0 : i32
    %c0_i32_0 = arith.constant 0 : i32
    %c0_i32_1 = arith.constant 0 : i32
    return %c0_i32, %c0_i32_0 : i32, i32
  }
  func.func @transform_2(%arg0: i32) -> (i32, i32) {
    %c0_i32 = arith.constant 0 : i32
    %c0_i32_0 = arith.constant 0 : i32
    %c0_i32_1 = arith.constant 0 : i32
    return %c0_i32, %c0_i32_0 : i32, i32
  }
  func.func @transform_3(%arg0: i32) -> (i32, i32) {
    %c0_i32 = arith.constant 0 : i32
    %c0_i32_0 = arith.constant 0 : i32
    %c0_i32_1 = arith.constant 0 : i32
    return %c0_i32, %c0_i32_0 : i32, i32
  }
  func.func @transform_4(%arg0: i32) -> (i32, i32) {
    %c0_i32 = arith.constant 0 : i32
    %c0_i32_0 = arith.constant 0 : i32
    %c0_i32_1 = arith.constant 0 : i32
    return %c0_i32, %c0_i32_0 : i32, i32
  }
  func.func @transform_5(%arg0: i32) -> (i32, i32) {
    %c0_i32 = arith.constant 0 : i32
    %c0_i32_0 = arith.constant 0 : i32
    %c0_i32_1 = arith.constant 0 : i32
    return %c0_i32, %c0_i32_0 : i32, i32
  }
  func.func @transform_6(%arg0: i32) -> (i32, i32) {
    %c0_i32 = arith.constant 0 : i32
    %c0_i32_0 = arith.constant 0 : i32
    %c0_i32_1 = arith.constant 0 : i32
    return %c0_i32, %c0_i32_0 : i32, i32
  }
  func.func @transform_7(%arg0: i32) -> (i32, i32) {
    %c0_i32 = arith.constant 0 : i32
    %c0_i32_0 = arith.constant 0 : i32
    return %arg0, %c0_i32 : i32, i32
  }
}

</mosaic_0001>

<bundles_post_ra>
// kernel: neg.15
= control target key start
LH: loop header
LB: loop body
LE: loop exit
PB: predicated region body
PF: predicated region fallthrough
CT: control target
= control target key end

     0   :  { %s520_s0 = inlined_call_operand.vmem [shape: f32[2,128,128], index: 0, kind: input, shape index: {}]   ;;  %s521_s1 = inlined_call_operand.vmem [shape: f32[2,128,128], index: 1, kind: output, shape index: {}]  }
   0x1   :  { %v2_v0 = vld [vmem:[%s520_s0] sm:$0xff]  ;;  %v258_v2 = vld [vmem:[%s520_s0 + $0x8] sm:$0xff]  ;;  %v262_v7 = vld [vmem:[%s520_s0 + $0x10] sm:$0xff] }
   0x2   :  { %v256_v1 = vld [vmem:[%s520_s0 + $0x80] sm:$0xff]  ;;  %v5_v3 = vxor.u32 2147483648, %v2_v0  ;;  %v20_v5 = vxor.u32 2147483648, %v258_v2  ;;  %v260_v6 = vld [vmem:[%s520_s0 + $0x88] sm:$0xff]  ;;  %v264_v8 = vld [vmem:[%s520_s0 + $0x90] sm:$0xff]  ;;  %v36_v10 = vxor.u32 2147483648, %v262_v7 }
   0x3   :  { %v12_v4 = vxor.u32 2147483648, %v256_v1  ;;  %v28_v9 = vxor.u32 2147483648, %v260_v6  ;;  %v44_v11 = vxor.u32 2147483648, %v264_v8  ;;  %v266_v12 = vld [vmem:[%s520_s0 + $0x18] sm:$0xff]  ;;  %v270_v14 = vld [vmem:[%s520_s0 + $0x20] sm:$0xff]  ;;  %v274_v19 = vld [vmem:[%s520_s0 + $0x28] sm:$0xff] }
   0x4   :  { %v268_v13 = vld [vmem:[%s520_s0 + $0x98] sm:$0xff]  ;;  %7 = vst [vmem:[%s521_s1] sm:$0xff] %v5_v3  ;;  %259 = vst [vmem:[%s521_s1 + $0x8] sm:$0xff] %v20_v5  ;;  %v52_v15 = vxor.u32 2147483648, %v266_v12  ;;  %v68_v17 = vxor.u32 2147483648, %v270_v14  ;;  %v272_v18 = vld [vmem:[%s520_s0 + $0xa0] sm:$0xff]  ;;  %v84_v22 = vxor.u32 2147483648, %v274_v19 }
   0x5   :  { %257 = vst [vmem:[%s521_s1 + $0x80] sm:$0xff] %v12_v4  ;;  %v60_v16 = vxor.u32 2147483648, %v268_v13  ;;  %v276_v20 = vld [vmem:[%s520_s0 + $0xa8] sm:$0xff]  ;;  %261 = vst [vmem:[%s521_s1 + $0x88] sm:$0xff] %v28_v9  ;;  %v76_v21 = vxor.u32 2147483648, %v272_v18  ;;  %v278_v24 = vld [vmem:[%s520_s0 + $0x30] sm:$0xff] }
   0x6   :  { %263 = vst [vmem:[%s521_s1 + $0x10] sm:$0xff] %v36_v10  ;;  %265 = vst [vmem:[%s521_s1 + $0x90] sm:$0xff] %v44_v11  ;;  %v92_v23 = vxor.u32 2147483648, %v276_v20  ;;  %v280_v25 = vld [vmem:[%s520_s0 + $0xb0] sm:$0xff]  ;;  %v282_v26 = vld [vmem:[%s520_s0 + $0x38] sm:$0xff]  ;;  %v100_v27 = vxor.u32 2147483648, %v278_v24 }
   0x7   :  { %267 = vst [vmem:[%s521_s1 + $0x18] sm:$0xff] %v52_v15  ;;  %269 = vst [vmem:[%s521_s1 + $0x98] sm:$0xff] %v60_v16  ;;  %v108_v28 = vxor.u32 2147483648, %v280_v25  ;;  %v116_v29 = vxor.u32 2147483648, %v282_v26  ;;  %v284_v30 = vld [vmem:[%s520_s0 + $0xb8] sm:$0xff]  ;;  %v286_v31 = vld [vmem:[%s520_s0 + $0x40] sm:$0xff] }
   0x8   :  { %271 = vst [vmem:[%s521_s1 + $0x20] sm:$0xff] %v68_v17  ;;  %v288_v32 = vld [vmem:[%s520_s0 + $0xc0] sm:$0xff]  ;;  %273 = vst [vmem:[%s521_s1 + $0xa0] sm:$0xff] %v76_v21  ;;  %v124_v33 = vxor.u32 2147483648, %v284_v30  ;;  %v132_v34 = vxor.u32 2147483648, %v286_v31  ;;  %v290_v36 = vld [vmem:[%s520_s0 + $0x48] sm:$0xff] }
   0x9   :  { %275 = vst [vmem:[%s521_s1 + $0x28] sm:$0xff] %v84_v22  ;;  %277 = vst [vmem:[%s521_s1 + $0xa8] sm:$0xff] %v92_v23  ;;  %v140_v35 = vxor.u32 2147483648, %v288_v32  ;;  %v292_v37 = vld [vmem:[%s520_s0 + $0xc8] sm:$0xff]  ;;  %v294_v38 = vld [vmem:[%s520_s0 + $0x50] sm:$0xff]  ;;  %v148_v39 = vxor.u32 2147483648, %v290_v36 }
   0xa   :  { %279 = vst [vmem:[%s521_s1 + $0x30] sm:$0xff] %v100_v27  ;;  %281 = vst [vmem:[%s521_s1 + $0xb0] sm:$0xff] %v108_v28  ;;  %v156_v40 = vxor.u32 2147483648, %v292_v37  ;;  %v164_v41 = vxor.u32 2147483648, %v294_v38  ;;  %v296_v42 = vld [vmem:[%s520_s0 + $0xd0] sm:$0xff]  ;;  %v298_v43 = vld [vmem:[%s520_s0 + $0x58] sm:$0xff] }
   0xb   :  { %283 = vst [vmem:[%s521_s1 + $0x38] sm:$0xff] %v116_v29  ;;  %v300_v44 = vld [vmem:[%s520_s0 + $0xd8] sm:$0xff]  ;;  %285 = vst [vmem:[%s521_s1 + $0xb8] sm:$0xff] %v124_v33  ;;  %v172_v45 = vxor.u32 2147483648, %v296_v42  ;;  %v180_v46 = vxor.u32 2147483648, %v298_v43  ;;  %v302_v48 = vld [vmem:[%s520_s0 + $0x60] sm:$0xff] }
   0xc   :  { %287 = vst [vmem:[%s521_s1 + $0x40] sm:$0xff] %v132_v34  ;;  %289 = vst [vmem:[%s521_s1 + $0xc0] sm:$0xff] %v140_v35  ;;  %v188_v47 = vxor.u32 2147483648, %v300_v44  ;;  %v304_v49 = vld [vmem:[%s520_s0 + $0xe0] sm:$0xff]  ;;  %v306_v50 = vld [vmem:[%s520_s0 + $0x68] sm:$0xff]  ;;  %v196_v51 = vxor.u32 2147483648, %v302_v48 }
   0xd   :  { %291 = vst [vmem:[%s521_s1 + $0x48] sm:$0xff] %v148_v39  ;;  %293 = vst [vmem:[%s521_s1 + $0xc8] sm:$0xff] %v156_v40  ;;  %v204_v52 = vxor.u32 2147483648, %v304_v49  ;;  %v212_v53 = vxor.u32 2147483648, %v306_v50  ;;  %v308_v54 = vld [vmem:[%s520_s0 + $0xe8] sm:$0xff]  ;;  %v310_v55 = vld [vmem:[%s520_s0 + $0x70] sm:$0xff] }
   0xe   :  { %295 = vst [vmem:[%s521_s1 + $0x50] sm:$0xff] %v164_v41  ;;  %v312_v56 = vld [vmem:[%s520_s0 + $0xf0] sm:$0xff]  ;;  %297 = vst [vmem:[%s521_s1 + $0xd0] sm:$0xff] %v172_v45  ;;  %v220_v57 = vxor.u32 2147483648, %v308_v54  ;;  %v228_v58 = vxor.u32 2147483648, %v310_v55  ;;  %v314_v60 = vld [vmem:[%s520_s0 + $0x78] sm:$0xff] }
   0xf   :  { %299 = vst [vmem:[%s521_s1 + $0x58] sm:$0xff] %v180_v46  ;;  %301 = vst [vmem:[%s521_s1 + $0xd8] sm:$0xff] %v188_v47  ;;  %v236_v59 = vxor.u32 2147483648, %v312_v56  ;;  %v316_v61 = vld [vmem:[%s520_s0 + $0xf8] sm:$0xff]  ;;  %v244_v62 = vxor.u32 2147483648, %v314_v60 }
  0x10   :  { %303 = vst [vmem:[%s521_s1 + $0x60] sm:$0xff] %v196_v51  ;;  %305 = vst [vmem:[%s521_s1 + $0xe0] sm:$0xff] %v204_v52  ;;  %v252_v63 = vxor.u32 2147483648, %v316_v61 }
  0x11   :  { %307 = vst [vmem:[%s521_s1 + $0x68] sm:$0xff] %v212_v53  ;;  %309 = vst [vmem:[%s521_s1 + $0xe8] sm:$0xff] %v220_v57 }
  0x12   :  { %311 = vst [vmem:[%s521_s1 + $0x70] sm:$0xff] %v228_v58  ;;  %313 = vst [vmem:[%s521_s1 + $0xf0] sm:$0xff] %v236_v59 }
  0x13   :  { %315 = vst [vmem:[%s521_s1 + $0x78] sm:$0xff] %v244_v62  ;;  %317 = vst [vmem:[%s521_s1 + $0xf8] sm:$0xff] %v252_v63 }

// kernel: flownet3d_forward.22
= control target key start
LH: loop header
LB: loop body
LE: loop exit
PB: predicated region body
PF: predicated region fallthrough
CT: control target
= control target key end

     0   :  { %s855_s12 = smov 0   ;;  %s857_s13 = smov 0   ;;  %s995_s0 = inlined_call_operand.vmem [shape: f32[2,128,8], index: 0, kind: input, shape index: {}]   ;;  %s996_s1 = inlined_call_operand.vmem [shape: f32[2,8,128], index: 1, kind: input, shape index: {}]   ;;  %s997_s2 = inlined_call_operand.vmem [shape: f32[2,1,128], index: 2, kind: input, shape index: {}]   ;;  %s998_s3 = inlined_call_operand.vmem [shape: f32[2,128,128], index: 3, kind: output, shape index: {}]  }
   0x1   :  { %s859_s14 = smov 0  }
   0x2 LB: > { %s25_s15 = sadd.s32 1, %s829_s13  ;;  %p715_p0 = scmp.ge.s32.totalorder %s833_s14, 1  ;;  %s833_s14 = sphi %s859_s14, %s13_s14   ;;  %s829_s13 = sphi %s857_s13, %s1000_s13   ;;  %s825_s12 = sphi %s855_s12, %s999_s12  }
   0x3   : > { %p27_p1 = scmp.ge.s32.totalorder %s25_s15, 2  ;;  %p175_p2 = scmp.lt.s32.totalorder %s833_s14, 3 }
   0x5   : > { %s1002_s15 = smov (%p27_p1, %s25_s15), 0  ;;  %p176_p3 = pnand %p715_p0, %p175_p2 }
   0x6   : > { %p215_p4 = scmp.lt.s32.totalorder (!%p176_p3), %s825_s12, 1  ;;  %vm275_vm0 = vcmask (!%p176_p3), 64512  }
   0x7   : > { %179 = sbr.rel (%p176_p3) target bundleno = 253 (0xfd), region = 32 }
   0xe   : > { %s1004_s12 = smov (!%p215_p4, %s825_s12), 1 }
   0xf   : > { %s740_s16 = sshll.u32 %s1004_s12, 7  ;;  %s718_s17 = sshll.u32 %s1004_s12, 3 }
  0x10   : > { %s882_s20 = scalar_lea.vmem %s995_s0, %s740_s16  ;;  %s227_s23 = scalar_lea.vmem %s996_s1, %s718_s17 }
  0x11   : > { %v257_v0 = vld [vmem:[%s227_s23] sm:$0xff]  ;;  %v242_v4 = vld [vmem:[%s882_s20 + $0x8] sm:$0xff]  ;;  %v243_v6 = vld [vmem:[%s882_s20 + $0x10] sm:$0xff]  ;;  %s230_s26 = scalar_lea.vmem %s997_s2, %s1004_s12  ;;  %s956_s29 = scalar_lea.vmem %s998_s3, %s740_s16 }
  0x12   : > { %v241_v1 = vld [vmem:[%s882_s20] sm:$0xff]  ;;  %759 = vmatprep.subr.mxu0 %v257_v0  ;;  %785 = vmatprep.subr.mxu1 %v257_v0  ;;  %v250_v5 = vld [vmem:[%s882_s20 + $0x48] sm:$0xff]  ;;  %v251_v7 = vld [vmem:[%s882_s20 + $0x50] sm:$0xff]  ;;  %v261_v9 = vmul.f32 %v243_v6, %v243_v6  ;;  %v260_v12 = vmul.f32 %v242_v4, %v242_v4 }
  0x13   : > { %v249_v2 = vld [vmem:[%s882_s20 + $0x40] sm:$0xff]  ;;  %v259_v3 = vmul.f32 %v241_v1, %v241_v1  ;;  %760 = vmatpush3.msra.mxu0 %v257_v0  ;;  %786 = vmatpush3.msra.mxu1 %v257_v0  ;;  %v244_v8 = vld [vmem:[%s882_s20 + $0x18] sm:$0xff]  ;;  %v246_v17 = vld [vmem:[%s882_s20 + $0x28] sm:$0xff]  ;;  %v268_v34 = vmul.f32 %v250_v5, %v250_v5  ;;  %v269_v38 = vmul.f32 %v251_v7, %v251_v7 }
  0x14   : > { %761 = vmatprep.mubr.msk.f32.mxu0 %vm275_vm0, %v241_v1  ;;  %773 = vmatprep.mubr.msk.f32.mxu1 %vm275_vm0, %v249_v2  ;;  %v262_v11 = vmul.f32 %v244_v8, %v244_v8  ;;  %v252_v13 = vld [vmem:[%s882_s20 + $0x58] sm:$0xff]  ;;  %v282_v14 = vsel %vm275_vm0, %v261_v9, 0.0  ;;  %v245_v15 = vld [vmem:[%s882_s20 + $0x20] sm:$0xff]  ;;  %v279_v19 = vsel %vm275_vm0, %v260_v12, 0.0  ;;  %v264_v20 = vmul.f32 %v246_v17, %v246_v17  ;;  %v254_v22 = vld [vmem:[%s882_s20 + $0x68] sm:$0xff] }
  0x15   : > { %v276_v10 = vsel %vm275_vm0, %v259_v3, 0.0  ;;  %762 = vmatmul.mubr.msk.f32.vlgmr.msra.gmra.mrb[0].mxu0 %vm275_vm0, %v242_v4  ;;  %774 = vmatmul.mubr.msk.f32.vlgmr.msra.gmra.mrb[0].mxu1 %vm275_vm0, %v250_v5  ;;  %v253_v16 = vld [vmem:[%s882_s20 + $0x60] sm:$0xff]  ;;  %v263_v21 = vmul.f32 %v245_v15, %v245_v15  ;;  %v247_v23 = vld [vmem:[%s882_s20 + $0x30] sm:$0xff]  ;;  %v248_v25 = vld [vmem:[%s882_s20 + $0x38] sm:$0xff]  ;;  %v267_v31 = vmul.f32 %v249_v2, %v249_v2  ;;  %v303_v35 = vsel %vm275_vm0, %v268_v34, 0.0 }
  0x16   : > { %764 = vmatprep.mubr.msk.f32.mxu0 %vm275_vm0, %v243_v6  ;;  %776 = vmatprep.mubr.msk.f32.mxu1 %vm275_vm0, %v251_v7  ;;  %v285_v18 = vsel %vm275_vm0, %v262_v11, 0.0  ;;  %v255_v24 = vld [vmem:[%s882_s20 + $0x70] sm:$0xff]  ;;  %v291_v26 = vsel %vm275_vm0, %v264_v20, 0.0  ;;  %v266_v28 = vmul.f32 %v248_v25, %v248_v25  ;;  %v265_v29 = vmul.f32 %v247_v23, %v247_v23  ;;  %v256_v30 = vld [vmem:[%s882_s20 + $0x78] sm:$0xff]  ;;  %v943_v61 = vld [vmem:[%s230_s26] ss:$0 sm:$0xff] }
  0x17   : > { %283 = vadd.xlane.f32.xlu1 %v282_v14  ;;  %277 = vadd.xlane.f32.xlu0 %v276_v10  ;;  %v288_v27 = vsel %vm275_vm0, %v263_v21, 0.0  ;;  %v300_v36 = vsel %vm275_vm0, %v267_v31, 0.0  ;;  %v270_v37 = vmul.f32 %v252_v13, %v252_v13  ;;  %v306_v40 = vsel %vm275_vm0, %v269_v38, 0.0 }
  0x18   : > { %v297_v32 = vsel %vm275_vm0, %v266_v28, 0.0  ;;  %v294_v33 = vsel %vm275_vm0, %v265_v29, 0.0  ;;  %v272_v41 = vmul.f32 %v254_v22, %v254_v22  ;;  %v271_v42 = vmul.f32 %v253_v16, %v253_v16 }
  0x19   : > { %765 = vmatmul.mubr.msk.f32.gmra.mrb[2].mxu0 %vm275_vm0, %v244_v8  ;;  %777 = vmatmul.mubr.msk.f32.gmra.mrb[2].mxu1 %vm275_vm0, %v252_v13  ;;  %v309_v39 = vsel %vm275_vm0, %v270_v37, 0.0  ;;  %v274_v45 = vmul.f32 %v256_v30, %v256_v30  ;;  %v273_v46 = vmul.f32 %v255_v24, %v255_v24 }
  0x1a   : > { %767 = vmatprep.mubr.msk.f32.mxu0 %vm275_vm0, %v245_v15  ;;  %779 = vmatprep.mubr.msk.f32.mxu1 %vm275_vm0, %v253_v16  ;;  %v315_v43 = vsel %vm275_vm0, %v272_v41, 0.0  ;;  %v312_v44 = vsel %vm275_vm0, %v271_v42, 0.0 }
  0x1b   : > { %286 = vadd.xlane.f32.xlu1 %v285_v18  ;;  %280 = vadd.xlane.f32.xlu0 %v279_v19  ;;  %v321_v47 = vsel %vm275_vm0, %v274_v45, 0.0  ;;  %v318_v48 = vsel %vm275_vm0, %v273_v46, 0.0 }
  0x1d   : > { %768 = vmatmul.mubr.msk.f32.gmra.mrb[4].mxu0 %vm275_vm0, %v246_v17  ;;  %780 = vmatmul.mubr.msk.f32.gmra.mrb[4].mxu1 %vm275_vm0, %v254_v22 }
  0x1e   : > { %770 = vmatprep.mubr.msk.f32.mxu0 %vm275_vm0, %v247_v23  ;;  %782 = vmatprep.mubr.msk.f32.mxu1 %vm275_vm0, %v255_v24 }
  0x1f   : > { %292 = vadd.xlane.f32.xlu1 %v291_v26  ;;  %289 = vadd.xlane.f32.xlu0 %v288_v27 }
  0x21   : > { %771 = vmatmul.mubr.msk.f32.gmra.mrb[6].mxu0 %vm275_vm0, %v248_v25  ;;  %783 = vmatmul.mubr.msk.f32.gmra.mrb[6].mxu1 %vm275_vm0, %v256_v30 }
  0x23   : > { %298 = vadd.xlane.f32.xlu1 %v297_v32  ;;  %295 = vadd.xlane.f32.xlu0 %v294_v33 }
  0x27   : > { %304 = vadd.xlane.f32.xlu1 %v303_v35  ;;  %301 = vadd.xlane.f32.xlu0 %v300_v36 }
  0x2b   : > { %310 = vadd.xlane.f32.xlu1 %v309_v39  ;;  %307 = vadd.xlane.f32.xlu0 %v306_v40 }
  0x2f   : > { %316 = vadd.xlane.f32.xlu1 %v315_v43  ;;  %313 = vadd.xlane.f32.xlu0 %v312_v44 }
  0x33   : > { %322 = vadd.xlane.f32.xlu1 %v321_v47  ;;  %319 = vadd.xlane.f32.xlu0 %v318_v48 }
  0xa4   : > { %v284_v49 = vpop.xlane.xlu1 %283  ;;  %v278_v50 = vpop.xlane.xlu0 %277 }
  0xa5   : > { %v523_v9 = vadd.f32 %v943_v61, %v278_v50  ;;  %v525_v12 = vadd.f32 %v943_v61, %v284_v49 }
  0xa8   : > { %v287_v51 = vpop.xlane.xlu1 %286  ;;  %v281_v52 = vpop.xlane.xlu0 %280 }
  0xa9   : > { %v524_v4 = vadd.f32 %v943_v61, %v281_v52  ;;  %v526_v16 = vadd.f32 %v943_v61, %v287_v51 }
  0xac   : > { %v293_v53 = vpop.xlane.xlu1 %292  ;;  %v290_v54 = vpop.xlane.xlu0 %289 }
  0xad   : > { %v528_v32 = vadd.f32 %v943_v61, %v293_v53  ;;  %v527_v38 = vadd.f32 %v943_v61, %v290_v54 }
  0xb0   : > { %v935_v55 = vpop.xlane.xlu1 %298  ;;  %v937_v56 = vpop.xlane.xlu0 %295 }
  0xb1   : > { %v530_v54 = vadd.f32 %v943_v61, %v935_v55 }
  0xb4   : > { %v305_v57 = vpop.xlane.xlu1 %304  ;;  %v302_v58 = vpop.xlane.xlu0 %301 }
  0xb5   : > { %v532_v62 = vadd.f32 %v943_v61, %v305_v57  ;;  %v531_v3 = vadd.f32 %v943_v61, %v302_v58 }
  0xb8   : > { %v311_v59 = vpop.xlane.xlu1 %310  ;;  %v308_v60 = vpop.xlane.xlu0 %307 }
  0xb9   : > { %v534_v15 = vadd.f32 %v943_v61, %v311_v59  ;;  %v533_v21 = vadd.f32 %v943_v61, %v308_v60  ;;  %v529_v60 = vadd.f32 %v943_v61, %v937_v56 }
  0xbc   : > { %v317_v63 = vpop.xlane.xlu1 %316  ;;  %v314_v0 = vpop.xlane.xlu0 %313 }
  0xbd   : > { %v536_v35 = vadd.f32 %v943_v61, %v317_v63  ;;  %v535_v43 = vadd.f32 %v943_v61, %v314_v0 }
  0xc0   : > { %v323_v36 = vpop.xlane.xlu1 %322  ;;  %v320_v37 = vpop.xlane.xlu0 %319 }
  0xc1   : > { %v538_v59 = vadd.f32 %v943_v61, %v323_v36  ;;  %v537_v55 = vadd.f32 %v943_v61, %v320_v37 }
  0xe8   : > { %v775_v1 = vpop.f32.mrb[0].mxu1  ;;  %v763_v2 = vpop.f32.mrb[0].mxu0 }
  0xe9   : > { %v548_v5 = vmul.f32 2.0, %v775_v1  ;;  %v540_v6 = vmul.f32 2.0, %v763_v2  ;;  %v438_v7 = vpop.f32.mrb[1].mxu0  ;;  %v478_v8 = vpop.f32.mrb[1].mxu1 }
  0xea   : > { %v539_v10 = vmul.f32 2.0, %v438_v7  ;;  %v547_v11 = vmul.f32 2.0, %v478_v8 }
  0xeb   : > { %v564_v13 = vsub.f32 %v532_v62, %v548_v5  ;;  %v556_v14 = vsub.f32 %v524_v4, %v540_v6 }
  0xec   : > { %v555_v17 = vsub.f32 %v523_v9, %v539_v10  ;;  %v563_v18 = vsub.f32 %v531_v3, %v547_v11  ;;  %v778_v19 = vpop.f32.mrb[2].mxu1  ;;  %v766_v20 = vpop.f32.mrb[2].mxu0 }
  0xed   : > { %v580_v22 = vmax.f32 %v564_v13, 0.0  ;;  %v572_v23 = vmax.f32 %v556_v14, 0.0  ;;  %v550_v24 = vmul.f32 2.0, %v778_v19  ;;  %v542_v25 = vmul.f32 2.0, %v766_v20  ;;  %v448_v26 = vpop.f32.mrb[3].mxu0  ;;  %v488_v27 = vpop.f32.mrb[3].mxu1 }
  0xee   : > { %v571_v28 = vmax.f32 %v555_v17, 0.0  ;;  %v579_v29 = vmax.f32 %v563_v18, 0.0  ;;  %v541_v30 = vmul.f32 2.0, %v448_v26  ;;  %v549_v31 = vmul.f32 2.0, %v488_v27 }
  0xef   : > { %596 = vst [vmem:[%s956_s29 + $0x48] sm:$0xff] %v580_v22  ;;  %588 = vst [vmem:[%s956_s29 + $0x8] sm:$0xff] %v572_v23  ;;  %v566_v33 = vsub.f32 %v534_v15, %v550_v24  ;;  %v558_v34 = vsub.f32 %v526_v16, %v542_v25 }
  0xf0   : > { %587 = vst [vmem:[%s956_s29] sm:$0xff] %v571_v28  ;;  %595 = vst [vmem:[%s956_s29 + $0x40] sm:$0xff] %v579_v29  ;;  %v557_v39 = vsub.f32 %v525_v12, %v541_v30  ;;  %v565_v40 = vsub.f32 %v533_v21, %v549_v31  ;;  %v781_v41 = vpop.f32.mrb[4].mxu1  ;;  %v769_v42 = vpop.f32.mrb[4].mxu0 }
  0xf1   : > { %v582_v44 = vmax.f32 %v566_v33, 0.0  ;;  %v574_v45 = vmax.f32 %v558_v34, 0.0  ;;  %v552_v46 = vmul.f32 2.0, %v781_v41  ;;  %v544_v47 = vmul.f32 2.0, %v769_v42  ;;  %v458_v48 = vpop.f32.mrb[5].mxu0  ;;  %v498_v49 = vpop.f32.mrb[5].mxu1 }
  0xf2   : > { %v573_v50 = vmax.f32 %v557_v39, 0.0  ;;  %v581_v51 = vmax.f32 %v565_v40, 0.0  ;;  %v543_v52 = vmul.f32 2.0, %v458_v48  ;;  %v551_v53 = vmul.f32 2.0, %v498_v49 }
  0xf3   : > { %598 = vst [vmem:[%s956_s29 + $0x58] sm:$0xff] %v582_v44  ;;  %590 = vst [vmem:[%s956_s29 + $0x18] sm:$0xff] %v574_v45  ;;  %v568_v57 = vsub.f32 %v536_v35, %v552_v46  ;;  %v560_v58 = vsub.f32 %v528_v32, %v544_v47 }
  0xf4   : > { %589 = vst [vmem:[%s956_s29 + $0x10] sm:$0xff] %v573_v50  ;;  %597 = vst [vmem:[%s956_s29 + $0x50] sm:$0xff] %v581_v51  ;;  %v559_v62 = vsub.f32 %v527_v38, %v543_v52  ;;  %v567_v63 = vsub.f32 %v535_v43, %v551_v53  ;;  %v784_v0 = vpop.f32.mrb[6].mxu1  ;;  %v772_v1 = vpop.f32.mrb[6].mxu0 }
  0xf5   : > { %v584_v2 = vmax.f32 %v568_v57, 0.0  ;;  %v576_v3 = vmax.f32 %v560_v58, 0.0  ;;  %v554_v4 = vmul.f32 2.0, %v784_v0  ;;  %v546_v5 = vmul.f32 2.0, %v772_v1  ;;  %v468_v6 = vpop.f32.mrb[7].mxu0  ;;  %v508_v7 = vpop.f32.mrb[7].mxu1 }
  0xf6   : > { %v575_v8 = vmax.f32 %v559_v62, 0.0  ;;  %v583_v56 = vmax.f32 %v567_v63, 0.0  ;;  %v545_v9 = vmul.f32 2.0, %v468_v6  ;;  %v553_v10 = vmul.f32 2.0, %v508_v7 }
  0xf7   : > { %600 = vst [vmem:[%s956_s29 + $0x68] sm:$0xff] %v584_v2  ;;  %592 = vst [vmem:[%s956_s29 + $0x28] sm:$0xff] %v576_v3  ;;  %v570_v11 = vsub.f32 %v538_v59, %v554_v4  ;;  %v562_v12 = vsub.f32 %v530_v54, %v546_v5 }
  0xf8   : > { %591 = vst [vmem:[%s956_s29 + $0x20] sm:$0xff] %v575_v8  ;;  %599 = vst [vmem:[%s956_s29 + $0x60] sm:$0xff] %v583_v56  ;;  %v561_v61 = vsub.f32 %v529_v60, %v545_v9  ;;  %v569_v13 = vsub.f32 %v537_v55, %v553_v10 }
  0xf9   : > { %v586_v14 = vmax.f32 %v570_v11, 0.0  ;;  %v578_v15 = vmax.f32 %v562_v12, 0.0 }
  0xfa   : > { %v577_v16 = vmax.f32 %v561_v61, 0.0  ;;  %v585_v17 = vmax.f32 %v569_v13, 0.0 }
  0xfb   : > { %602 = vst [vmem:[%s956_s29 + $0x78] sm:$0xff] %v586_v14  ;;  %594 = vst [vmem:[%s956_s29 + $0x38] sm:$0xff] %v578_v15 }
  0xfc   : > { %593 = vst [vmem:[%s956_s29 + $0x30] sm:$0xff] %v577_v16  ;;  %601 = vst [vmem:[%s956_s29 + $0x70] sm:$0xff] %v585_v17 }
  0xfd PF: > { %s13_s14 = sadd.s32 1, %s833_s14   ;;  %s999_s12 = smov %s829_s13 }
  0xfe   : > { %p10_p5 = scmp.ge.s32.totalorder %s13_s14, 4   ;;  %s1000_s13 = smov %s1002_s15 }
 0x100   :  { %12 = sbr.rel (!%p10_p5) target bundleno = 2 (0x2), region = 68 }

// kernel: flownet3d_forward.23
= control target key start
LH: loop header
LB: loop body
LE: loop exit
PB: predicated region body
PF: predicated region fallthrough
CT: control target
= control target key end

     0   :  { %s2775_s24 = smov 0   ;;  %s2777_s25 = smov 0   ;;  %s3956_s0 = inlined_call_operand.vmem [shape: bf16[8,256,8], index: 0, kind: input, shape index: {}]   ;;  %s3957_s1 = inlined_call_operand.vmem [shape: bf16[8,256], index: 1, kind: input, shape index: {}]   ;;  %s3958_s2 = inlined_call_operand.vmem [shape: bf16[256,256], index: 2, kind: input, shape index: {}]   ;;  %s3959_s3 = inlined_call_operand.vmem [shape: bf16[256,512], index: 3, kind: input, shape index: {}]   ;;  %s3960_s4 = inlined_call_operand.vmem [shape: f32[1,256], index: 4, kind: input, shape index: {}]   ;;  %s3961_s5 = inlined_call_operand.vmem [shape: f32[1,256], index: 5, kind: input, shape index: {}]   ;;  %s3962_s6 = inlined_call_operand.vmem [shape: f32[1,512], index: 6, kind: input, shape index: {}]   ;;  %s3963_s7 = inlined_call_operand.vmem [shape: bf16[256,512], index: 7, kind: output, shape index: {}]  }
   0x1   :  { %s2779_s26 = smov 0   ;;  %s2781_s27 = smov 0  }
   0x2   :  { %s2783_s28 = smov 0  }
   0x3 LB: > { %s26_s29 = sadd.s32 1, %s2724_s26  ;;  %s29_s30 = sadd.s32 1, %s2728_s27  ;;  %s2732_s28 = sphi %s2783_s28, %s17_s28   ;;  %s2728_s27 = sphi %s2781_s27, %s4158_s27   ;;  %s2724_s26 = sphi %s2779_s26, %s4157_s26   ;;  %s2720_s25 = sphi %s2777_s25, %s4156_s25   ;;  %s2716_s24 = sphi %s2775_s24, %s4155_s24  }
   0x4   : > { %p27_p0 = scmp.ge.s32.totalorder %s26_s29, 8  ;;  %p2275_p1 = scmp.ge.s32.totalorder %s2732_s28, 1 }
   0x5   : > { %p256_p2 = scmp.lt.s32.totalorder %s2732_s28, 17 }
   0x6   : > { %s4160_s29 = smov (%p27_p0, %s26_s29), 0  ;;  %s4162_s30 = smov (!%p27_p0, %s29_s30), %s2728_s27 }
   0x7   : > { %p257_p3 = pnand %p2275_p1, %p256_p2  ;;  %p31_p4 = scmp.ge.s32.totalorder %s4162_s30, 2 }
   0x9   : > { %s4164_s30 = smov (%p31_p4, %s4162_s30), 0  ;;  %260 = sbr.rel (%p257_p3) target bundleno = 867 (0x363), region = 48 }
  0x10   : > { %v327_v0 = vld [vmem:[%s3957_s1] sm:$0xff]  ;;  %vm410_vm0 = vcmask 1043456   ;;  %s2276_s10 = sshll.u32 %s2720_s25, 4  ;;  %p294_p5 = scmp.lt.s32.totalorder %s2716_s24, 7  ;;  %v2734_v3 = vmov 0   ;;  %vm385_vm1 = vcmask 64512  }
  0x11   : > { %v2291_v1 = vcombine.high %v327_v0, %v327_v0  ;;  %v2290_v2 = vcombine.low %v327_v0, %v327_v0  ;;  %449 = vmatprep.mubr.bf16.mxu0 %v2734_v3  ;;  %p296_p6 = scmp.lt.s32.totalorder %s2276_s10, 31  ;;  %v2550_v4 = vld [vmem:[%s3958_s2 + $0x4] ss:$8 sps:$4 sm:$0xff]   ;;  %v2552_v5 = vld [vmem:[%s3958_s2] ss:$8 sps:$4 sm:$0xff]   ;;  %p2397_p7 = scmp.ne.s32.totalorder %s2716_s24, 0 }
  0x12   : > { %s295_s13 = scalar_select %p294_p5, %s2716_s24, 7  ;;  %782 = vmatprep.subr.bf16.mxu1 %v2550_v4  ;;  %v2553_v7 = vld [vmem:[%s3958_s2 + $0x14] ss:$8 sps:$4 sm:$0xff]   ;;  %v2555_v8 = vld [vmem:[%s3958_s2 + $0x10] ss:$8 sps:$4 sm:$0xff]  }
  0x13   : > { %2292 = vmatprep.subr.msk.bf16.mxu0 %vm410_vm0, %v2291_v1  ;;  %v412_v6 = vsel %vm410_vm0, %v2290_v2, 0  ;;  %s4166_s10 = smov (!%p296_p6, %s2276_s10), 31  ;;  %783 = vmatpush1.bf16.msra.mxu1 %v2552_v5  ;;  %v2556_v9 = vld [vmem:[%s3958_s2 + $0x24] ss:$8 sps:$4 sm:$0xff]   ;;  %v2558_v10 = vld [vmem:[%s3958_s2 + $0x20] ss:$8 sps:$4 sm:$0xff]  }
  0x14   : > { %418 = vmatpush1.bf16.msra.mxu0 %v412_v6  ;;  %s2277_s18 = sshll.u32 %s295_s13, 5  ;;  %s2434_s22 = sshll.u32 %s4166_s10, 4  ;;  %784 = vmatprep.subr.bf16.mxu1 %v2553_v7  ;;  %v2559_v12 = vld [vmem:[%s3958_s2 + $0x34] ss:$8 sps:$4 sm:$0xff]   ;;  %v2561_v13 = vld [vmem:[%s3958_s2 + $0x30] ss:$8 sps:$4 sm:$0xff]   ;;  %v330_v7 = vlaneseq }
  0x15   : > { %s299_s21 = sadd.s32 %s2277_s18, %s4166_s10  ;;  %s2834_s12 = scalar_lea.vmem %s3963_s7, %s2434_s22  ;;  %v2562_v14 = vld [vmem:[%s3958_s2 + $0x44] ss:$8 sps:$4 sm:$0xff]   ;;  %v2564_v16 = vld [vmem:[%s3958_s2 + $0x40] ss:$8 sps:$4 sm:$0xff]   ;;  %v2565_v17 = vld [vmem:[%s3958_s2 + $0x54] ss:$8 sps:$4 sm:$0xff]  }
  0x16   : > { %s2278_s8 = sshll.u32 %s299_s21, 2  ;;  %v2567_v18 = vld [vmem:[%s3958_s2 + $0x50] ss:$8 sps:$4 sm:$0xff]   ;;  %v2568_v19 = vld [vmem:[%s3958_s2 + $0x64] ss:$8 sps:$4 sm:$0xff]  }
  0x17   : > { %s2839_s15 = scalar_lea.vmem %s3956_s0, %s2278_s8  ;;  %785 = vmatpush1.bf16.msra.mxu1 %v2555_v8  ;;  %v2570_v21 = vld [vmem:[%s3958_s2 + $0x60] ss:$8 sps:$4 sm:$0xff]   ;;  %v2571_v22 = vld [vmem:[%s3958_s2 + $0x74] ss:$8 sps:$4 sm:$0xff]   ;;  %v2573_v23 = vld [vmem:[%s3958_s2 + $0x70] ss:$8 sps:$4 sm:$0xff]  }
  0x18   : > { %v2542_v11 = vld [vmem:[%s2839_s15] sm:$0xff]   ;;  %786 = vmatprep.subr.bf16.mxu1 %v2556_v9  ;;  %v2543_v15 = vld [vmem:[%s2839_s15 + $0x8] sm:$0xff]   ;;  %v2544_v20 = vld [vmem:[%s2839_s15 + $0x10] sm:$0xff]  }
  0x19   : > { %2293 = vmatmul.mubr.msk.bf16.vlgmr.msra.gmra.mrb[0].mxu0 %vm385_vm1, %v2542_v11  ;;  %v2574_v24 = vld [vmem:[%s3958_s2 + $0x84] ss:$8 sps:$4 sm:$0xff]   ;;  %v2545_v25 = vld [vmem:[%s2839_s15 + $0x18] sm:$0xff]   ;;  %v2576_v26 = vld [vmem:[%s3958_s2 + $0x80] ss:$8 sps:$4 sm:$0xff]  }
  0x1a   : > { %459 = vmatprep.mubr.bf16.mxu0 %v2734_v3  ;;  %v2577_v27 = vld [vmem:[%s3958_s2 + $0x94] ss:$8 sps:$4 sm:$0xff]   ;;  %v2579_v28 = vld [vmem:[%s3958_s2 + $0x90] ss:$8 sps:$4 sm:$0xff]   ;;  %v2580_v29 = vld [vmem:[%s3958_s2 + $0xa4] ss:$8 sps:$4 sm:$0xff]  }
  0x1b   : > { %787 = vmatpush1.bf16.msra.mxu1 %v2558_v10  ;;  %v2546_v30 = vld [vmem:[%s2839_s15 + $0x20] sm:$0xff]   ;;  %v2583_v32 = vld [vmem:[%s3958_s2 + $0xb4] ss:$8 sps:$4 sm:$0xff]   ;;  %v2585_v33 = vld [vmem:[%s3958_s2 + $0xb0] ss:$8 sps:$4 sm:$0xff]   ;;  %v3032_v10 = vshrl.u32 %v330_v7, 7 }
  0x1c   : > { %788 = vmatprep.subr.bf16.mxu1 %v2559_v12  ;;  %v2582_v31 = vld [vmem:[%s3958_s2 + $0xa0] ss:$8 sps:$4 sm:$0xff]   ;;  %v2586_v34 = vld [vmem:[%s3958_s2 + $0xc4] ss:$8 sps:$4 sm:$0xff]   ;;  %v2589_v37 = vld [vmem:[%s3958_s2 + $0xd4] ss:$8 sps:$4 sm:$0xff]  }
  0x1d   : > { %v2547_v35 = vld [vmem:[%s2839_s15 + $0x28] sm:$0xff]   ;;  %v2548_v38 = vld [vmem:[%s2839_s15 + $0x30] sm:$0xff]   ;;  %v2549_v39 = vld [vmem:[%s2839_s15 + $0x38] sm:$0xff]   ;;  %v3038_v12 = vsub.s32 0, %v3032_v10 }
  0x1e   : > { %v2588_v36 = vld [vmem:[%s3958_s2 + $0xc0] ss:$8 sps:$4 sm:$0xff]   ;;  %v2591_v40 = vld [vmem:[%s3958_s2 + $0xd0] ss:$8 sps:$4 sm:$0xff]   ;;  %v2592_v41 = vld [vmem:[%s3958_s2 + $0xe4] ss:$8 sps:$4 sm:$0xff]  }
  0x1f   : > { %789 = vmatpush1.bf16.msra.mxu1 %v2561_v13  ;;  %v2594_v42 = vld [vmem:[%s3958_s2 + $0xe0] ss:$8 sps:$4 sm:$0xff]   ;;  %v2595_v43 = vld [vmem:[%s3958_s2 + $0xf4] ss:$8 sps:$4 sm:$0xff]   ;;  %v2597_v44 = vld [vmem:[%s3958_s2 + $0xf0] ss:$8 sps:$4 sm:$0xff]  }
  0x20   : > { %790 = vmatprep.subr.bf16.mxu1 %v2562_v14  ;;  %v2598_v45 = vld [vmem:[%s3959_s3] ss:$16 sps:$4 sm:$0xff]   ;;  %v2600_v46 = vld [vmem:[%s3959_s3 + $0x4] ss:$16 sps:$4 sm:$0xff]   ;;  %v2963_v50 = vld [vmem:[%s3959_s3 + $0xc] ss:$16 sps:$4 sm:$0xff]  }
  0x21   : > { %2294 = vmatmul.mubr.msk.bf16.gmra.mrb[4].mxu0 %vm385_vm1, %v2543_v15  ;;  %v2603_v47 = vld [vmem:[%s3959_s3 + $0x24] ss:$16 sps:$4 sm:$0xff]   ;;  %1349 = vmatprep.subr.bf16.mxu0 %v2600_v46  ;;  %v2601_v48 = vld [vmem:[%s3959_s3 + $0x20] ss:$16 sps:$4 sm:$0xff]   ;;  %v3044_v14 = vsub.s32 1, %v3032_v10 }
  0x22   : > { %469 = vmatprep.mubr.bf16.mxu0 %v2734_v3  ;;  %1350 = vmatpush1.bf16.msra.mxu0 %v2598_v45  ;;  %v2606_v49 = vld [vmem:[%s3959_s3 + $0x44] ss:$16 sps:$4 sm:$0xff]   ;;  %v2604_v51 = vld [vmem:[%s3959_s3 + $0x40] ss:$16 sps:$4 sm:$0xff]  }
  0x23   : > { %791 = vmatpush1.bf16.msra.mxu1 %v2564_v16  ;;  %1351 = vmatprep.subr.bf16.mxu0 %v2603_v47  ;;  %v2609_v52 = vld [vmem:[%s3959_s3 + $0x64] ss:$16 sps:$4 sm:$0xff]   ;;  %v2607_v53 = vld [vmem:[%s3959_s3 + $0x60] ss:$16 sps:$4 sm:$0xff]  }
  0x24   : > { %792 = vmatprep.subr.bf16.mxu1 %v2565_v17  ;;  %v2612_v54 = vld [vmem:[%s3959_s3 + $0x84] ss:$16 sps:$4 sm:$0xff]   ;;  %v2610_v55 = vld [vmem:[%s3959_s3 + $0x80] ss:$16 sps:$4 sm:$0xff]  }
  0x25   : > { %v2615_v56 = vld [vmem:[%s3959_s3 + $0xa4] ss:$16 sps:$4 sm:$0xff]   ;;  %v2613_v57 = vld [vmem:[%s3959_s3 + $0xa0] ss:$16 sps:$4 sm:$0xff]  }
  0x26   : > { %1352 = vmatpush1.bf16.msra.mxu0 %v2601_v48  ;;  %v2618_v58 = vld [vmem:[%s3959_s3 + $0xc4] ss:$16 sps:$4 sm:$0xff]   ;;  %v2616_v59 = vld [vmem:[%s3959_s3 + $0xc0] ss:$16 sps:$4 sm:$0xff]  }
  0x27   : > { %793 = vmatpush1.bf16.msra.mxu1 %v2567_v18  ;;  %1353 = vmatprep.subr.bf16.mxu0 %v2606_v49  ;;  %v2624_v60 = vld [vmem:[%s3959_s3 + $0xe4] ss:$16 sps:$4 sm:$0xff]   ;;  %v2622_v61 = vld [vmem:[%s3959_s3 + $0xe0] ss:$16 sps:$4 sm:$0xff]  }
  0x28   : > { %794 = vmatprep.subr.bf16.mxu1 %v2568_v19  ;;  %v2630_v62 = vld [vmem:[%s3959_s3 + $0x104] ss:$16 sps:$4 sm:$0xff]   ;;  %v2628_v63 = vld [vmem:[%s3959_s3 + $0x100] ss:$16 sps:$4 sm:$0xff]  }
  0x29   : > { %2295 = vmatmul.mubr.msk.bf16.gmra.mrb[8].mxu0 %vm385_vm1, %v2544_v20  ;;  %v2636_v0 = vld [vmem:[%s3959_s3 + $0x124] ss:$16 sps:$4 sm:$0xff]   ;;  %v2634_v1 = vld [vmem:[%s3959_s3 + $0x120] ss:$16 sps:$4 sm:$0xff]  }
  0x2a   : > { %479 = vmatprep.mubr.bf16.mxu0 %v2734_v3  ;;  %1354 = vmatpush1.bf16.msra.mxu0 %v2604_v51  ;;  %v2642_v2 = vld [vmem:[%s3959_s3 + $0x144] ss:$16 sps:$4 sm:$0xff]   ;;  %v2646_v5 = vld [vmem:[%s3959_s3 + $0x160] ss:$16 sps:$4 sm:$0xff]   ;;  %v3086_v51 = vld [vmem:[%s3959_s3 + $0x48] ss:$16 sps:$4 sm:$0xff]  }
  0x2b   : > { %795 = vmatpush1.bf16.msra.mxu1 %v2570_v21  ;;  %1355 = vmatprep.subr.bf16.mxu0 %v2609_v52  ;;  %v2648_v4 = vld [vmem:[%s3959_s3 + $0x164] ss:$16 sps:$4 sm:$0xff]   ;;  %v2652_v8 = vld [vmem:[%s3959_s3 + $0x180] ss:$16 sps:$4 sm:$0xff]  }
  0x2c   : > { %796 = vmatprep.subr.bf16.mxu1 %v2571_v22  ;;  %v2654_v6 = vld [vmem:[%s3959_s3 + $0x184] ss:$16 sps:$4 sm:$0xff]   ;;  %v2658_v11 = vld [vmem:[%s3959_s3 + $0x1a0] ss:$16 sps:$4 sm:$0xff]  }
  0x2d   : > { %v2660_v9 = vld [vmem:[%s3959_s3 + $0x1a4] ss:$16 sps:$4 sm:$0xff]   ;;  %v328_v13 = vld [vmem:[%s3960_s4] sm:$0x3] }
  0x2e   : > { %1356 = vmatpush1.bf16.msra.mxu0 %v2607_v53  ;;  %v3047_v15 = vrot.slane %v328_v13, %v3038_v12  ;;  %v3050_v16 = vrot.slane %v328_v13, %v3044_v14 }
  0x2f   : > { %797 = vmatpush1.bf16.msra.mxu1 %v2573_v23  ;;  %1357 = vmatprep.subr.bf16.mxu0 %v2612_v54  ;;  %v3093_v54 = vld [vmem:[%s3959_s3 + $0x6c] ss:$16 sps:$4 sm:$0xff]  }
  0x30   : > { %798 = vmatprep.subr.bf16.mxu1 %v2574_v24 }
  0x31   : > { %2296 = vmatmul.mubr.msk.bf16.gmra.mrb[12].mxu0 %vm385_vm1, %v2545_v25 }
  0x32   : > { %489 = vmatprep.mubr.bf16.mxu0 %v2734_v3  ;;  %1358 = vmatpush1.bf16.msra.mxu0 %v2610_v55 }
  0x33   : > { %799 = vmatpush1.bf16.msra.mxu1 %v2576_v26  ;;  %1359 = vmatprep.subr.bf16.mxu0 %v2615_v56 }
  0x34   : > { %800 = vmatprep.subr.bf16.mxu1 %v2577_v27 }
  0x36   : > { %1360 = vmatpush1.bf16.msra.mxu0 %v2613_v57 }
  0x37   : > { %801 = vmatpush1.bf16.msra.mxu1 %v2579_v28  ;;  %1361 = vmatprep.subr.bf16.mxu0 %v2618_v58 }
  0x38   : > { %802 = vmatprep.subr.bf16.mxu1 %v2580_v29 }
  0x39   : > { %2297 = vmatmul.mubr.msk.bf16.gmra.mrb[16].mxu0 %vm385_vm1, %v2546_v30 }
  0x3a   : > { %499 = vmatprep.mubr.bf16.mxu0 %v2734_v3  ;;  %1362 = vmatpush1.bf16.msra.mxu0 %v2616_v59 }
  0x3b   : > { %803 = vmatpush1.bf16.msra.mxu1 %v2582_v31  ;;  %1363 = vmatprep.subr.bf16.mxu0 %v2624_v60  ;;  %v3102_v60 = vld [vmem:[%s3959_s3 + $0x68] ss:$16 sps:$4 sm:$0xff]  }
  0x3c   : > { %804 = vmatprep.subr.bf16.mxu1 %v2583_v32  ;;  %v3059_v32 = vld [vmem:[%s3959_s3 + $0x8] ss:$16 sps:$4 sm:$0xff]  }
  0x3e   : > { %1364 = vmatpush1.bf16.msra.mxu0 %v2622_v61 }
  0x3f   : > { %805 = vmatpush1.bf16.msra.mxu1 %v2585_v33  ;;  %1365 = vmatprep.subr.bf16.mxu0 %v2630_v62 }
  0x40   : > { %806 = vmatprep.subr.bf16.mxu1 %v2586_v34 }
  0x41   : > { %2298 = vmatmul.mubr.msk.bf16.gmra.mrb[20].mxu0 %vm385_vm1, %v2547_v35  ;;  %v3065_v35 = vld [vmem:[%s3959_s3 + $0x2c] ss:$16 sps:$4 sm:$0xff]  }
  0x42   : > { %509 = vmatprep.mubr.bf16.mxu0 %v2734_v3  ;;  %1366 = vmatpush1.bf16.msra.mxu0 %v2628_v63  ;;  %v3108_v63 = vld [vmem:[%s3959_s3 + $0x8c] ss:$16 sps:$4 sm:$0xff]  }
  0x43   : > { %807 = vmatpush1.bf16.msra.mxu1 %v2588_v36  ;;  %1367 = vmatprep.subr.bf16.mxu0 %v2636_v0 }
  0x44   : > { %808 = vmatprep.subr.bf16.mxu1 %v2589_v37 }
  0x46   : > { %1368 = vmatpush1.bf16.msra.mxu0 %v2634_v1 }
  0x47   : > { %809 = vmatpush1.bf16.msra.mxu1 %v2591_v40  ;;  %1369 = vmatprep.subr.bf16.mxu0 %v2642_v2 }
  0x48   : > { %810 = vmatprep.subr.bf16.mxu1 %v2592_v41  ;;  %v3074_v41 = vld [vmem:[%s3959_s3 + $0x28] ss:$16 sps:$4 sm:$0xff]  }
  0x49   : > { %2299 = vmatmul.mubr.msk.bf16.gmra.mrb[24].mxu0 %vm385_vm1, %v2548_v38 }
  0x4a   : > { %519 = vmatprep.mubr.bf16.mxu0 %v2734_v3  ;;  %v2640_v3 = vld [vmem:[%s3959_s3 + $0x140] ss:$16 sps:$4 sm:$0xff]  }
  0x4b   : > { %811 = vmatpush1.bf16.msra.mxu1 %v2594_v42  ;;  %1370 = vmatpush1.bf16.msra.mxu0 %v2640_v3 }
  0x4c   : > { %812 = vmatprep.subr.bf16.mxu1 %v2595_v43  ;;  %1371 = vmatprep.subr.bf16.mxu0 %v2648_v4 }
  0x4f   : > { %813 = vmatpush1.bf16.msra.mxu1 %v2597_v44  ;;  %1372 = vmatpush1.bf16.msra.mxu0 %v2646_v5  ;;  %v3080_v44 = vld [vmem:[%s3959_s3 + $0x4c] ss:$16 sps:$4 sm:$0xff]   ;;  %v3114_v5 = vld [vmem:[%s3959_s3 + $0x88] ss:$16 sps:$4 sm:$0xff]  }
  0x50   : > { %2467 = vmatprep.subr.bf16.mxu1 %v2963_v50  ;;  %1373 = vmatprep.subr.bf16.mxu0 %v2654_v6 }
  0x51   : > { %2300 = vmatmul.mubr.msk.bf16.gmra.mrb[28].mxu0 %vm385_vm1, %v2549_v39 }
  0x53   : > { %1374 = vmatpush1.bf16.msra.mxu0 %v2652_v8  ;;  %v3121_v8 = vld [vmem:[%s3959_s3 + $0xac] ss:$16 sps:$4 sm:$0xff]  }
  0x54   : > { %1375 = vmatprep.subr.bf16.mxu0 %v2660_v9 }
  0x57   : > { %1376 = vmatpush1.bf16.msra.mxu0 %v2658_v11 }
  0xec   : > { %v451_v17 = vpop.f32.mrb[0].mxu0 }
  0xed   : > { %v452_v18 = vadd.f32 %v451_v17, %v3047_v15  ;;  %v453_v19 = vpop.f32.mrb[1].mxu0 }
  0xee   : > { %v454_v20 = vadd.f32 %v453_v19, %v3050_v16  ;;  %v455_v21 = vpop.f32.mrb[2].mxu0  ;;  %v3130_v19 = vld [vmem:[%s3959_s3 + $0xa8] ss:$16 sps:$4 sm:$0xff]  }
  0xef   : > { %v456_v22 = vadd.f32 %v455_v21, %v3047_v15  ;;  %v457_v23 = vpop.f32.mrb[3].mxu0  ;;  %v530_v25 = vmax.f32 %v452_v18, 0.0 }
  0xf0   : > { %v458_v24 = vadd.f32 %v457_v23, %v3050_v16  ;;  %v531_v27 = vmax.f32 %v454_v20, 0.0 }
  0xf1   : > { %v532_v26 = vmax.f32 %v456_v22, 0.0  ;;  %v3136_v22 = vld [vmem:[%s3959_s3 + $0xcc] ss:$16 sps:$4 sm:$0xff]  }
  0xf2   : > { %v533_v28 = vmax.f32 %v458_v24, 0.0 }
  0xf3   : > { %v562_v29 = vpack.c.bf16 %v532_v26, %v530_v25 }
  0xf4   : > { %v461_v30 = vpop.f32.mrb[4].mxu0  ;;  %v563_v31 = vpack.c.bf16 %v533_v28, %v531_v27  ;;  %v3142_v28 = vld [vmem:[%s3959_s3 + $0xc8] ss:$16 sps:$4 sm:$0xff]  }
  0xf5   : > { %v462_v33 = vadd.f32 %v461_v30, %v3047_v15  ;;  %v463_v34 = vpop.f32.mrb[5].mxu0 }
  0xf6   : > { %v464_v36 = vadd.f32 %v463_v34, %v3050_v16  ;;  %v465_v37 = vpop.f32.mrb[6].mxu0  ;;  %814 = vmatprep.mubr.bf16.mxu1 %v563_v31  ;;  %v3149_v31 = vld [vmem:[%s3959_s3 + $0xec] ss:$16 sps:$4 sm:$0xff]  }
  0xf7   : > { %v466_v38 = vadd.f32 %v465_v37, %v3047_v15  ;;  %v467_v39 = vpop.f32.mrb[7].mxu0  ;;  %815 = vmatmul.mubr.bf16.vlgmr.msra.gmra.mrb[0].mxu1 %v562_v29  ;;  %v534_v42 = vmax.f32 %v462_v33, 0.0 }
  0xf8   : > { %v468_v40 = vadd.f32 %v467_v39, %v3050_v16  ;;  %2483 = vmatpush1.bf16.msra.mxu1 %v3059_v32  ;;  %v535_v45 = vmax.f32 %v464_v36, 0.0  ;;  %v3158_v39 = vld [vmem:[%s3959_s3 + $0xe8] ss:$16 sps:$4 sm:$0xff]  }
  0xf9   : > { %v536_v43 = vmax.f32 %v466_v38, 0.0  ;;  %2468 = vmatprep.subr.bf16.mxu1 %v3065_v35 }
  0xfa   : > { %v537_v46 = vmax.f32 %v468_v40, 0.0 }
  0xfb   : > { %v564_v47 = vpack.c.bf16 %v536_v43, %v534_v42 }
  0xfc   : > { %v565_v48 = vpack.c.bf16 %v537_v46, %v535_v45  ;;  %v471_v49 = vpop.f32.mrb[8].mxu0  ;;  %2484 = vmatpush1.bf16.msra.mxu1 %v3074_v41 }
  0xfd   : > { %v472_v52 = vadd.f32 %v471_v49, %v3047_v15  ;;  %v473_v53 = vpop.f32.mrb[9].mxu0  ;;  %2469 = vmatprep.subr.bf16.mxu1 %v3080_v44 }
  0xfe   : > { %v474_v55 = vadd.f32 %v473_v53, %v3050_v16  ;;  %v475_v56 = vpop.f32.mrb[10].mxu0  ;;  %824 = vmatprep.mubr.bf16.mxu1 %v565_v48 }
  0xff   : > { %v476_v57 = vadd.f32 %v475_v56, %v3047_v15  ;;  %v477_v58 = vpop.f32.mrb[11].mxu0  ;;  %825 = vmatmul.mubr.bf16.gmra.mrb[4].mxu1 %v564_v47  ;;  %v538_v61 = vmax.f32 %v472_v52, 0.0 }
 0x100   : > { %v478_v59 = vadd.f32 %v477_v58, %v3050_v16  ;;  %2485 = vmatpush1.bf16.msra.mxu1 %v3086_v51  ;;  %v539_v0 = vmax.f32 %v474_v55, 0.0 }
 0x101   : > { %v540_v62 = vmax.f32 %v476_v57, 0.0  ;;  %2470 = vmatprep.subr.bf16.mxu1 %v3093_v54 }
 0x102   : > { %v541_v1 = vmax.f32 %v478_v59, 0.0 }
 0x103   : > { %v566_v2 = vpack.c.bf16 %v540_v62, %v538_v61 }
 0x104   : > { %v567_v3 = vpack.c.bf16 %v541_v1, %v539_v0  ;;  %v481_v4 = vpop.f32.mrb[12].mxu0  ;;  %2486 = vmatpush1.bf16.msra.mxu1 %v3102_v60 }
 0x105   : > { %v482_v6 = vadd.f32 %v481_v4, %v3047_v15  ;;  %v483_v7 = vpop.f32.mrb[13].mxu0  ;;  %2471 = vmatprep.subr.bf16.mxu1 %v3108_v63 }
 0x106   : > { %v484_v9 = vadd.f32 %v483_v7, %v3050_v16  ;;  %v485_v11 = vpop.f32.mrb[14].mxu0  ;;  %834 = vmatprep.mubr.bf16.mxu1 %v567_v3 }
 0x107   : > { %v486_v13 = vadd.f32 %v485_v11, %v3047_v15  ;;  %v487_v17 = vpop.f32.mrb[15].mxu0  ;;  %835 = vmatmul.mubr.bf16.gmra.mrb[8].mxu1 %v566_v2  ;;  %v542_v20 = vmax.f32 %v482_v6, 0.0 }
 0x108   : > { %v488_v18 = vadd.f32 %v487_v17, %v3050_v16  ;;  %2487 = vmatpush1.bf16.msra.mxu1 %v3114_v5  ;;  %v543_v23 = vmax.f32 %v484_v9, 0.0 }
 0x109   : > { %v544_v21 = vmax.f32 %v486_v13, 0.0  ;;  %2472 = vmatprep.subr.bf16.mxu1 %v3121_v8 }
 0x10a   : > { %v545_v24 = vmax.f32 %v488_v18, 0.0 }
 0x10b   : > { %v568_v25 = vpack.c.bf16 %v544_v21, %v542_v20 }
 0x10c   : > { %v569_v26 = vpack.c.bf16 %v545_v24, %v543_v23  ;;  %v491_v27 = vpop.f32.mrb[16].mxu0  ;;  %2488 = vmatpush1.bf16.msra.mxu1 %v3130_v19 }
 0x10d   : > { %v492_v29 = vadd.f32 %v491_v27, %v3047_v15  ;;  %v493_v30 = vpop.f32.mrb[17].mxu0  ;;  %2473 = vmatprep.subr.bf16.mxu1 %v3136_v22 }
 0x10e   : > { %v494_v33 = vadd.f32 %v493_v30, %v3050_v16  ;;  %v495_v34 = vpop.f32.mrb[18].mxu0  ;;  %844 = vmatprep.mubr.bf16.mxu1 %v569_v26 }
 0x10f   : > { %v496_v36 = vadd.f32 %v495_v34, %v3047_v15  ;;  %v497_v37 = vpop.f32.mrb[19].mxu0  ;;  %845 = vmatmul.mubr.bf16.gmra.mrb[12].mxu1 %v568_v25  ;;  %v546_v40 = vmax.f32 %v492_v29, 0.0 }
 0x110   : > { %v498_v38 = vadd.f32 %v497_v37, %v3050_v16  ;;  %2489 = vmatpush1.bf16.msra.mxu1 %v3142_v28  ;;  %v547_v43 = vmax.f32 %v494_v33, 0.0 }
 0x111   : > { %v548_v42 = vmax.f32 %v496_v36, 0.0  ;;  %2474 = vmatprep.subr.bf16.mxu1 %v3149_v31 }
 0x112   : > { %v549_v45 = vmax.f32 %v498_v38, 0.0 }
 0x113   : > { %v570_v46 = vpack.c.bf16 %v548_v42, %v546_v40 }
 0x114   : > { %v571_v47 = vpack.c.bf16 %v549_v45, %v547_v43  ;;  %v501_v48 = vpop.f32.mrb[20].mxu0  ;;  %2490 = vmatpush1.bf16.msra.mxu1 %v3158_v39 }
 0x115   : > { %v502_v49 = vadd.f32 %v501_v48, %v3047_v15  ;;  %v503_v52 = vpop.f32.mrb[21].mxu0  ;;  %v3188_v48 = vld [vmem:[%s3959_s3 + $0x108] ss:$16 sps:$4 sm:$0xff]  }
 0x116   : > { %v504_v53 = vadd.f32 %v503_v52, %v3050_v16  ;;  %v505_v55 = vpop.f32.mrb[22].mxu0  ;;  %854 = vmatprep.mubr.bf16.mxu1 %v571_v47  ;;  %v2666_v47 = vld [vmem:[%s3959_s3 + $0x1c4] ss:$16 sps:$4 sm:$0xff]   ;;  %v3198_v52 = vld [vmem:[%s3959_s3 + $0x12c] ss:$16 sps:$4 sm:$0xff]  }
 0x117   : > { %v506_v56 = vadd.f32 %v505_v55, %v3047_v15  ;;  %v507_v57 = vpop.f32.mrb[23].mxu0  ;;  %855 = vmatmul.mubr.bf16.gmra.mrb[16].mxu1 %v570_v46  ;;  %v550_v59 = vmax.f32 %v502_v49, 0.0  ;;  %1377 = vmatprep.subr.bf16.mxu0 %v2666_v47  ;;  %v2672_v49 = vld [vmem:[%s3959_s3 + $0x1e4] ss:$16 sps:$4 sm:$0xff]   ;;  %v3206_v55 = vld [vmem:[%s3959_s3 + $0x128] ss:$16 sps:$4 sm:$0xff]  }
 0x118   : > { %v508_v58 = vadd.f32 %v507_v57, %v3050_v16  ;;  %v551_v62 = vmax.f32 %v504_v53, 0.0  ;;  %v2670_v53 = vld [vmem:[%s3959_s3 + $0x1e0] ss:$16 sps:$4 sm:$0xff]   ;;  %v3219_v57 = vld [vmem:[%s3959_s3 + $0x148] ss:$16 sps:$4 sm:$0xff]  }
 0x119   : > { %v552_v61 = vmax.f32 %v506_v56, 0.0  ;;  %v3214_v56 = vld [vmem:[%s3959_s3 + $0x14c] ss:$16 sps:$4 sm:$0xff]  }
 0x11a   : > { %v553_v0 = vmax.f32 %v508_v58, 0.0  ;;  %v3226_v58 = vld [vmem:[%s3959_s3 + $0x16c] ss:$16 sps:$4 sm:$0xff]  }
 0x11b   : > { %v572_v1 = vpack.c.bf16 %v552_v61, %v550_v59  ;;  %v3238_v59 = vld [vmem:[%s3959_s3 + $0x18c] ss:$16 sps:$4 sm:$0xff]   ;;  %v3243_v61 = vld [vmem:[%s3959_s3 + $0x188] ss:$16 sps:$4 sm:$0xff]  }
 0x11c   : > { %v573_v2 = vpack.c.bf16 %v553_v0, %v551_v62  ;;  %v511_v3 = vpop.f32.mrb[24].mxu0  ;;  %v3250_v62 = vld [vmem:[%s3959_s3 + $0x1ac] ss:$16 sps:$4 sm:$0xff]   ;;  %v3255_v0 = vld [vmem:[%s3959_s3 + $0x1a8] ss:$16 sps:$4 sm:$0xff]  }
 0x11d   : > { %v512_v4 = vadd.f32 %v511_v3, %v3047_v15  ;;  %v513_v6 = vpop.f32.mrb[25].mxu0  ;;  %v3274_v3 = vld [vmem:[%s3959_s3 + $0x1ec] ss:$16 sps:$4 sm:$0xff]  }
 0x11e   : > { %v514_v7 = vadd.f32 %v513_v6, %v3050_v16  ;;  %v515_v9 = vpop.f32.mrb[26].mxu0  ;;  %864 = vmatprep.mubr.bf16.mxu1 %v573_v2  ;;  %v3267_v2 = vld [vmem:[%s3959_s3 + $0x1c8] ss:$16 sps:$4 sm:$0xff]   ;;  %v610_v6 = vld [vmem:[%s3961_s5] sm:$0x3] }
 0x11f   : > { %v516_v11 = vadd.f32 %v515_v9, %v3047_v15  ;;  %v517_v13 = vpop.f32.mrb[27].mxu0  ;;  %865 = vmatmul.mubr.bf16.gmra.mrb[20].mxu1 %v572_v1  ;;  %v554_v18 = vmax.f32 %v512_v4, 0.0  ;;  %v3262_v1 = vld [vmem:[%s3959_s3 + $0x1cc] ss:$16 sps:$4 sm:$0xff]   ;;  %v3279_v4 = vld [vmem:[%s3959_s3 + $0x1e8] ss:$16 sps:$4 sm:$0xff]   ;;  %v3290_v9 = vrot.slane %v610_v6, %v3044_v14 }
 0x120   : > { %v518_v17 = vadd.f32 %v517_v13, %v3050_v16  ;;  %v555_v21 = vmax.f32 %v514_v7, 0.0  ;;  %v3287_v7 = vrot.slane %v610_v6, %v3038_v12 }
 0x121   : > { %v556_v20 = vmax.f32 %v516_v11, 0.0 }
 0x122   : > { %v557_v23 = vmax.f32 %v518_v17, 0.0 }
 0x123   : > { %v574_v24 = vpack.c.bf16 %v556_v20, %v554_v18 }
 0x124   : > { %v575_v25 = vpack.c.bf16 %v557_v23, %v555_v21  ;;  %v521_v26 = vpop.f32.mrb[28].mxu0 }
 0x125   : > { %v522_v27 = vadd.f32 %v521_v26, %v3047_v15  ;;  %v523_v29 = vpop.f32.mrb[29].mxu0 }
 0x126   : > { %v524_v30 = vadd.f32 %v523_v29, %v3050_v16  ;;  %v525_v33 = vpop.f32.mrb[30].mxu0  ;;  %874 = vmatprep.mubr.bf16.mxu1 %v575_v25 }
 0x127   : > { %v526_v34 = vadd.f32 %v525_v33, %v3047_v15  ;;  %v527_v36 = vpop.f32.mrb[31].mxu0  ;;  %875 = vmatmul.mubr.bf16.gmra.mrb[24].mxu1 %v574_v24  ;;  %v558_v38 = vmax.f32 %v522_v27, 0.0  ;;  %v3180_v15 = vld [vmem:[%s3959_s3 + $0x10c] ss:$16 sps:$4 sm:$0xff]  }
 0x128   : > { %v528_v37 = vadd.f32 %v527_v36, %v3050_v16  ;;  %v559_v42 = vmax.f32 %v524_v30, 0.0  ;;  %v2664_v16 = vld [vmem:[%s3959_s3 + $0x1c0] ss:$16 sps:$4 sm:$0xff]   ;;  %2475 = vmatprep.subr.bf16.mxu1 %v3180_v15 }
 0x129   : > { %v560_v40 = vmax.f32 %v526_v34, 0.0  ;;  %1378 = vmatpush1.bf16.msra.mxu0 %v2664_v16  ;;  %2491 = vmatpush1.bf16.msra.mxu1 %v3188_v48 }
 0x12a   : > { %v561_v43 = vmax.f32 %v528_v37, 0.0  ;;  %1379 = vmatprep.subr.bf16.mxu0 %v2672_v49  ;;  %2476 = vmatprep.subr.bf16.mxu1 %v3198_v52 }
 0x12b   : > { %v576_v45 = vpack.c.bf16 %v560_v40, %v558_v38 }
 0x12c   : > { %v577_v46 = vpack.c.bf16 %v561_v43, %v559_v42 }
 0x12d   : > { %1380 = vmatpush1.bf16.msra.mxu0 %v2670_v53  ;;  %2492 = vmatpush1.bf16.msra.mxu1 %v3206_v55 }
 0x12e   : > { %884 = vmatprep.mubr.bf16.mxu1 %v577_v46  ;;  %1462 = vmatprep.subr.bf16.mxu0 %v2963_v50  ;;  %v3231_v50 = vld [vmem:[%s3959_s3 + $0x168] ss:$16 sps:$4 sm:$0xff]  }
 0x12f   : > { %885 = vmatmul.mubr.bf16.gmra.mrb[28].mxu1 %v576_v45  ;;  %2477 = vmatprep.subr.bf16.mxu1 %v3214_v56 }
 0x131   : > { %2493 = vmatpush1.bf16.msra.mxu1 %v3219_v57 }
 0x132   : > { %2478 = vmatprep.subr.bf16.mxu1 %v3226_v58 }
 0x135   : > { %2494 = vmatpush1.bf16.msra.mxu1 %v3231_v50 }
 0x136   : > { %2479 = vmatprep.subr.bf16.mxu1 %v3238_v59 }
 0x139   : > { %2495 = vmatpush1.bf16.msra.mxu1 %v3243_v61 }
 0x13a   : > { %2480 = vmatprep.subr.bf16.mxu1 %v3250_v62 }
 0x13d   : > { %2496 = vmatpush1.bf16.msra.mxu1 %v3255_v0 }
 0x13e   : > { %2481 = vmatprep.subr.bf16.mxu1 %v3262_v1 }
 0x141   : > { %2497 = vmatpush1.bf16.msra.mxu1 %v3267_v2 }
 0x142   : > { %2482 = vmatprep.subr.bf16.mxu1 %v3274_v3 }
 0x145   : > { %2498 = vmatpush1.bf16.msra.mxu1 %v3279_v4 }
 0x1ca   : > { %v816_v11 = vpop.f32.mrb[0].mxu1 }
 0x1cb   : > { %v817_v13 = vadd.f32 %v816_v11, %v3287_v7  ;;  %v818_v17 = vpop.f32.mrb[1].mxu1 }
 0x1cc   : > { %v819_v18 = vadd.f32 %v818_v17, %v3290_v9  ;;  %v820_v20 = vpop.f32.mrb[2].mxu1 }
 0x1cd   : > { %v821_v21 = vadd.f32 %v820_v20, %v3287_v7  ;;  %v822_v23 = vpop.f32.mrb[3].mxu1  ;;  %v895_v25 = vmax.f32 %v817_v13, 0.0 }
 0x1ce   : > { %v823_v24 = vadd.f32 %v822_v23, %v3290_v9  ;;  %v896_v27 = vmax.f32 %v819_v18, 0.0 }
 0x1cf   : > { %v897_v26 = vmax.f32 %v821_v21, 0.0 }
 0x1d0   : > { %v898_v29 = vmax.f32 %v823_v24, 0.0 }
 0x1d1   : > { %v3296_v30 = vpack.c.bf16 %v897_v26, %v895_v25 }
 0x1d2   : > { %v3298_v33 = vpack.c.bf16 %v898_v29, %v896_v27  ;;  %v826_v34 = vpop.f32.mrb[4].mxu1 }
 0x1d3   : > { %v827_v36 = vadd.f32 %v826_v34, %v3287_v7  ;;  %v828_v37 = vpop.f32.mrb[5].mxu1 }
 0x1d4   : > { %v829_v38 = vadd.f32 %v828_v37, %v3290_v9  ;;  %v830_v40 = vpop.f32.mrb[6].mxu1  ;;  %1381 = vmatprep.mubr.bf16.mxu0 %v3298_v33 }
 0x1d5   : > { %v831_v42 = vadd.f32 %v830_v40, %v3287_v7  ;;  %v832_v43 = vpop.f32.mrb[7].mxu1  ;;  %1382 = vmatmul.mubr.bf16.vlgmr.msra.gmra.mrb[32].mxu0 %v3296_v30  ;;  %v899_v46 = vmax.f32 %v827_v36, 0.0 }
 0x1d6   : > { %v833_v45 = vadd.f32 %v832_v43, %v3290_v9  ;;  %1463 = vmatpush1.bf16.msra.mxu0 %v3059_v32  ;;  %v900_v16 = vmax.f32 %v829_v38, 0.0 }
 0x1d7   : > { %v901_v47 = vmax.f32 %v831_v42, 0.0  ;;  %1464 = vmatprep.subr.bf16.mxu0 %v3065_v35 }
 0x1d8   : > { %v902_v49 = vmax.f32 %v833_v45, 0.0 }
 0x1d9   : > { %v3308_v53 = vpack.c.bf16 %v901_v47, %v899_v46 }
 0x1da   : > { %v3310_v6 = vpack.c.bf16 %v902_v49, %v900_v16  ;;  %1465 = vmatpush1.bf16.msra.mxu0 %v3074_v41  ;;  %v836_v11 = vpop.f32.mrb[8].mxu1 }
 0x1db   : > { %v837_v13 = vadd.f32 %v836_v11, %v3287_v7  ;;  %v838_v17 = vpop.f32.mrb[9].mxu1  ;;  %1466 = vmatprep.subr.bf16.mxu0 %v3080_v44 }
 0x1dc   : > { %v839_v32 = vadd.f32 %v838_v17, %v3290_v9  ;;  %v840_v18 = vpop.f32.mrb[10].mxu1  ;;  %1391 = vmatprep.mubr.bf16.mxu0 %v3310_v6 }
 0x1dd   : > { %v841_v35 = vadd.f32 %v840_v18, %v3287_v7  ;;  %v842_v20 = vpop.f32.mrb[11].mxu1  ;;  %1392 = vmatmul.mubr.bf16.gmra.mrb[36].mxu0 %v3308_v53  ;;  %v903_v41 = vmax.f32 %v837_v13, 0.0 }
 0x1de   : > { %v843_v21 = vadd.f32 %v842_v20, %v3290_v9  ;;  %1467 = vmatpush1.bf16.msra.mxu0 %v3086_v51  ;;  %v904_v24 = vmax.f32 %v839_v32, 0.0 }
 0x1df   : > { %v905_v23 = vmax.f32 %v841_v35, 0.0  ;;  %1468 = vmatprep.subr.bf16.mxu0 %v3093_v54 }
 0x1e0   : > { %v906_v44 = vmax.f32 %v843_v21, 0.0 }
 0x1e1   : > { %v3322_v25 = vpack.c.bf16 %v905_v23, %v903_v41 }
 0x1e2   : > { %v3324_v26 = vpack.c.bf16 %v906_v44, %v904_v24  ;;  %1469 = vmatpush1.bf16.msra.mxu0 %v3102_v60  ;;  %v846_v27 = vpop.f32.mrb[12].mxu1 }
 0x1e3   : > { %v847_v29 = vadd.f32 %v846_v27, %v3287_v7  ;;  %v848_v34 = vpop.f32.mrb[13].mxu1  ;;  %1470 = vmatprep.subr.bf16.mxu0 %v3108_v63 }
 0x1e4   : > { %v849_v51 = vadd.f32 %v848_v34, %v3290_v9  ;;  %v850_v36 = vpop.f32.mrb[14].mxu1  ;;  %1401 = vmatprep.mubr.bf16.mxu0 %v3324_v26 }
 0x1e5   : > { %v851_v54 = vadd.f32 %v850_v36, %v3287_v7  ;;  %v852_v37 = vpop.f32.mrb[15].mxu1  ;;  %1402 = vmatmul.mubr.bf16.gmra.mrb[40].mxu0 %v3322_v25  ;;  %v907_v60 = vmax.f32 %v847_v29, 0.0 }
 0x1e6   : > { %v853_v38 = vadd.f32 %v852_v37, %v3290_v9  ;;  %1471 = vmatpush1.bf16.msra.mxu0 %v3114_v5  ;;  %v908_v42 = vmax.f32 %v849_v51, 0.0 }
 0x1e7   : > { %v909_v40 = vmax.f32 %v851_v54, 0.0  ;;  %1472 = vmatprep.subr.bf16.mxu0 %v3121_v8 }
 0x1e8   : > { %v910_v63 = vmax.f32 %v853_v38, 0.0 }
 0x1e9   : > { %v933_v43 = vpack.c.bf16 %v909_v40, %v907_v60 }
 0x1ea   : > { %v934_v45 = vpack.c.bf16 %v910_v63, %v908_v42  ;;  %1473 = vmatpush1.bf16.msra.mxu0 %v3130_v19  ;;  %v856_v46 = vpop.f32.mrb[16].mxu1 }
 0x1eb   : > { %v857_v47 = vadd.f32 %v856_v46, %v3287_v7  ;;  %v858_v16 = vpop.f32.mrb[17].mxu1  ;;  %1474 = vmatprep.subr.bf16.mxu0 %v3136_v22 }
 0x1ec   : > { %v859_v49 = vadd.f32 %v858_v16, %v3290_v9  ;;  %v860_v11 = vpop.f32.mrb[18].mxu1  ;;  %1411 = vmatprep.mubr.bf16.mxu0 %v934_v45  ;;  %1524 = vmatprep.mubr.bf16.mxu1 %v934_v45 }
 0x1ed   : > { %v861_v5 = vadd.f32 %v860_v11, %v3287_v7  ;;  %v862_v8 = vpop.f32.mrb[19].mxu1  ;;  %1412 = vmatmul.mubr.bf16.gmra.mrb[44].mxu0 %v933_v43  ;;  %1525 = vmatmul.mubr.bf16.vlgmr.msra.gmra.mrb[32].mxu1 %v933_v43  ;;  %v911_v19 = vmax.f32 %v857_v47, 0.0 }
 0x1ee   : > { %v863_v13 = vadd.f32 %v862_v8, %v3290_v9  ;;  %1475 = vmatpush1.bf16.msra.mxu0 %v3142_v28  ;;  %v912_v32 = vmax.f32 %v859_v49, 0.0 }
 0x1ef   : > { %v913_v17 = vmax.f32 %v861_v5, 0.0  ;;  %1476 = vmatprep.subr.bf16.mxu0 %v3149_v31 }
 0x1f0   : > { %v914_v22 = vmax.f32 %v863_v13, 0.0 }
 0x1f1   : > { %v935_v18 = vpack.c.bf16 %v913_v17, %v911_v19 }
 0x1f2   : > { %v936_v35 = vpack.c.bf16 %v914_v22, %v912_v32  ;;  %1477 = vmatpush1.bf16.msra.mxu0 %v3158_v39  ;;  %v866_v20 = vpop.f32.mrb[20].mxu1 }
 0x1f3   : > { %v867_v21 = vadd.f32 %v866_v20, %v3287_v7  ;;  %v868_v41 = vpop.f32.mrb[21].mxu1  ;;  %1478 = vmatprep.subr.bf16.mxu0 %v3180_v15 }
 0x1f4   : > { %v869_v23 = vadd.f32 %v868_v41, %v3290_v9  ;;  %v870_v24 = vpop.f32.mrb[22].mxu1  ;;  %1421 = vmatprep.mubr.bf16.mxu0 %v936_v35  ;;  %1534 = vmatprep.mubr.bf16.mxu1 %v936_v35 }
 0x1f5   : > { %v871_v28 = vadd.f32 %v870_v24, %v3287_v7  ;;  %v872_v31 = vpop.f32.mrb[23].mxu1  ;;  %1422 = vmatmul.mubr.bf16.gmra.mrb[48].mxu0 %v935_v18  ;;  %1535 = vmatmul.mubr.bf16.gmra.mrb[36].mxu1 %v935_v18  ;;  %v915_v39 = vmax.f32 %v867_v21, 0.0 }
 0x1f6   : > { %v873_v44 = vadd.f32 %v872_v31, %v3290_v9  ;;  %1479 = vmatpush1.bf16.msra.mxu0 %v3188_v48  ;;  %v916_v29 = vmax.f32 %v869_v23, 0.0 }
 0x1f7   : > { %v917_v27 = vmax.f32 %v871_v28, 0.0  ;;  %1480 = vmatprep.subr.bf16.mxu0 %v3198_v52 }
 0x1f8   : > { %v918_v15 = vmax.f32 %v873_v44, 0.0 }
 0x1f9   : > { %v937_v34 = vpack.c.bf16 %v917_v27, %v915_v39  ;;  %v1019_v27 = vsub.s32 2, %v3032_v10 }
 0x1fa   : > { %v938_v51 = vpack.c.bf16 %v918_v15, %v916_v29  ;;  %1481 = vmatpush1.bf16.msra.mxu0 %v3206_v55  ;;  %v876_v36 = vpop.f32.mrb[24].mxu1 }
 0x1fb   : > { %v877_v54 = vadd.f32 %v876_v36, %v3287_v7  ;;  %v878_v37 = vpop.f32.mrb[25].mxu1  ;;  %1482 = vmatprep.subr.bf16.mxu0 %v3214_v56 }
 0x1fc   : > { %v879_v38 = vadd.f32 %v878_v37, %v3290_v9  ;;  %v880_v60 = vpop.f32.mrb[26].mxu1  ;;  %1431 = vmatprep.mubr.bf16.mxu0 %v938_v51  ;;  %1544 = vmatprep.mubr.bf16.mxu1 %v938_v51 }
 0x1fd   : > { %v881_v48 = vadd.f32 %v880_v60, %v3287_v7  ;;  %v882_v52 = vpop.f32.mrb[27].mxu1  ;;  %1432 = vmatmul.mubr.bf16.gmra.mrb[52].mxu0 %v937_v34  ;;  %1545 = vmatmul.mubr.bf16.gmra.mrb[40].mxu1 %v937_v34  ;;  %v919_v55 = vmax.f32 %v877_v54, 0.0  ;;  %v1023_v34 = vsub.s32 3, %v3032_v10 }
 0x1fe   : > { %v883_v40 = vadd.f32 %v882_v52, %v3290_v9  ;;  %1483 = vmatpush1.bf16.msra.mxu0 %v3219_v57  ;;  %v920_v63 = vmax.f32 %v879_v38, 0.0 }
 0x1ff   : > { %v921_v42 = vmax.f32 %v881_v48, 0.0  ;;  %1484 = vmatprep.subr.bf16.mxu0 %v3226_v58 }
 0x200   : > { %v922_v56 = vmax.f32 %v883_v40, 0.0 }
 0x201   : > { %v939_v43 = vpack.c.bf16 %v921_v42, %v919_v55 }
 0x202   : > { %v940_v45 = vpack.c.bf16 %v922_v56, %v920_v63  ;;  %1485 = vmatpush1.bf16.msra.mxu0 %v3231_v50  ;;  %v886_v46 = vpop.f32.mrb[28].mxu1 }
 0x203   : > { %v887_v47 = vadd.f32 %v886_v46, %v3287_v7  ;;  %v888_v16 = vpop.f32.mrb[29].mxu1  ;;  %1486 = vmatprep.subr.bf16.mxu0 %v3238_v59 }
 0x204   : > { %v889_v49 = vadd.f32 %v888_v16, %v3290_v9  ;;  %v890_v11 = vpop.f32.mrb[30].mxu1  ;;  %1441 = vmatprep.mubr.bf16.mxu0 %v940_v45  ;;  %1554 = vmatprep.mubr.bf16.mxu1 %v940_v45 }
 0x205   : > { %v891_v57 = vadd.f32 %v890_v11, %v3287_v7  ;;  %v892_v58 = vpop.f32.mrb[31].mxu1  ;;  %1442 = vmatmul.mubr.bf16.gmra.mrb[56].mxu0 %v939_v43  ;;  %1555 = vmatmul.mubr.bf16.gmra.mrb[44].mxu1 %v939_v43  ;;  %v923_v50 = vmax.f32 %v887_v47, 0.0 }
 0x206   : > { %v893_v5 = vadd.f32 %v892_v58, %v3290_v9  ;;  %1487 = vmatpush1.bf16.msra.mxu0 %v3243_v61  ;;  %v924_v13 = vmax.f32 %v889_v49, 0.0  ;;  %v1007_v61 = vld [vmem:[%s3962_s6] sm:$0xf] }
 0x207   : > { %v925_v8 = vmax.f32 %v891_v57, 0.0  ;;  %1488 = vmatprep.subr.bf16.mxu0 %v3250_v62  ;;  %v3383_v62 = vrot.slane %v1007_v61, %v3038_v12  ;;  %v3437_v48 = vrot.slane %v1007_v61, %v1019_v27  ;;  %v3440_v40 = vrot.slane %v1007_v61, %v1023_v34 }
 0x208   : > { %v926_v59 = vmax.f32 %v893_v5, 0.0 }
 0x209   : > { %v941_v19 = vpack.c.bf16 %v925_v8, %v923_v50 }
 0x20a   : > { %v942_v17 = vpack.c.bf16 %v926_v59, %v924_v13  ;;  %1489 = vmatpush1.bf16.msra.mxu0 %v3255_v0  ;;  %v3386_v0 = vrot.slane %v1007_v61, %v3044_v14 }
 0x20b   : > { %1490 = vmatprep.subr.bf16.mxu0 %v3262_v1 }
 0x20c   : > { %1451 = vmatprep.mubr.bf16.mxu0 %v942_v17  ;;  %1564 = vmatprep.mubr.bf16.mxu1 %v942_v17 }
 0x20d   : > { %1452 = vmatmul.mubr.bf16.gmra.mrb[60].mxu0 %v941_v19  ;;  %1565 = vmatmul.mubr.bf16.gmra.mrb[48].mxu1 %v941_v19 }
 0x20e   : > { %1491 = vmatpush1.bf16.msra.mxu0 %v3267_v2  ;;  %1494 = vmatprep.mubr.bf16.mxu0 %v3298_v33 }
 0x20f   : > { %1492 = vmatprep.subr.bf16.mxu0 %v3274_v3 }
 0x212   : > { %1493 = vmatpush1.bf16.msra.mxu0 %v3279_v4 }
 0x215   : > { %1495 = vmatmul.mubr.bf16.vlgmr.msra.gmra.mrb[64].mxu0 %v3296_v30 }
 0x216   : > { %1504 = vmatprep.mubr.bf16.mxu0 %v3310_v6 }
 0x21d   : > { %1505 = vmatmul.mubr.bf16.gmra.mrb[68].mxu0 %v3308_v53 }
 0x21e   : > { %1514 = vmatprep.mubr.bf16.mxu0 %v3324_v26 }
 0x225   : > { %1515 = vmatmul.mubr.bf16.gmra.mrb[72].mxu0 %v3322_v25 }
 0x2a8   : > { %v1383_v1 = vpop.f32.mrb[32].mxu0 }
 0x2a9   : > { %v3389_v2 = vadd.f32 %v1383_v1, %v3383_v62  ;;  %v1385_v3 = vpop.f32.mrb[33].mxu0 }
 0x2aa   : > { %v3392_v4 = vadd.f32 %v1385_v3, %v3386_v0  ;;  %v1387_v7 = vpop.f32.mrb[34].mxu0 }
 0x2ab   : > { %v3396_v30 = vadd.f32 %v1387_v7, %v3383_v62  ;;  %v1389_v33 = vpop.f32.mrb[35].mxu0 }
 0x2ac   : > { %v3400_v14 = vadd.f32 %v1389_v33, %v3386_v0 }
 0x2b0   : > { %v1393_v25 = vpop.f32.mrb[36].mxu0 }
 0x2b1   : > { %v3405_v26 = vadd.f32 %v1393_v25, %v3383_v62  ;;  %v1395_v32 = vpop.f32.mrb[37].mxu0 }
 0x2b2   : > { %v3408_v22 = vadd.f32 %v1395_v32, %v3386_v0  ;;  %v1397_v18 = vpop.f32.mrb[38].mxu0 }
 0x2b3   : > { %v3412_v20 = vadd.f32 %v1397_v18, %v3383_v62  ;;  %v1399_v21 = vpop.f32.mrb[39].mxu0 }
 0x2b4   : > { %v3416_v23 = vadd.f32 %v1399_v21, %v3386_v0 }
 0x2b8   : > { %v1403_v31 = vpop.f32.mrb[40].mxu0 }
 0x2b9   : > { %v3421_v44 = vadd.f32 %v1403_v31, %v3383_v62  ;;  %v1405_v39 = vpop.f32.mrb[41].mxu0 }
 0x2ba   : > { %v3425_v29 = vadd.f32 %v1405_v39, %v3386_v0  ;;  %v1407_v15 = vpop.f32.mrb[42].mxu0 }
 0x2bb   : > { %v3430_v36 = vadd.f32 %v1407_v15, %v3383_v62  ;;  %v1409_v54 = vpop.f32.mrb[43].mxu0 }
 0x2bc   : > { %v3434_v38 = vadd.f32 %v1409_v54, %v3386_v0 }
 0x2c0   : > { %v1413_v10 = vpop.f32.mrb[44].mxu0  ;;  %v1526_v55 = vpop.f32.mrb[32].mxu1 }
 0x2c1   : > { %v3443_v42 = vadd.f32 %v1413_v10, %v3383_v62  ;;  %v3446_v63 = vadd.f32 %v1526_v55, %v3437_v48  ;;  %v1415_v56 = vpop.f32.mrb[45].mxu0  ;;  %v1528_v43 = vpop.f32.mrb[33].mxu1 }
 0x2c2   : > { %v3449_v45 = vadd.f32 %v1415_v56, %v3386_v0  ;;  %v3452_v46 = vadd.f32 %v1528_v43, %v3440_v40  ;;  %v1417_v47 = vpop.f32.mrb[46].mxu0  ;;  %v1530_v16 = vpop.f32.mrb[34].mxu1 }
 0x2c3   : > { %v3457_v57 = vadd.f32 %v1417_v47, %v3383_v62  ;;  %v3460_v58 = vadd.f32 %v1530_v16, %v3437_v48  ;;  %v1419_v5 = vpop.f32.mrb[47].mxu0  ;;  %v1532_v50 = vpop.f32.mrb[35].mxu1 }
 0x2c4   : > { %v3465_v59 = vadd.f32 %v1419_v5, %v3386_v0  ;;  %v3468_v19 = vadd.f32 %v1532_v50, %v3440_v40 }
 0x2c8   : > { %v1423_v7 = vpop.f32.mrb[48].mxu0  ;;  %v1536_v33 = vpop.f32.mrb[36].mxu1 }
 0x2c9   : > { %v3475_v25 = vadd.f32 %v1423_v7, %v3383_v62  ;;  %v3478_v32 = vadd.f32 %v1536_v33, %v3437_v48  ;;  %v1425_v18 = vpop.f32.mrb[49].mxu0  ;;  %v1538_v21 = vpop.f32.mrb[37].mxu1 }
 0x2ca   : > { %v3481_v31 = vadd.f32 %v1425_v18, %v3386_v0  ;;  %v3484_v39 = vadd.f32 %v1538_v21, %v3440_v40  ;;  %v1427_v27 = vpop.f32.mrb[50].mxu0  ;;  %v1540_v15 = vpop.f32.mrb[38].mxu1 }
 0x2cb   : > { %v3489_v10 = vadd.f32 %v1427_v27, %v3383_v62  ;;  %v3492_v55 = vadd.f32 %v1540_v15, %v3437_v48  ;;  %v1429_v56 = vpop.f32.mrb[51].mxu0  ;;  %v1542_v43 = vpop.f32.mrb[39].mxu1 }
 0x2cc   : > { %v3497_v5 = vadd.f32 %v1429_v56, %v3386_v0  ;;  %v3500_v50 = vadd.f32 %v1542_v43, %v3440_v40 }
 0x2d0   : > { %v1433_v27 = vpop.f32.mrb[52].mxu0  ;;  %v1546_v15 = vpop.f32.mrb[40].mxu1 }
 0x2d1   : > { %v3507_v54 = vadd.f32 %v1433_v27, %v3383_v62  ;;  %v3510_v16 = vadd.f32 %v1546_v15, %v3437_v48  ;;  %v1435_v56 = vpop.f32.mrb[53].mxu0  ;;  %v1548_v47 = vpop.f32.mrb[41].mxu1 }
 0x2d2   : > { %v3513_v43 = vadd.f32 %v1435_v56, %v3386_v0  ;;  %v3516_v7 = vadd.f32 %v1548_v47, %v3440_v40  ;;  %v1437_v33 = vpop.f32.mrb[54].mxu0  ;;  %v1550_v18 = vpop.f32.mrb[42].mxu1 }
 0x2d3   : > { %v3521_v27 = vadd.f32 %v1437_v33, %v3383_v62  ;;  %v3524_v15 = vadd.f32 %v1550_v18, %v3437_v48  ;;  %v1439_v3 = vpop.f32.mrb[55].mxu0  ;;  %v1552_v61 = vpop.f32.mrb[43].mxu1 }
 0x2d4   : > { %v3529_v47 = vadd.f32 %v1439_v3, %v3386_v0  ;;  %v3532_v17 = vadd.f32 %v1552_v61, %v3440_v40 }
 0x2d5   : > { %3984 = vst [vmem:[#allocation3_spill] sm:$0xff] %v3524_v15 }
 0x2d6   : > { %3985 = vst [vmem:[#allocation4_spill] sm:$0xff] %v3532_v17 }
 0x2d8   : > { %v1443_v13 = vpop.f32.mrb[56].mxu0  ;;  %v1556_v11 = vpop.f32.mrb[44].mxu1 }
 0x2d9   : > { %v3539_v56 = vadd.f32 %v1443_v13, %v3383_v62  ;;  %v3542_v1 = vadd.f32 %v1556_v11, %v3437_v48  ;;  %v1445_v3 = vpop.f32.mrb[57].mxu0  ;;  %v1558_v8 = vpop.f32.mrb[45].mxu1 }
 0x2da   : > { %v3545_v61 = vadd.f32 %v1445_v3, %v3386_v0  ;;  %v3548_v34 = vadd.f32 %v1558_v8, %v3440_v40  ;;  %v1447_v33 = vpop.f32.mrb[58].mxu0  ;;  %v1560_v21 = vpop.f32.mrb[46].mxu1 }
 0x2db   : > { %3986 = vst [vmem:[#allocation5_spill] sm:$0xff] %v3539_v56  ;;  %3987 = vst [vmem:[#allocation6_spill] sm:$0xff] %v3542_v1  ;;  %v3553_v13 = vadd.f32 %v1447_v33, %v3383_v62  ;;  %v3556_v11 = vadd.f32 %v1560_v21, %v3437_v48  ;;  %v1449_v52 = vpop.f32.mrb[59].mxu0  ;;  %v1562_v60 = vpop.f32.mrb[47].mxu1 }
 0x2dc   : > { %3988 = vst [vmem:[#allocation7_spill] sm:$0xff] %v3545_v61  ;;  %3989 = vst [vmem:[#allocation8_spill] sm:$0xff] %v3548_v34  ;;  %v3561_v8 = vadd.f32 %v1449_v52, %v3386_v0  ;;  %v3564_v51 = vadd.f32 %v1562_v60, %v3440_v40 }
 0x2dd   : > { %3990 = vst [vmem:[#allocation9_spill] sm:$0xff] %v3553_v13  ;;  %3991 = vst [vmem:[#allocation10_spill] sm:$0xff] %v3556_v11 }
 0x2de   : > { %3992 = vst [vmem:[#allocation11_spill] sm:$0xff] %v3561_v8  ;;  %3993 = vst [vmem:[#allocation12_spill] sm:$0xff] %v3564_v51 }
 0x2e0   : > { %v1453_v28 = vpop.f32.mrb[60].mxu0  ;;  %v1566_v24 = vpop.f32.mrb[48].mxu1 }
 0x2e1   : > { %v3571_v3 = vadd.f32 %v1453_v28, %v3383_v62  ;;  %v3574_v37 = vadd.f32 %v1566_v24, %v3437_v48  ;;  %v1455_v52 = vpop.f32.mrb[61].mxu0  ;;  %v1568_v41 = vpop.f32.mrb[49].mxu1 }
 0x2e2   : > { %v3577_v60 = vadd.f32 %v1455_v52, %v3386_v0  ;;  %v3580_v49 = vadd.f32 %v1568_v41, %v3440_v40  ;;  %v1457_v33 = vpop.f32.mrb[62].mxu0  ;;  %v1570_v18 = vpop.f32.mrb[50].mxu1 }
 0x2e3   : > { %3994 = vst [vmem:[#allocation13_spill] sm:$0xff] %v3571_v3  ;;  %3995 = vst [vmem:[#allocation14_spill] sm:$0xff] %v3574_v37  ;;  %v3585_v28 = vadd.f32 %v1457_v33, %v3383_v62  ;;  %v3588_v24 = vadd.f32 %v1570_v18, %v3437_v48  ;;  %v1459_v6 = vpop.f32.mrb[63].mxu0  ;;  %v1572_v53 = vpop.f32.mrb[51].mxu1  ;;  %v4003_v3 = vmax.f32 (!%p2397_p7), %v3392_v4, 0.0 }
 0x2e4   : > { %3996 = vst [vmem:[#allocation15_spill] sm:$0xff] %v3577_v60  ;;  %3997 = vst [vmem:[#allocation16_spill] sm:$0xff] %v3580_v49  ;;  %v3593_v41 = vadd.f32 %v1459_v6, %v3386_v0  ;;  %v3596_v9 = vadd.f32 %v1572_v53, %v3440_v40 }
 0x2e5   : > { %3998 = vst [vmem:[#allocation17_spill] sm:$0xff] %v3585_v28  ;;  %3999 = vst [vmem:[#allocation18_spill] sm:$0xff] %v3588_v24 }
 0x2e6   : > { %4000 = vst [vmem:[#allocation19_spill] sm:$0xff] %v3593_v41  ;;  %4001 = vst [vmem:[#allocation20_spill] sm:$0xff] %v3596_v9 }
 0x2e7   : > { %1644 = vst [vmem:[#allocation2 + $0x8] sm:$0xff] (!%p2397_p7), %v4003_v3  ;;  %v4010_v3 = vmax.f32 (!%p2397_p7), %v3405_v26, 0.0 }
 0x2e8   : > { %v1496_v21 = vpop.f32.mrb[64].mxu0 }
 0x2e9   : > { %v3603_v37 = vadd.f32 %v1496_v21, %v3437_v48  ;;  %v1498_v52 = vpop.f32.mrb[65].mxu0  ;;  %1651 = vst [vmem:[#allocation2 + $0x40] sm:$0xff] (!%p2397_p7), %v4010_v3 }
 0x2ea   : > { %v3606_v12 = vadd.f32 %v1498_v52, %v3440_v40  ;;  %v1500_v0 = vpop.f32.mrb[66].mxu0 }
 0x2eb   : > { %v3610_v6 = vadd.f32 %v1500_v0, %v3437_v48  ;;  %v1502_v35 = vpop.f32.mrb[67].mxu0 }
 0x2ec   : > { %v3614_v33 = vadd.f32 %v1502_v35, %v3440_v40 }
 0x2f0   : > { %v1506_v9 = vpop.f32.mrb[68].mxu0 }
 0x2f1   : > { %v3619_v52 = vadd.f32 %v1506_v9, %v3437_v48  ;;  %v1508_v24 = vpop.f32.mrb[69].mxu0 }
 0x2f2   : > { %v3622_v53 = vadd.f32 %v1508_v24, %v3440_v40  ;;  %v1510_v0 = vpop.f32.mrb[70].mxu0 }
 0x2f3   : > { %v3626_v62 = vadd.f32 %v1510_v0, %v3437_v48  ;;  %v1512_v35 = vpop.f32.mrb[71].mxu0 }
 0x2f4   : > { %v3630_v18 = vadd.f32 %v1512_v35, %v3440_v40 }
 0x2f6   : > { %v4017_v3 = vmax.f32 (!%p2397_p7), %v3630_v18, 0.0 }
 0x2f7   : > { %1642 = sbr.rel (%p2397_p7) target bundleno = 794 (0x31a), region = 52 }
 0x2f8   : > { %v1516_v49 = vpop.f32.mrb[72].mxu0  ;;  %1658 = vst [vmem:[#allocation2 + $0x78] sm:$0xff] (!%p2397_p7), %v4017_v3  ;;  %v4024_v3 = vmax.f32 (!%p2397_p7), %v3443_v42, 0.0 }
 0x2f9   : > { %v3635_v24 = vadd.f32 %v1516_v49, %v3437_v48  ;;  %v1518_v60 = vpop.f32.mrb[73].mxu0  ;;  %v4008_v49 = vmax.f32 (!%p2397_p7), %v3610_v6, 0.0 }
 0x2fa   : > { %v3638_v41 = vadd.f32 %v1518_v60, %v3440_v40  ;;  %v1520_v0 = vpop.f32.mrb[74].mxu0  ;;  %v4002_v60 = vmax.f32 (!%p2397_p7), %v3389_v2, 0.0  ;;  %1667 = vst [vmem:[#allocation2 + $0xc0] sm:$0xff] (!%p2397_p7), %v4024_v3  ;;  %v4031_v3 = vmax.f32 (!%p2397_p7), %v3468_v19, 0.0 }
 0x2fb   : > { %v3642_v28 = vadd.f32 %v1520_v0, %v3437_v48  ;;  %v1522_v35 = vpop.f32.mrb[75].mxu0  ;;  %v4004_v48 = vmax.f32 (!%p2397_p7), %v3603_v37, 0.0  ;;  %v4005_v0 = vmax.f32 (!%p2397_p7), %v3606_v12, 0.0  ;;  %1649 = vst [vmem:[#allocation2 + $0x30] sm:$0xff] (!%p2397_p7), %v4008_v49  ;;  %v4015_v49 = vmax.f32 (!%p2397_p7), %v3416_v23, 0.0 }
 0x2fc   : > { %v3974_v51 = vmax.f32 %v3638_v41, 0.0  ;;  %v3646_v21 = vadd.f32 %v1522_v35, %v3440_v40  ;;  %1643 = vst [vmem:[#allocation2] sm:$0xff] (!%p2397_p7), %v4002_v60  ;;  %v4006_v40 = vmax.f32 (!%p2397_p7), %v3396_v30, 0.0  ;;  %v4007_v35 = vmax.f32 (!%p2397_p7), %v3400_v14, 0.0  ;;  %1674 = vst [vmem:[#allocation2 + $0xf8] sm:$0xff] (!%p2397_p7), %v4031_v3 }
 0x2fd   : > { %v3973_v9 = vmax.f32 %v3642_v28, 0.0  ;;  %1645 = vst [vmem:[#allocation2 + $0x10] sm:$0xff] (!%p2397_p7), %v4004_v48  ;;  %1646 = vst [vmem:[#allocation2 + $0x18] sm:$0xff] (!%p2397_p7), %v4005_v0  ;;  %v4009_v60 = vmax.f32 (!%p2397_p7), %v3614_v33, 0.0  ;;  %v4011_v48 = vmax.f32 (!%p2397_p7), %v3408_v22, 0.0  ;;  %v4012_v0 = vmax.f32 (!%p2397_p7), %v3619_v52, 0.0 }
 0x2fe   : > { %1647 = vst [vmem:[#allocation2 + $0x20] sm:$0xff] %v4006_v40  ;;  %1648 = vst [vmem:[#allocation2 + $0x28] sm:$0xff] %v4007_v35  ;;  %v4013_v40 = vmax.f32 %v3622_v53, 0.0  ;;  %v4014_v35 = vmax.f32 %v3412_v20, 0.0  ;;  %v4038_v3 = vmax.f32 %v3492_v55, 0.0 }
 0x2ff   : > { %1650 = vst [vmem:[#allocation2 + $0x38] sm:$0xff] %v4009_v60  ;;  %1652 = vst [vmem:[#allocation2 + $0x48] sm:$0xff] %v4011_v48  ;;  %v4016_v60 = vmax.f32 %v3626_v62, 0.0  ;;  %v4018_v48 = vmax.f32 %v3421_v44, 0.0 }
 0x300   : > { %1653 = vst [vmem:[#allocation2 + $0x50] sm:$0xff] %v4012_v0  ;;  %1654 = vst [vmem:[#allocation2 + $0x58] sm:$0xff] %v4013_v40  ;;  %v4019_v0 = vmax.f32 %v3425_v29, 0.0  ;;  %v4020_v40 = vmax.f32 %v3635_v24, 0.0 }
 0x301   : > { %1655 = vst [vmem:[#allocation2 + $0x60] sm:$0xff] %v4014_v35  ;;  %1656 = vst [vmem:[#allocation2 + $0x68] sm:$0xff] %v4015_v49  ;;  %v4021_v35 = vmax.f32 %v3430_v36, 0.0  ;;  %v4022_v49 = vmax.f32 %v3434_v38, 0.0 }
 0x302   : > { %1657 = vst [vmem:[#allocation2 + $0x70] sm:$0xff] %v4016_v60  ;;  %1659 = vst [vmem:[#allocation2 + $0x80] sm:$0xff] %v4018_v48  ;;  %v4023_v60 = vmax.f32 %v3646_v21, 0.0  ;;  %v4025_v48 = vmax.f32 %v3449_v45, 0.0 }
 0x303   : > { %1660 = vst [vmem:[#allocation2 + $0x88] sm:$0xff] %v4019_v0  ;;  %1661 = vst [vmem:[#allocation2 + $0x90] sm:$0xff] %v4020_v40  ;;  %v4026_v0 = vmax.f32 %v3446_v63, 0.0  ;;  %v4027_v40 = vmax.f32 %v3452_v46, 0.0 }
 0x304   : > { %1662 = vst [vmem:[#allocation2 + $0x98] sm:$0xff] %v3974_v51  ;;  %1663 = vst [vmem:[#allocation2 + $0xa0] sm:$0xff] %v4021_v35  ;;  %v4028_v35 = vmax.f32 %v3457_v57, 0.0  ;;  %v4057_v51 = vld [vmem:[#allocation13_spill] sm:$0xff] }
 0x305   : > { %1664 = vst [vmem:[#allocation2 + $0xa8] sm:$0xff] %v4022_v49  ;;  %1665 = vst [vmem:[#allocation2 + $0xb0] sm:$0xff] %v3973_v9  ;;  %v4029_v49 = vmax.f32 %v3465_v59, 0.0  ;;  %v4055_v9 = vld [vmem:[#allocation12_spill] sm:$0xff] }
 0x306   : > { %1666 = vst [vmem:[#allocation2 + $0xb8] sm:$0xff] %v4023_v60  ;;  %1668 = vst [vmem:[#allocation2 + $0xc8] sm:$0xff] %v4025_v48  ;;  %v4030_v60 = vmax.f32 %v3460_v58, 0.0  ;;  %v4032_v48 = vmax.f32 %v3475_v25, 0.0 }
 0x307   : > { %1669 = vst [vmem:[#allocation2 + $0xd0] sm:$0xff] %v4026_v0  ;;  %1670 = vst [vmem:[#allocation2 + $0xd8] sm:$0xff] %v4027_v40  ;;  %v4033_v0 = vmax.f32 %v3481_v31, 0.0  ;;  %v4034_v40 = vmax.f32 %v3478_v32, 0.0 }
 0x308   : > { %1671 = vst [vmem:[#allocation2 + $0xe0] sm:$0xff] %v4028_v35  ;;  %1672 = vst [vmem:[#allocation2 + $0xe8] sm:$0xff] %v4029_v49  ;;  %v4035_v35 = vmax.f32 %v3484_v39, 0.0  ;;  %v4036_v49 = vmax.f32 %v3489_v10, 0.0 }
 0x309   : > { %1673 = vst [vmem:[#allocation2 + $0xf0] sm:$0xff] %v4030_v60  ;;  %1675 = vst [vmem:[#allocation2 + $0x100] sm:$0xff] %v4032_v48  ;;  %v4037_v60 = vmax.f32 %v3497_v5, 0.0  ;;  %v4039_v48 = vmax.f32 %v3500_v50, 0.0 }
 0x30a   : > { %1676 = vst [vmem:[#allocation2 + $0x108] sm:$0xff] %v4033_v0  ;;  %1677 = vst [vmem:[#allocation2 + $0x110] sm:$0xff] %v4034_v40  ;;  %v4040_v0 = vmax.f32 %v3507_v54, 0.0  ;;  %v4041_v40 = vmax.f32 %v3513_v43, 0.0 }
 0x30b   : > { %1678 = vst [vmem:[#allocation2 + $0x118] sm:$0xff] %v4035_v35  ;;  %1679 = vst [vmem:[#allocation2 + $0x120] sm:$0xff] %v4036_v49  ;;  %v4042_v35 = vmax.f32 %v3510_v16, 0.0  ;;  %v4043_v49 = vmax.f32 %v3516_v7, 0.0 }
 0x30c   : > { %1680 = vst [vmem:[#allocation2 + $0x128] sm:$0xff] %v4037_v60  ;;  %1681 = vst [vmem:[#allocation2 + $0x130] sm:$0xff] %v4038_v3  ;;  %v4044_v60 = vmax.f32 %v3521_v27, 0.0  ;;  %v4045_v3 = vmax.f32 %v3529_v47, 0.0 }
 0x30d   : > { %1682 = vst [vmem:[#allocation2 + $0x138] sm:$0xff] %v4039_v48  ;;  %1683 = vst [vmem:[#allocation2 + $0x140] sm:$0xff] %v4040_v0  ;;  %v4046_v48 = vmax.f32 %v3524_v15, 0.0  ;;  %v4047_v0 = vmax.f32 %v3532_v17, 0.0 }
 0x30e   : > { %1684 = vst [vmem:[#allocation2 + $0x148] sm:$0xff] %v4041_v40  ;;  %1685 = vst [vmem:[#allocation2 + $0x150] sm:$0xff] %v4042_v35  ;;  %v4048_v40 = vmax.f32 %v3539_v56, 0.0  ;;  %v4049_v35 = vmax.f32 %v3545_v61, 0.0 }
 0x30f   : > { %1686 = vst [vmem:[#allocation2 + $0x158] sm:$0xff] %v4043_v49  ;;  %1687 = vst [vmem:[#allocation2 + $0x160] sm:$0xff] %v4044_v60  ;;  %v4050_v49 = vmax.f32 %v3542_v1, 0.0  ;;  %v4051_v60 = vmax.f32 %v3548_v34, 0.0  ;;  %v4059_v1 = vld [vmem:[#allocation15_spill] sm:$0xff]  ;;  %v4061_v34 = vld [vmem:[#allocation14_spill] sm:$0xff] }
 0x310   : > { %1688 = vst [vmem:[#allocation2 + $0x168] sm:$0xff] %v4045_v3  ;;  %1689 = vst [vmem:[#allocation2 + $0x170] sm:$0xff] %v4046_v48  ;;  %v4052_v3 = vmax.f32 %v3553_v13, 0.0  ;;  %v4053_v48 = vmax.f32 %v3561_v8, 0.0  ;;  %v4063_v13 = vld [vmem:[#allocation16_spill] sm:$0xff]  ;;  %v4065_v8 = vld [vmem:[#allocation17_spill] sm:$0xff] }
 0x311   : > { %1690 = vst [vmem:[#allocation2 + $0x178] sm:$0xff] %v4047_v0  ;;  %1691 = vst [vmem:[#allocation2 + $0x180] sm:$0xff] %v4048_v40  ;;  %v4054_v0 = vmax.f32 %v3556_v11, 0.0  ;;  %v4056_v40 = vmax.f32 %v4055_v9, 0.0  ;;  %v4067_v11 = vld [vmem:[#allocation19_spill] sm:$0xff]  ;;  %v4069_v9 = vld [vmem:[#allocation18_spill] sm:$0xff] }
 0x312   : > { %1692 = vst [vmem:[#allocation2 + $0x188] sm:$0xff] %v4049_v35  ;;  %1693 = vst [vmem:[#allocation2 + $0x190] sm:$0xff] %v4050_v49  ;;  %v4058_v35 = vmax.f32 %v4057_v51, 0.0  ;;  %v4060_v49 = vmax.f32 %v4059_v1, 0.0  ;;  %v4071_v51 = vld [vmem:[#allocation20_spill] sm:$0xff] }
 0x313   : > { %1694 = vst [vmem:[#allocation2 + $0x198] sm:$0xff] %v4051_v60  ;;  %1695 = vst [vmem:[#allocation2 + $0x1a0] sm:$0xff] %v4052_v3  ;;  %v4062_v60 = vmax.f32 %v4061_v34, 0.0  ;;  %v4064_v3 = vmax.f32 %v4063_v13, 0.0 }
 0x314   : > { %1696 = vst [vmem:[#allocation2 + $0x1a8] sm:$0xff] %v4053_v48  ;;  %1697 = vst [vmem:[#allocation2 + $0x1b0] sm:$0xff] %v4054_v0  ;;  %v4066_v48 = vmax.f32 %v4065_v8, 0.0  ;;  %v4068_v0 = vmax.f32 %v4067_v11, 0.0 }
 0x315   : > { %1698 = vst [vmem:[#allocation2 + $0x1b8] sm:$0xff] %v4056_v40  ;;  %1699 = vst [vmem:[#allocation2 + $0x1c0] sm:$0xff] %v4058_v35  ;;  %v4070_v40 = vmax.f32 %v4069_v9, 0.0  ;;  %v4072_v35 = vmax.f32 %v4071_v51, 0.0 }
 0x316   : > { %1700 = vst [vmem:[#allocation2 + $0x1c8] sm:$0xff] %v4060_v49  ;;  %1701 = vst [vmem:[#allocation2 + $0x1d0] sm:$0xff] %v4062_v60 }
 0x317   : > { %1702 = vst [vmem:[#allocation2 + $0x1d8] sm:$0xff] %v4064_v3  ;;  %1703 = vst [vmem:[#allocation2 + $0x1e0] sm:$0xff] %v4066_v48 }
 0x318   : > { %1704 = vst [vmem:[#allocation2 + $0x1e8] sm:$0xff] %v4068_v0  ;;  %1705 = vst [vmem:[#allocation2 + $0x1f0] sm:$0xff] %v4070_v40 }
 0x319   : > { %1706 = vst [vmem:[#allocation2 + $0x1f8] sm:$0xff] %v4072_v35 }
 0x31a PF: > { %p2398_p8 = scmp.le.s32.totalorder %s2716_s24, 0 }
 0x31b   : > { %v1712_v34 = vld [vmem:[#allocation2 + $0x8] sm:$0xff] (!%p2398_p8)  ;;  %v4073_v49 = vmax.f32 (!%p2398_p8), %v3389_v2, 0.0  ;;  %v4074_v60 = vmax.f32 (!%p2398_p8), %v3392_v4, 0.0  ;;  %v4075_v3 = vmax.f32 (!%p2398_p8), %v3603_v37, 0.0  ;;  %v4076_v51 = vmax.f32 (!%p2398_p8), %v3606_v12, 0.0 }
 0x31c   : > { %1710 = sbr.rel (%p2398_p8) target bundleno = 839 (0x347), region = 56  ;;  %v4077_v61 = vmax.f32 (!%p2398_p8), %v3396_v30, 0.0  ;;  %v4078_v17 = vmax.f32 (!%p2398_p8), %v3400_v14, 0.0  ;;  %v4079_v4 = vmax.f32 (!%p2398_p8), %v3610_v6, 0.0  ;;  %v4081_v12 = vmax.f32 (!%p2398_p8), %v3405_v26, 0.0  ;;  %v1720_v30 = vld [vmem:[#allocation2 + $0x48] sm:$0xff] (!%p2398_p8) }
 0x31d   : > { %v1776_v11 = vmax.f32 (!%p2398_p8), %v1712_v34, %v4074_v60  ;;  %v4080_v34 = vmax.f32 (!%p2398_p8), %v3614_v33, 0.0  ;;  %v4082_v14 = vmax.f32 (!%p2398_p8), %v3408_v22, 0.0  ;;  %v4084_v6 = vmax.f32 (!%p2398_p8), %v3622_v53, 0.0  ;;  %v1723_v33 = vld [vmem:[#allocation2 + $0x60] sm:$0xff] (!%p2398_p8) }
 0x31e   : > { %v1717_v2 = vld [vmem:[#allocation2 + $0x30] sm:$0xff] (!%p2398_p8)  ;;  %v4085_v26 = vmax.f32 (!%p2398_p8), %v3412_v20, 0.0  ;;  %v4087_v22 = vmax.f32 (!%p2398_p8), %v3626_v62, 0.0  ;;  %v4088_v53 = vmax.f32 (!%p2398_p8), %v3630_v18, 0.0  ;;  %v4090_v20 = vmax.f32 (!%p2398_p8), %v3425_v29, 0.0 }
 0x31f   : > { %v1711_v1 = vld [vmem:[#allocation2] sm:$0xff] (!%p2398_p8)  ;;  %1840 = vst [vmem:[#allocation2 + $0x8] sm:$0xff] (!%p2398_p8), %v1776_v11  ;;  %v1781_v37 = vmax.f32 (!%p2398_p8), %v1717_v2, %v4079_v4  ;;  %v1728_v2 = vld [vmem:[#allocation2 + $0x88] sm:$0xff] (!%p2398_p8)  ;;  %v4091_v62 = vmax.f32 (!%p2398_p8), %v3635_v24, 0.0  ;;  %v4093_v18 = vmax.f32 (!%p2398_p8), %v3430_v36, 0.0  ;;  %v4094_v29 = vmax.f32 (!%p2398_p8), %v3434_v38, 0.0 }
 0x320   : > { %v1713_v13 = vld [vmem:[#allocation2 + $0x10] sm:$0xff] (!%p2398_p8)  ;;  %v1775_v8 = vmax.f32 (!%p2398_p8), %v1711_v1, %v4073_v49  ;;  %v1714_v0 = vld [vmem:[#allocation2 + $0x18] sm:$0xff] (!%p2398_p8)  ;;  %v1719_v49 = vld [vmem:[#allocation2 + $0x40] sm:$0xff] (!%p2398_p8)  ;;  %v4096_v24 = vmax.f32 (!%p2398_p8), %v3646_v21, 0.0  ;;  %v4097_v36 = vmax.f32 (!%p2398_p8), %v3443_v42, 0.0  ;;  %v4099_v38 = vmax.f32 (!%p2398_p8), %v3446_v63, 0.0 }
 0x321   : > { %v1777_v48 = vmax.f32 (!%p2398_p8), %v1713_v13, %v4075_v3  ;;  %v1715_v9 = vld [vmem:[#allocation2 + $0x20] sm:$0xff] (!%p2398_p8)  ;;  %v1716_v40 = vld [vmem:[#allocation2 + $0x28] sm:$0xff] (!%p2398_p8)  ;;  %v1778_v35 = vmax.f32 (!%p2398_p8), %v1714_v0, %v4076_v51  ;;  %v1718_v1 = vld [vmem:[#allocation2 + $0x38] sm:$0xff] (!%p2398_p8)  ;;  %v1783_v60 = vmax.f32 (!%p2398_p8), %v1719_v49, %v4081_v12  ;;  %1845 = vst [vmem:[#allocation2 + $0x30] sm:$0xff] (!%p2398_p8), %v1781_v37  ;;  %v4089_v49 = vmax.f32 (!%p2398_p8), %v3421_v44, 0.0 }
 0x322   : > { %v1779_v56 = vmax.f32 (!%p2398_p8), %v1715_v9, %v4077_v61  ;;  %v1780_v15 = vmax.f32 (!%p2398_p8), %v1716_v40, %v4078_v17  ;;  %1839 = vst [vmem:[#allocation2] sm:$0xff] (!%p2398_p8), %v1775_v8  ;;  %v1782_v13 = vmax.f32 (!%p2398_p8), %v1718_v1, %v4080_v34  ;;  %v1721_v61 = vld [vmem:[#allocation2 + $0x50] sm:$0xff] (!%p2398_p8)  ;;  %v1722_v3 = vld [vmem:[#allocation2 + $0x58] sm:$0xff] (!%p2398_p8)  ;;  %v1784_v17 = vmax.f32 (!%p2398_p8), %v1720_v30, %v4082_v14  ;;  %v1724_v0 = vld [vmem:[#allocation2 + $0x68] sm:$0xff] (!%p2398_p8) }
 0x323   : > { %1841 = vst [vmem:[#allocation2 + $0x10] sm:$0xff] %v1777_v48  ;;  %1842 = vst [vmem:[#allocation2 + $0x18] sm:$0xff] %v1778_v35  ;;  %v4083_v8 = vmax.f32 %v3619_v52, 0.0  ;;  %v1786_v48 = vmax.f32 %v1722_v3, %v4084_v6  ;;  %v1725_v9 = vld [vmem:[#allocation2 + $0x70] sm:$0xff]  ;;  %v1787_v40 = vmax.f32 %v1723_v33, %v4085_v26  ;;  %v1726_v52 = vld [vmem:[#allocation2 + $0x78] sm:$0xff]  ;;  %v1792_v37 = vmax.f32 %v1728_v2, %v4090_v20 }
 0x324   : > { %1843 = vst [vmem:[#allocation2 + $0x20] sm:$0xff] %v1779_v56  ;;  %1844 = vst [vmem:[#allocation2 + $0x28] sm:$0xff] %v1780_v15  ;;  %v4086_v15 = vmax.f32 %v3416_v23, 0.0  ;;  %v1789_v51 = vmax.f32 %v1725_v9, %v4087_v22  ;;  %v1727_v35 = vld [vmem:[#allocation2 + $0x80] sm:$0xff]  ;;  %v1790_v1 = vmax.f32 %v1726_v52, %v4088_v53  ;;  %v1729_v23 = vld [vmem:[#allocation2 + $0x90] sm:$0xff]  ;;  %v4098_v9 = vmax.f32 %v3449_v45, 0.0 }
 0x325   : > { %v1785_v11 = vmax.f32 %v1721_v61, %v4083_v8  ;;  %1846 = vst [vmem:[#allocation2 + $0x38] sm:$0xff] %v1782_v13  ;;  %1847 = vst [vmem:[#allocation2 + $0x40] sm:$0xff] %v1783_v60  ;;  %v1791_v4 = vmax.f32 %v1727_v35, %v4089_v49  ;;  %v1730_v34 = vld [vmem:[#allocation2 + $0x98] sm:$0xff]  ;;  %v1731_v13 = vld [vmem:[#allocation2 + $0xa0] sm:$0xff]  ;;  %v1793_v12 = vmax.f32 %v1729_v23, %v4091_v62  ;;  %v4092_v60 = vmax.f32 %v3638_v41, 0.0 }
 0x326   : > { %v1788_v56 = vmax.f32 %v1724_v0, %v4086_v15  ;;  %1848 = vst [vmem:[#allocation2 + $0x48] sm:$0xff] %v1784_v17  ;;  %1850 = vst [vmem:[#allocation2 + $0x58] sm:$0xff] %v1786_v48  ;;  %v1795_v61 = vmax.f32 %v1731_v13, %v4093_v18  ;;  %v1732_v44 = vld [vmem:[#allocation2 + $0xa8] sm:$0xff]  ;;  %v1733_v3 = vld [vmem:[#allocation2 + $0xb0] sm:$0xff]  ;;  %v4095_v8 = vmax.f32 %v3642_v28, 0.0  ;;  %v4100_v21 = vmax.f32 %v3452_v46, 0.0 }
 0x327   : > { %1849 = vst [vmem:[#allocation2 + $0x50] sm:$0xff] %v1785_v11  ;;  %1851 = vst [vmem:[#allocation2 + $0x60] sm:$0xff] %v1787_v40  ;;  %v1794_v30 = vmax.f32 %v1730_v34, %v4092_v60  ;;  %v1734_v14 = vld [vmem:[#allocation2 + $0xb8] sm:$0xff]  ;;  %v1796_v17 = vmax.f32 %v1732_v44, %v4094_v29  ;;  %v1735_v41 = vld [vmem:[#allocation2 + $0xc0] sm:$0xff]  ;;  %v4102_v42 = vmax.f32 %v3465_v59, 0.0  ;;  %v4103_v63 = vmax.f32 %v3460_v58, 0.0 }
 0x328   : > { %1852 = vst [vmem:[#allocation2 + $0x68] sm:$0xff] %v1788_v56  ;;  %1853 = vst [vmem:[#allocation2 + $0x70] sm:$0xff] %v1789_v51  ;;  %v1797_v11 = vmax.f32 %v1733_v3, %v4095_v8  ;;  %v1798_v6 = vmax.f32 %v1734_v14, %v4096_v24  ;;  %v1736_v48 = vld [vmem:[#allocation2 + $0xc8] sm:$0xff]  ;;  %v1737_v33 = vld [vmem:[#allocation2 + $0xd0] sm:$0xff]  ;;  %v1799_v0 = vmax.f32 %v1735_v41, %v4097_v36  ;;  %v4101_v51 = vmax.f32 %v3457_v57, 0.0 }
 0x329   : > { %1854 = vst [vmem:[#allocation2 + $0x78] sm:$0xff] %v1790_v1  ;;  %1855 = vst [vmem:[#allocation2 + $0x80] sm:$0xff] %v1791_v4  ;;  %v1800_v26 = vmax.f32 %v1736_v48, %v4098_v9  ;;  %v1801_v40 = vmax.f32 %v1737_v33, %v4099_v38  ;;  %v1738_v28 = vld [vmem:[#allocation2 + $0xd8] sm:$0xff]  ;;  %v1739_v15 = vld [vmem:[#allocation2 + $0xe0] sm:$0xff]  ;;  %v4104_v49 = vmax.f32 %v3468_v19, 0.0  ;;  %v4105_v46 = vmax.f32 %v3475_v25, 0.0 }
 0x32a   : > { %1856 = vst [vmem:[#allocation2 + $0x88] sm:$0xff] %v1792_v37  ;;  %1857 = vst [vmem:[#allocation2 + $0x90] sm:$0xff] %v1793_v12  ;;  %v1740_v56 = vld [vmem:[#allocation2 + $0xe8] sm:$0xff]  ;;  %v1802_v22 = vmax.f32 %v1738_v28, %v4100_v21  ;;  %v1803_v52 = vmax.f32 %v1739_v15, %v4101_v51  ;;  %v1741_v45 = vld [vmem:[#allocation2 + $0xf0] sm:$0xff]  ;;  %v4106_v59 = vmax.f32 %v3481_v31, 0.0  ;;  %v4107_v13 = vmax.f32 %v3478_v32, 0.0 }
 0x32b   : > { %1858 = vst [vmem:[#allocation2 + $0x98] sm:$0xff] %v1794_v30  ;;  %1859 = vst [vmem:[#allocation2 + $0xa0] sm:$0xff] %v1795_v61  ;;  %v1804_v35 = vmax.f32 %v1740_v56, %v4102_v42  ;;  %v1742_v2 = vld [vmem:[#allocation2 + $0xf8] sm:$0xff]  ;;  %v1743_v53 = vld [vmem:[#allocation2 + $0x100] sm:$0xff]  ;;  %v1805_v1 = vmax.f32 %v1741_v45, %v4103_v63  ;;  %v4108_v58 = vmax.f32 %v3484_v39, 0.0  ;;  %v4109_v25 = vmax.f32 %v3489_v10, 0.0 }
 0x32c   : > { %1860 = vst [vmem:[#allocation2 + $0xa8] sm:$0xff] %v1796_v17  ;;  %1861 = vst [vmem:[#allocation2 + $0xb0] sm:$0xff] %v1797_v11  ;;  %v1806_v4 = vmax.f32 %v1742_v2, %v4104_v49  ;;  %v1807_v20 = vmax.f32 %v1743_v53, %v4105_v46  ;;  %v1744_v57 = vld [vmem:[#allocation2 + $0x108] sm:$0xff]  ;;  %v1745_v37 = vld [vmem:[#allocation2 + $0x110] sm:$0xff]  ;;  %v4110_v61 = vmax.f32 %v3497_v5, 0.0  ;;  %v4111_v31 = vmax.f32 %v3492_v55, 0.0 }
 0x32d   : > { %1862 = vst [vmem:[#allocation2 + $0xb8] sm:$0xff] %v1798_v6  ;;  %1863 = vst [vmem:[#allocation2 + $0xc0] sm:$0xff] %v1799_v0  ;;  %v1746_v23 = vld [vmem:[#allocation2 + $0x118] sm:$0xff]  ;;  %v1808_v34 = vmax.f32 %v1744_v57, %v4106_v59  ;;  %v1809_v62 = vmax.f32 %v1745_v37, %v4107_v13  ;;  %v1747_v19 = vld [vmem:[#allocation2 + $0x120] sm:$0xff]  ;;  %v4112_v39 = vmax.f32 %v3500_v50, 0.0  ;;  %v4113_v8 = vmax.f32 %v3507_v54, 0.0 }
 0x32e   : > { %1864 = vst [vmem:[#allocation2 + $0xc8] sm:$0xff] %v1800_v26  ;;  %1865 = vst [vmem:[#allocation2 + $0xd0] sm:$0xff] %v1801_v40  ;;  %v1810_v12 = vmax.f32 %v1746_v23, %v4108_v58  ;;  %v1748_v60 = vld [vmem:[#allocation2 + $0x128] sm:$0xff]  ;;  %v1749_v30 = vld [vmem:[#allocation2 + $0x130] sm:$0xff]  ;;  %v1811_v18 = vmax.f32 %v1747_v19, %v4109_v25  ;;  %v4114_v10 = vmax.f32 %v3513_v43, 0.0  ;;  %v4115_v55 = vmax.f32 %v3510_v16, 0.0 }
 0x32f   : > { %1866 = vst [vmem:[#allocation2 + $0xd8] sm:$0xff] %v1802_v22  ;;  %1867 = vst [vmem:[#allocation2 + $0xe0] sm:$0xff] %v1803_v52  ;;  %v1812_v44 = vmax.f32 %v1748_v60, %v4110_v61  ;;  %v1813_v3 = vmax.f32 %v1749_v30, %v4111_v31  ;;  %v1750_v32 = vld [vmem:[#allocation2 + $0x138] sm:$0xff]  ;;  %v1751_v14 = vld [vmem:[#allocation2 + $0x140] sm:$0xff]  ;;  %v4116_v33 = vmax.f32 %v3516_v7, 0.0  ;;  %v4117_v50 = vmax.f32 %v3521_v27, 0.0 }
 0x330   : > { %1868 = vst [vmem:[#allocation2 + $0xe8] sm:$0xff] %v1804_v35  ;;  %1869 = vst [vmem:[#allocation2 + $0xf0] sm:$0xff] %v1805_v1  ;;  %v1752_v29 = vld [vmem:[#allocation2 + $0x148] sm:$0xff]  ;;  %v1814_v17 = vmax.f32 %v1750_v32, %v4112_v39  ;;  %v1815_v11 = vmax.f32 %v1751_v14, %v4113_v8  ;;  %v1753_v5 = vld [vmem:[#allocation2 + $0x150] sm:$0xff]  ;;  %v4118_v43 = vmax.f32 %v3529_v47, 0.0 }
 0x331   : > { %1870 = vst [vmem:[#allocation2 + $0xf8] sm:$0xff] %v1806_v4  ;;  %1871 = vst [vmem:[#allocation2 + $0x100] sm:$0xff] %v1807_v20  ;;  %v1816_v24 = vmax.f32 %v1752_v29, %v4114_v10  ;;  %v1754_v6 = vld [vmem:[#allocation2 + $0x158] sm:$0xff]  ;;  %v1755_v41 = vld [vmem:[#allocation2 + $0x160] sm:$0xff]  ;;  %v1817_v48 = vmax.f32 %v1753_v5, %v4115_v55 }
 0x332   : > { %1872 = vst [vmem:[#allocation2 + $0x108] sm:$0xff] %v1808_v34  ;;  %1873 = vst [vmem:[#allocation2 + $0x110] sm:$0xff] %v1809_v62  ;;  %v1818_v36 = vmax.f32 %v1754_v6, %v4116_v33  ;;  %v1819_v0 = vmax.f32 %v1755_v41, %v4117_v50  ;;  %v1756_v54 = vld [vmem:[#allocation2 + $0x168] sm:$0xff]  ;;  %v1757_v9 = vld [vmem:[#allocation2 + $0x170] sm:$0xff] }
 0x333   : > { %1874 = vst [vmem:[#allocation2 + $0x118] sm:$0xff] %v1810_v12  ;;  %1875 = vst [vmem:[#allocation2 + $0x120] sm:$0xff] %v1811_v18  ;;  %v1758_v26 = vld [vmem:[#allocation2 + $0x178] sm:$0xff]  ;;  %v1820_v38 = vmax.f32 %v1756_v54, %v4118_v43  ;;  %v4119_v40 = vld [vmem:[#allocation3_spill] sm:$0xff] }
 0x334   : > { %1876 = vst [vmem:[#allocation2 + $0x128] sm:$0xff] %v1812_v44  ;;  %1877 = vst [vmem:[#allocation2 + $0x130] sm:$0xff] %v1813_v3  ;;  %v4120_v28 = vmax.f32 %v4119_v40, 0.0  ;;  %v4121_v16 = vld [vmem:[#allocation4_spill] sm:$0xff]  ;;  %v1759_v7 = vld [vmem:[#allocation2 + $0x180] sm:$0xff] }
 0x335   : > { %1878 = vst [vmem:[#allocation2 + $0x138] sm:$0xff] %v1814_v17  ;;  %1879 = vst [vmem:[#allocation2 + $0x140] sm:$0xff] %v1815_v11  ;;  %v4122_v56 = vmax.f32 %v4121_v16, 0.0  ;;  %v1760_v22 = vld [vmem:[#allocation2 + $0x188] sm:$0xff]  ;;  %v1761_v51 = vld [vmem:[#allocation2 + $0x190] sm:$0xff] }
 0x336   : > { %1880 = vst [vmem:[#allocation2 + $0x148] sm:$0xff] %v1816_v24  ;;  %v1821_v15 = vmax.f32 %v1757_v9, %v4120_v28  ;;  %1881 = vst [vmem:[#allocation2 + $0x150] sm:$0xff] %v1817_v48  ;;  %v4123_v27 = vld [vmem:[#allocation5_spill] sm:$0xff]  ;;  %v4125_v35 = vld [vmem:[#allocation7_spill] sm:$0xff] }
 0x337   : > { %v1822_v21 = vmax.f32 %v1758_v26, %v4122_v56  ;;  %1882 = vst [vmem:[#allocation2 + $0x158] sm:$0xff] %v1818_v36  ;;  %1883 = vst [vmem:[#allocation2 + $0x160] sm:$0xff] %v1819_v0  ;;  %v4124_v52 = vmax.f32 %v4123_v27, 0.0  ;;  %v4126_v45 = vmax.f32 %v4125_v35, 0.0  ;;  %v4127_v47 = vld [vmem:[#allocation6_spill] sm:$0xff]  ;;  %v1763_v49 = vld [vmem:[#allocation2 + $0x1a0] sm:$0xff] }
 0x338   : > { %v4128_v53 = vmax.f32 %v4127_v47, 0.0  ;;  %v1762_v1 = vld [vmem:[#allocation2 + $0x198] sm:$0xff]  ;;  %v1764_v4 = vld [vmem:[#allocation2 + $0x1a8] sm:$0xff]  ;;  %1884 = vst [vmem:[#allocation2 + $0x168] sm:$0xff] %v1820_v38  ;;  %1885 = vst [vmem:[#allocation2 + $0x170] sm:$0xff] %v1821_v15 }
 0x339   : > { %v1823_v42 = vmax.f32 %v1759_v7, %v4124_v52  ;;  %v1824_v2 = vmax.f32 %v1760_v22, %v4126_v45  ;;  %1886 = vst [vmem:[#allocation2 + $0x178] sm:$0xff] %v1822_v21  ;;  %v4129_v46 = vld [vmem:[#allocation8_spill] sm:$0xff]  ;;  %v4131_v37 = vld [vmem:[#allocation9_spill] sm:$0xff]  ;;  %v4133_v34 = vld [vmem:[#allocation11_spill] sm:$0xff] }
 0x33a   : > { %v1825_v63 = vmax.f32 %v1761_v51, %v4128_v53  ;;  %v4130_v20 = vmax.f32 %v4129_v46, 0.0  ;;  %v4132_v23 = vmax.f32 %v4131_v37, 0.0  ;;  %v4134_v13 = vmax.f32 %v4133_v34, 0.0  ;;  %v1765_v58 = vld [vmem:[#allocation2 + $0x1b0] sm:$0xff]  ;;  %v1766_v12 = vld [vmem:[#allocation2 + $0x1b8] sm:$0xff]  ;;  %v1767_v19 = vld [vmem:[#allocation2 + $0x1c0] sm:$0xff] }
 0x33b   : > { %1887 = vst [vmem:[#allocation2 + $0x180] sm:$0xff] %v1823_v42  ;;  %1888 = vst [vmem:[#allocation2 + $0x188] sm:$0xff] %v1824_v2  ;;  %v4135_v60 = vld [vmem:[#allocation10_spill] sm:$0xff]  ;;  %v4137_v18 = vld [vmem:[#allocation12_spill] sm:$0xff] }
 0x33c   : > { %v1826_v57 = vmax.f32 %v1762_v1, %v4130_v20  ;;  %v1827_v59 = vmax.f32 %v1763_v49, %v4132_v23  ;;  %v1828_v62 = vmax.f32 %v1764_v4, %v4134_v13  ;;  %1889 = vst [vmem:[#allocation2 + $0x190] sm:$0xff] %v1825_v63  ;;  %v4136_v30 = vmax.f32 %v4135_v60, 0.0  ;;  %v4139_v31 = vld [vmem:[#allocation13_spill] sm:$0xff]  ;;  %v1768_v14 = vld [vmem:[#allocation2 + $0x1c8] sm:$0xff]  ;;  %v1770_v39 = vld [vmem:[#allocation2 + $0x1d8] sm:$0xff] }
 0x33d   : > { %v4138_v61 = vmax.f32 %v4137_v18, 0.0  ;;  %v4140_v3 = vmax.f32 %v4139_v31, 0.0  ;;  %v1769_v29 = vld [vmem:[#allocation2 + $0x1d0] sm:$0xff]  ;;  %v4141_v17 = vld [vmem:[#allocation15_spill] sm:$0xff]  ;;  %v4143_v10 = vld [vmem:[#allocation14_spill] sm:$0xff] }
 0x33e   : > { %v1829_v25 = vmax.f32 %v1765_v58, %v4136_v30  ;;  %1890 = vst [vmem:[#allocation2 + $0x198] sm:$0xff] %v1826_v57  ;;  %1891 = vst [vmem:[#allocation2 + $0x1a0] sm:$0xff] %v1827_v59  ;;  %v4142_v8 = vmax.f32 %v4141_v17, 0.0  ;;  %v4144_v24 = vmax.f32 %v4143_v10, 0.0  ;;  %v4145_v6 = vld [vmem:[#allocation16_spill] sm:$0xff]  ;;  %v1771_v48 = vld [vmem:[#allocation2 + $0x1e0] sm:$0xff] }
 0x33f   : > { %v1830_v44 = vmax.f32 %v1766_v12, %v4138_v61  ;;  %v1831_v32 = vmax.f32 %v1767_v19, %v4140_v3  ;;  %1892 = vst [vmem:[#allocation2 + $0x1a8] sm:$0xff] %v1828_v62  ;;  %v4146_v41 = vmax.f32 %v4145_v6, 0.0  ;;  %v1772_v33 = vld [vmem:[#allocation2 + $0x1e8] sm:$0xff]  ;;  %v1773_v36 = vld [vmem:[#allocation2 + $0x1f0] sm:$0xff]  ;;  %v4149_v9 = vld [vmem:[#allocation19_spill] sm:$0xff] }
 0x340   : > { %v1832_v11 = vmax.f32 %v1768_v14, %v4142_v8  ;;  %v1833_v5 = vmax.f32 %v1769_v29, %v4144_v24  ;;  %1893 = vst [vmem:[#allocation2 + $0x1b0] sm:$0xff] %v1829_v25  ;;  %v4147_v50 = vld [vmem:[#allocation17_spill] sm:$0xff]  ;;  %v4150_v26 = vmax.f32 %v4149_v9, 0.0  ;;  %v4151_v38 = vld [vmem:[#allocation18_spill] sm:$0xff]  ;;  %v4153_v16 = vld [vmem:[#allocation20_spill] sm:$0xff] }
 0x341   : > { %v1834_v55 = vmax.f32 %v1770_v39, %v4146_v41  ;;  %1894 = vst [vmem:[#allocation2 + $0x1b8] sm:$0xff] %v1830_v44  ;;  %1895 = vst [vmem:[#allocation2 + $0x1c0] sm:$0xff] %v1831_v32  ;;  %v4148_v0 = vmax.f32 %v4147_v50, 0.0  ;;  %v4152_v40 = vmax.f32 %v4151_v38, 0.0  ;;  %v1774_v15 = vld [vmem:[#allocation2 + $0x1f8] sm:$0xff]  ;;  %v4154_v56 = vmax.f32 %v4153_v16, 0.0 }
 0x342   : > { %v1836_v43 = vmax.f32 %v1772_v33, %v4150_v26  ;;  %1896 = vst [vmem:[#allocation2 + $0x1c8] sm:$0xff] %v1832_v11  ;;  %1897 = vst [vmem:[#allocation2 + $0x1d0] sm:$0xff] %v1833_v5 }
 0x343   : > { %v1835_v54 = vmax.f32 %v1771_v48, %v4148_v0  ;;  %v1837_v28 = vmax.f32 %v1773_v36, %v4152_v40  ;;  %1898 = vst [vmem:[#allocation2 + $0x1d8] sm:$0xff] %v1834_v55  ;;  %v1838_v21 = vmax.f32 %v1774_v15, %v4154_v56 }
 0x344   : > { %1900 = vst [vmem:[#allocation2 + $0x1e8] sm:$0xff] %v1836_v43 }
 0x345   : > { %1899 = vst [vmem:[#allocation2 + $0x1e0] sm:$0xff] %v1835_v54  ;;  %1901 = vst [vmem:[#allocation2 + $0x1f0] sm:$0xff] %v1837_v28 }
 0x346   : > { %1902 = vst [vmem:[#allocation2 + $0x1f8] sm:$0xff] %v1838_v21 }
 0x347 PF: > { %p2399_p9 = scmp.ne.s32.totalorder %s2716_s24, 7 }
 0x348   : > { %v1911_v42 = vld [vmem:[#allocation2 + $0x20] sm:$0xff] (!%p2399_p9)  ;;  %v1912_v35 = vld [vmem:[#allocation2 + $0x28] sm:$0xff] (!%p2399_p9)  ;;  %v1914_v53 = vld [vmem:[#allocation2 + $0x38] sm:$0xff] (!%p2399_p9) }
 0x349   : > { %1906 = sbr.rel (%p2399_p9) target bundleno = 867 (0x363), region = 60  ;;  %v2437_v2 = vpack.c.bf16 (!%p2399_p9), %v1912_v35, %v1911_v42  ;;  %v1915_v63 = vld [vmem:[#allocation2 + $0x40] sm:$0xff] (!%p2399_p9)  ;;  %v1916_v49 = vld [vmem:[#allocation2 + $0x48] sm:$0xff] (!%p2399_p9)  ;;  %v1917_v4 = vld [vmem:[#allocation2 + $0x50] sm:$0xff] (!%p2399_p9) }
 0x34a   : > { %v1908_v22 = vld [vmem:[#allocation2 + $0x8] sm:$0xff] (!%p2399_p9)  ;;  %v1918_v46 = vld [vmem:[#allocation2 + $0x58] sm:$0xff] (!%p2399_p9)  ;;  %v2439_v20 = vpack.c.bf16 (!%p2399_p9), %v1916_v49, %v1915_v63  ;;  %v1919_v37 = vld [vmem:[#allocation2 + $0x60] sm:$0xff] (!%p2399_p9) }
 0x34b   : > { %2165 = vst [vmem:[%s2834_s12 + $0x10] sm:$0xff] (!%p2399_p9), %v2437_v2  ;;  %v2440_v57 = vpack.c.bf16 (!%p2399_p9), %v1918_v46, %v1917_v4  ;;  %v1920_v23 = vld [vmem:[#allocation2 + $0x68] sm:$0xff] (!%p2399_p9)  ;;  %v1921_v59 = vld [vmem:[#allocation2 + $0x70] sm:$0xff] (!%p2399_p9)  ;;  %v1922_v13 = vld [vmem:[#allocation2 + $0x78] sm:$0xff] (!%p2399_p9) }
 0x34c   : > { %v1913_v47 = vld [vmem:[#allocation2 + $0x30] sm:$0xff] (!%p2399_p9)  ;;  %v2441_v34 = vpack.c.bf16 (!%p2399_p9), %v1920_v23, %v1919_v37  ;;  %v1923_v62 = vld [vmem:[#allocation2 + $0x80] sm:$0xff] (!%p2399_p9)  ;;  %v1924_v58 = vld [vmem:[#allocation2 + $0x88] sm:$0xff] (!%p2399_p9)  ;;  %2167 = vst [vmem:[%s2834_s12 + $0x20] sm:$0xff] (!%p2399_p9), %v2439_v20  ;;  %v2442_v12 = vpack.c.bf16 (!%p2399_p9), %v1922_v13, %v1921_v59 }
 0x34d   : > { %v1907_v7 = vld [vmem:[#allocation2] sm:$0xff] (!%p2399_p9)  ;;  %v2438_v1 = vpack.c.bf16 (!%p2399_p9), %v1914_v53, %v1913_v47  ;;  %2168 = vst [vmem:[%s2834_s12 + $0x28] sm:$0xff] (!%p2399_p9), %v2440_v57  ;;  %v2443_v19 = vpack.c.bf16 (!%p2399_p9), %v1924_v58, %v1923_v62  ;;  %v1925_v60 = vld [vmem:[#allocation2 + $0x90] sm:$0xff] (!%p2399_p9)  ;;  %v1926_v30 = vld [vmem:[#allocation2 + $0x98] sm:$0xff] (!%p2399_p9) }
 0x34e   : > { %v1909_v51 = vld [vmem:[#allocation2 + $0x10] sm:$0xff] (!%p2399_p9)  ;;  %v2435_v27 = vpack.c.bf16 (!%p2399_p9), %v1908_v22, %v1907_v7  ;;  %v1910_v52 = vld [vmem:[#allocation2 + $0x18] sm:$0xff] (!%p2399_p9)  ;;  %v1927_v25 = vld [vmem:[#allocation2 + $0xa0] sm:$0xff] (!%p2399_p9)  ;;  %2169 = vst [vmem:[%s2834_s12 + $0x30] sm:$0xff] (!%p2399_p9), %v2441_v34  ;;  %v2444_v18 = vpack.c.bf16 (!%p2399_p9), %v1926_v30, %v1925_v60 }
 0x34f   : > { %v2436_v45 = vpack.c.bf16 (!%p2399_p9), %v1910_v52, %v1909_v51  ;;  %2166 = vst [vmem:[%s2834_s12 + $0x18] sm:$0xff] (!%p2399_p9), %v2438_v1  ;;  %v1928_v61 = vld [vmem:[#allocation2 + $0xa8] sm:$0xff] (!%p2399_p9)  ;;  %v1929_v44 = vld [vmem:[#allocation2 + $0xb0] sm:$0xff] (!%p2399_p9)  ;;  %v1930_v31 = vld [vmem:[#allocation2 + $0xb8] sm:$0xff] (!%p2399_p9) }
 0x350   : > { %2163 = vst [vmem:[%s2834_s12] sm:$0xff] %v2435_v27  ;;  %2170 = vst [vmem:[%s2834_s12 + $0x38] sm:$0xff] %v2442_v12  ;;  %v2445_v3 = vpack.c.bf16 %v1928_v61, %v1927_v25  ;;  %v2446_v32 = vpack.c.bf16 %v1930_v31, %v1929_v44  ;;  %v1931_v14 = vld [vmem:[#allocation2 + $0xc0] sm:$0xff]  ;;  %v1932_v29 = vld [vmem:[#allocation2 + $0xc8] sm:$0xff] }
 0x351   : > { %2164 = vst [vmem:[%s2834_s12 + $0x8] sm:$0xff] %v2436_v45  ;;  %2171 = vst [vmem:[%s2834_s12 + $0x40] sm:$0xff] %v2443_v19  ;;  %v1933_v39 = vld [vmem:[#allocation2 + $0xd0] sm:$0xff]  ;;  %v2447_v17 = vpack.c.bf16 %v1932_v29, %v1931_v14  ;;  %v1934_v8 = vld [vmem:[#allocation2 + $0xd8] sm:$0xff] }
 0x352   : > { %2172 = vst [vmem:[%s2834_s12 + $0x48] sm:$0xff] %v2444_v18  ;;  %v1935_v11 = vld [vmem:[#allocation2 + $0xe0] sm:$0xff]  ;;  %v1936_v10 = vld [vmem:[#allocation2 + $0xe8] sm:$0xff]  ;;  %2173 = vst [vmem:[%s2834_s12 + $0x50] sm:$0xff] %v2445_v3  ;;  %v2448_v24 = vpack.c.bf16 %v1934_v8, %v1933_v39 }
 0x353   : > { %2174 = vst [vmem:[%s2834_s12 + $0x58] sm:$0xff] %v2446_v32  ;;  %v2449_v5 = vpack.c.bf16 %v1936_v10, %v1935_v11  ;;  %v1937_v6 = vld [vmem:[#allocation2 + $0xf0] sm:$0xff]  ;;  %v1938_v41 = vld [vmem:[#allocation2 + $0xf8] sm:$0xff]  ;;  %v1939_v55 = vld [vmem:[#allocation2 + $0x100] sm:$0xff] }
 0x354   : > { %2175 = vst [vmem:[%s2834_s12 + $0x60] sm:$0xff] %v2447_v17  ;;  %v2450_v48 = vpack.c.bf16 %v1938_v41, %v1937_v6  ;;  %v1940_v33 = vld [vmem:[#allocation2 + $0x108] sm:$0xff]  ;;  %v1941_v36 = vld [vmem:[#allocation2 + $0x110] sm:$0xff]  ;;  %v1942_v50 = vld [vmem:[#allocation2 + $0x118] sm:$0xff] }
 0x355   : > { %2176 = vst [vmem:[%s2834_s12 + $0x68] sm:$0xff] %v2448_v24  ;;  %2177 = vst [vmem:[%s2834_s12 + $0x70] sm:$0xff] %v2449_v5  ;;  %v2451_v0 = vpack.c.bf16 %v1940_v33, %v1939_v55  ;;  %v2452_v54 = vpack.c.bf16 %v1942_v50, %v1941_v36  ;;  %v1943_v9 = vld [vmem:[#allocation2 + $0x120] sm:$0xff]  ;;  %v1944_v26 = vld [vmem:[#allocation2 + $0x128] sm:$0xff] }
 0x356   : > { %v1945_v43 = vld [vmem:[#allocation2 + $0x130] sm:$0xff]  ;;  %2178 = vst [vmem:[%s2834_s12 + $0x78] sm:$0xff] %v2450_v48  ;;  %v2453_v38 = vpack.c.bf16 %v1944_v26, %v1943_v9  ;;  %v1946_v40 = vld [vmem:[#allocation2 + $0x138] sm:$0xff]  ;;  %v1947_v28 = vld [vmem:[#allocation2 + $0x140] sm:$0xff] }
 0x357   : > { %v1948_v15 = vld [vmem:[#allocation2 + $0x148] sm:$0xff]  ;;  %2179 = vst [vmem:[%s2834_s12 + $0x80] sm:$0xff] %v2451_v0  ;;  %2180 = vst [vmem:[%s2834_s12 + $0x88] sm:$0xff] %v2452_v54  ;;  %v2454_v16 = vpack.c.bf16 %v1946_v40, %v1945_v43  ;;  %v1949_v21 = vld [vmem:[#allocation2 + $0x150] sm:$0xff] }
 0x358   : > { %v2455_v56 = vpack.c.bf16 %v1948_v15, %v1947_v28  ;;  %v1950_v7 = vld [vmem:[#allocation2 + $0x158] sm:$0xff]  ;;  %v1951_v22 = vld [vmem:[#allocation2 + $0x160] sm:$0xff]  ;;  %2181 = vst [vmem:[%s2834_s12 + $0x90] sm:$0xff] %v2453_v38  ;;  %v1952_v27 = vld [vmem:[#allocation2 + $0x168] sm:$0xff] }
 0x359   : > { %v2456_v51 = vpack.c.bf16 %v1950_v7, %v1949_v21  ;;  %v1953_v52 = vld [vmem:[#allocation2 + $0x170] sm:$0xff]  ;;  %v1954_v42 = vld [vmem:[#allocation2 + $0x178] sm:$0xff]  ;;  %2182 = vst [vmem:[%s2834_s12 + $0x98] sm:$0xff] %v2454_v16  ;;  %v2457_v35 = vpack.c.bf16 %v1952_v27, %v1951_v22  ;;  %v1955_v2 = vld [vmem:[#allocation2 + $0x180] sm:$0xff] }
 0x35a   : > { %2183 = vst [vmem:[%s2834_s12 + $0xa0] sm:$0xff] %v2455_v56  ;;  %v2458_v45 = vpack.c.bf16 %v1954_v42, %v1953_v52  ;;  %v1956_v47 = vld [vmem:[#allocation2 + $0x188] sm:$0xff]  ;;  %v1957_v53 = vld [vmem:[#allocation2 + $0x190] sm:$0xff]  ;;  %v1958_v1 = vld [vmem:[#allocation2 + $0x198] sm:$0xff] }
 0x35b   : > { %2184 = vst [vmem:[%s2834_s12 + $0xa8] sm:$0xff] %v2456_v51  ;;  %v2459_v63 = vpack.c.bf16 %v1956_v47, %v1955_v2  ;;  %v1959_v49 = vld [vmem:[#allocation2 + $0x1a0] sm:$0xff]  ;;  %v1960_v4 = vld [vmem:[#allocation2 + $0x1a8] sm:$0xff]  ;;  %2185 = vst [vmem:[%s2834_s12 + $0xb0] sm:$0xff] %v2457_v35  ;;  %v2460_v46 = vpack.c.bf16 %v1958_v1, %v1957_v53 }
 0x35c   : > { %2186 = vst [vmem:[%s2834_s12 + $0xb8] sm:$0xff] %v2458_v45  ;;  %v2461_v20 = vpack.c.bf16 %v1960_v4, %v1959_v49  ;;  %v1961_v57 = vld [vmem:[#allocation2 + $0x1b0] sm:$0xff]  ;;  %v1962_v37 = vld [vmem:[#allocation2 + $0x1b8] sm:$0xff]  ;;  %v1963_v23 = vld [vmem:[#allocation2 + $0x1c0] sm:$0xff] }
 0x35d   : > { %2187 = vst [vmem:[%s2834_s12 + $0xc0] sm:$0xff] %v2459_v63  ;;  %v2462_v59 = vpack.c.bf16 %v1962_v37, %v1961_v57  ;;  %v1964_v34 = vld [vmem:[#allocation2 + $0x1c8] sm:$0xff]  ;;  %v1965_v13 = vld [vmem:[#allocation2 + $0x1d0] sm:$0xff]  ;;  %v1966_v62 = vld [vmem:[#allocation2 + $0x1d8] sm:$0xff] }
 0x35e   : > { %2188 = vst [vmem:[%s2834_s12 + $0xc8] sm:$0xff] %v2460_v46  ;;  %2189 = vst [vmem:[%s2834_s12 + $0xd0] sm:$0xff] %v2461_v20  ;;  %v2463_v58 = vpack.c.bf16 %v1964_v34, %v1963_v23  ;;  %v2464_v12 = vpack.c.bf16 %v1966_v62, %v1965_v13  ;;  %v1967_v19 = vld [vmem:[#allocation2 + $0x1e0] sm:$0xff]  ;;  %v1968_v60 = vld [vmem:[#allocation2 + $0x1e8] sm:$0xff] }
 0x35f   : > { %v1969_v30 = vld [vmem:[#allocation2 + $0x1f0] sm:$0xff]  ;;  %2190 = vst [vmem:[%s2834_s12 + $0xd8] sm:$0xff] %v2462_v59  ;;  %v2465_v25 = vpack.c.bf16 %v1968_v60, %v1967_v19  ;;  %v1970_v18 = vld [vmem:[#allocation2 + $0x1f8] sm:$0xff] }
 0x360   : > { %2191 = vst [vmem:[%s2834_s12 + $0xe0] sm:$0xff] %v2463_v58  ;;  %2192 = vst [vmem:[%s2834_s12 + $0xe8] sm:$0xff] %v2464_v12  ;;  %v2466_v61 = vpack.c.bf16 %v1970_v18, %v1969_v30 }
 0x361   : > { %2193 = vst [vmem:[%s2834_s12 + $0xf0] sm:$0xff] %v2465_v25 }
 0x362   : > { %2194 = vst [vmem:[%s2834_s12 + $0xf8] sm:$0xff] %v2466_v61 }
 0x363 PF: > { %s17_s28 = sadd.s32 1, %s2732_s28   ;;  %s4155_s24 = smov %s2724_s26 }
 0x364   : > { %p14_p10 = scmp.ge.s32.totalorder %s17_s28, 18   ;;  %s4156_s25 = smov %s2728_s27 }
 0x365   : > { %s4157_s26 = smov %s4160_s29  ;;  %s4158_s27 = smov %s4164_s30 }
 0x366   :  { %16 = sbr.rel (!%p14_p10) target bundleno = 3 (0x3), region = 90 }

// kernel: flownet3d_forward.21
= control target key start
LH: loop header
LB: loop body
LE: loop exit
PB: predicated region body
PF: predicated region fallthrough
CT: control target
= control target key end

     0   :  { %s1675_s24 = smov 0   ;;  %s1677_s25 = smov 0   ;;  %s2149_s0 = inlined_call_operand.vmem [shape: bf16[8,256,8], index: 0, kind: input, shape index: {}]   ;;  %s2150_s1 = inlined_call_operand.vmem [shape: bf16[8,128], index: 1, kind: input, shape index: {}]   ;;  %s2151_s2 = inlined_call_operand.vmem [shape: bf16[128,128], index: 2, kind: input, shape index: {}]   ;;  %s2152_s3 = inlined_call_operand.vmem [shape: bf16[128,256], index: 3, kind: input, shape index: {}]   ;;  %s2153_s4 = inlined_call_operand.vmem [shape: f32[1,128], index: 4, kind: input, shape index: {}]   ;;  %s2154_s5 = inlined_call_operand.vmem [shape: f32[1,128], index: 5, kind: input, shape index: {}]   ;;  %s2155_s6 = inlined_call_operand.vmem [shape: f32[1,256], index: 6, kind: input, shape index: {}]   ;;  %s2156_s7 = inlined_call_operand.vmem [shape: bf16[256,256], index: 7, kind: output, shape index: {}]  }
   0x1   :  { %s1679_s26 = smov 0   ;;  %s1681_s27 = smov 0  }
   0x2   :  { %s1683_s28 = smov 0  }
   0x3 LB: > { %s26_s29 = sadd.s32 1, %s1624_s26  ;;  %s29_s30 = sadd.s32 1, %s1628_s27  ;;  %s1632_s28 = sphi %s1683_s28, %s17_s28   ;;  %s1628_s27 = sphi %s1681_s27, %s2184_s27   ;;  %s1624_s26 = sphi %s1679_s26, %s2183_s26   ;;  %s1620_s25 = sphi %s1677_s25, %s2182_s25   ;;  %s1616_s24 = sphi %s1675_s24, %s2181_s24  }
   0x4   : > { %p27_p0 = scmp.ge.s32.totalorder %s26_s29, 8  ;;  %p1334_p1 = scmp.ge.s32.totalorder %s1632_s28, 1 }
   0x5   : > { %p256_p2 = scmp.lt.s32.totalorder %s1632_s28, 17 }
   0x6   : > { %s2186_s29 = smov (%p27_p0, %s26_s29), 0  ;;  %s2188_s30 = smov (!%p27_p0, %s29_s30), %s1628_s27 }
   0x7   : > { %p257_p3 = pnand %p1334_p1, %p256_p2  ;;  %p31_p4 = scmp.ge.s32.totalorder %s2188_s30, 2 }
   0x8   : > { %v327_v0 = vld [vmem:[%s2150_s1] sm:$0xf] (!%p257_p3)  ;;  %vm400_vm0 = vcmask (!%p257_p3), 1043456   ;;  %s1335_s10 = sshll.u32 (!%p257_p3), %s1620_s25, 4  ;;  %p294_p5 = scmp.lt.s32.totalorder (!%p257_p3), %s1616_s24, 7  ;;  %v1563_v3 = vld [vmem:[%s2151_s2 + $0x8] sm:$0xff] (!%p257_p3)  }
   0x9   : > { %s2190_s30 = smov (%p31_p4, %s2188_s30), 0  ;;  %260 = sbr.rel (%p257_p3) target bundleno = 763 (0x2fb), region = 48 }
   0xa   : > { %1512 = vmatprep.subr.msk.bf16.mxu0 (!%p257_p3), %vm400_vm0, %v327_v0  ;;  %v402_v1 = vsel (!%p257_p3), %vm400_vm0, %v327_v0, 0  ;;  %p296_p6 = scmp.lt.s32.totalorder (!%p257_p3), %s1335_s10, 31  ;;  %v1562_v2 = vld [vmem:[%s2151_s2] sm:$0xff] (!%p257_p3)   ;;  %v1564_v4 = vld [vmem:[%s2151_s2 + $0x10] sm:$0xff] (!%p257_p3)   ;;  %vm375_vm1 = vcmask (!%p257_p3), 64512   ;;  %v1565_v6 = vld [vmem:[%s2151_s2 + $0x18] sm:$0xff] (!%p257_p3)  }
   0xb   : > { %1447 = vmatpush3.bf16.msra.mxu0 (!%p257_p3), %v402_v1  ;;  %1464 = vmatprep.subr.bf16.mxu1 (!%p257_p3), %v1562_v2  ;;  %v1566_v9 = vld [vmem:[%s2151_s2 + $0x20] sm:$0xff] (!%p257_p3)   ;;  %v1567_v12 = vld [vmem:[%s2151_s2 + $0x28] sm:$0xff] (!%p257_p3)   ;;  %v1568_v16 = vld [vmem:[%s2151_s2 + $0x30] sm:$0xff] (!%p257_p3)   ;;  %p1383_p7 = scmp.ne.s32.totalorder (!%p257_p3), %s1616_s24, 0 }
   0xc   : > { %1465 = vmatpush3.bf16.msra.mxu1 (!%p257_p3), %v1562_v2  ;;  %v1569_v17 = vld [vmem:[%s2151_s2 + $0x38] sm:$0xff] (!%p257_p3)   ;;  %v1570_v18 = vld [vmem:[%s2152_s3] ss:$8 sps:$4 sm:$0xff] (!%p257_p3)   ;;  %v1572_v19 = vld [vmem:[%s2152_s3 + $0x4] ss:$8 sps:$4 sm:$0xff] (!%p257_p3)  }
   0xd   : > { %1466 = vmatprep.subr.bf16.mxu1 (!%p257_p3), %v1563_v3  ;;  %v1575_v20 = vld [vmem:[%s2152_s3 + $0x14] ss:$8 sps:$4 sm:$0xff] (!%p257_p3)   ;;  %825 = vmatprep.subr.bf16.mxu0 (!%p257_p3), %v1572_v19  ;;  %v1573_v21 = vld [vmem:[%s2152_s3 + $0x10] ss:$8 sps:$4 sm:$0xff] (!%p257_p3)   ;;  %v1578_v22 = vld [vmem:[%s2152_s3 + $0x24] ss:$8 sps:$4 sm:$0xff] (!%p257_p3)  }
   0xe   : > { %v1576_v23 = vld [vmem:[%s2152_s3 + $0x20] ss:$8 sps:$4 sm:$0xff] (!%p257_p3)   ;;  %v1581_v24 = vld [vmem:[%s2152_s3 + $0x34] ss:$8 sps:$4 sm:$0xff] (!%p257_p3)   ;;  %v1776_v25 = vld [vmem:[%s2152_s3 + $0x30] ss:$8 sps:$4 sm:$0xff] (!%p257_p3)  }
   0xf   : > { %v1781_v26 = vld [vmem:[%s2152_s3 + $0x44] ss:$8 sps:$4 sm:$0xff] (!%p257_p3)   ;;  %v1787_v27 = vld [vmem:[%s2152_s3 + $0x40] ss:$8 sps:$4 sm:$0xff] (!%p257_p3)   ;;  %v1793_v28 = vld [vmem:[%s2152_s3 + $0x54] ss:$8 sps:$4 sm:$0xff] (!%p257_p3)  }
  0x10   : > { %s295_s11 = scalar_select %p294_p5, %s1616_s24, 7  ;;  %1467 = vmatpush3.bf16.msra.mxu1 %v1563_v3  ;;  %v1799_v29 = vld [vmem:[%s2152_s3 + $0x50] ss:$8 sps:$4 sm:$0xff]   ;;  %v1806_v30 = vld [vmem:[%s2153_s4] ss:$0 sm:$0xff] }
  0x11   : > { %s2192_s10 = smov (!%p296_p6, %s1335_s10), 31  ;;  %1468 = vmatprep.subr.bf16.mxu1 %v1564_v4 }
  0x12   : > { %s1336_s16 = sshll.u32 %s295_s11, 5  ;;  %s1404_s18 = sshll.u32 %s2192_s10, 3 }
  0x13   : > { %s299_s17 = sadd.s32 %s1336_s16, %s2192_s10  ;;  %s1721_s22 = scalar_lea.vmem %s2156_s7, %s1404_s18 }
  0x14   : > { %s1337_s19 = sshll.u32 %s299_s17, 2  ;;  %1469 = vmatpush3.bf16.msra.mxu1 %v1564_v4 }
  0x15   : > { %s301_s12 = scalar_lea.vmem %s2149_s0, %s1337_s19  ;;  %1470 = vmatprep.subr.bf16.mxu1 %v1565_v6 }
  0x16   : > { %v1554_v5 = vld [vmem:[%s301_s12] sm:$0xff]   ;;  %v1555_v7 = vld [vmem:[%s301_s12 + $0x8] sm:$0xff]   ;;  %v1556_v8 = vld [vmem:[%s301_s12 + $0x10] sm:$0xff]  }
  0x17   : > { %1448 = vmatprep.mubr.msk.bf16.mxu0 %vm375_vm1, %v1554_v5  ;;  %v1557_v10 = vld [vmem:[%s301_s12 + $0x18] sm:$0xff]   ;;  %v1558_v11 = vld [vmem:[%s301_s12 + $0x20] sm:$0xff]   ;;  %v1559_v13 = vld [vmem:[%s301_s12 + $0x28] sm:$0xff]  }
  0x18   : > { %1449 = vmatmul.mubr.msk.bf16.vlgmr.msra.gmra.mrb[0].mxu0 %vm375_vm1, %v1555_v7  ;;  %1471 = vmatpush3.bf16.msra.mxu1 %v1565_v6  ;;  %v1560_v14 = vld [vmem:[%s301_s12 + $0x30] sm:$0xff]   ;;  %v1561_v15 = vld [vmem:[%s301_s12 + $0x38] sm:$0xff]  }
  0x19   : > { %1452 = vmatprep.mubr.msk.bf16.mxu0 %vm375_vm1, %v1556_v8  ;;  %1472 = vmatprep.subr.bf16.mxu1 %v1566_v9 }
  0x1a   : > { %826 = vmatpush1.bf16.msra.mxu0 %v1570_v18 }
  0x1b   : > { %827 = vmatprep.subr.bf16.mxu0 %v1575_v20 }
  0x1c   : > { %1473 = vmatpush3.bf16.msra.mxu1 %v1566_v9 }
  0x1d   : > { %1474 = vmatprep.subr.bf16.mxu1 %v1567_v12 }
  0x1e   : > { %828 = vmatpush1.bf16.msra.mxu0 %v1573_v21 }
  0x1f   : > { %829 = vmatprep.subr.bf16.mxu0 %v1578_v22 }
  0x20   : > { %1453 = vmatmul.mubr.msk.bf16.gmra.mrb[4].mxu0 %vm375_vm1, %v1557_v10  ;;  %1475 = vmatpush3.bf16.msra.mxu1 %v1567_v12 }
  0x21   : > { %1456 = vmatprep.mubr.msk.bf16.mxu0 %vm375_vm1, %v1558_v11  ;;  %1476 = vmatprep.subr.bf16.mxu1 %v1568_v16 }
  0x22   : > { %830 = vmatpush1.bf16.msra.mxu0 %v1576_v23 }
  0x23   : > { %831 = vmatprep.subr.bf16.mxu0 %v1581_v24 }
  0x24   : > { %1477 = vmatpush3.bf16.msra.mxu1 %v1568_v16 }
  0x25   : > { %1478 = vmatprep.subr.bf16.mxu1 %v1569_v17 }
  0x26   : > { %832 = vmatpush1.bf16.msra.mxu0 %v1776_v25 }
  0x27   : > { %833 = vmatprep.subr.bf16.mxu0 %v1781_v26 }
  0x28   : > { %1457 = vmatmul.mubr.msk.bf16.gmra.mrb[8].mxu0 %vm375_vm1, %v1559_v13  ;;  %1479 = vmatpush3.bf16.msra.mxu1 %v1569_v17 }
  0x29   : > { %1460 = vmatprep.mubr.msk.bf16.mxu0 %vm375_vm1, %v1560_v14  ;;  %1496 = vmatprep.subr.bf16.mxu1 %v1572_v19 }
  0x2a   : > { %834 = vmatpush1.bf16.msra.mxu0 %v1787_v27 }
  0x2b   : > { %835 = vmatprep.subr.bf16.mxu0 %v1793_v28 }
  0x2e   : > { %836 = vmatpush1.bf16.msra.mxu0 %v1799_v29 }
  0x30   : > { %1461 = vmatmul.mubr.msk.bf16.gmra.mrb[12].mxu0 %vm375_vm1, %v1561_v15 }
  0xeb   : > { %v1450_v31 = vpop.f32.mrb[0].mxu0 }
  0xec   : > { %v447_v32 = vadd.f32 %v1450_v31, %v1806_v30  ;;  %v438_v33 = vpop.f32.mrb[1].mxu0 }
  0xed   : > { %v439_v34 = vadd.f32 %v1806_v30, %v438_v33  ;;  %v1451_v35 = vpop.f32.mrb[2].mxu0 }
  0xee   : > { %v450_v36 = vadd.f32 %v1451_v35, %v1806_v30  ;;  %v441_v37 = vpop.f32.mrb[3].mxu0  ;;  %v503_v39 = vmax.f32 %v447_v32, 0.0 }
  0xef   : > { %v442_v38 = vadd.f32 %v1806_v30, %v441_v37  ;;  %v501_v41 = vmax.f32 %v439_v34, 0.0 }
  0xf0   : > { %v504_v40 = vmax.f32 %v450_v36, 0.0 }
  0xf1   : > { %v502_v42 = vmax.f32 %v442_v38, 0.0 }
  0xf2   : > { %v518_v43 = vpack.c.bf16 %v504_v40, %v503_v39 }
  0xf3   : > { %v1454_v44 = vpop.f32.mrb[4].mxu0  ;;  %v517_v45 = vpack.c.bf16 %v502_v42, %v501_v41 }
  0xf4   : > { %v463_v46 = vadd.f32 %v1454_v44, %v1806_v30  ;;  %v454_v47 = vpop.f32.mrb[5].mxu0 }
  0xf5   : > { %v455_v48 = vadd.f32 %v1806_v30, %v454_v47  ;;  %v1455_v49 = vpop.f32.mrb[6].mxu0  ;;  %1480 = vmatprep.mubr.bf16.mxu1 %v517_v45 }
  0xf6   : > { %v507_v50 = vmax.f32 %v463_v46, 0.0  ;;  %v466_v51 = vadd.f32 %v1455_v49, %v1806_v30  ;;  %v457_v52 = vpop.f32.mrb[7].mxu0  ;;  %1481 = vmatmul.mubr.bf16.vlgmr.msra.gmra.mrb[0].mxu1 %v518_v43 }
  0xf7   : > { %v505_v53 = vmax.f32 %v455_v48, 0.0  ;;  %v458_v54 = vadd.f32 %v1806_v30, %v457_v52  ;;  %1504 = vmatpush1.bf16.msra.mxu1 %v1570_v18 }
  0xf8   : > { %v508_v55 = vmax.f32 %v466_v51, 0.0  ;;  %1497 = vmatprep.subr.bf16.mxu1 %v1575_v20 }
  0xf9   : > { %v506_v56 = vmax.f32 %v458_v54, 0.0 }
  0xfa   : > { %v520_v57 = vpack.c.bf16 %v508_v55, %v507_v50 }
  0xfb   : > { %v519_v58 = vpack.c.bf16 %v506_v56, %v505_v53  ;;  %v1458_v59 = vpop.f32.mrb[8].mxu0  ;;  %1505 = vmatpush1.bf16.msra.mxu1 %v1573_v21 }
  0xfc   : > { %v479_v60 = vadd.f32 %v1458_v59, %v1806_v30  ;;  %v470_v61 = vpop.f32.mrb[9].mxu0  ;;  %1498 = vmatprep.subr.bf16.mxu1 %v1578_v22 }
  0xfd   : > { %v471_v62 = vadd.f32 %v1806_v30, %v470_v61  ;;  %v1459_v63 = vpop.f32.mrb[10].mxu0  ;;  %1484 = vmatprep.mubr.bf16.mxu1 %v519_v58 }
  0xfe   : > { %v511_v0 = vmax.f32 %v479_v60, 0.0  ;;  %v482_v1 = vadd.f32 %v1459_v63, %v1806_v30  ;;  %v473_v2 = vpop.f32.mrb[11].mxu0  ;;  %1485 = vmatmul.mubr.bf16.gmra.mrb[4].mxu1 %v520_v57 }
  0xff   : > { %v509_v3 = vmax.f32 %v471_v62, 0.0  ;;  %v474_v4 = vadd.f32 %v1806_v30, %v473_v2  ;;  %1506 = vmatpush1.bf16.msra.mxu1 %v1576_v23  ;;  %v1590_v23 = vld [vmem:[%s2152_s3 + $0x64] ss:$8 sps:$4 sm:$0xff]  }
 0x100   : > { %v512_v5 = vmax.f32 %v482_v1, 0.0  ;;  %1499 = vmatprep.subr.bf16.mxu1 %v1581_v24  ;;  %v1588_v24 = vld [vmem:[%s2152_s3 + $0x60] ss:$8 sps:$4 sm:$0xff]   ;;  %837 = vmatprep.subr.bf16.mxu0 %v1590_v23 }
 0x101   : > { %v510_v6 = vmax.f32 %v474_v4, 0.0  ;;  %838 = vmatpush1.bf16.msra.mxu0 %v1588_v24 }
 0x102   : > { %v522_v7 = vpack.c.bf16 %v512_v5, %v511_v0 }
 0x103   : > { %v521_v8 = vpack.c.bf16 %v510_v6, %v509_v3  ;;  %v1462_v9 = vpop.f32.mrb[12].mxu0  ;;  %1507 = vmatpush1.bf16.msra.mxu1 %v1776_v25  ;;  %v1593_v25 = vld [vmem:[%s2152_s3 + $0x74] ss:$8 sps:$4 sm:$0xff]  }
 0x104   : > { %v495_v10 = vadd.f32 %v1462_v9, %v1806_v30  ;;  %v486_v11 = vpop.f32.mrb[13].mxu0  ;;  %1500 = vmatprep.subr.bf16.mxu1 %v1781_v26  ;;  %v1591_v26 = vld [vmem:[%s2152_s3 + $0x70] ss:$8 sps:$4 sm:$0xff]   ;;  %839 = vmatprep.subr.bf16.mxu0 %v1593_v25 }
 0x105   : > { %v487_v12 = vadd.f32 %v1806_v30, %v486_v11  ;;  %v1463_v13 = vpop.f32.mrb[14].mxu0  ;;  %1488 = vmatprep.mubr.bf16.mxu1 %v521_v8  ;;  %840 = vmatpush1.bf16.msra.mxu0 %v1591_v26 }
 0x106   : > { %v515_v14 = vmax.f32 %v495_v10, 0.0  ;;  %v498_v15 = vadd.f32 %v1463_v13, %v1806_v30  ;;  %v489_v16 = vpop.f32.mrb[15].mxu0  ;;  %1489 = vmatmul.mubr.bf16.gmra.mrb[8].mxu1 %v522_v7 }
 0x107   : > { %v513_v17 = vmax.f32 %v487_v12, 0.0  ;;  %v490_v18 = vadd.f32 %v1806_v30, %v489_v16  ;;  %1508 = vmatpush1.bf16.msra.mxu1 %v1787_v27  ;;  %v1634_v27 = vmov 0  }
 0x108   : > { %v516_v19 = vmax.f32 %v498_v15, 0.0  ;;  %1501 = vmatprep.subr.bf16.mxu1 %v1793_v28  ;;  %857 = vmatprep.mubr.bf16.mxu0 %v1634_v27  ;;  %v1358_v28 = vld [vmem:[%s2154_s5] ss:$0 sm:$0xff] }
 0x109   : > { %v514_v20 = vmax.f32 %v490_v18, 0.0 }
 0x10a   : > { %v524_v21 = vpack.c.bf16 %v516_v19, %v515_v14 }
 0x10b   : > { %v523_v22 = vpack.c.bf16 %v514_v20, %v513_v17  ;;  %1509 = vmatpush1.bf16.msra.mxu1 %v1799_v29 }
 0x10c   : > { %1502 = vmatprep.subr.bf16.mxu1 %v1590_v23 }
 0x10d   : > { %1492 = vmatprep.mubr.bf16.mxu1 %v523_v22 }
 0x10e   : > { %1493 = vmatmul.mubr.bf16.gmra.mrb[12].mxu1 %v524_v21  ;;  %v735_v21 = vlaneseq }
 0x10f   : > { %1510 = vmatpush1.bf16.msra.mxu1 %v1588_v24  ;;  %917 = vmatprep.mubr.bf16.mxu1 %v1634_v27  ;;  %v733_v24 = vld [vmem:[%s2155_s6] sm:$0x3] }
 0x110   : > { %1503 = vmatprep.subr.bf16.mxu1 %v1593_v25  ;;  %v736_v22 = vshrl.u32 %v735_v21, 7 }
 0x112   : > { %v737_v23 = vsub.s32 0, %v736_v22  ;;  %v741_v25 = vsub.s32 1, %v736_v22 }
 0x113   : > { %1511 = vmatpush1.bf16.msra.mxu1 %v1591_v26 }
 0x114   : > { %v1855_v26 = vrot.slane %v733_v24, %v737_v23 }
 0x1c9   : > { %v1482_v29 = vpop.f32.mrb[0].mxu1 }
 0x1ca   : > { %v639_v30 = vadd.f32 %v1482_v29, %v1358_v28  ;;  %v630_v31 = vpop.f32.mrb[1].mxu1 }
 0x1cb   : > { %v631_v32 = vadd.f32 %v1358_v28, %v630_v31  ;;  %v1483_v33 = vpop.f32.mrb[2].mxu1 }
 0x1cc   : > { %v642_v34 = vadd.f32 %v1483_v33, %v1358_v28  ;;  %v633_v35 = vpop.f32.mrb[3].mxu1  ;;  %v695_v37 = vmax.f32 %v639_v30, 0.0 }
 0x1cd   : > { %v634_v36 = vadd.f32 %v1358_v28, %v633_v35  ;;  %v693_v39 = vmax.f32 %v631_v32, 0.0 }
 0x1ce   : > { %v696_v38 = vmax.f32 %v642_v34, 0.0 }
 0x1cf   : > { %v694_v40 = vmax.f32 %v634_v36, 0.0 }
 0x1d0   : > { %v710_v41 = vpack.c.bf16 %v696_v38, %v695_v37 }
 0x1d1   : > { %v709_v42 = vpack.c.bf16 %v694_v40, %v693_v39  ;;  %v1486_v43 = vpop.f32.mrb[4].mxu1 }
 0x1d2   : > { %v655_v44 = vadd.f32 %v1486_v43, %v1358_v28  ;;  %v646_v45 = vpop.f32.mrb[5].mxu1 }
 0x1d3   : > { %v647_v46 = vadd.f32 %v1358_v28, %v646_v45  ;;  %858 = vmatmul.mubr.bf16.vlgmr.msra.gmra.mrb[16].mxu0 %v709_v42  ;;  %v1487_v47 = vpop.f32.mrb[6].mxu1 }
 0x1d4   : > { %v699_v48 = vmax.f32 %v655_v44, 0.0  ;;  %v658_v49 = vadd.f32 %v1487_v47, %v1358_v28  ;;  %v649_v50 = vpop.f32.mrb[7].mxu1  ;;  %867 = vmatprep.mubr.bf16.mxu0 %v1634_v27 }
 0x1d5   : > { %v697_v51 = vmax.f32 %v647_v46, 0.0  ;;  %v650_v52 = vadd.f32 %v1358_v28, %v649_v50 }
 0x1d6   : > { %v700_v53 = vmax.f32 %v658_v49, 0.0 }
 0x1d7   : > { %v698_v54 = vmax.f32 %v650_v52, 0.0 }
 0x1d8   : > { %v712_v55 = vpack.c.bf16 %v700_v53, %v699_v48 }
 0x1d9   : > { %v711_v56 = vpack.c.bf16 %v698_v54, %v697_v51  ;;  %v1490_v57 = vpop.f32.mrb[8].mxu1 }
 0x1da   : > { %v671_v58 = vadd.f32 %v1490_v57, %v1358_v28  ;;  %v662_v59 = vpop.f32.mrb[9].mxu1 }
 0x1db   : > { %v663_v60 = vadd.f32 %v1358_v28, %v662_v59  ;;  %868 = vmatmul.mubr.bf16.gmra.mrb[20].mxu0 %v710_v41  ;;  %v1491_v61 = vpop.f32.mrb[10].mxu1 }
 0x1dc   : > { %v703_v62 = vmax.f32 %v671_v58, 0.0  ;;  %v674_v63 = vadd.f32 %v1491_v61, %v1358_v28  ;;  %v665_v0 = vpop.f32.mrb[11].mxu1  ;;  %877 = vmatprep.mubr.bf16.mxu0 %v1634_v27 }
 0x1dd   : > { %v701_v1 = vmax.f32 %v663_v60, 0.0  ;;  %v666_v2 = vadd.f32 %v1358_v28, %v665_v0 }
 0x1de   : > { %v704_v3 = vmax.f32 %v674_v63, 0.0 }
 0x1df   : > { %v702_v4 = vmax.f32 %v666_v2, 0.0 }
 0x1e0   : > { %v714_v5 = vpack.c.bf16 %v704_v3, %v703_v62 }
 0x1e1   : > { %v713_v6 = vpack.c.bf16 %v702_v4, %v701_v1  ;;  %v1494_v7 = vpop.f32.mrb[12].mxu1 }
 0x1e2   : > { %v687_v8 = vadd.f32 %v1494_v7, %v1358_v28  ;;  %v678_v9 = vpop.f32.mrb[13].mxu1 }
 0x1e3   : > { %v679_v10 = vadd.f32 %v1358_v28, %v678_v9  ;;  %v1495_v11 = vpop.f32.mrb[14].mxu1  ;;  %878 = vmatmul.mubr.bf16.gmra.mrb[24].mxu0 %v711_v56 }
 0x1e4   : > { %v707_v12 = vmax.f32 %v687_v8, 0.0  ;;  %v690_v13 = vadd.f32 %v1495_v11, %v1358_v28  ;;  %v681_v14 = vpop.f32.mrb[15].mxu1  ;;  %887 = vmatprep.mubr.bf16.mxu0 %v1634_v27 }
 0x1e5   : > { %v705_v15 = vmax.f32 %v679_v10, 0.0  ;;  %v682_v16 = vadd.f32 %v1358_v28, %v681_v14  ;;  %v1857_v28 = vrot.slane %v733_v24, %v741_v25 }
 0x1e6   : > { %v708_v17 = vmax.f32 %v690_v13, 0.0 }
 0x1e7   : > { %v706_v18 = vmax.f32 %v682_v16, 0.0 }
 0x1e8   : > { %v716_v19 = vpack.c.bf16 %v708_v17, %v707_v12 }
 0x1e9   : > { %v715_v20 = vpack.c.bf16 %v706_v18, %v705_v15 }
 0x1eb   : > { %888 = vmatmul.mubr.bf16.gmra.mrb[28].mxu0 %v712_v55  ;;  %918 = vmatmul.mubr.bf16.vlgmr.msra.gmra.mrb[16].mxu1 %v715_v20 }
 0x1ec   : > { %897 = vmatprep.mubr.bf16.mxu0 %v1634_v27  ;;  %927 = vmatprep.mubr.bf16.mxu1 %v1634_v27 }
 0x1f3   : > { %898 = vmatmul.mubr.bf16.gmra.mrb[32].mxu0 %v713_v6  ;;  %928 = vmatmul.mubr.bf16.gmra.mrb[20].mxu1 %v716_v19 }
 0x1f4   : > { %907 = vmatprep.mubr.bf16.mxu0 %v1634_v27 }
 0x1fb   : > { %908 = vmatmul.mubr.bf16.gmra.mrb[36].mxu0 %v714_v5 }
 0x2a6   : > { %v859_v29 = vpop.f32.mrb[16].mxu0 }
 0x2a7   : > { %v1860_v30 = vadd.f32 %v859_v29, %v1855_v26  ;;  %v861_v31 = vpop.f32.mrb[17].mxu0 }
 0x2a8   : > { %v1863_v27 = vadd.f32 %v861_v31, %v1857_v28  ;;  %v863_v32 = vpop.f32.mrb[18].mxu0 }
 0x2a9   : > { %v938_v33 = vmax.f32 %v1860_v30, 0.0  ;;  %v1867_v34 = vadd.f32 %v863_v32, %v1855_v26  ;;  %v865_v35 = vpop.f32.mrb[19].mxu0 }
 0x2aa   : > { %v939_v36 = vmax.f32 %v1863_v27, 0.0  ;;  %v1871_v37 = vadd.f32 %v865_v35, %v1857_v28 }
 0x2ab   : > { %v940_v38 = vmax.f32 %v1867_v34, 0.0  ;;  %974 = vst [vmem:[#allocation2] sm:$0xff] (!%p1383_p7), %v938_v33 }
 0x2ac   : > { %v941_v39 = vmax.f32 %v1871_v37, 0.0  ;;  %975 = vst [vmem:[#allocation2 + $0x8] sm:$0xff] (!%p1383_p7), %v939_v36 }
 0x2ad   : > { %976 = vst [vmem:[#allocation2 + $0x10] sm:$0xff] (!%p1383_p7), %v940_v38 }
 0x2ae   : > { %v869_v40 = vpop.f32.mrb[20].mxu0  ;;  %977 = vst [vmem:[#allocation2 + $0x18] sm:$0xff] (!%p1383_p7), %v941_v39 }
 0x2af   : > { %v1876_v41 = vadd.f32 %v869_v40, %v1855_v26  ;;  %v871_v42 = vpop.f32.mrb[21].mxu0 }
 0x2b0   : > { %v1879_v43 = vadd.f32 %v871_v42, %v1857_v28  ;;  %v873_v44 = vpop.f32.mrb[22].mxu0 }
 0x2b1   : > { %v942_v45 = vmax.f32 %v1876_v41, 0.0  ;;  %v1883_v46 = vadd.f32 %v873_v44, %v1855_v26  ;;  %v875_v47 = vpop.f32.mrb[23].mxu0 }
 0x2b2   : > { %v943_v48 = vmax.f32 %v1879_v43, 0.0  ;;  %v1887_v49 = vadd.f32 %v875_v47, %v1857_v28 }
 0x2b3   : > { %v944_v50 = vmax.f32 %v1883_v46, 0.0  ;;  %978 = vst [vmem:[#allocation2 + $0x20] sm:$0xff] (!%p1383_p7), %v942_v45 }
 0x2b4   : > { %v945_v51 = vmax.f32 %v1887_v49, 0.0  ;;  %979 = vst [vmem:[#allocation2 + $0x28] sm:$0xff] (!%p1383_p7), %v943_v48 }
 0x2b5   : > { %980 = vst [vmem:[#allocation2 + $0x30] sm:$0xff] (!%p1383_p7), %v944_v50 }
 0x2b6   : > { %v879_v52 = vpop.f32.mrb[24].mxu0  ;;  %981 = vst [vmem:[#allocation2 + $0x38] sm:$0xff] (!%p1383_p7), %v945_v51 }
 0x2b7   : > { %v1892_v53 = vadd.f32 %v879_v52, %v1855_v26  ;;  %v881_v54 = vpop.f32.mrb[25].mxu0 }
 0x2b8   : > { %v1895_v55 = vadd.f32 %v881_v54, %v1857_v28  ;;  %v883_v56 = vpop.f32.mrb[26].mxu0 }
 0x2b9   : > { %v946_v57 = vmax.f32 %v1892_v53, 0.0  ;;  %v1899_v58 = vadd.f32 %v883_v56, %v1855_v26  ;;  %v885_v59 = vpop.f32.mrb[27].mxu0 }
 0x2ba   : > { %v947_v60 = vmax.f32 %v1895_v55, 0.0  ;;  %v1903_v61 = vadd.f32 %v885_v59, %v1857_v28 }
 0x2bb   : > { %v948_v62 = vmax.f32 %v1899_v58, 0.0  ;;  %982 = vst [vmem:[#allocation2 + $0x40] sm:$0xff] (!%p1383_p7), %v946_v57 }
 0x2bc   : > { %v949_v63 = vmax.f32 %v1903_v61, 0.0  ;;  %983 = vst [vmem:[#allocation2 + $0x48] sm:$0xff] (!%p1383_p7), %v947_v60 }
 0x2bd   : > { %984 = vst [vmem:[#allocation2 + $0x50] sm:$0xff] (!%p1383_p7), %v948_v62 }
 0x2be   : > { %v889_v0 = vpop.f32.mrb[28].mxu0  ;;  %v919_v1 = vpop.f32.mrb[16].mxu1  ;;  %985 = vst [vmem:[#allocation2 + $0x58] sm:$0xff] (!%p1383_p7), %v949_v63 }
 0x2bf   : > { %v1908_v2 = vadd.f32 %v889_v0, %v1855_v26  ;;  %v1911_v3 = vadd.f32 %v919_v1, %v1855_v26  ;;  %v891_v4 = vpop.f32.mrb[29].mxu0  ;;  %v921_v5 = vpop.f32.mrb[17].mxu1 }
 0x2c0   : > { %v1914_v6 = vadd.f32 %v891_v4, %v1857_v28  ;;  %v1917_v7 = vadd.f32 %v921_v5, %v1857_v28  ;;  %v893_v8 = vpop.f32.mrb[30].mxu0  ;;  %v923_v9 = vpop.f32.mrb[18].mxu1 }
 0x2c1   : > { %v950_v10 = vmax.f32 %v1908_v2, 0.0  ;;  %v2159_v11 = vmax.f32 %v1911_v3, 0.0  ;;  %v1922_v12 = vadd.f32 %v893_v8, %v1855_v26  ;;  %v1925_v13 = vadd.f32 %v923_v9, %v1855_v26  ;;  %v895_v14 = vpop.f32.mrb[31].mxu0  ;;  %v925_v15 = vpop.f32.mrb[19].mxu1 }
 0x2c2   : > { %v951_v16 = vmax.f32 %v1914_v6, 0.0  ;;  %v2158_v17 = vmax.f32 %v1917_v7, 0.0  ;;  %v1930_v18 = vadd.f32 %v895_v14, %v1857_v28  ;;  %v1933_v19 = vadd.f32 %v925_v15, %v1857_v28 }
 0x2c3   : > { %v952_v20 = vmax.f32 %v1922_v12, 0.0  ;;  %v2157_v21 = vmax.f32 %v1925_v13, 0.0  ;;  %986 = vst [vmem:[#allocation2 + $0x60] sm:$0xff] (!%p1383_p7), %v950_v10  ;;  %998 = vst [vmem:[#allocation2 + $0xc0] sm:$0xff] (!%p1383_p7), %v2159_v11 }
 0x2c4   : > { %v953_v22 = vmax.f32 %v1930_v18, 0.0  ;;  %987 = vst [vmem:[#allocation2 + $0x68] sm:$0xff] (!%p1383_p7), %v951_v16  ;;  %999 = vst [vmem:[#allocation2 + $0xc8] sm:$0xff] (!%p1383_p7), %v2158_v17 }
 0x2c5   : > { %988 = vst [vmem:[#allocation2 + $0x70] sm:$0xff] (!%p1383_p7), %v952_v20  ;;  %1000 = vst [vmem:[#allocation2 + $0xd0] sm:$0xff] (!%p1383_p7), %v2157_v21 }
 0x2c6   : > { %v899_v24 = vpop.f32.mrb[32].mxu0  ;;  %v929_v25 = vpop.f32.mrb[20].mxu1  ;;  %989 = vst [vmem:[#allocation2 + $0x78] sm:$0xff] (!%p1383_p7), %v953_v22 }
 0x2c7   : > { %v1940_v29 = vadd.f32 %v899_v24, %v1855_v26  ;;  %v1943_v31 = vadd.f32 %v929_v25, %v1855_v26  ;;  %v901_v32 = vpop.f32.mrb[33].mxu0  ;;  %v931_v35 = vpop.f32.mrb[21].mxu1 }
 0x2c8   : > { %v1946_v40 = vadd.f32 %v901_v32, %v1857_v28  ;;  %v1949_v42 = vadd.f32 %v931_v35, %v1857_v28  ;;  %v903_v44 = vpop.f32.mrb[34].mxu0  ;;  %v933_v47 = vpop.f32.mrb[22].mxu1 }
 0x2c9   : > { %v954_v52 = vmax.f32 %v1940_v29, 0.0  ;;  %v1954_v56 = vadd.f32 %v903_v44, %v1855_v26  ;;  %v1957_v59 = vadd.f32 %v933_v47, %v1855_v26  ;;  %v905_v0 = vpop.f32.mrb[35].mxu0  ;;  %v935_v1 = vpop.f32.mrb[23].mxu1 }
 0x2ca   : > { %v955_v4 = vmax.f32 %v1946_v40, 0.0  ;;  %v1962_v8 = vadd.f32 %v905_v0, %v1857_v28  ;;  %v1965_v9 = vadd.f32 %v935_v1, %v1857_v28 }
 0x2cb   : > { %v956_v14 = vmax.f32 %v1954_v56, 0.0  ;;  %990 = vst [vmem:[#allocation2 + $0x80] sm:$0xff] (!%p1383_p7), %v954_v52 }
 0x2cc   : > { %v957_v24 = vmax.f32 %v1962_v8, 0.0  ;;  %991 = vst [vmem:[#allocation2 + $0x88] sm:$0xff] (!%p1383_p7), %v955_v4 }
 0x2cd   : > { %992 = vst [vmem:[#allocation2 + $0x90] sm:$0xff] (!%p1383_p7), %v956_v14 }
 0x2ce   : > { %v909_v32 = vpop.f32.mrb[36].mxu0  ;;  %973 = sbr.rel (%p1383_p7) target bundleno = 727 (0x2d7), region = 52  ;;  %993 = vst [vmem:[#allocation2 + $0x98] sm:$0xff] (!%p1383_p7), %v957_v24 }
 0x2cf   : > { %v1972_v35 = vadd.f32 %v909_v32, %v1855_v26  ;;  %v911_v44 = vpop.f32.mrb[37].mxu0 }
 0x2d0   : > { %v1975_v47 = vadd.f32 %v911_v44, %v1857_v28  ;;  %v913_v0 = vpop.f32.mrb[38].mxu0  ;;  %v2167_v44 = vmax.f32 (!%p1383_p7), %v1957_v59, 0.0 }
 0x2d1   : > { %v2163_v1 = vmax.f32 %v1972_v35, 0.0  ;;  %v1979_v5 = vadd.f32 %v913_v0, %v1855_v26  ;;  %v915_v54 = vpop.f32.mrb[39].mxu0  ;;  %v2164_v26 = vmax.f32 (!%p1383_p7), %v1933_v19, 0.0  ;;  %v2168_v0 = vmax.f32 (!%p1383_p7), %v1965_v9, 0.0 }
 0x2d2   : > { %v2162_v15 = vmax.f32 %v1975_v47, 0.0  ;;  %v1983_v23 = vadd.f32 %v915_v54, %v1857_v28  ;;  %v2165_v28 = vmax.f32 (!%p1383_p7), %v1943_v31, 0.0  ;;  %v2166_v54 = vmax.f32 (!%p1383_p7), %v1949_v42, 0.0  ;;  %1004 = vst [vmem:[#allocation2 + $0xf0] sm:$0xff] (!%p1383_p7), %v2167_v44 }
 0x2d3   : > { %v2161_v25 = vmax.f32 %v1979_v5, 0.0  ;;  %994 = vst [vmem:[#allocation2 + $0xa0] sm:$0xff] (!%p1383_p7), %v2163_v1  ;;  %1001 = vst [vmem:[#allocation2 + $0xd8] sm:$0xff] (!%p1383_p7), %v2164_v26 }
 0x2d4   : > { %v2160_v32 = vmax.f32 %v1983_v23, 0.0  ;;  %995 = vst [vmem:[#allocation2 + $0xa8] sm:$0xff] (!%p1383_p7), %v2162_v15  ;;  %1002 = vst [vmem:[#allocation2 + $0xe0] sm:$0xff] (!%p1383_p7), %v2165_v28 }
 0x2d5   : > { %996 = vst [vmem:[#allocation2 + $0xb0] sm:$0xff] %v2161_v25  ;;  %1003 = vst [vmem:[#allocation2 + $0xe8] sm:$0xff] %v2166_v54 }
 0x2d6   : > { %997 = vst [vmem:[#allocation2 + $0xb8] sm:$0xff] %v2160_v32  ;;  %1005 = vst [vmem:[#allocation2 + $0xf8] sm:$0xff] %v2168_v0 }
 0x2d7 PF: > { %p1384_p8 = scmp.le.s32.totalorder %s1616_s24, 0 }
 0x2d8   : > { %v1010_v21 = vld [vmem:[#allocation2] sm:$0xff] (!%p1384_p8)  ;;  %v1011_v17 = vld [vmem:[#allocation2 + $0x8] sm:$0xff] (!%p1384_p8)  ;;  %v1012_v11 = vld [vmem:[#allocation2 + $0x10] sm:$0xff] (!%p1384_p8)  ;;  %v2169_v12 = vmax.f32 (!%p1384_p8), %v1972_v35, 0.0  ;;  %v2171_v40 = vmax.f32 (!%p1384_p8), %v1979_v5, 0.0  ;;  %v2172_v56 = vmax.f32 (!%p1384_p8), %v1983_v23, 0.0 }
 0x2d9   : > { %1009 = sbr.rel (%p1384_p8) target bundleno = 747 (0x2eb), region = 56  ;;  %v1042_v26 = vmax.f32 (!%p1384_p8), %v1010_v21, %v938_v33  ;;  %v1043_v28 = vmax.f32 (!%p1384_p8), %v1011_v17, %v939_v36  ;;  %v1044_v54 = vmax.f32 (!%p1384_p8), %v1012_v11, %v940_v38  ;;  %v1013_v44 = vld [vmem:[#allocation2 + $0x18] sm:$0xff] (!%p1384_p8)  ;;  %v1014_v32 = vld [vmem:[#allocation2 + $0x20] sm:$0xff] (!%p1384_p8)  ;;  %v1015_v25 = vld [vmem:[#allocation2 + $0x28] sm:$0xff] (!%p1384_p8)  ;;  %v2174_v35 = vmax.f32 (!%p1384_p8), %v1917_v7, 0.0 }
 0x2da   : > { %v1045_v0 = vmax.f32 (!%p1384_p8), %v1013_v44, %v941_v39  ;;  %v1046_v15 = vmax.f32 (!%p1384_p8), %v1014_v32, %v942_v45  ;;  %v1047_v1 = vmax.f32 (!%p1384_p8), %v1015_v25, %v943_v48  ;;  %v1016_v30 = vld [vmem:[#allocation2 + $0x30] sm:$0xff] (!%p1384_p8)  ;;  %v1017_v33 = vld [vmem:[#allocation2 + $0x38] sm:$0xff] (!%p1384_p8)  ;;  %v1018_v21 = vld [vmem:[#allocation2 + $0x40] sm:$0xff] (!%p1384_p8)  ;;  %v2176_v23 = vmax.f32 (!%p1384_p8), %v1933_v19, 0.0 }
 0x2db   : > { %1074 = vst [vmem:[#allocation2] sm:$0xff] (!%p1384_p8), %v1042_v26  ;;  %1075 = vst [vmem:[#allocation2 + $0x8] sm:$0xff] (!%p1384_p8), %v1043_v28  ;;  %v1048_v27 = vmax.f32 (!%p1384_p8), %v1016_v30, %v944_v50  ;;  %v1049_v34 = vmax.f32 (!%p1384_p8), %v1017_v33, %v945_v51  ;;  %v1050_v36 = vmax.f32 (!%p1384_p8), %v1018_v21, %v946_v57  ;;  %v1019_v37 = vld [vmem:[#allocation2 + $0x48] sm:$0xff] (!%p1384_p8)  ;;  %v1020_v38 = vld [vmem:[#allocation2 + $0x50] sm:$0xff] (!%p1384_p8)  ;;  %v2177_v44 = vmax.f32 (!%p1384_p8), %v1943_v31, 0.0 }
 0x2dc   : > { %1076 = vst [vmem:[#allocation2 + $0x10] sm:$0xff] (!%p1384_p8), %v1044_v54  ;;  %v1021_v39 = vld [vmem:[#allocation2 + $0x58] sm:$0xff] (!%p1384_p8)  ;;  %1077 = vst [vmem:[#allocation2 + $0x18] sm:$0xff] (!%p1384_p8), %v1045_v0  ;;  %v1051_v41 = vmax.f32 (!%p1384_p8), %v1019_v37, %v947_v60  ;;  %v1052_v43 = vmax.f32 (!%p1384_p8), %v1020_v38, %v948_v62  ;;  %v1022_v46 = vld [vmem:[#allocation2 + $0x60] sm:$0xff] (!%p1384_p8) }
 0x2dd   : > { %1078 = vst [vmem:[#allocation2 + $0x20] sm:$0xff] (!%p1384_p8), %v1046_v15  ;;  %1079 = vst [vmem:[#allocation2 + $0x28] sm:$0xff] (!%p1384_p8), %v1047_v1  ;;  %v1053_v45 = vmax.f32 (!%p1384_p8), %v1021_v39, %v949_v63  ;;  %v1023_v48 = vld [vmem:[#allocation2 + $0x68] sm:$0xff] (!%p1384_p8)  ;;  %v1024_v49 = vld [vmem:[#allocation2 + $0x70] sm:$0xff] (!%p1384_p8)  ;;  %v1054_v50 = vmax.f32 (!%p1384_p8), %v1022_v46, %v950_v10 }
 0x2de   : > { %1080 = vst [vmem:[#allocation2 + $0x30] sm:$0xff] (!%p1384_p8), %v1048_v27  ;;  %1081 = vst [vmem:[#allocation2 + $0x38] sm:$0xff] (!%p1384_p8), %v1049_v34  ;;  %v1055_v51 = vmax.f32 (!%p1384_p8), %v1023_v48, %v951_v16  ;;  %v1056_v53 = vmax.f32 (!%p1384_p8), %v1024_v49, %v952_v20  ;;  %v1025_v55 = vld [vmem:[#allocation2 + $0x78] sm:$0xff] (!%p1384_p8)  ;;  %v1026_v57 = vld [vmem:[#allocation2 + $0x80] sm:$0xff] (!%p1384_p8)  ;;  %v2180_v27 = vmax.f32 (!%p1384_p8), %v1965_v9, 0.0 }
 0x2df   : > { %1082 = vst [vmem:[#allocation2 + $0x40] sm:$0xff] (!%p1384_p8), %v1050_v36  ;;  %v1027_v58 = vld [vmem:[#allocation2 + $0x88] sm:$0xff] (!%p1384_p8)  ;;  %1083 = vst [vmem:[#allocation2 + $0x48] sm:$0xff] (!%p1384_p8), %v1051_v41  ;;  %v1057_v60 = vmax.f32 (!%p1384_p8), %v1025_v55, %v953_v22  ;;  %v1058_v61 = vmax.f32 (!%p1384_p8), %v1026_v57, %v954_v52  ;;  %v1028_v63 = vld [vmem:[#allocation2 + $0x90] sm:$0xff] (!%p1384_p8)  ;;  %v2170_v22 = vmax.f32 (!%p1384_p8), %v1975_v47, 0.0  ;;  %v2175_v47 = vmax.f32 (!%p1384_p8), %v1925_v13, 0.0 }
 0x2e0   : > { %1084 = vst [vmem:[#allocation2 + $0x50] sm:$0xff] %v1052_v43  ;;  %1085 = vst [vmem:[#allocation2 + $0x58] sm:$0xff] %v1053_v45  ;;  %v1059_v62 = vmax.f32 %v1027_v58, %v955_v4  ;;  %v1029_v2 = vld [vmem:[#allocation2 + $0x98] sm:$0xff]  ;;  %v1030_v6 = vld [vmem:[#allocation2 + $0xa0] sm:$0xff]  ;;  %v1060_v10 = vmax.f32 %v1028_v63, %v956_v14  ;;  %v2179_v13 = vmax.f32 %v1957_v59, 0.0 }
 0x2e1   : > { %1086 = vst [vmem:[#allocation2 + $0x60] sm:$0xff] %v1054_v50  ;;  %1087 = vst [vmem:[#allocation2 + $0x68] sm:$0xff] %v1055_v51  ;;  %v1061_v11 = vmax.f32 %v1029_v2, %v957_v24  ;;  %v1062_v16 = vmax.f32 %v1030_v6, %v2169_v12  ;;  %v1031_v17 = vld [vmem:[#allocation2 + $0xa8] sm:$0xff]  ;;  %v1032_v18 = vld [vmem:[#allocation2 + $0xb0] sm:$0xff]  ;;  %v2173_v24 = vmax.f32 %v1911_v3, 0.0  ;;  %v2178_v3 = vmax.f32 %v1949_v42, 0.0 }
 0x2e2   : > { %1088 = vst [vmem:[#allocation2 + $0x70] sm:$0xff] %v1056_v53  ;;  %v1033_v20 = vld [vmem:[#allocation2 + $0xb8] sm:$0xff]  ;;  %1089 = vst [vmem:[#allocation2 + $0x78] sm:$0xff] %v1057_v60  ;;  %v1063_v29 = vmax.f32 %v1031_v17, %v2170_v22  ;;  %v1064_v52 = vmax.f32 %v1032_v18, %v2171_v40  ;;  %v1034_v8 = vld [vmem:[#allocation2 + $0xc0] sm:$0xff] }
 0x2e3   : > { %1090 = vst [vmem:[#allocation2 + $0x80] sm:$0xff] %v1058_v61  ;;  %1091 = vst [vmem:[#allocation2 + $0x88] sm:$0xff] %v1059_v62  ;;  %v1065_v4 = vmax.f32 %v1033_v20, %v2172_v56  ;;  %v1035_v14 = vld [vmem:[#allocation2 + $0xc8] sm:$0xff]  ;;  %v1036_v15 = vld [vmem:[#allocation2 + $0xd0] sm:$0xff]  ;;  %v1066_v25 = vmax.f32 %v1034_v8, %v2173_v24 }
 0x2e4   : > { %1092 = vst [vmem:[#allocation2 + $0x90] sm:$0xff] %v1060_v10  ;;  %1093 = vst [vmem:[#allocation2 + $0x98] sm:$0xff] %v1061_v11  ;;  %v1067_v1 = vmax.f32 %v1035_v14, %v2174_v35  ;;  %v1068_v32 = vmax.f32 %v1036_v15, %v2175_v47  ;;  %v1037_v5 = vld [vmem:[#allocation2 + $0xd8] sm:$0xff]  ;;  %v1038_v26 = vld [vmem:[#allocation2 + $0xe0] sm:$0xff] }
 0x2e5   : > { %1094 = vst [vmem:[#allocation2 + $0xa0] sm:$0xff] %v1062_v16  ;;  %v1039_v28 = vld [vmem:[#allocation2 + $0xe8] sm:$0xff]  ;;  %1095 = vst [vmem:[#allocation2 + $0xa8] sm:$0xff] %v1063_v29  ;;  %v1069_v54 = vmax.f32 %v1037_v5, %v2176_v23  ;;  %v1070_v0 = vmax.f32 %v1038_v26, %v2177_v44  ;;  %v1040_v7 = vld [vmem:[#allocation2 + $0xf0] sm:$0xff] }
 0x2e6   : > { %1096 = vst [vmem:[#allocation2 + $0xb0] sm:$0xff] %v1064_v52  ;;  %1097 = vst [vmem:[#allocation2 + $0xb8] sm:$0xff] %v1065_v4  ;;  %v1071_v30 = vmax.f32 %v1039_v28, %v2178_v3  ;;  %v1041_v33 = vld [vmem:[#allocation2 + $0xf8] sm:$0xff]  ;;  %v1072_v21 = vmax.f32 %v1040_v7, %v2179_v13 }
 0x2e7   : > { %1098 = vst [vmem:[#allocation2 + $0xc0] sm:$0xff] %v1066_v25  ;;  %1099 = vst [vmem:[#allocation2 + $0xc8] sm:$0xff] %v1067_v1  ;;  %v1073_v34 = vmax.f32 %v1041_v33, %v2180_v27 }
 0x2e8   : > { %1100 = vst [vmem:[#allocation2 + $0xd0] sm:$0xff] %v1068_v32  ;;  %1101 = vst [vmem:[#allocation2 + $0xd8] sm:$0xff] %v1069_v54 }
 0x2e9   : > { %1102 = vst [vmem:[#allocation2 + $0xe0] sm:$0xff] %v1070_v0  ;;  %1103 = vst [vmem:[#allocation2 + $0xe8] sm:$0xff] %v1071_v30 }
 0x2ea   : > { %1104 = vst [vmem:[#allocation2 + $0xf0] sm:$0xff] %v1072_v21  ;;  %1105 = vst [vmem:[#allocation2 + $0xf8] sm:$0xff] %v1073_v34 }
 0x2eb PF: > { %p1385_p9 = scmp.ne.s32.totalorder %s1616_s24, 7 }
 0x2ec   : > { %v1122_v55 = vld [vmem:[#allocation2 + $0x60] sm:$0xff] (!%p1385_p9)  ;;  %v1123_v57 = vld [vmem:[#allocation2 + $0x68] sm:$0xff] (!%p1385_p9)  ;;  %v1124_v58 = vld [vmem:[#allocation2 + $0x70] sm:$0xff] (!%p1385_p9) }
 0x2ed   : > { %1109 = sbr.rel (%p1385_p9) target bundleno = 763 (0x2fb), region = 60  ;;  %v1110_v19 = vld [vmem:[#allocation2] sm:$0xff] (!%p1385_p9)  ;;  %v1111_v31 = vld [vmem:[#allocation2 + $0x8] sm:$0xff] (!%p1385_p9)  ;;  %v1411_v60 = vpack.c.bf16 (!%p1385_p9), %v1123_v57, %v1122_v55  ;;  %v1125_v61 = vld [vmem:[#allocation2 + $0x78] sm:$0xff] (!%p1385_p9) }
 0x2ee   : > { %v1112_v42 = vld [vmem:[#allocation2 + $0x10] sm:$0xff] (!%p1385_p9)  ;;  %v1405_v59 = vpack.c.bf16 (!%p1385_p9), %v1111_v31, %v1110_v19  ;;  %v1113_v36 = vld [vmem:[#allocation2 + $0x18] sm:$0xff] (!%p1385_p9)  ;;  %v1126_v62 = vld [vmem:[#allocation2 + $0x80] sm:$0xff] (!%p1385_p9)  ;;  %v1412_v2 = vpack.c.bf16 (!%p1385_p9), %v1125_v61, %v1124_v58 }
 0x2ef   : > { %v1114_v37 = vld [vmem:[#allocation2 + $0x20] sm:$0xff] (!%p1385_p9)  ;;  %v1115_v9 = vld [vmem:[#allocation2 + $0x28] sm:$0xff] (!%p1385_p9)  ;;  %v1406_v38 = vpack.c.bf16 (!%p1385_p9), %v1113_v36, %v1112_v42  ;;  %v1128_v10 = vld [vmem:[#allocation2 + $0x90] sm:$0xff] (!%p1385_p9)  ;;  %1244 = vst [vmem:[%s1721_s22 + $0x30] sm:$0xff] (!%p1385_p9), %v1411_v60 }
 0x2f0   : > { %v1407_v39 = vpack.c.bf16 (!%p1385_p9), %v1115_v9, %v1114_v37  ;;  %v1116_v41 = vld [vmem:[#allocation2 + $0x30] sm:$0xff] (!%p1385_p9)  ;;  %v1117_v43 = vld [vmem:[#allocation2 + $0x38] sm:$0xff] (!%p1385_p9)  ;;  %1238 = vst [vmem:[%s1721_s22] sm:$0xff] (!%p1385_p9), %v1405_v59  ;;  %v1127_v63 = vld [vmem:[#allocation2 + $0x88] sm:$0xff] (!%p1385_p9) }
 0x2f1   : > { %v1118_v45 = vld [vmem:[#allocation2 + $0x40] sm:$0xff] (!%p1385_p9)  ;;  %v1408_v46 = vpack.c.bf16 (!%p1385_p9), %v1117_v43, %v1116_v41  ;;  %v1119_v48 = vld [vmem:[#allocation2 + $0x48] sm:$0xff] (!%p1385_p9)  ;;  %1239 = vst [vmem:[%s1721_s22 + $0x8] sm:$0xff] (!%p1385_p9), %v1406_v38  ;;  %v1413_v6 = vpack.c.bf16 (!%p1385_p9), %v1127_v63, %v1126_v62  ;;  %v1129_v11 = vld [vmem:[#allocation2 + $0x98] sm:$0xff] (!%p1385_p9) }
 0x2f2   : > { %v1120_v49 = vld [vmem:[#allocation2 + $0x50] sm:$0xff] (!%p1385_p9)  ;;  %v1121_v50 = vld [vmem:[#allocation2 + $0x58] sm:$0xff] (!%p1385_p9)  ;;  %1240 = vst [vmem:[%s1721_s22 + $0x10] sm:$0xff] (!%p1385_p9), %v1407_v39  ;;  %v1409_v51 = vpack.c.bf16 (!%p1385_p9), %v1119_v48, %v1118_v45  ;;  %v1130_v12 = vld [vmem:[#allocation2 + $0xa0] sm:$0xff] (!%p1385_p9)  ;;  %v1414_v16 = vpack.c.bf16 (!%p1385_p9), %v1129_v11, %v1128_v10 }
 0x2f3   : > { %v1410_v53 = vpack.c.bf16 (!%p1385_p9), %v1121_v50, %v1120_v49  ;;  %1241 = vst [vmem:[%s1721_s22 + $0x18] sm:$0xff] (!%p1385_p9), %v1408_v46  ;;  %v1131_v17 = vld [vmem:[#allocation2 + $0xa8] sm:$0xff] (!%p1385_p9)  ;;  %v1132_v18 = vld [vmem:[#allocation2 + $0xb0] sm:$0xff] (!%p1385_p9)  ;;  %v1133_v20 = vld [vmem:[#allocation2 + $0xb8] sm:$0xff] (!%p1385_p9) }
 0x2f4   : > { %1242 = vst [vmem:[%s1721_s22 + $0x20] sm:$0xff] %v1409_v51  ;;  %1245 = vst [vmem:[%s1721_s22 + $0x38] sm:$0xff] %v1412_v2  ;;  %v1415_v22 = vpack.c.bf16 %v1131_v17, %v1130_v12  ;;  %v1416_v29 = vpack.c.bf16 %v1133_v20, %v1132_v18  ;;  %v1134_v40 = vld [vmem:[#allocation2 + $0xc0] sm:$0xff]  ;;  %v1135_v52 = vld [vmem:[#allocation2 + $0xc8] sm:$0xff] }
 0x2f5   : > { %1243 = vst [vmem:[%s1721_s22 + $0x28] sm:$0xff] %v1410_v53  ;;  %1246 = vst [vmem:[%s1721_s22 + $0x40] sm:$0xff] %v1413_v6  ;;  %v1136_v56 = vld [vmem:[#allocation2 + $0xd0] sm:$0xff]  ;;  %v1417_v4 = vpack.c.bf16 %v1135_v52, %v1134_v40  ;;  %v1137_v8 = vld [vmem:[#allocation2 + $0xd8] sm:$0xff] }
 0x2f6   : > { %1247 = vst [vmem:[%s1721_s22 + $0x48] sm:$0xff] %v1414_v16  ;;  %v1138_v14 = vld [vmem:[#allocation2 + $0xe0] sm:$0xff]  ;;  %v1139_v15 = vld [vmem:[#allocation2 + $0xe8] sm:$0xff]  ;;  %1248 = vst [vmem:[%s1721_s22 + $0x50] sm:$0xff] %v1415_v22  ;;  %v1418_v24 = vpack.c.bf16 %v1137_v8, %v1136_v56 }
 0x2f7   : > { %1249 = vst [vmem:[%s1721_s22 + $0x58] sm:$0xff] %v1416_v29  ;;  %v1419_v25 = vpack.c.bf16 %v1139_v15, %v1138_v14  ;;  %v1140_v35 = vld [vmem:[#allocation2 + $0xf0] sm:$0xff]  ;;  %v1141_v1 = vld [vmem:[#allocation2 + $0xf8] sm:$0xff]  ;;  %1250 = vst [vmem:[%s1721_s22 + $0x60] sm:$0xff] %v1417_v4 }
 0x2f8   : > { %v1420_v47 = vpack.c.bf16 %v1141_v1, %v1140_v35  ;;  %1251 = vst [vmem:[%s1721_s22 + $0x68] sm:$0xff] %v1418_v24 }
 0x2f9   : > { %1252 = vst [vmem:[%s1721_s22 + $0x70] sm:$0xff] %v1419_v25 }
 0x2fa   : > { %1253 = vst [vmem:[%s1721_s22 + $0x78] sm:$0xff] %v1420_v47 }
 0x2fb PF: > { %s17_s28 = sadd.s32 1, %s1632_s28   ;;  %s2181_s24 = smov %s1624_s26 }
 0x2fc   : > { %p14_p10 = scmp.ge.s32.totalorder %s17_s28, 18   ;;  %s2182_s25 = smov %s1628_s27 }
 0x2fd   : > { %s2183_s26 = smov %s2186_s29  ;;  %s2184_s27 = smov %s2190_s30 }
 0x2fe   :  { %16 = sbr.rel (!%p14_p10) target bundleno = 3 (0x3), region = 90 }

// kernel: flownet3d_forward.25
= control target key start
LH: loop header
LB: loop body
LE: loop exit
PB: predicated region body
PF: predicated region fallthrough
CT: control target
= control target key end

     0   :  { %s2119_s18 = smov 0   ;;  %s2610_s0 = inlined_call_operand.vmem [shape: bf16[256,768], index: 0, kind: input, shape index: {}]   ;;  %s2611_s1 = inlined_call_operand.vmem [shape: bf16[768,256], index: 1, kind: input, shape index: {}]   ;;  %s2612_s2 = inlined_call_operand.vmem [shape: bf16[256,256], index: 2, kind: input, shape index: {}]   ;;  %s2613_s3 = inlined_call_operand.vmem [shape: f32[1,256], index: 3, kind: input, shape index: {}]   ;;  %s2614_s4 = inlined_call_operand.vmem [shape: f32[1,256], index: 4, kind: input, shape index: {}]   ;;  %s2615_s5 = inlined_call_operand.vmem [shape: bf16[256,256], index: 5, kind: output, shape index: {}]  }
   0x1 LB: > { %s1615_s19 = sadd.s32 4294967295, %s2087_s18   ;;  %p1619_p0 = scmp.ge.s32.totalorder %s2087_s18, 1  ;;  %s2087_s18 = sphi %s2119_s18, %s15_s18  }
   0x2   : > { %p189_p1 = scmp.lt.s32.totalorder %s2087_s18, 5 }
   0x4   : > { %p190_p2 = pnand %p1619_p0, %p189_p1 }
   0x5   : > { %v1853_v0 = vld [vmem:[%s2611_s1 + $0x104] ss:$8 sps:$4 sm:$0xff] (!%p190_p2)   ;;  %v1855_v1 = vld [vmem:[%s2611_s1 + $0x100] ss:$8 sps:$4 sm:$0xff] (!%p190_p2)   ;;  %v1856_v2 = vld [vmem:[%s2611_s1 + $0x114] ss:$8 sps:$4 sm:$0xff] (!%p190_p2)  }
   0x6   : > { %193 = sbr.rel (%p190_p2) target bundleno = 602 (0x25a), region = 40  ;;  %1038 = vmatprep.subr.bf16.mxu0 (!%p190_p2), %v1853_v0  ;;  %v1858_v3 = vld [vmem:[%s2611_s1 + $0x110] ss:$8 sps:$4 sm:$0xff] (!%p190_p2)   ;;  %v1859_v4 = vld [vmem:[%s2611_s1 + $0x124] ss:$8 sps:$4 sm:$0xff] (!%p190_p2)   ;;  %s1620_s7 = sshll.u32 (!%p190_p2), %s1615_s19, 3 }
   0x7   : > { %1039 = vmatpush1.bf16.msra.mxu0 (!%p190_p2), %v1855_v1  ;;  %v1861_v5 = vld [vmem:[%s2611_s1 + $0x120] ss:$8 sps:$4 sm:$0xff] (!%p190_p2)   ;;  %v1862_v6 = vld [vmem:[%s2611_s1 + $0x134] ss:$8 sps:$4 sm:$0xff] (!%p190_p2)   ;;  %p220_p3 = scmp.lt.s32.totalorder (!%p190_p2), %s1620_s7, 31 }
   0x8   : > { %1040 = vmatprep.subr.bf16.mxu0 (!%p190_p2), %v1856_v2  ;;  %v1864_v7 = vld [vmem:[%s2611_s1 + $0x130] ss:$8 sps:$4 sm:$0xff] (!%p190_p2)   ;;  %v1865_v8 = vld [vmem:[%s2611_s1 + $0x144] ss:$8 sps:$4 sm:$0xff] (!%p190_p2)   ;;  %v1867_v9 = vld [vmem:[%s2611_s1 + $0x140] ss:$8 sps:$4 sm:$0xff] (!%p190_p2)  }
   0x9   : > { %v1868_v10 = vld [vmem:[%s2611_s1 + $0x154] ss:$8 sps:$4 sm:$0xff] (!%p190_p2)   ;;  %v1870_v11 = vld [vmem:[%s2611_s1 + $0x150] ss:$8 sps:$4 sm:$0xff] (!%p190_p2)   ;;  %v1871_v12 = vld [vmem:[%s2611_s1 + $0x164] ss:$8 sps:$4 sm:$0xff] (!%p190_p2)  }
   0xa   : > { %v1898_v13 = vld [vmem:[%s2611_s1 + $0x4] ss:$8 sps:$4 sm:$0xff] (!%p190_p2)   ;;  %v1900_v14 = vld [vmem:[%s2611_s1] ss:$8 sps:$4 sm:$0xff] (!%p190_p2)   ;;  %v1904_v16 = vld [vmem:[%s2611_s1 + $0x14] ss:$8 sps:$4 sm:$0xff] (!%p190_p2)  }
   0xb   : > { %1041 = vmatpush1.bf16.msra.mxu0 (!%p190_p2), %v1858_v3  ;;  %v1873_v15 = vld [vmem:[%s2611_s1 + $0x160] ss:$8 sps:$4 sm:$0xff] (!%p190_p2)   ;;  %965 = vmatprep.subr.bf16.mxu1 (!%p190_p2), %v1898_v13  ;;  %v1906_v17 = vld [vmem:[%s2611_s1 + $0x10] ss:$8 sps:$4 sm:$0xff] (!%p190_p2)   ;;  %v1874_v18 = vld [vmem:[%s2611_s1 + $0x174] ss:$8 sps:$4 sm:$0xff] (!%p190_p2)  }
   0xc   : > { %1042 = vmatprep.subr.bf16.mxu0 (!%p190_p2), %v1859_v4  ;;  %966 = vmatpush1.bf16.msra.mxu1 (!%p190_p2), %v1900_v14  ;;  %v1876_v20 = vld [vmem:[%s2611_s1 + $0x170] ss:$8 sps:$4 sm:$0xff] (!%p190_p2)   ;;  %v1913_v21 = vld [vmem:[%s2611_s1 + $0x24] ss:$8 sps:$4 sm:$0xff] (!%p190_p2)   ;;  %v1915_v22 = vld [vmem:[%s2611_s1 + $0x20] ss:$8 sps:$4 sm:$0xff] (!%p190_p2)  }
   0xd   : > { %s2617_s7 = smov (!%p220_p3, %s1620_s7), 31  ;;  %967 = vmatprep.subr.bf16.mxu1 %v1904_v16  ;;  %v1877_v23 = vld [vmem:[%s2611_s1 + $0x184] ss:$8 sps:$4 sm:$0xff]   ;;  %v1879_v24 = vld [vmem:[%s2611_s1 + $0x180] ss:$8 sps:$4 sm:$0xff]  }
   0xe   : > { %s1844_s19 = smul.u32 24, %s2617_s7  ;;  %v1919_v25 = vld [vmem:[%s2611_s1 + $0x34] ss:$8 sps:$4 sm:$0xff]   ;;  %v1921_v27 = vld [vmem:[%s2611_s1 + $0x30] ss:$8 sps:$4 sm:$0xff]   ;;  %s1787_s16 = sshll.u32 %s2617_s7, 3 }
   0xf   : > { %1043 = vmatpush1.bf16.msra.mxu0 %v1861_v5  ;;  %v1880_v26 = vld [vmem:[%s2611_s1 + $0x194] ss:$8 sps:$4 sm:$0xff]   ;;  %v1925_v28 = vld [vmem:[%s2611_s1 + $0x44] ss:$8 sps:$4 sm:$0xff]   ;;  %v1882_v29 = vld [vmem:[%s2611_s1 + $0x190] ss:$8 sps:$4 sm:$0xff]   ;;  %s2597_s20 = scalar_lea.vmem %s2615_s5, %s1787_s16 }
  0x10   : > { %1044 = vmatprep.subr.bf16.mxu0 %v1862_v6  ;;  %s2181_s8 = scalar_lea.vmem %s2610_s0, %s1844_s19  ;;  %968 = vmatpush1.bf16.msra.mxu1 %v1906_v17  ;;  %v1883_v30 = vld [vmem:[%s2611_s1 + $0x1a4] ss:$8 sps:$4 sm:$0xff]   ;;  %v1927_v31 = vld [vmem:[%s2611_s1 + $0x40] ss:$8 sps:$4 sm:$0xff]   ;;  %v1931_v32 = vld [vmem:[%s2611_s1 + $0x54] ss:$8 sps:$4 sm:$0xff]  }
  0x11   : > { %v1909_v19 = vld [vmem:[%s2181_s8 + $0xc] ss:$24 sps:$4 sm:$0xff]   ;;  %969 = vmatprep.subr.bf16.mxu1 %v1913_v21  ;;  %v1885_v33 = vld [vmem:[%s2611_s1 + $0x1a0] ss:$8 sps:$4 sm:$0xff]   ;;  %v1886_v34 = vld [vmem:[%s2611_s1 + $0x1b4] ss:$8 sps:$4 sm:$0xff]  }
  0x12   : > { %1070 = vmatprep.mubr.bf16.mxu0 %v1909_v19  ;;  %v1933_v35 = vld [vmem:[%s2611_s1 + $0x50] ss:$8 sps:$4 sm:$0xff]   ;;  %v1937_v36 = vld [vmem:[%s2611_s1 + $0x64] ss:$8 sps:$4 sm:$0xff]   ;;  %v1939_v39 = vld [vmem:[%s2611_s1 + $0x60] ss:$8 sps:$4 sm:$0xff]  }
  0x13   : > { %1045 = vmatpush1.bf16.msra.mxu0 %v1864_v7  ;;  %v1888_v37 = vld [vmem:[%s2611_s1 + $0x1b0] ss:$8 sps:$4 sm:$0xff]   ;;  %v1889_v38 = vld [vmem:[%s2611_s1 + $0x1c4] ss:$8 sps:$4 sm:$0xff]   ;;  %v1943_v40 = vld [vmem:[%s2611_s1 + $0x74] ss:$8 sps:$4 sm:$0xff]  }
  0x14   : > { %1046 = vmatprep.subr.bf16.mxu0 %v1865_v8  ;;  %970 = vmatpush1.bf16.msra.mxu1 %v1915_v22  ;;  %v1891_v41 = vld [vmem:[%s2611_s1 + $0x1c0] ss:$8 sps:$4 sm:$0xff]   ;;  %v1892_v42 = vld [vmem:[%s2611_s1 + $0x1d4] ss:$8 sps:$4 sm:$0xff]   ;;  %v1945_v43 = vld [vmem:[%s2611_s1 + $0x70] ss:$8 sps:$4 sm:$0xff]  }
  0x15   : > { %971 = vmatprep.subr.bf16.mxu1 %v1919_v25  ;;  %v1949_v44 = vld [vmem:[%s2611_s1 + $0x84] ss:$8 sps:$4 sm:$0xff]   ;;  %v1894_v45 = vld [vmem:[%s2611_s1 + $0x1d0] ss:$8 sps:$4 sm:$0xff]   ;;  %v1951_v46 = vld [vmem:[%s2611_s1 + $0x80] ss:$8 sps:$4 sm:$0xff]  }
  0x16   : > { %v1895_v47 = vld [vmem:[%s2611_s1 + $0x1e4] ss:$8 sps:$4 sm:$0xff]   ;;  %v1955_v48 = vld [vmem:[%s2611_s1 + $0x94] ss:$8 sps:$4 sm:$0xff]   ;;  %v1897_v49 = vld [vmem:[%s2611_s1 + $0x1e0] ss:$8 sps:$4 sm:$0xff]  }
  0x17   : > { %1047 = vmatpush1.bf16.msra.mxu0 %v1867_v9  ;;  %v1901_v50 = vld [vmem:[%s2611_s1 + $0x1f4] ss:$8 sps:$4 sm:$0xff]   ;;  %v1957_v51 = vld [vmem:[%s2611_s1 + $0x90] ss:$8 sps:$4 sm:$0xff]   ;;  %v1961_v52 = vld [vmem:[%s2611_s1 + $0xa4] ss:$8 sps:$4 sm:$0xff]  }
  0x18   : > { %1048 = vmatprep.subr.bf16.mxu0 %v1868_v10  ;;  %972 = vmatpush1.bf16.msra.mxu1 %v1921_v27  ;;  %v1903_v53 = vld [vmem:[%s2611_s1 + $0x1f0] ss:$8 sps:$4 sm:$0xff]   ;;  %v1912_v54 = vld [vmem:[%s2611_s1 + $0x204] ss:$8 sps:$4 sm:$0xff]   ;;  %v1963_v55 = vld [vmem:[%s2611_s1 + $0xa0] ss:$8 sps:$4 sm:$0xff]  }
  0x19   : > { %973 = vmatprep.subr.bf16.mxu1 %v1925_v28  ;;  %v1967_v56 = vld [vmem:[%s2611_s1 + $0xb4] ss:$8 sps:$4 sm:$0xff]   ;;  %v1907_v57 = vld [vmem:[%s2181_s8 + $0x8] ss:$24 sps:$4 sm:$0xff]   ;;  %v1971_v61 = vld [vmem:[%s2611_s1 + $0xb0] ss:$8 sps:$4 sm:$0xff]  }
  0x1a   : > { %v1910_v58 = vld [vmem:[%s2611_s1 + $0x200] ss:$8 sps:$4 sm:$0xff]   ;;  %v1918_v59 = vld [vmem:[%s2611_s1 + $0x214] ss:$8 sps:$4 sm:$0xff]   ;;  %v1976_v62 = vld [vmem:[%s2611_s1 + $0xc4] ss:$8 sps:$4 sm:$0xff]  }
  0x1b   : > { %1049 = vmatpush1.bf16.msra.mxu0 %v1870_v11  ;;  %v1969_v60 = vld [vmem:[%s2181_s8 + $0x3c] ss:$24 sps:$4 sm:$0xff]   ;;  %v1916_v63 = vld [vmem:[%s2611_s1 + $0x210] ss:$8 sps:$4 sm:$0xff]   ;;  %v1924_v0 = vld [vmem:[%s2611_s1 + $0x224] ss:$8 sps:$4 sm:$0xff]  }
  0x1c   : > { %1050 = vmatprep.subr.bf16.mxu0 %v1871_v12  ;;  %974 = vmatpush1.bf16.msra.mxu1 %v1927_v31  ;;  %v1978_v1 = vld [vmem:[%s2611_s1 + $0xc0] ss:$8 sps:$4 sm:$0xff]   ;;  %v1982_v2 = vld [vmem:[%s2611_s1 + $0xd4] ss:$8 sps:$4 sm:$0xff]   ;;  %v1972_v5 = vld [vmem:[%s2181_s8 + $0x38] ss:$24 sps:$4 sm:$0xff]  }
  0x1d   : > { %975 = vmatprep.subr.bf16.mxu1 %v1931_v32  ;;  %v2008_v3 = vld [vmem:[%s2181_s8 + $0x4] ss:$24 sps:$4 sm:$0xff]   ;;  %v1922_v4 = vld [vmem:[%s2611_s1 + $0x220] ss:$8 sps:$4 sm:$0xff]   ;;  %v1986_v8 = vld [vmem:[%s2611_s1 + $0xd0] ss:$8 sps:$4 sm:$0xff]  }
  0x1e   : > { %v1930_v6 = vld [vmem:[%s2611_s1 + $0x234] ss:$8 sps:$4 sm:$0xff]   ;;  %v1984_v7 = vld [vmem:[%s2181_s8 + $0x6c] ss:$24 sps:$4 sm:$0xff]   ;;  %997 = vmatprep.mubr.bf16.mxu1 %v2008_v3  ;;  %v1928_v10 = vld [vmem:[%s2611_s1 + $0x230] ss:$8 sps:$4 sm:$0xff]  }
  0x1f   : > { %1051 = vmatpush1.bf16.msra.mxu0 %v1873_v15  ;;  %v1991_v9 = vld [vmem:[%s2611_s1 + $0xe4] ss:$8 sps:$4 sm:$0xff]   ;;  %v1993_v12 = vld [vmem:[%s2611_s1 + $0xe0] ss:$8 sps:$4 sm:$0xff]   ;;  %v1997_v13 = vld [vmem:[%s2611_s1 + $0xf4] ss:$8 sps:$4 sm:$0xff]  }
  0x20   : > { %1052 = vmatprep.subr.bf16.mxu0 %v1874_v18  ;;  %976 = vmatpush1.bf16.msra.mxu1 %v1933_v35  ;;  %v1936_v11 = vld [vmem:[%s2611_s1 + $0x244] ss:$8 sps:$4 sm:$0xff]   ;;  %v1934_v14 = vld [vmem:[%s2611_s1 + $0x240] ss:$8 sps:$4 sm:$0xff]   ;;  %v1942_v16 = vld [vmem:[%s2611_s1 + $0x254] ss:$8 sps:$4 sm:$0xff]  }
  0x21   : > { %977 = vmatprep.subr.bf16.mxu1 %v1937_v36  ;;  %v1987_v15 = vld [vmem:[%s2181_s8 + $0x68] ss:$24 sps:$4 sm:$0xff]   ;;  %v1999_v17 = vld [vmem:[%s2181_s8 + $0x9c] ss:$24 sps:$4 sm:$0xff]   ;;  %v2001_v18 = vld [vmem:[%s2611_s1 + $0xf0] ss:$8 sps:$4 sm:$0xff]  }
  0x22   : > { %v2035_v19 = vld [vmem:[%s2612_s2 + $0x4] ss:$8 sps:$4 sm:$0xff]   ;;  %v2006_v22 = vld [vmem:[%s2181_s8] ss:$24 sps:$4 sm:$0xff]  }
  0x23   : > { %1053 = vmatpush1.bf16.msra.mxu0 %v1876_v20  ;;  %v1940_v20 = vld [vmem:[%s2611_s1 + $0x250] ss:$8 sps:$4 sm:$0xff]   ;;  %v1948_v21 = vld [vmem:[%s2611_s1 + $0x264] ss:$8 sps:$4 sm:$0xff]   ;;  %v1946_v27 = vld [vmem:[%s2611_s1 + $0x260] ss:$8 sps:$4 sm:$0xff]  }
  0x24   : > { %1054 = vmatprep.subr.bf16.mxu0 %v1877_v23  ;;  %978 = vmatpush1.bf16.msra.mxu1 %v1939_v39  ;;  %v2015_v23 = vld [vmem:[%s2181_s8 + $0x34] ss:$24 sps:$4 sm:$0xff]   ;;  %v2002_v25 = vld [vmem:[%s2181_s8 + $0x98] ss:$24 sps:$4 sm:$0xff]   ;;  %v2021_v35 = vld [vmem:[%s2181_s8 + $0x64] ss:$24 sps:$4 sm:$0xff]  }
  0x25   : > { %979 = vmatprep.subr.bf16.mxu1 %v1943_v40  ;;  %v2014_v28 = vld [vmem:[%s2181_s8 + $0x14] ss:$24 sps:$4 sm:$0xff]   ;;  %v1952_v31 = vld [vmem:[%s2611_s1 + $0x270] ss:$8 sps:$4 sm:$0xff]   ;;  %v2039_v36 = vld [vmem:[%s2612_s2 + $0x20] ss:$8 sps:$4 sm:$0xff]  }
  0x26   : > { %v2041_v32 = vld [vmem:[%s2612_s2 + $0x24] ss:$8 sps:$4 sm:$0xff]   ;;  %v1966_v39 = vld [vmem:[%s2611_s1 + $0x294] ss:$8 sps:$4 sm:$0xff]   ;;  %v2042_v40 = vld [vmem:[%s2612_s2 + $0x30] ss:$8 sps:$4 sm:$0xff]  }
  0x27   : > { %1055 = vmatpush1.bf16.msra.mxu0 %v1879_v24  ;;  %v2033_v24 = vld [vmem:[%s2612_s2] ss:$8 sps:$4 sm:$0xff]   ;;  %v2060_v3 = vld [vmem:[%s2612_s2 + $0x90] ss:$8 sps:$4 sm:$0xff]  }
  0x28   : > { %1056 = vmatprep.subr.bf16.mxu0 %v1880_v26  ;;  %980 = vmatpush1.bf16.msra.mxu1 %v1945_v43  ;;  %v2038_v26 = vld [vmem:[%s2612_s2 + $0x14] ss:$8 sps:$4 sm:$0xff]   ;;  %v2023_v43 = vld [vmem:[%s2181_s8 + $0x60] ss:$24 sps:$4 sm:$0xff]  }
  0x29   : > { %981 = vmatprep.subr.bf16.mxu1 %v1949_v44  ;;  %v1975_v44 = vld [vmem:[%s2611_s1 + $0x2a4] ss:$8 sps:$4 sm:$0xff]  }
  0x2b   : > { %1057 = vmatpush1.bf16.msra.mxu0 %v1882_v29  ;;  %v1954_v29 = vld [vmem:[%s2611_s1 + $0x274] ss:$8 sps:$4 sm:$0xff]  }
  0x2c   : > { %1058 = vmatprep.subr.bf16.mxu0 %v1883_v30  ;;  %982 = vmatpush1.bf16.msra.mxu1 %v1951_v46  ;;  %v2036_v30 = vld [vmem:[%s2612_s2 + $0x10] ss:$8 sps:$4 sm:$0xff]   ;;  %v2045_v46 = vld [vmem:[%s2612_s2 + $0x40] ss:$8 sps:$4 sm:$0xff]  }
  0x2d   : > { %983 = vmatprep.subr.bf16.mxu1 %v1955_v48  ;;  %v1973_v48 = vld [vmem:[%s2611_s1 + $0x2a0] ss:$8 sps:$4 sm:$0xff]  }
  0x2f   : > { %1059 = vmatpush1.bf16.msra.mxu0 %v1885_v33  ;;  %v1960_v33 = vld [vmem:[%s2611_s1 + $0x284] ss:$8 sps:$4 sm:$0xff]  }
  0x30   : > { %1060 = vmatprep.subr.bf16.mxu0 %v1886_v34  ;;  %984 = vmatpush1.bf16.msra.mxu1 %v1957_v51  ;;  %v2017_v34 = vld [vmem:[%s2181_s8 + $0x30] ss:$24 sps:$4 sm:$0xff]   ;;  %v2053_v51 = vld [vmem:[%s2612_s2 + $0x64] ss:$8 sps:$4 sm:$0xff]  }
  0x31   : > { %985 = vmatprep.subr.bf16.mxu1 %v1961_v52  ;;  %v1979_v52 = vld [vmem:[%s2611_s1 + $0x2b0] ss:$8 sps:$4 sm:$0xff]  }
  0x33   : > { %1061 = vmatpush1.bf16.msra.mxu0 %v1888_v37  ;;  %v1958_v37 = vld [vmem:[%s2611_s1 + $0x280] ss:$8 sps:$4 sm:$0xff]  }
  0x34   : > { %1062 = vmatprep.subr.bf16.mxu0 %v1889_v38  ;;  %986 = vmatpush1.bf16.msra.mxu1 %v1963_v55  ;;  %v2044_v38 = vld [vmem:[%s2612_s2 + $0x34] ss:$8 sps:$4 sm:$0xff]   ;;  %v2051_v55 = vld [vmem:[%s2612_s2 + $0x60] ss:$8 sps:$4 sm:$0xff]  }
  0x35   : > { %987 = vmatprep.subr.bf16.mxu1 %v1967_v56  ;;  %v2056_v56 = vld [vmem:[%s2612_s2 + $0x74] ss:$8 sps:$4 sm:$0xff]  }
  0x37   : > { %1063 = vmatpush1.bf16.msra.mxu0 %v1891_v41  ;;  %v2047_v41 = vld [vmem:[%s2612_s2 + $0x44] ss:$8 sps:$4 sm:$0xff]  }
  0x38   : > { %1064 = vmatprep.subr.bf16.mxu0 %v1892_v42  ;;  %988 = vmatpush1.bf16.msra.mxu1 %v1971_v61  ;;  %v1964_v42 = vld [vmem:[%s2611_s1 + $0x290] ss:$8 sps:$4 sm:$0xff]  }
  0x39   : > { %989 = vmatprep.subr.bf16.mxu1 %v1976_v62  ;;  %v1994_v61 = vld [vmem:[%s2611_s1 + $0x2d0] ss:$8 sps:$4 sm:$0xff]   ;;  %v2005_v62 = vld [vmem:[%s2611_s1 + $0x2e4] ss:$8 sps:$4 sm:$0xff]  }
  0x3b   : > { %1065 = vmatpush1.bf16.msra.mxu0 %v1894_v45  ;;  %v2027_v45 = vld [vmem:[%s2181_s8 + $0x94] ss:$24 sps:$4 sm:$0xff]  }
  0x3c   : > { %1066 = vmatprep.subr.bf16.mxu0 %v1895_v47  ;;  %990 = vmatpush1.bf16.msra.mxu1 %v1978_v1  ;;  %v2050_v47 = vld [vmem:[%s2612_s2 + $0x54] ss:$8 sps:$4 sm:$0xff]   ;;  %v2003_v1 = vld [vmem:[%s2611_s1 + $0x2e0] ss:$8 sps:$4 sm:$0xff]  }
  0x3d   : > { %991 = vmatprep.subr.bf16.mxu1 %v1982_v2  ;;  %v2011_v2 = vld [vmem:[%s2611_s1 + $0x2f4] ss:$8 sps:$4 sm:$0xff]  }
  0x3f   : > { %1067 = vmatpush1.bf16.msra.mxu0 %v1897_v49  ;;  %v1981_v49 = vld [vmem:[%s2611_s1 + $0x2b4] ss:$8 sps:$4 sm:$0xff]  }
  0x40   : > { %1068 = vmatprep.subr.bf16.mxu0 %v1901_v50  ;;  %992 = vmatpush1.bf16.msra.mxu1 %v1986_v8  ;;  %v2048_v50 = vld [vmem:[%s2612_s2 + $0x50] ss:$8 sps:$4 sm:$0xff]   ;;  %v2068_v8 = vld [vmem:[%s2612_s2 + $0xb4] ss:$8 sps:$4 sm:$0xff]  }
  0x41   : > { %993 = vmatprep.subr.bf16.mxu1 %v1991_v9  ;;  %v2018_v9 = vld [vmem:[%s2181_s8 + $0x44] ss:$24 sps:$4 sm:$0xff]  }
  0x43   : > { %1069 = vmatpush1.bf16.msra.mxu0 %v1903_v53  ;;  %v2029_v53 = vld [vmem:[%s2181_s8 + $0x90] ss:$24 sps:$4 sm:$0xff]  }
  0x44   : > { %1111 = vmatprep.subr.bf16.mxu0 %v1912_v54  ;;  %994 = vmatpush1.bf16.msra.mxu1 %v1993_v12  ;;  %v1990_v54 = vld [vmem:[%s2611_s1 + $0x2c4] ss:$8 sps:$4 sm:$0xff]  }
  0x45   : > { %995 = vmatprep.subr.bf16.mxu1 %v1997_v13  ;;  %v2024_v12 = vld [vmem:[%s2181_s8 + $0x74] ss:$24 sps:$4 sm:$0xff]   ;;  %v2026_v13 = vld [vmem:[%s2181_s8 + $0x70] ss:$24 sps:$4 sm:$0xff]  }
  0x46   : > { %1071 = vmatmul.mubr.bf16.vlgmr.msra.gmra.mrb[0].mxu0 %v1907_v57  ;;  %v1988_v57 = vld [vmem:[%s2611_s1 + $0x2c0] ss:$8 sps:$4 sm:$0xff]  }
  0x47   : > { %1112 = vmatpush1.bf16.msra.mxu0 %v1910_v58  ;;  %1080 = vmatprep.mubr.bf16.mxu0 %v1969_v60  ;;  %v1996_v58 = vld [vmem:[%s2611_s1 + $0x2d4] ss:$8 sps:$4 sm:$0xff]   ;;  %v2059_v60 = vld [vmem:[%s2612_s2 + $0x84] ss:$8 sps:$4 sm:$0xff]  }
  0x48   : > { %1113 = vmatprep.subr.bf16.mxu0 %v1918_v59  ;;  %996 = vmatpush1.bf16.msra.mxu1 %v2001_v18  ;;  %v2054_v59 = vld [vmem:[%s2612_s2 + $0x70] ss:$8 sps:$4 sm:$0xff]  }
  0x49   : > { %1412 = vmatprep.subr.bf16.mxu1 %v2035_v19  ;;  %v2072_v18 = vld [vmem:[%s2612_s2 + $0xd0] ss:$8 sps:$4 sm:$0xff]   ;;  %v2074_v19 = vld [vmem:[%s2612_s2 + $0xd4] ss:$8 sps:$4 sm:$0xff]  }
  0x4b   : > { %1114 = vmatpush1.bf16.msra.mxu0 %v1916_v63  ;;  %998 = vmatmul.mubr.bf16.vlgmr.msra.gmra.mrb[0].mxu1 %v2006_v22  ;;  %v2057_v63 = vld [vmem:[%s2612_s2 + $0x80] ss:$8 sps:$4 sm:$0xff]   ;;  %v2080_v22 = vld [vmem:[%s2612_s2 + $0xf4] ss:$8 sps:$4 sm:$0xff]  }
  0x4c   : > { %1115 = vmatprep.subr.bf16.mxu0 %v1924_v0  ;;  %1007 = vmatprep.mubr.bf16.mxu1 %v2015_v23  ;;  %v2062_v0 = vld [vmem:[%s2612_s2 + $0x94] ss:$8 sps:$4 sm:$0xff]   ;;  %v2078_v23 = vld [vmem:[%s2612_s2 + $0xf0] ss:$8 sps:$4 sm:$0xff]  }
  0x4d   : > { %1413 = vmatpush1.bf16.msra.mxu1 %v2033_v24 }
  0x4e   : > { %1081 = vmatmul.mubr.bf16.gmra.mrb[4].mxu0 %v1972_v5  ;;  %1414 = vmatprep.subr.bf16.mxu1 %v2038_v26  ;;  %v2009_v5 = vld [vmem:[%s2611_s1 + $0x2f0] ss:$8 sps:$4 sm:$0xff]  }
  0x4f   : > { %1116 = vmatpush1.bf16.msra.mxu0 %v1922_v4  ;;  %1090 = vmatprep.mubr.bf16.mxu0 %v1984_v7  ;;  %v2065_v4 = vld [vmem:[%s2612_s2 + $0xa4] ss:$8 sps:$4 sm:$0xff]   ;;  %v2012_v7 = vld [vmem:[%s2181_s8 + $0x10] ss:$24 sps:$4 sm:$0xff]  }
  0x50   : > { %1117 = vmatprep.subr.bf16.mxu0 %v1930_v6  ;;  %v2063_v6 = vld [vmem:[%s2612_s2 + $0xa0] ss:$8 sps:$4 sm:$0xff]  }
  0x51   : > { %1415 = vmatpush1.bf16.msra.mxu1 %v2036_v30 }
  0x52   : > { %1416 = vmatprep.subr.bf16.mxu1 %v2041_v32 }
  0x53   : > { %1118 = vmatpush1.bf16.msra.mxu0 %v1928_v10  ;;  %1008 = vmatmul.mubr.bf16.gmra.mrb[4].mxu1 %v2017_v34  ;;  %v2066_v10 = vld [vmem:[%s2612_s2 + $0xb0] ss:$8 sps:$4 sm:$0xff]  }
  0x54   : > { %1119 = vmatprep.subr.bf16.mxu0 %v1936_v11  ;;  %1017 = vmatprep.mubr.bf16.mxu1 %v2021_v35  ;;  %v2020_v11 = vld [vmem:[%s2181_s8 + $0x40] ss:$24 sps:$4 sm:$0xff]  }
  0x55   : > { %1417 = vmatpush1.bf16.msra.mxu1 %v2039_v36  ;;  %v355_v36 = vlaneseq }
  0x56   : > { %1091 = vmatmul.mubr.bf16.gmra.mrb[8].mxu0 %v1987_v15  ;;  %1418 = vmatprep.subr.bf16.mxu1 %v2044_v38  ;;  %v2032_v15 = vld [vmem:[%s2181_s8 + $0xa0] ss:$24 sps:$4 sm:$0xff]  }
  0x57   : > { %1120 = vmatpush1.bf16.msra.mxu0 %v1934_v14  ;;  %1100 = vmatprep.mubr.bf16.mxu0 %v1999_v17  ;;  %v2030_v14 = vld [vmem:[%s2181_s8 + $0xa4] ss:$24 sps:$4 sm:$0xff]  }
  0x58   : > { %1121 = vmatprep.subr.bf16.mxu0 %v1942_v16  ;;  %v2069_v16 = vld [vmem:[%s2612_s2 + $0xc0] ss:$8 sps:$4 sm:$0xff]   ;;  %v2071_v17 = vld [vmem:[%s2612_s2 + $0xc4] ss:$8 sps:$4 sm:$0xff]  }
  0x59   : > { %1419 = vmatpush1.bf16.msra.mxu1 %v2042_v40 }
  0x5a   : > { %1420 = vmatprep.subr.bf16.mxu1 %v2047_v41  ;;  %v2551_v41 = vshrl.u32 %v355_v36, 7 }
  0x5b   : > { %1122 = vmatpush1.bf16.msra.mxu0 %v1940_v20  ;;  %1018 = vmatmul.mubr.bf16.gmra.mrb[8].mxu1 %v2023_v43  ;;  %v2077_v20 = vld [vmem:[%s2612_s2 + $0xe4] ss:$8 sps:$4 sm:$0xff]   ;;  %v353_v43 = vld [vmem:[%s2613_s3] sm:$0x3] }
  0x5c   : > { %1123 = vmatprep.subr.bf16.mxu0 %v1948_v21  ;;  %1027 = vmatprep.mubr.bf16.mxu1 %v2027_v45  ;;  %v2075_v21 = vld [vmem:[%s2612_s2 + $0xe0] ss:$8 sps:$4 sm:$0xff]  }
  0x5d   : > { %1421 = vmatpush1.bf16.msra.mxu1 %v2045_v46 }
  0x5e   : > { %1101 = vmatmul.mubr.bf16.gmra.mrb[12].mxu0 %v2002_v25  ;;  %1422 = vmatprep.subr.bf16.mxu1 %v2050_v47 }
  0x5f   : > { %1124 = vmatpush1.bf16.msra.mxu0 %v1946_v27  ;;  %1143 = vmatprep.mubr.bf16.mxu0 %v2014_v28 }
  0x60   : > { %1125 = vmatprep.subr.bf16.mxu0 %v1954_v29 }
  0x61   : > { %1423 = vmatpush1.bf16.msra.mxu1 %v2048_v50 }
  0x62   : > { %1424 = vmatprep.subr.bf16.mxu1 %v2053_v51 }
  0x63   : > { %1126 = vmatpush1.bf16.msra.mxu0 %v1952_v31  ;;  %1028 = vmatmul.mubr.bf16.gmra.mrb[12].mxu1 %v2029_v53 }
  0x64   : > { %1127 = vmatprep.subr.bf16.mxu0 %v1960_v33 }
  0x65   : > { %1425 = vmatpush1.bf16.msra.mxu1 %v2051_v55 }
  0x66   : > { %1426 = vmatprep.subr.bf16.mxu1 %v2056_v56 }
  0x67   : > { %1128 = vmatpush1.bf16.msra.mxu0 %v1958_v37 }
  0x68   : > { %1129 = vmatprep.subr.bf16.mxu0 %v1966_v39 }
  0x69   : > { %1427 = vmatpush1.bf16.msra.mxu1 %v2054_v59 }
  0x6a   : > { %1428 = vmatprep.subr.bf16.mxu1 %v2059_v60 }
  0x6b   : > { %1130 = vmatpush1.bf16.msra.mxu0 %v1964_v42  ;;  %v357_v42 = vsub.s32 0, %v2551_v41 }
  0x6c   : > { %1131 = vmatprep.subr.bf16.mxu0 %v1975_v44  ;;  %v361_v44 = vsub.s32 1, %v2551_v41 }
  0x6d   : > { %1429 = vmatpush1.bf16.msra.mxu1 %v2057_v63  ;;  %v2560_v45 = vrot.slane %v353_v43, %v357_v42 }
  0x6e   : > { %1430 = vmatprep.subr.bf16.mxu1 %v2062_v0  ;;  %v2564_v46 = vrot.slane %v353_v43, %v361_v44 }
  0x6f   : > { %1132 = vmatpush1.bf16.msra.mxu0 %v1973_v48 }
  0x70   : > { %1133 = vmatprep.subr.bf16.mxu0 %v1981_v49 }
  0x71   : > { %1431 = vmatpush1.bf16.msra.mxu1 %v2060_v3 }
  0x72   : > { %1432 = vmatprep.subr.bf16.mxu1 %v2065_v4 }
  0x73   : > { %1134 = vmatpush1.bf16.msra.mxu0 %v1979_v52 }
  0x74   : > { %1135 = vmatprep.subr.bf16.mxu0 %v1990_v54 }
  0x75   : > { %1433 = vmatpush1.bf16.msra.mxu1 %v2063_v6 }
  0x76   : > { %1434 = vmatprep.subr.bf16.mxu1 %v2068_v8 }
  0x77   : > { %1136 = vmatpush1.bf16.msra.mxu0 %v1988_v57 }
  0x78   : > { %1137 = vmatprep.subr.bf16.mxu0 %v1996_v58 }
  0x79   : > { %1435 = vmatpush1.bf16.msra.mxu1 %v2066_v10 }
  0x7a   : > { %1436 = vmatprep.subr.bf16.mxu1 %v2071_v17 }
  0x7b   : > { %1138 = vmatpush1.bf16.msra.mxu0 %v1994_v61 }
  0x7c   : > { %1139 = vmatprep.subr.bf16.mxu0 %v2005_v62 }
  0x7d   : > { %1437 = vmatpush1.bf16.msra.mxu1 %v2069_v16 }
  0x7e   : > { %1438 = vmatprep.subr.bf16.mxu1 %v2074_v19 }
  0x7f   : > { %1140 = vmatpush1.bf16.msra.mxu0 %v2003_v1 }
  0x80   : > { %1141 = vmatprep.subr.bf16.mxu0 %v2011_v2 }
  0x81   : > { %1439 = vmatpush1.bf16.msra.mxu1 %v2072_v18 }
  0x82   : > { %1440 = vmatprep.subr.bf16.mxu1 %v2077_v20 }
  0x83   : > { %1142 = vmatpush1.bf16.msra.mxu0 %v2009_v5 }
  0x85   : > { %1441 = vmatpush1.bf16.msra.mxu1 %v2075_v21 }
  0x86   : > { %1144 = vmatmul.mubr.bf16.vlgmr.msra.gmra.mrb[0].mxu0 %v2012_v7  ;;  %1442 = vmatprep.subr.bf16.mxu1 %v2080_v22 }
  0x87   : > { %1153 = vmatprep.mubr.bf16.mxu0 %v2018_v9 }
  0x89   : > { %1443 = vmatpush1.bf16.msra.mxu1 %v2078_v23 }
  0x8e   : > { %1154 = vmatmul.mubr.bf16.gmra.mrb[4].mxu0 %v2020_v11 }
  0x8f   : > { %1163 = vmatprep.mubr.bf16.mxu0 %v2024_v12 }
  0x96   : > { %1164 = vmatmul.mubr.bf16.gmra.mrb[8].mxu0 %v2026_v13 }
  0x97   : > { %1173 = vmatprep.mubr.bf16.mxu0 %v2030_v14 }
  0x9e   : > { %1174 = vmatmul.mubr.bf16.gmra.mrb[12].mxu0 %v2032_v15 }
 0x11e   : > { %v999_v24 = vpop.f32.mrb[0].mxu1 }
 0x11f   : > { %v1001_v25 = vpop.f32.mrb[1].mxu1  ;;  %v1000_v47 = vadd.f32 %v999_v24, %v2560_v45 }
 0x120   : > { %v1003_v26 = vpop.f32.mrb[2].mxu1  ;;  %v1002_v48 = vadd.f32 %v1001_v25, %v2564_v46 }
 0x121   : > { %v1005_v27 = vpop.f32.mrb[3].mxu1  ;;  %v1004_v50 = vadd.f32 %v1003_v26, %v2560_v45 }
 0x122   : > { %v1006_v53 = vadd.f32 %v1005_v27, %v2564_v46 }
 0x126   : > { %v1009_v28 = vpop.f32.mrb[4].mxu1 }
 0x127   : > { %v1011_v29 = vpop.f32.mrb[5].mxu1  ;;  %v1010_v61 = vadd.f32 %v1009_v28, %v2560_v45 }
 0x128   : > { %v1013_v30 = vpop.f32.mrb[6].mxu1  ;;  %v1012_v0 = vadd.f32 %v1011_v29, %v2564_v46 }
 0x129   : > { %v1015_v31 = vpop.f32.mrb[7].mxu1  ;;  %v1014_v4 = vadd.f32 %v1013_v30, %v2560_v45 }
 0x12a   : > { %v1016_v7 = vadd.f32 %v1015_v31, %v2564_v46 }
 0x12e   : > { %v1019_v32 = vpop.f32.mrb[8].mxu1 }
 0x12f   : > { %v1021_v33 = vpop.f32.mrb[9].mxu1  ;;  %v1020_v15 = vadd.f32 %v1019_v32, %v2560_v45 }
 0x130   : > { %v1023_v34 = vpop.f32.mrb[10].mxu1  ;;  %v1022_v18 = vadd.f32 %v1021_v33, %v2564_v46 }
 0x131   : > { %v1025_v35 = vpop.f32.mrb[11].mxu1  ;;  %v1024_v22 = vadd.f32 %v1023_v34, %v2560_v45 }
 0x132   : > { %v1026_v25 = vadd.f32 %v1025_v35, %v2564_v46 }
 0x136   : > { %v2543_v37 = vpop.f32.mrb[12].mxu1 }
 0x137   : > { %v2545_v38 = vpop.f32.mrb[13].mxu1  ;;  %v1030_v33 = vadd.f32 %v2543_v37, %v2560_v45 }
 0x138   : > { %v2547_v39 = vpop.f32.mrb[14].mxu1  ;;  %v1032_v34 = vadd.f32 %v2545_v38, %v2564_v46 }
 0x139   : > { %v2549_v40 = vpop.f32.mrb[15].mxu1 }
 0x159   : > { %v1145_v49 = vpop.f32.mrb[0].mxu0 }
 0x15a   : > { %v1797_v51 = vadd.f32 %v1145_v49, %v1000_v47  ;;  %v1147_v52 = vpop.f32.mrb[1].mxu0  ;;  %v1034_v49 = vadd.f32 %v2547_v39, %v2560_v45  ;;  %v1240_v39 = vld [vmem:[%s2614_s4] sm:$0x3] }
 0x15b   : > { %v1799_v54 = vadd.f32 %v1147_v52, %v1002_v48  ;;  %v1149_v55 = vpop.f32.mrb[2].mxu0  ;;  %v1036_v52 = vadd.f32 %v2549_v40, %v2564_v46  ;;  %v1245_v40 = vrot.slane %v1240_v39, %v357_v42  ;;  %v1249_v45 = vrot.slane %v1240_v39, %v361_v44 }
 0x15c   : > { %v1801_v56 = vadd.f32 %v1149_v55, %v1004_v50  ;;  %v1151_v57 = vpop.f32.mrb[3].mxu0  ;;  %v1184_v59 = vmax.f32 %v1797_v51, 0.0 }
 0x15d   : > { %v1803_v58 = vadd.f32 %v1151_v57, %v1006_v53  ;;  %v1185_v62 = vmax.f32 %v1799_v54, 0.0 }
 0x15e   : > { %v1186_v60 = vmax.f32 %v1801_v56, 0.0 }
 0x15f   : > { %v1187_v63 = vmax.f32 %v1803_v58, 0.0 }
 0x160   : > { %v1200_v1 = vpack.c.bf16 %v1186_v60, %v1184_v59 }
 0x161   : > { %v1201_v2 = vpack.c.bf16 %v1187_v63, %v1185_v62  ;;  %v1155_v3 = vpop.f32.mrb[4].mxu0 }
 0x162   : > { %v1805_v5 = vadd.f32 %v1155_v3, %v1010_v61  ;;  %v1157_v6 = vpop.f32.mrb[5].mxu0 }
 0x163   : > { %v1807_v8 = vadd.f32 %v1157_v6, %v1012_v0  ;;  %v1159_v9 = vpop.f32.mrb[6].mxu0  ;;  %1444 = vmatprep.mubr.bf16.mxu1 %v1201_v2 }
 0x164   : > { %v1809_v10 = vadd.f32 %v1159_v9, %v1014_v4  ;;  %v1161_v11 = vpop.f32.mrb[7].mxu0  ;;  %1445 = vmatmul.mubr.bf16.vlgmr.msra.gmra.mrb[16].mxu1 %v1200_v1  ;;  %v1188_v13 = vmax.f32 %v1805_v5, 0.0 }
 0x165   : > { %v1811_v12 = vadd.f32 %v1161_v11, %v1016_v7  ;;  %v1189_v16 = vmax.f32 %v1807_v8, 0.0 }
 0x166   : > { %v1190_v14 = vmax.f32 %v1809_v10, 0.0 }
 0x167   : > { %v1191_v17 = vmax.f32 %v1811_v12, 0.0 }
 0x168   : > { %v1202_v19 = vpack.c.bf16 %v1190_v14, %v1188_v13 }
 0x169   : > { %v1203_v20 = vpack.c.bf16 %v1191_v17, %v1189_v16  ;;  %v1165_v21 = vpop.f32.mrb[8].mxu0 }
 0x16a   : > { %v1813_v23 = vadd.f32 %v1165_v21, %v1020_v15  ;;  %v1167_v24 = vpop.f32.mrb[9].mxu0 }
 0x16b   : > { %v1815_v26 = vadd.f32 %v1167_v24, %v1022_v18  ;;  %v1169_v27 = vpop.f32.mrb[10].mxu0  ;;  %1454 = vmatprep.mubr.bf16.mxu1 %v1203_v20 }
 0x16c   : > { %v1817_v28 = vadd.f32 %v1169_v27, %v1024_v22  ;;  %v1171_v29 = vpop.f32.mrb[11].mxu0  ;;  %1455 = vmatmul.mubr.bf16.gmra.mrb[20].mxu1 %v1202_v19  ;;  %v1192_v31 = vmax.f32 %v1813_v23, 0.0 }
 0x16d   : > { %v1819_v30 = vadd.f32 %v1171_v29, %v1026_v25  ;;  %v1193_v36 = vmax.f32 %v1815_v26, 0.0 }
 0x16e   : > { %v1194_v32 = vmax.f32 %v1817_v28, 0.0 }
 0x16f   : > { %v1195_v43 = vmax.f32 %v1819_v30, 0.0 }
 0x170   : > { %v1204_v47 = vpack.c.bf16 %v1194_v32, %v1192_v31 }
 0x171   : > { %v1205_v48 = vpack.c.bf16 %v1195_v43, %v1193_v36  ;;  %v1175_v35 = vpop.f32.mrb[12].mxu0 }
 0x172   : > { %v1821_v50 = vadd.f32 %v1175_v35, %v1030_v33  ;;  %v1177_v51 = vpop.f32.mrb[13].mxu0 }
 0x173   : > { %v1823_v53 = vadd.f32 %v1177_v51, %v1032_v34  ;;  %v1179_v54 = vpop.f32.mrb[14].mxu0  ;;  %1464 = vmatprep.mubr.bf16.mxu1 %v1205_v48 }
 0x174   : > { %v1825_v37 = vadd.f32 %v1179_v54, %v1034_v49  ;;  %v1181_v55 = vpop.f32.mrb[15].mxu0  ;;  %1465 = vmatmul.mubr.bf16.gmra.mrb[24].mxu1 %v1204_v47  ;;  %v1196_v38 = vmax.f32 %v1821_v50, 0.0 }
 0x175   : > { %v1827_v56 = vadd.f32 %v1181_v55, %v1036_v52  ;;  %v1197_v58 = vmax.f32 %v1823_v53, 0.0 }
 0x176   : > { %v1198_v57 = vmax.f32 %v1825_v37, 0.0 }
 0x177   : > { %v1199_v59 = vmax.f32 %v1827_v56, 0.0 }
 0x178   : > { %v1206_v60 = vpack.c.bf16 %v1198_v57, %v1196_v38 }
 0x179   : > { %v1207_v61 = vpack.c.bf16 %v1199_v59, %v1197_v58 }
 0x17b   : > { %1474 = vmatprep.mubr.bf16.mxu1 %v1207_v61 }
 0x17c   : > { %1475 = vmatmul.mubr.bf16.gmra.mrb[28].mxu1 %v1206_v60 }
 0x237   : > { %v1446_v46 = vpop.f32.mrb[16].mxu1 }
 0x238   : > { %v1447_v62 = vadd.f32 %v1446_v46, %v1245_v40  ;;  %v1448_v63 = vpop.f32.mrb[17].mxu1 }
 0x239   : > { %v1449_v0 = vadd.f32 %v1448_v63, %v1249_v45  ;;  %v1450_v1 = vpop.f32.mrb[18].mxu1 }
 0x23a   : > { %v1485_v2 = vmax.f32 %v1447_v62, 0.0  ;;  %v1451_v3 = vadd.f32 %v1450_v1, %v1245_v40  ;;  %v1452_v4 = vpop.f32.mrb[19].mxu1 }
 0x23b   : > { %v1486_v5 = vmax.f32 %v1449_v0, 0.0  ;;  %v1453_v6 = vadd.f32 %v1452_v4, %v1249_v45 }
 0x23c   : > { %v1487_v41 = vmax.f32 %v1451_v3, 0.0 }
 0x23d   : > { %v1788_v42 = vpack.c.bf16 %v1486_v5, %v1485_v2  ;;  %v1488_v44 = vmax.f32 %v1453_v6, 0.0 }
 0x23f   : > { %1549 = vst [vmem:[%s2597_s20] sm:$0xff] %v1788_v42  ;;  %v1789_v7 = vpack.c.bf16 %v1488_v44, %v1487_v41  ;;  %v1456_v8 = vpop.f32.mrb[20].mxu1 }
 0x240   : > { %v1457_v9 = vadd.f32 %v1456_v8, %v1245_v40  ;;  %v1458_v10 = vpop.f32.mrb[21].mxu1 }
 0x241   : > { %1550 = vst [vmem:[%s2597_s20 + $0x8] sm:$0xff] %v1789_v7  ;;  %v1459_v11 = vadd.f32 %v1458_v10, %v1249_v45  ;;  %v1460_v12 = vpop.f32.mrb[22].mxu1 }
 0x242   : > { %v1489_v13 = vmax.f32 %v1457_v9, 0.0  ;;  %v1461_v14 = vadd.f32 %v1460_v12, %v1245_v40  ;;  %v1462_v15 = vpop.f32.mrb[23].mxu1 }
 0x243   : > { %v1490_v16 = vmax.f32 %v1459_v11, 0.0  ;;  %v1463_v17 = vadd.f32 %v1462_v15, %v1249_v45 }
 0x244   : > { %v1491_v18 = vmax.f32 %v1461_v14, 0.0 }
 0x245   : > { %v1790_v19 = vpack.c.bf16 %v1490_v16, %v1489_v13  ;;  %v1492_v20 = vmax.f32 %v1463_v17, 0.0 }
 0x247   : > { %1551 = vst [vmem:[%s2597_s20 + $0x10] sm:$0xff] %v1790_v19  ;;  %v1791_v21 = vpack.c.bf16 %v1492_v20, %v1491_v18  ;;  %v1466_v22 = vpop.f32.mrb[24].mxu1 }
 0x248   : > { %v1467_v23 = vadd.f32 %v1466_v22, %v1245_v40  ;;  %v1468_v24 = vpop.f32.mrb[25].mxu1 }
 0x249   : > { %1552 = vst [vmem:[%s2597_s20 + $0x18] sm:$0xff] %v1791_v21  ;;  %v1469_v25 = vadd.f32 %v1468_v24, %v1249_v45  ;;  %v1470_v26 = vpop.f32.mrb[26].mxu1 }
 0x24a   : > { %v1493_v27 = vmax.f32 %v1467_v23, 0.0  ;;  %v1471_v28 = vadd.f32 %v1470_v26, %v1245_v40  ;;  %v1472_v29 = vpop.f32.mrb[27].mxu1 }
 0x24b   : > { %v1494_v30 = vmax.f32 %v1469_v25, 0.0  ;;  %v1473_v31 = vadd.f32 %v1472_v29, %v1249_v45 }
 0x24c   : > { %v1495_v32 = vmax.f32 %v1471_v28, 0.0 }
 0x24d   : > { %v1792_v33 = vpack.c.bf16 %v1494_v30, %v1493_v27  ;;  %v1496_v36 = vmax.f32 %v1473_v31, 0.0 }
 0x24f   : > { %1553 = vst [vmem:[%s2597_s20 + $0x20] sm:$0xff] %v1792_v33  ;;  %v1793_v43 = vpack.c.bf16 %v1496_v36, %v1495_v32  ;;  %v1476_v34 = vpop.f32.mrb[28].mxu1 }
 0x250   : > { %v1477_v47 = vadd.f32 %v1476_v34, %v1245_v40  ;;  %v1478_v48 = vpop.f32.mrb[29].mxu1 }
 0x251   : > { %1554 = vst [vmem:[%s2597_s20 + $0x28] sm:$0xff] %v1793_v43  ;;  %v1479_v35 = vadd.f32 %v1478_v48, %v1249_v45  ;;  %v1480_v49 = vpop.f32.mrb[30].mxu1 }
 0x252   : > { %v1497_v50 = vmax.f32 %v1477_v47, 0.0  ;;  %v1481_v51 = vadd.f32 %v1480_v49, %v1245_v40  ;;  %v1482_v52 = vpop.f32.mrb[31].mxu1 }
 0x253   : > { %v1498_v53 = vmax.f32 %v1479_v35, 0.0  ;;  %v1483_v54 = vadd.f32 %v1482_v52, %v1249_v45 }
 0x254   : > { %v1499_v37 = vmax.f32 %v1481_v51, 0.0 }
 0x255   : > { %v1794_v55 = vpack.c.bf16 %v1498_v53, %v1497_v50  ;;  %v1500_v56 = vmax.f32 %v1483_v54, 0.0 }
 0x257   : > { %1555 = vst [vmem:[%s2597_s20 + $0x30] sm:$0xff] %v1794_v55  ;;  %v1795_v38 = vpack.c.bf16 %v1500_v56, %v1499_v37 }
 0x259   : > { %1556 = vst [vmem:[%s2597_s20 + $0x38] sm:$0xff] %v1795_v38 }
 0x25a PF: > { %s15_s18 = sadd.s32 1, %s2087_s18  }
 0x25b   : > { %p12_p4 = scmp.ge.s32.totalorder %s15_s18, 6  }
 0x25d   :  { %14 = sbr.rel (!%p12_p4) target bundleno = 1 (0x1), region = 70 }

// kernel: flownet3d_forward.19
= control target key start
LH: loop header
LB: loop body
LE: loop exit
PB: predicated region body
PF: predicated region fallthrough
CT: control target
= control target key end

     0   :  { %s1506_s24 = smov 0   ;;  %s1508_s25 = smov 0   ;;  %s1712_s0 = inlined_call_operand.vmem [shape: bf16[16,256,8], index: 0, kind: input, shape index: {}]   ;;  %s1713_s1 = inlined_call_operand.vmem [shape: bf16[8,64], index: 1, kind: input, shape index: {}]   ;;  %s1714_s2 = inlined_call_operand.vmem [shape: bf16[64,64], index: 2, kind: input, shape index: {}]   ;;  %s1715_s3 = inlined_call_operand.vmem [shape: bf16[64,128], index: 3, kind: input, shape index: {}]   ;;  %s1716_s4 = inlined_call_operand.vmem [shape: f32[1,64], index: 4, kind: input, shape index: {}]   ;;  %s1717_s5 = inlined_call_operand.vmem [shape: f32[1,64], index: 5, kind: input, shape index: {}]   ;;  %s1718_s6 = inlined_call_operand.vmem [shape: f32[1,128], index: 6, kind: input, shape index: {}]   ;;  %s1719_s7 = inlined_call_operand.vmem [shape: bf16[256,128], index: 7, kind: output, shape index: {}]  }
   0x1   :  { %s1510_s26 = smov 0   ;;  %s1512_s27 = smov 0  }
   0x2   :  { %s1514_s28 = smov 0  }
   0x3 LB: > { %s26_s29 = sadd.s32 1, %s1456_s26  ;;  %s29_s30 = sadd.s32 1, %s1460_s27  ;;  %s1464_s28 = sphi %s1514_s28, %s17_s28   ;;  %s1460_s27 = sphi %s1512_s27, %s1723_s27   ;;  %s1456_s26 = sphi %s1510_s26, %s1722_s26   ;;  %s1452_s25 = sphi %s1508_s25, %s1721_s25   ;;  %s1448_s24 = sphi %s1506_s24, %s1720_s24  }
   0x4   : > { %p27_p0 = scmp.ge.s32.totalorder %s26_s29, 16  ;;  %p1134_p1 = scmp.ge.s32.totalorder %s1464_s28, 1 }
   0x5   : > { %p256_p2 = scmp.lt.s32.totalorder %s1464_s28, 33 }
   0x6   : > { %s1725_s29 = smov (%p27_p0, %s26_s29), 0  ;;  %s1727_s30 = smov (!%p27_p0, %s29_s30), %s1460_s27 }
   0x7   : > { %p257_p3 = pnand %p1134_p1, %p256_p2  ;;  %p31_p4 = scmp.ge.s32.totalorder %s1727_s30, 2 }
   0x8   : > { %v325_v0 = vld [vmem:[%s1713_s1] sm:$0xf] (!%p257_p3)  ;;  %vm398_vm0 = vcmask (!%p257_p3), 1043456   ;;  %s1135_s10 = sshll.u32 (!%p257_p3), %s1452_s25, 4  ;;  %p293_p5 = scmp.lt.s32.totalorder (!%p257_p3), %s1448_s24, 15  ;;  %vm373_vm1 = vcmask (!%p257_p3), 64512  }
   0x9   : > { %s1729_s30 = smov (%p31_p4, %s1727_s30), 0  ;;  %260 = sbr.rel (%p257_p3) target bundleno = 736 (0x2e0), region = 48 }
   0xa   : > { %1368 = vmatprep.subr.msk.bf16.mxu0 (!%p257_p3), %vm398_vm0, %v325_v0  ;;  %v400_v1 = vsel (!%p257_p3), %vm398_vm0, %v325_v0, 0  ;;  %p295_p6 = scmp.lt.s32.totalorder (!%p257_p3), %s1135_s10, 31  ;;  %1369 = vmatprep.subr.msk.bf16.mxu1 (!%p257_p3), %vm398_vm0, %v325_v0  ;;  %v1418_v2 = vld [vmem:[%s1714_s2] sm:$0xff] (!%p257_p3)   ;;  %v1419_v6 = vld [vmem:[%s1714_s2 + $0x8] sm:$0xff] (!%p257_p3)   ;;  %v1420_v12 = vld [vmem:[%s1714_s2 + $0x10] sm:$0xff] (!%p257_p3)   ;;  %vm562_vm2 = vcmask (!%p257_p3), 523264  }
   0xb   : > { %1301 = vmatpush3.bf16.msra.mxu0 (!%p257_p3), %v400_v1  ;;  %1367 = vmatpush3.bf16.msra.mxu1 (!%p257_p3), %v400_v1  ;;  %v1421_v13 = vld [vmem:[%s1714_s2 + $0x18] sm:$0xff] (!%p257_p3)   ;;  %v1422_v14 = vld [vmem:[%s1715_s3] sm:$0xff] (!%p257_p3)   ;;  %v1423_v15 = vld [vmem:[%s1715_s3 + $0x8] sm:$0xff] (!%p257_p3)   ;;  %p1183_p7 = scmp.ne.s32.totalorder (!%p257_p3), %s1448_s24, 0 }
   0xc   : > { %1318 = vmatprep.subr.bf16.mxu1 (!%p257_p3), %v1418_v2  ;;  %1342 = vmatprep.subr.bf16.mxu0 (!%p257_p3), %v1422_v14  ;;  %v1140_v16 = vld [vmem:[%s1716_s4] ss:$0 sm:$0xff] (!%p257_p3) }
  0x10   : > { %s294_s11 = scalar_select %p293_p5, %s1448_s24, 15 }
  0x11   : > { %s1731_s10 = smov (!%p295_p6, %s1135_s10), 31 }
  0x12   : > { %s1136_s14 = sshll.u32 %s294_s11, 5  ;;  %s1139_s16 = sshll.u32 %s1731_s10, 2 }
  0x13   : > { %s298_s15 = sadd.s32 %s1136_s14, %s1731_s10  ;;  %s1549_s20 = scalar_lea.vmem %s1719_s7, %s1139_s16 }
  0x14   : > { %s1137_s17 = sshll.u32 %s298_s15, 2 }
  0x15   : > { %s300_s23 = scalar_lea.vmem %s1712_s0, %s1137_s17 }
  0x16   : > { %v1410_v3 = vld [vmem:[%s300_s23] sm:$0xff]   ;;  %v1411_v4 = vld [vmem:[%s300_s23 + $0x8] sm:$0xff]   ;;  %v1412_v5 = vld [vmem:[%s300_s23 + $0x10] sm:$0xff]  }
  0x17   : > { %1302 = vmatprep.mubr.msk.bf16.mxu0 %vm373_vm1, %v1410_v3  ;;  %v1414_v7 = vld [vmem:[%s300_s23 + $0x20] sm:$0xff]   ;;  %v1415_v8 = vld [vmem:[%s300_s23 + $0x28] sm:$0xff]   ;;  %v1416_v9 = vld [vmem:[%s300_s23 + $0x30] sm:$0xff]  }
  0x18   : > { %1303 = vmatmul.mubr.msk.bf16.vlgmr.msra.gmra.mrb[0].mxu0 %vm373_vm1, %v1411_v4  ;;  %1310 = vmatprep.mubr.msk.bf16.mxu1 %vm373_vm1, %v1414_v7  ;;  %v1413_v10 = vld [vmem:[%s300_s23 + $0x18] sm:$0xff]  }
  0x19   : > { %1306 = vmatprep.mubr.msk.bf16.mxu0 %vm373_vm1, %v1412_v5  ;;  %1311 = vmatmul.mubr.msk.bf16.vlgmr.msra.gmra.mrb[0].mxu1 %vm373_vm1, %v1415_v8  ;;  %v1417_v11 = vld [vmem:[%s300_s23 + $0x38] sm:$0xff]  }
  0x1a   : > { %1314 = vmatprep.mubr.msk.bf16.mxu1 %vm373_vm1, %v1416_v9  ;;  %1319 = vmatpush3.bf16.msra.mxu1 %v1418_v2  ;;  %v1424_v9 = vld [vmem:[%s1715_s3 + $0x10] sm:$0xff]  }
  0x1b   : > { %1320 = vmatprep.subr.bf16.mxu1 %v1419_v6  ;;  %1343 = vmatpush3.bf16.msra.mxu0 %v1422_v14 }
  0x1c   : > { %1344 = vmatprep.subr.bf16.mxu0 %v1423_v15 }
  0x1e   : > { %1321 = vmatpush3.bf16.msra.mxu1 %v1419_v6 }
  0x1f   : > { %1322 = vmatprep.subr.bf16.mxu1 %v1420_v12  ;;  %1345 = vmatpush3.bf16.msra.mxu0 %v1423_v15 }
  0x20   : > { %1307 = vmatmul.mubr.msk.bf16.gmra.mrb[4].mxu0 %vm373_vm1, %v1413_v10  ;;  %1346 = vmatprep.subr.bf16.mxu0 %v1424_v9  ;;  %v1425_v10 = vld [vmem:[%s1715_s3 + $0x18] sm:$0xff]  }
  0x21   : > { %1315 = vmatmul.mubr.msk.bf16.gmra.mrb[4].mxu1 %vm373_vm1, %v1417_v11  ;;  %v1157_v11 = vld [vmem:[%s1717_s5] ss:$0 sm:$0xff] }
  0x22   : > { %1323 = vmatpush3.bf16.msra.mxu1 %v1420_v12 }
  0x23   : > { %1324 = vmatprep.subr.bf16.mxu1 %v1421_v13  ;;  %1347 = vmatpush3.bf16.msra.mxu0 %v1424_v9 }
  0x24   : > { %1348 = vmatprep.subr.bf16.mxu0 %v1425_v10 }
  0x26   : > { %1325 = vmatpush3.bf16.msra.mxu1 %v1421_v13 }
  0x27   : > { %1349 = vmatpush3.bf16.msra.mxu0 %v1425_v10 }
  0xeb   : > { %v1304_v17 = vpop.f32.mrb[0].mxu0 }
  0xec   : > { %v445_v18 = vadd.f32 %v1304_v17, %v1140_v16  ;;  %v436_v19 = vpop.f32.mrb[1].mxu0  ;;  %v1312_v25 = vpop.f32.mrb[0].mxu1 }
  0xed   : > { %v437_v20 = vadd.f32 %v1140_v16, %v436_v19  ;;  %v1305_v21 = vpop.f32.mrb[2].mxu0  ;;  %v477_v28 = vadd.f32 %v1312_v25, %v1140_v16  ;;  %v468_v29 = vpop.f32.mrb[1].mxu1 }
  0xee   : > { %v448_v22 = vadd.f32 %v1305_v21, %v1140_v16  ;;  %v439_v23 = vpop.f32.mrb[3].mxu0  ;;  %v501_v26 = vmax.f32 %v445_v18, 0.0  ;;  %v469_v32 = vadd.f32 %v1140_v16, %v468_v29  ;;  %v1313_v33 = vpop.f32.mrb[2].mxu1 }
  0xef   : > { %v440_v24 = vadd.f32 %v1140_v16, %v439_v23  ;;  %v499_v30 = vmax.f32 %v437_v20, 0.0  ;;  %v509_v35 = vmax.f32 %v477_v28, 0.0  ;;  %v480_v36 = vadd.f32 %v1313_v33, %v1140_v16  ;;  %v471_v37 = vpop.f32.mrb[3].mxu1 }
  0xf0   : > { %v502_v27 = vmax.f32 %v448_v22, 0.0  ;;  %v507_v40 = vmax.f32 %v469_v32, 0.0  ;;  %v472_v41 = vadd.f32 %v1140_v16, %v471_v37 }
  0xf1   : > { %v500_v31 = vmax.f32 %v440_v24, 0.0  ;;  %v510_v44 = vmax.f32 %v480_v36, 0.0 }
  0xf2   : > { %v516_v34 = vpack.c.bf16 %v502_v27, %v501_v26  ;;  %v508_v47 = vmax.f32 %v472_v41, 0.0 }
  0xf3   : > { %v515_v38 = vpack.c.bf16 %v500_v31, %v499_v30  ;;  %v1308_v39 = vpop.f32.mrb[4].mxu0  ;;  %v520_v50 = vpack.c.bf16 %v510_v44, %v509_v35 }
  0xf4   : > { %v461_v42 = vadd.f32 %v1308_v39, %v1140_v16  ;;  %v452_v43 = vpop.f32.mrb[5].mxu0  ;;  %v519_v52 = vpack.c.bf16 %v508_v47, %v507_v40  ;;  %v1316_v53 = vpop.f32.mrb[4].mxu1 }
  0xf5   : > { %v453_v45 = vadd.f32 %v1140_v16, %v452_v43  ;;  %v1309_v46 = vpop.f32.mrb[6].mxu0  ;;  %1326 = vmatprep.mubr.msk.bf16.mxu1 %vm562_vm2, %v515_v38  ;;  %v493_v56 = vadd.f32 %v1316_v53, %v1140_v16  ;;  %v484_v57 = vpop.f32.mrb[5].mxu1 }
  0xf6   : > { %v464_v48 = vadd.f32 %v1309_v46, %v1140_v16  ;;  %v455_v49 = vpop.f32.mrb[7].mxu0  ;;  %1327 = vmatmul.mubr.msk.bf16.vlgmr.msra.gmra.mrb[8].mxu1 %vm562_vm2, %v516_v34  ;;  %v505_v54 = vmax.f32 %v461_v42, 0.0  ;;  %v485_v60 = vadd.f32 %v1140_v16, %v484_v57  ;;  %v1317_v61 = vpop.f32.mrb[6].mxu1 }
  0xf7   : > { %v456_v51 = vadd.f32 %v1140_v16, %v455_v49  ;;  %v503_v58 = vmax.f32 %v453_v45, 0.0  ;;  %v513_v63 = vmax.f32 %v493_v56, 0.0  ;;  %v496_v0 = vadd.f32 %v1317_v61, %v1140_v16  ;;  %v487_v1 = vpop.f32.mrb[7].mxu1 }
  0xf8   : > { %v506_v55 = vmax.f32 %v464_v48, 0.0  ;;  %v511_v3 = vmax.f32 %v485_v60, 0.0  ;;  %v488_v4 = vadd.f32 %v1140_v16, %v487_v1 }
  0xf9   : > { %v504_v59 = vmax.f32 %v456_v51, 0.0  ;;  %v514_v5 = vmax.f32 %v496_v0, 0.0 }
  0xfa   : > { %v518_v62 = vpack.c.bf16 %v506_v55, %v505_v54  ;;  %v512_v6 = vmax.f32 %v488_v4, 0.0  ;;  %v1170_v4 = vld [vmem:[%s1718_s6] ss:$0 sm:$0xff] }
  0xfb   : > { %v517_v2 = vpack.c.bf16 %v504_v59, %v503_v58  ;;  %v522_v7 = vpack.c.bf16 %v514_v5, %v513_v63 }
  0xfc   : > { %v521_v8 = vpack.c.bf16 %v512_v6, %v511_v3 }
  0xfd   : > { %1330 = vmatprep.mubr.msk.bf16.mxu1 %vm562_vm2, %v517_v2 }
  0xfe   : > { %1331 = vmatmul.mubr.msk.bf16.gmra.mrb[12].mxu1 %vm562_vm2, %v518_v62 }
  0xff   : > { %1334 = vmatprep.mubr.msk.bf16.mxu1 %vm562_vm2, %v519_v52 }
 0x106   : > { %1335 = vmatmul.mubr.msk.bf16.gmra.mrb[16].mxu1 %vm562_vm2, %v520_v50 }
 0x107   : > { %1338 = vmatprep.mubr.msk.bf16.mxu1 %vm562_vm2, %v521_v8 }
 0x10e   : > { %1339 = vmatmul.mubr.msk.bf16.gmra.mrb[20].mxu1 %vm562_vm2, %v522_v7 }
 0x1c9   : > { %v1328_v12 = vpop.f32.mrb[8].mxu1 }
 0x1ca   : > { %v630_v13 = vadd.f32 %v1328_v12, %v1157_v11  ;;  %v621_v14 = vpop.f32.mrb[9].mxu1 }
 0x1cb   : > { %v622_v15 = vadd.f32 %v1157_v11, %v621_v14  ;;  %v1329_v16 = vpop.f32.mrb[10].mxu1 }
 0x1cc   : > { %v633_v17 = vadd.f32 %v1329_v16, %v1157_v11  ;;  %v624_v18 = vpop.f32.mrb[11].mxu1  ;;  %v686_v20 = vmax.f32 %v630_v13, 0.0 }
 0x1cd   : > { %v625_v19 = vadd.f32 %v1157_v11, %v624_v18  ;;  %v684_v22 = vmax.f32 %v622_v15, 0.0 }
 0x1ce   : > { %v687_v21 = vmax.f32 %v633_v17, 0.0 }
 0x1cf   : > { %v685_v23 = vmax.f32 %v625_v19, 0.0 }
 0x1d0   : > { %v701_v24 = vpack.c.bf16 %v687_v21, %v686_v20 }
 0x1d1   : > { %v700_v25 = vpack.c.bf16 %v685_v23, %v684_v22  ;;  %v1332_v26 = vpop.f32.mrb[12].mxu1 }
 0x1d2   : > { %v646_v27 = vadd.f32 %v1332_v26, %v1157_v11  ;;  %v637_v28 = vpop.f32.mrb[13].mxu1 }
 0x1d3   : > { %v638_v29 = vadd.f32 %v1157_v11, %v637_v28  ;;  %v1333_v30 = vpop.f32.mrb[14].mxu1  ;;  %1350 = vmatprep.mubr.msk.bf16.mxu0 %vm562_vm2, %v700_v25 }
 0x1d4   : > { %v649_v31 = vadd.f32 %v1333_v30, %v1157_v11  ;;  %v640_v32 = vpop.f32.mrb[15].mxu1  ;;  %1351 = vmatmul.mubr.msk.bf16.vlgmr.msra.gmra.mrb[8].mxu0 %vm562_vm2, %v701_v24  ;;  %v690_v34 = vmax.f32 %v646_v27, 0.0 }
 0x1d5   : > { %v641_v33 = vadd.f32 %v1157_v11, %v640_v32  ;;  %v688_v36 = vmax.f32 %v638_v29, 0.0 }
 0x1d6   : > { %v691_v35 = vmax.f32 %v649_v31, 0.0 }
 0x1d7   : > { %v689_v37 = vmax.f32 %v641_v33, 0.0 }
 0x1d8   : > { %v703_v38 = vpack.c.bf16 %v691_v35, %v690_v34 }
 0x1d9   : > { %v702_v39 = vpack.c.bf16 %v689_v37, %v688_v36  ;;  %v1336_v40 = vpop.f32.mrb[16].mxu1 }
 0x1da   : > { %v662_v41 = vadd.f32 %v1336_v40, %v1157_v11  ;;  %v653_v42 = vpop.f32.mrb[17].mxu1 }
 0x1db   : > { %v654_v43 = vadd.f32 %v1157_v11, %v653_v42  ;;  %v1337_v44 = vpop.f32.mrb[18].mxu1  ;;  %1354 = vmatprep.mubr.msk.bf16.mxu0 %vm562_vm2, %v702_v39 }
 0x1dc   : > { %v665_v45 = vadd.f32 %v1337_v44, %v1157_v11  ;;  %v656_v46 = vpop.f32.mrb[19].mxu1  ;;  %1355 = vmatmul.mubr.msk.bf16.gmra.mrb[12].mxu0 %vm562_vm2, %v703_v38  ;;  %v694_v48 = vmax.f32 %v662_v41, 0.0 }
 0x1dd   : > { %v657_v47 = vadd.f32 %v1157_v11, %v656_v46  ;;  %v692_v50 = vmax.f32 %v654_v43, 0.0 }
 0x1de   : > { %v695_v49 = vmax.f32 %v665_v45, 0.0 }
 0x1df   : > { %v693_v51 = vmax.f32 %v657_v47, 0.0 }
 0x1e0   : > { %v705_v52 = vpack.c.bf16 %v695_v49, %v694_v48 }
 0x1e1   : > { %v704_v53 = vpack.c.bf16 %v693_v51, %v692_v50  ;;  %v1340_v54 = vpop.f32.mrb[20].mxu1 }
 0x1e2   : > { %v678_v55 = vadd.f32 %v1340_v54, %v1157_v11  ;;  %v669_v56 = vpop.f32.mrb[21].mxu1 }
 0x1e3   : > { %v670_v57 = vadd.f32 %v1157_v11, %v669_v56  ;;  %v1341_v58 = vpop.f32.mrb[22].mxu1  ;;  %1358 = vmatprep.mubr.msk.bf16.mxu0 %vm562_vm2, %v704_v53 }
 0x1e4   : > { %v681_v59 = vadd.f32 %v1341_v58, %v1157_v11  ;;  %v672_v60 = vpop.f32.mrb[23].mxu1  ;;  %1359 = vmatmul.mubr.msk.bf16.gmra.mrb[16].mxu0 %vm562_vm2, %v705_v52  ;;  %v698_v62 = vmax.f32 %v678_v55, 0.0 }
 0x1e5   : > { %v673_v61 = vadd.f32 %v1157_v11, %v672_v60  ;;  %v696_v0 = vmax.f32 %v670_v57, 0.0 }
 0x1e6   : > { %v699_v63 = vmax.f32 %v681_v59, 0.0 }
 0x1e7   : > { %v697_v1 = vmax.f32 %v673_v61, 0.0 }
 0x1e8   : > { %v707_v2 = vpack.c.bf16 %v699_v63, %v698_v62 }
 0x1e9   : > { %v706_v3 = vpack.c.bf16 %v697_v1, %v696_v0 }
 0x1eb   : > { %1362 = vmatprep.mubr.msk.bf16.mxu0 %vm562_vm2, %v706_v3 }
 0x1ec   : > { %1363 = vmatmul.mubr.msk.bf16.gmra.mrb[20].mxu0 %vm562_vm2, %v707_v2 }
 0x2a7   : > { %v1352_v5 = vpop.f32.mrb[8].mxu0 }
 0x2a8   : > { %v1608_v6 = vadd.f32 %v1352_v5, %v1170_v4  ;;  %v805_v7 = vpop.f32.mrb[9].mxu0 }
 0x2a9   : > { %v1610_v8 = vadd.f32 %v1170_v4, %v805_v7  ;;  %v1353_v9 = vpop.f32.mrb[10].mxu0 }
 0x2aa   : > { %v870_v10 = vmax.f32 %v1608_v6, 0.0  ;;  %v1613_v11 = vadd.f32 %v1353_v9, %v1170_v4  ;;  %v808_v12 = vpop.f32.mrb[11].mxu0 }
 0x2ab   : > { %v868_v13 = vmax.f32 %v1610_v8, 0.0  ;;  %v1616_v14 = vadd.f32 %v1170_v4, %v808_v12 }
 0x2ac   : > { %v871_v15 = vmax.f32 %v1613_v11, 0.0  ;;  %890 = vst [vmem:[#allocation2 + $0x10] sm:$0xff] (!%p1183_p7), %v870_v10 }
 0x2ad   : > { %v869_v16 = vmax.f32 %v1616_v14, 0.0  ;;  %888 = vst [vmem:[#allocation2] sm:$0xff] (!%p1183_p7), %v868_v13 }
 0x2ae   : > { %891 = vst [vmem:[#allocation2 + $0x18] sm:$0xff] (!%p1183_p7), %v871_v15 }
 0x2af   : > { %v1356_v17 = vpop.f32.mrb[12].mxu0  ;;  %889 = vst [vmem:[#allocation2 + $0x8] sm:$0xff] (!%p1183_p7), %v869_v16 }
 0x2b0   : > { %v1620_v18 = vadd.f32 %v1356_v17, %v1170_v4  ;;  %v821_v19 = vpop.f32.mrb[13].mxu0 }
 0x2b1   : > { %v1622_v20 = vadd.f32 %v1170_v4, %v821_v19  ;;  %v1357_v21 = vpop.f32.mrb[14].mxu0 }
 0x2b2   : > { %v874_v22 = vmax.f32 %v1620_v18, 0.0  ;;  %v1625_v23 = vadd.f32 %v1357_v21, %v1170_v4  ;;  %v824_v24 = vpop.f32.mrb[15].mxu0 }
 0x2b3   : > { %v872_v25 = vmax.f32 %v1622_v20, 0.0  ;;  %v825_v26 = vadd.f32 %v1170_v4, %v824_v24 }
 0x2b4   : > { %v875_v27 = vmax.f32 %v1625_v23, 0.0  ;;  %894 = vst [vmem:[#allocation2 + $0x30] sm:$0xff] (!%p1183_p7), %v874_v22 }
 0x2b5   : > { %v873_v28 = vmax.f32 %v825_v26, 0.0  ;;  %892 = vst [vmem:[#allocation2 + $0x20] sm:$0xff] (!%p1183_p7), %v872_v25 }
 0x2b6   : > { %895 = vst [vmem:[#allocation2 + $0x38] sm:$0xff] (!%p1183_p7), %v875_v27 }
 0x2b7   : > { %v1360_v29 = vpop.f32.mrb[16].mxu0  ;;  %893 = vst [vmem:[#allocation2 + $0x28] sm:$0xff] (!%p1183_p7), %v873_v28 }
 0x2b8   : > { %v1629_v30 = vadd.f32 %v1360_v29, %v1170_v4  ;;  %v837_v31 = vpop.f32.mrb[17].mxu0 }
 0x2b9   : > { %v1631_v32 = vadd.f32 %v1170_v4, %v837_v31  ;;  %v1361_v33 = vpop.f32.mrb[18].mxu0 }
 0x2ba   : > { %v878_v34 = vmax.f32 %v1629_v30, 0.0  ;;  %v1634_v35 = vadd.f32 %v1361_v33, %v1170_v4  ;;  %v840_v36 = vpop.f32.mrb[19].mxu0 }
 0x2bb   : > { %v876_v37 = vmax.f32 %v1631_v32, 0.0  ;;  %v1637_v38 = vadd.f32 %v1170_v4, %v840_v36 }
 0x2bc   : > { %v879_v39 = vmax.f32 %v1634_v35, 0.0  ;;  %898 = vst [vmem:[#allocation2 + $0x50] sm:$0xff] (!%p1183_p7), %v878_v34 }
 0x2bd   : > { %v877_v40 = vmax.f32 %v1637_v38, 0.0  ;;  %896 = vst [vmem:[#allocation2 + $0x40] sm:$0xff] (!%p1183_p7), %v876_v37 }
 0x2be   : > { %899 = vst [vmem:[#allocation2 + $0x58] sm:$0xff] (!%p1183_p7), %v879_v39 }
 0x2bf   : > { %v1364_v41 = vpop.f32.mrb[20].mxu0  ;;  %887 = sbr.rel (%p1183_p7) target bundleno = 712 (0x2c8), region = 52  ;;  %897 = vst [vmem:[#allocation2 + $0x48] sm:$0xff] (!%p1183_p7), %v877_v40 }
 0x2c0   : > { %v1641_v42 = vadd.f32 %v1364_v41, %v1170_v4  ;;  %v853_v43 = vpop.f32.mrb[21].mxu0 }
 0x2c1   : > { %v1643_v44 = vadd.f32 %v1170_v4, %v853_v43  ;;  %v1365_v45 = vpop.f32.mrb[22].mxu0 }
 0x2c2   : > { %v882_v46 = vmax.f32 %v1641_v42, 0.0  ;;  %v1646_v47 = vadd.f32 %v1365_v45, %v1170_v4  ;;  %v856_v48 = vpop.f32.mrb[23].mxu0 }
 0x2c3   : > { %v880_v49 = vmax.f32 %v1643_v44, 0.0  ;;  %v857_v50 = vadd.f32 %v1170_v4, %v856_v48 }
 0x2c4   : > { %v883_v51 = vmax.f32 %v1646_v47, 0.0  ;;  %902 = vst [vmem:[#allocation2 + $0x70] sm:$0xff] (!%p1183_p7), %v882_v46 }
 0x2c5   : > { %v881_v52 = vmax.f32 %v857_v50, 0.0  ;;  %900 = vst [vmem:[#allocation2 + $0x60] sm:$0xff] (!%p1183_p7), %v880_v49 }
 0x2c6   : > { %903 = vst [vmem:[#allocation2 + $0x78] sm:$0xff] %v883_v51 }
 0x2c7   : > { %901 = vst [vmem:[#allocation2 + $0x68] sm:$0xff] %v881_v52 }
 0x2c8 PF: > { %p1184_p8 = scmp.le.s32.totalorder %s1448_s24, 0 }
 0x2c9   : > { %v908_v53 = vld [vmem:[#allocation2] sm:$0xff] (!%p1184_p8)  ;;  %v909_v54 = vld [vmem:[#allocation2 + $0x8] sm:$0xff] (!%p1184_p8)  ;;  %v910_v55 = vld [vmem:[#allocation2 + $0x10] sm:$0xff] (!%p1184_p8) }
 0x2ca   : > { %907 = sbr.rel (%p1184_p8) target bundleno = 724 (0x2d4), region = 56  ;;  %v924_v56 = vmax.f32 (!%p1184_p8), %v908_v53, %v868_v13  ;;  %v925_v57 = vmax.f32 (!%p1184_p8), %v909_v54, %v869_v16  ;;  %v926_v58 = vmax.f32 (!%p1184_p8), %v910_v55, %v870_v10  ;;  %v911_v59 = vld [vmem:[#allocation2 + $0x18] sm:$0xff] (!%p1184_p8)  ;;  %v912_v60 = vld [vmem:[#allocation2 + $0x20] sm:$0xff] (!%p1184_p8)  ;;  %v913_v61 = vld [vmem:[#allocation2 + $0x28] sm:$0xff] (!%p1184_p8) }
 0x2cb   : > { %v927_v62 = vmax.f32 (!%p1184_p8), %v911_v59, %v871_v15  ;;  %v928_v63 = vmax.f32 (!%p1184_p8), %v912_v60, %v872_v25  ;;  %v929_v0 = vmax.f32 (!%p1184_p8), %v913_v61, %v873_v28  ;;  %v914_v1 = vld [vmem:[#allocation2 + $0x30] sm:$0xff] (!%p1184_p8)  ;;  %v915_v2 = vld [vmem:[#allocation2 + $0x38] sm:$0xff] (!%p1184_p8)  ;;  %v916_v3 = vld [vmem:[#allocation2 + $0x40] sm:$0xff] (!%p1184_p8) }
 0x2cc   : > { %940 = vst [vmem:[#allocation2] sm:$0xff] (!%p1184_p8), %v924_v56  ;;  %941 = vst [vmem:[#allocation2 + $0x8] sm:$0xff] (!%p1184_p8), %v925_v57  ;;  %v930_v4 = vmax.f32 (!%p1184_p8), %v914_v1, %v874_v22  ;;  %v931_v5 = vmax.f32 (!%p1184_p8), %v915_v2, %v875_v27  ;;  %v932_v6 = vmax.f32 (!%p1184_p8), %v916_v3, %v876_v37  ;;  %v917_v7 = vld [vmem:[#allocation2 + $0x48] sm:$0xff] (!%p1184_p8)  ;;  %v918_v8 = vld [vmem:[#allocation2 + $0x50] sm:$0xff] (!%p1184_p8) }
 0x2cd   : > { %942 = vst [vmem:[#allocation2 + $0x10] sm:$0xff] (!%p1184_p8), %v926_v58  ;;  %v919_v9 = vld [vmem:[#allocation2 + $0x58] sm:$0xff] (!%p1184_p8)  ;;  %943 = vst [vmem:[#allocation2 + $0x18] sm:$0xff] (!%p1184_p8), %v927_v62  ;;  %v933_v10 = vmax.f32 (!%p1184_p8), %v917_v7, %v877_v40  ;;  %v934_v11 = vmax.f32 (!%p1184_p8), %v918_v8, %v878_v34  ;;  %v922_v15 = vld [vmem:[#allocation2 + $0x70] sm:$0xff] (!%p1184_p8) }
 0x2ce   : > { %944 = vst [vmem:[#allocation2 + $0x20] sm:$0xff] (!%p1184_p8), %v928_v63  ;;  %945 = vst [vmem:[#allocation2 + $0x28] sm:$0xff] (!%p1184_p8), %v929_v0  ;;  %v935_v12 = vmax.f32 (!%p1184_p8), %v919_v9, %v879_v39  ;;  %v920_v13 = vld [vmem:[#allocation2 + $0x60] sm:$0xff] (!%p1184_p8)  ;;  %v921_v14 = vld [vmem:[#allocation2 + $0x68] sm:$0xff] (!%p1184_p8)  ;;  %v938_v18 = vmax.f32 (!%p1184_p8), %v922_v15, %v882_v46 }
 0x2cf   : > { %946 = vst [vmem:[#allocation2 + $0x30] sm:$0xff] (!%p1184_p8), %v930_v4  ;;  %947 = vst [vmem:[#allocation2 + $0x38] sm:$0xff] (!%p1184_p8), %v931_v5  ;;  %v936_v16 = vmax.f32 (!%p1184_p8), %v920_v13, %v880_v49  ;;  %v937_v17 = vmax.f32 (!%p1184_p8), %v921_v14, %v881_v52  ;;  %v923_v19 = vld [vmem:[#allocation2 + $0x78] sm:$0xff] (!%p1184_p8) }
 0x2d0   : > { %948 = vst [vmem:[#allocation2 + $0x40] sm:$0xff] (!%p1184_p8), %v932_v6  ;;  %949 = vst [vmem:[#allocation2 + $0x48] sm:$0xff] (!%p1184_p8), %v933_v10  ;;  %v939_v20 = vmax.f32 (!%p1184_p8), %v923_v19, %v883_v51 }
 0x2d1   : > { %950 = vst [vmem:[#allocation2 + $0x50] sm:$0xff] %v934_v11  ;;  %951 = vst [vmem:[#allocation2 + $0x58] sm:$0xff] %v935_v12 }
 0x2d2   : > { %952 = vst [vmem:[#allocation2 + $0x60] sm:$0xff] %v936_v16  ;;  %953 = vst [vmem:[#allocation2 + $0x68] sm:$0xff] %v937_v17 }
 0x2d3   : > { %954 = vst [vmem:[#allocation2 + $0x70] sm:$0xff] %v938_v18  ;;  %955 = vst [vmem:[#allocation2 + $0x78] sm:$0xff] %v939_v20 }
 0x2d4 PF: > { %p1185_p9 = scmp.ne.s32.totalorder %s1448_s24, 15 }
 0x2d6   : > { %959 = sbr.rel (%p1185_p9) target bundleno = 736 (0x2e0), region = 60  ;;  %v960_v21 = vld [vmem:[#allocation2] sm:$0xff] (!%p1185_p9)  ;;  %v961_v22 = vld [vmem:[#allocation2 + $0x8] sm:$0xff] (!%p1185_p9) }
 0x2d7   : > { %v962_v23 = vld [vmem:[#allocation2 + $0x10] sm:$0xff] (!%p1185_p9)  ;;  %v1223_v24 = vpack.c.bf16 (!%p1185_p9), %v961_v22, %v960_v21  ;;  %v963_v25 = vld [vmem:[#allocation2 + $0x18] sm:$0xff] (!%p1185_p9) }
 0x2d8   : > { %v964_v26 = vld [vmem:[#allocation2 + $0x20] sm:$0xff] (!%p1185_p9)  ;;  %v965_v27 = vld [vmem:[#allocation2 + $0x28] sm:$0xff] (!%p1185_p9)  ;;  %v1228_v28 = vpack.c.bf16 (!%p1185_p9), %v963_v25, %v962_v23 }
 0x2d9   : > { %v1233_v29 = vpack.c.bf16 (!%p1185_p9), %v965_v27, %v964_v26  ;;  %v966_v30 = vld [vmem:[#allocation2 + $0x30] sm:$0xff] (!%p1185_p9)  ;;  %v967_v31 = vld [vmem:[#allocation2 + $0x38] sm:$0xff] (!%p1185_p9)  ;;  %1224 = vst [vmem:[%s1549_s20] sm:$0xff] (!%p1185_p9), %v1223_v24   ;;  %v972_v39 = vld [vmem:[#allocation2 + $0x60] sm:$0xff] (!%p1185_p9) }
 0x2da   : > { %v968_v32 = vld [vmem:[#allocation2 + $0x40] sm:$0xff] (!%p1185_p9)  ;;  %v1238_v33 = vpack.c.bf16 (!%p1185_p9), %v967_v31, %v966_v30  ;;  %v969_v34 = vld [vmem:[#allocation2 + $0x48] sm:$0xff] (!%p1185_p9)  ;;  %1260 = vst [vmem:[%s1549_s20 + $0x8] sm:$0xff] (!%p1185_p9), %v1228_v28   ;;  %v974_v41 = vld [vmem:[#allocation2 + $0x70] sm:$0xff] (!%p1185_p9) }
 0x2db   : > { %v970_v35 = vld [vmem:[#allocation2 + $0x50] sm:$0xff] (!%p1185_p9)  ;;  %v971_v36 = vld [vmem:[#allocation2 + $0x58] sm:$0xff] (!%p1185_p9)  ;;  %1261 = vst [vmem:[%s1549_s20 + $0x10] sm:$0xff] (!%p1185_p9), %v1233_v29   ;;  %v1243_v37 = vpack.c.bf16 (!%p1185_p9), %v969_v34, %v968_v32  ;;  %v973_v40 = vld [vmem:[#allocation2 + $0x68] sm:$0xff] (!%p1185_p9) }
 0x2dc   : > { %v1248_v38 = vpack.c.bf16 (!%p1185_p9), %v971_v36, %v970_v35  ;;  %1262 = vst [vmem:[%s1549_s20 + $0x18] sm:$0xff] (!%p1185_p9), %v1238_v33   ;;  %v1253_v42 = vpack.c.bf16 (!%p1185_p9), %v973_v40, %v972_v39  ;;  %v975_v43 = vld [vmem:[#allocation2 + $0x78] sm:$0xff] (!%p1185_p9) }
 0x2dd   : > { %1263 = vst [vmem:[%s1549_s20 + $0x20] sm:$0xff] %v1243_v37   ;;  %v1258_v44 = vpack.c.bf16 %v975_v43, %v974_v41 }
 0x2de   : > { %1264 = vst [vmem:[%s1549_s20 + $0x28] sm:$0xff] %v1248_v38   ;;  %1265 = vst [vmem:[%s1549_s20 + $0x30] sm:$0xff] %v1253_v42  }
 0x2df   : > { %1266 = vst [vmem:[%s1549_s20 + $0x38] sm:$0xff] %v1258_v44  }
 0x2e0 PF: > { %s17_s28 = sadd.s32 1, %s1464_s28   ;;  %s1720_s24 = smov %s1456_s26 }
 0x2e1   : > { %p14_p10 = scmp.ge.s32.totalorder %s17_s28, 34   ;;  %s1721_s25 = smov %s1460_s27 }
 0x2e2   : > { %s1722_s26 = smov %s1725_s29  ;;  %s1723_s27 = smov %s1729_s30 }
 0x2e3   :  { %16 = sbr.rel (!%p14_p10) target bundleno = 3 (0x3), region = 90 }

// kernel: flownet3d_forward.27
= control target key start
LH: loop header
LB: loop body
LE: loop exit
PB: predicated region body
PF: predicated region fallthrough
CT: control target
= control target key end

     0   :  { %s1529_s12 = smov 0   ;;  %s1859_s0 = inlined_call_operand.vmem [shape: bf16[256,640], index: 0, kind: input, shape index: {}]   ;;  %s1860_s1 = inlined_call_operand.vmem [shape: bf16[640,256], index: 1, kind: input, shape index: {}]   ;;  %s1861_s2 = inlined_call_operand.vmem [shape: f32[1,256], index: 2, kind: input, shape index: {}]   ;;  %s1862_s3 = inlined_call_operand.vmem [shape: bf16[256,256], index: 3, kind: output, shape index: {}]  }
   0x1 LB: > { %s1149_s13 = sadd.s32 4294967295, %s1506_s12   ;;  %p1153_p0 = scmp.ge.s32.totalorder %s1506_s12, 1  ;;  %s1506_s12 = sphi %s1529_s12, %s13_s12  }
   0x2   : > { %p139_p1 = scmp.lt.s32.totalorder %s1506_s12, 5 }
   0x4   : > { %p140_p2 = pnand %p1153_p0, %p139_p1 }
   0x5   : > { %v1352_v0 = vld [vmem:[%s1860_s1 + $0x4] ss:$8 sps:$4 sm:$0xff] (!%p140_p2)   ;;  %v1356_v2 = vld [vmem:[%s1860_s1] ss:$8 sps:$4 sm:$0xff] (!%p140_p2)   ;;  %v1358_v4 = vld [vmem:[%s1860_s1 + $0x14] ss:$8 sps:$4 sm:$0xff] (!%p140_p2)  }
   0x6   : > { %143 = sbr.rel (%p140_p2) target bundleno = 333 (0x14d), region = 32  ;;  %v1354_v1 = vld [vmem:[%s1860_s1 + $0x104] ss:$8 sps:$4 sm:$0xff] (!%p140_p2)   ;;  %800 = vmatprep.subr.bf16.mxu1 (!%p140_p2), %v1352_v0  ;;  %v1357_v3 = vld [vmem:[%s1860_s1 + $0x100] ss:$8 sps:$4 sm:$0xff] (!%p140_p2)   ;;  %s1154_s24 = sshll.u32 (!%p140_p2), %s1149_s13, 3 }
   0x7   : > { %873 = vmatprep.subr.bf16.mxu0 (!%p140_p2), %v1354_v1  ;;  %801 = vmatpush1.bf16.msra.mxu1 (!%p140_p2), %v1356_v2  ;;  %v1360_v5 = vld [vmem:[%s1860_s1 + $0x114] ss:$8 sps:$4 sm:$0xff] (!%p140_p2)   ;;  %v1362_v6 = vld [vmem:[%s1860_s1 + $0x10] ss:$8 sps:$4 sm:$0xff] (!%p140_p2)   ;;  %v1364_v8 = vld [vmem:[%s1860_s1 + $0x24] ss:$8 sps:$4 sm:$0xff] (!%p140_p2)  }
   0x8   : > { %874 = vmatpush1.bf16.msra.mxu0 (!%p140_p2), %v1357_v3  ;;  %802 = vmatprep.subr.bf16.mxu1 (!%p140_p2), %v1358_v4  ;;  %v1363_v7 = vld [vmem:[%s1860_s1 + $0x110] ss:$8 sps:$4 sm:$0xff] (!%p140_p2)   ;;  %v1366_v9 = vld [vmem:[%s1860_s1 + $0x124] ss:$8 sps:$4 sm:$0xff] (!%p140_p2)   ;;  %v1368_v10 = vld [vmem:[%s1860_s1 + $0x20] ss:$8 sps:$4 sm:$0xff] (!%p140_p2)  }
   0x9   : > { %875 = vmatprep.subr.bf16.mxu0 (!%p140_p2), %v1360_v5  ;;  %v1369_v11 = vld [vmem:[%s1860_s1 + $0x120] ss:$8 sps:$4 sm:$0xff] (!%p140_p2)   ;;  %v1370_v12 = vld [vmem:[%s1860_s1 + $0x34] ss:$8 sps:$4 sm:$0xff] (!%p140_p2)   ;;  %v1374_v14 = vld [vmem:[%s1860_s1 + $0x30] ss:$8 sps:$4 sm:$0xff] (!%p140_p2)  }
   0xa   : > { %v1372_v13 = vld [vmem:[%s1860_s1 + $0x134] ss:$8 sps:$4 sm:$0xff] (!%p140_p2)   ;;  %v1375_v15 = vld [vmem:[%s1860_s1 + $0x130] ss:$8 sps:$4 sm:$0xff] (!%p140_p2)   ;;  %v1376_v16 = vld [vmem:[%s1860_s1 + $0x44] ss:$8 sps:$4 sm:$0xff] (!%p140_p2)  }
   0xb   : > { %803 = vmatpush1.bf16.msra.mxu1 (!%p140_p2), %v1362_v6  ;;  %v1378_v17 = vld [vmem:[%s1860_s1 + $0x144] ss:$8 sps:$4 sm:$0xff] (!%p140_p2)   ;;  %v1380_v18 = vld [vmem:[%s1860_s1 + $0x40] ss:$8 sps:$4 sm:$0xff] (!%p140_p2)   ;;  %v1382_v20 = vld [vmem:[%s1860_s1 + $0x54] ss:$8 sps:$4 sm:$0xff] (!%p140_p2)  }
   0xc   : > { %876 = vmatpush1.bf16.msra.mxu0 (!%p140_p2), %v1363_v7  ;;  %804 = vmatprep.subr.bf16.mxu1 (!%p140_p2), %v1364_v8  ;;  %v1381_v19 = vld [vmem:[%s1860_s1 + $0x140] ss:$8 sps:$4 sm:$0xff] (!%p140_p2)   ;;  %v1384_v21 = vld [vmem:[%s1860_s1 + $0x154] ss:$8 sps:$4 sm:$0xff] (!%p140_p2)   ;;  %v1386_v22 = vld [vmem:[%s1860_s1 + $0x50] ss:$8 sps:$4 sm:$0xff] (!%p140_p2)  }
   0xd   : > { %877 = vmatprep.subr.bf16.mxu0 %v1366_v9  ;;  %v1387_v23 = vld [vmem:[%s1860_s1 + $0x150] ss:$8 sps:$4 sm:$0xff]   ;;  %v1388_v24 = vld [vmem:[%s1860_s1 + $0x64] ss:$8 sps:$4 sm:$0xff]   ;;  %v1392_v26 = vld [vmem:[%s1860_s1 + $0x60] ss:$8 sps:$4 sm:$0xff]  }
   0xe   : > { %v1390_v25 = vld [vmem:[%s1860_s1 + $0x164] ss:$8 sps:$4 sm:$0xff]   ;;  %v1393_v27 = vld [vmem:[%s1860_s1 + $0x160] ss:$8 sps:$4 sm:$0xff]   ;;  %v1394_v28 = vld [vmem:[%s1860_s1 + $0x74] ss:$8 sps:$4 sm:$0xff]  }
   0xf   : > { %805 = vmatpush1.bf16.msra.mxu1 %v1368_v10  ;;  %v1396_v29 = vld [vmem:[%s1860_s1 + $0x174] ss:$8 sps:$4 sm:$0xff]   ;;  %v1398_v30 = vld [vmem:[%s1860_s1 + $0x70] ss:$8 sps:$4 sm:$0xff]   ;;  %v1400_v32 = vld [vmem:[%s1860_s1 + $0x84] ss:$8 sps:$4 sm:$0xff]  }
  0x10   : > { %878 = vmatpush1.bf16.msra.mxu0 %v1369_v11  ;;  %806 = vmatprep.subr.bf16.mxu1 %v1370_v12  ;;  %v1399_v31 = vld [vmem:[%s1860_s1 + $0x170] ss:$8 sps:$4 sm:$0xff]   ;;  %p166_p3 = scmp.lt.s32.totalorder %s1154_s24, 31  ;;  %v1402_v33 = vld [vmem:[%s1860_s1 + $0x184] ss:$8 sps:$4 sm:$0xff]  }
  0x11   : > { %879 = vmatprep.subr.bf16.mxu0 %v1372_v13  ;;  %v1404_v34 = vld [vmem:[%s1860_s1 + $0x80] ss:$8 sps:$4 sm:$0xff]   ;;  %v1406_v36 = vld [vmem:[%s1860_s1 + $0x94] ss:$8 sps:$4 sm:$0xff]   ;;  %v1410_v38 = vld [vmem:[%s1860_s1 + $0x90] ss:$8 sps:$4 sm:$0xff]  }
  0x12   : > { %v1405_v35 = vld [vmem:[%s1860_s1 + $0x180] ss:$8 sps:$4 sm:$0xff]   ;;  %s1864_s24 = smov (!%p166_p3, %s1154_s24), 31  ;;  %v1408_v37 = vld [vmem:[%s1860_s1 + $0x194] ss:$8 sps:$4 sm:$0xff]  }
  0x13   : > { %807 = vmatpush1.bf16.msra.mxu1 %v1374_v14  ;;  %v1411_v39 = vld [vmem:[%s1860_s1 + $0x190] ss:$8 sps:$4 sm:$0xff]   ;;  %v1412_v40 = vld [vmem:[%s1860_s1 + $0xa4] ss:$8 sps:$4 sm:$0xff]   ;;  %s1342_s21 = smul.u32 20, %s1864_s24 }
  0x14   : > { %880 = vmatpush1.bf16.msra.mxu0 %v1375_v15  ;;  %808 = vmatprep.subr.bf16.mxu1 %v1376_v16  ;;  %v1414_v41 = vld [vmem:[%s1860_s1 + $0x1a4] ss:$8 sps:$4 sm:$0xff]   ;;  %v1416_v42 = vld [vmem:[%s1860_s1 + $0xa0] ss:$8 sps:$4 sm:$0xff]   ;;  %v1418_v44 = vld [vmem:[%s1860_s1 + $0xb4] ss:$8 sps:$4 sm:$0xff]  }
  0x15   : > { %881 = vmatprep.subr.bf16.mxu0 %v1378_v17  ;;  %v1417_v43 = vld [vmem:[%s1860_s1 + $0x1a0] ss:$8 sps:$4 sm:$0xff]   ;;  %s1680_s13 = scalar_lea.vmem %s1859_s0, %s1342_s21  ;;  %v1420_v45 = vld [vmem:[%s1860_s1 + $0x1b4] ss:$8 sps:$4 sm:$0xff]   ;;  %v1422_v46 = vld [vmem:[%s1860_s1 + $0xb0] ss:$8 sps:$4 sm:$0xff]  }
  0x16   : > { %v1423_v47 = vld [vmem:[%s1860_s1 + $0x1b0] ss:$8 sps:$4 sm:$0xff]   ;;  %v1424_v48 = vld [vmem:[%s1860_s1 + $0xc4] ss:$8 sps:$4 sm:$0xff]   ;;  %v1428_v52 = vld [vmem:[%s1860_s1 + $0xc0] ss:$8 sps:$4 sm:$0xff]  }
  0x17   : > { %809 = vmatpush1.bf16.msra.mxu1 %v1380_v18  ;;  %v1450_v49 = vld [vmem:[%s1680_s13 + $0x4] ss:$20 sps:$4 sm:$0xff]   ;;  %v1453_v51 = vld [vmem:[%s1680_s13 + $0xc] ss:$20 sps:$4 sm:$0xff]   ;;  %v1430_v54 = vld [vmem:[%s1860_s1 + $0xd4] ss:$8 sps:$4 sm:$0xff]  }
  0x18   : > { %882 = vmatpush1.bf16.msra.mxu0 %v1381_v19  ;;  %810 = vmatprep.subr.bf16.mxu1 %v1382_v20  ;;  %v1426_v50 = vld [vmem:[%s1860_s1 + $0x1c4] ss:$8 sps:$4 sm:$0xff]   ;;  %v1429_v53 = vld [vmem:[%s1860_s1 + $0x1c0] ss:$8 sps:$4 sm:$0xff]   ;;  %v1432_v55 = vld [vmem:[%s1860_s1 + $0x1d4] ss:$8 sps:$4 sm:$0xff]  }
  0x19   : > { %883 = vmatprep.subr.bf16.mxu0 %v1384_v21  ;;  %832 = vmatprep.mubr.bf16.mxu1 %v1450_v49  ;;  %v1434_v56 = vld [vmem:[%s1860_s1 + $0xd0] ss:$8 sps:$4 sm:$0xff]   ;;  %v1436_v58 = vld [vmem:[%s1860_s1 + $0xe4] ss:$8 sps:$4 sm:$0xff]   ;;  %v1440_v60 = vld [vmem:[%s1860_s1 + $0xe0] ss:$8 sps:$4 sm:$0xff]  }
  0x1a   : > { %905 = vmatprep.mubr.bf16.mxu0 %v1453_v51  ;;  %v1435_v57 = vld [vmem:[%s1860_s1 + $0x1d0] ss:$8 sps:$4 sm:$0xff]   ;;  %v1438_v59 = vld [vmem:[%s1860_s1 + $0x1e4] ss:$8 sps:$4 sm:$0xff]   ;;  %v1441_v61 = vld [vmem:[%s1860_s1 + $0x1e0] ss:$8 sps:$4 sm:$0xff]  }
  0x1b   : > { %811 = vmatpush1.bf16.msra.mxu1 %v1386_v22  ;;  %v1442_v62 = vld [vmem:[%s1860_s1 + $0xf4] ss:$8 sps:$4 sm:$0xff]   ;;  %v1446_v0 = vld [vmem:[%s1860_s1 + $0xf0] ss:$8 sps:$4 sm:$0xff]   ;;  %v1456_v2 = vld [vmem:[%s1860_s1 + $0x204] ss:$8 sps:$4 sm:$0xff]  }
  0x1c   : > { %884 = vmatpush1.bf16.msra.mxu0 %v1387_v23  ;;  %812 = vmatprep.subr.bf16.mxu1 %v1388_v24  ;;  %v1444_v63 = vld [vmem:[%s1860_s1 + $0x1f4] ss:$8 sps:$4 sm:$0xff]   ;;  %v1447_v1 = vld [vmem:[%s1860_s1 + $0x1f0] ss:$8 sps:$4 sm:$0xff]   ;;  %v1454_v5 = vld [vmem:[%s1860_s1 + $0x200] ss:$8 sps:$4 sm:$0xff]  }
  0x1d   : > { %885 = vmatprep.subr.bf16.mxu0 %v1390_v25  ;;  %v1448_v3 = vld [vmem:[%s1680_s13] ss:$20 sps:$4 sm:$0xff]   ;;  %v1451_v4 = vld [vmem:[%s1680_s13 + $0x8] ss:$20 sps:$4 sm:$0xff]   ;;  %v1457_v9 = vld [vmem:[%s1860_s1 + $0x210] ss:$8 sps:$4 sm:$0xff]  }
  0x1e   : > { %v1459_v6 = vld [vmem:[%s1860_s1 + $0x214] ss:$8 sps:$4 sm:$0xff]   ;;  %v1460_v7 = vld [vmem:[%s1680_s13 + $0x2c] ss:$20 sps:$4 sm:$0xff]   ;;  %v1465_v12 = vld [vmem:[%s1680_s13 + $0x30] ss:$20 sps:$4 sm:$0xff]  }
  0x1f   : > { %813 = vmatpush1.bf16.msra.mxu1 %v1392_v26  ;;  %v1462_v8 = vld [vmem:[%s1680_s13 + $0x34] ss:$20 sps:$4 sm:$0xff]   ;;  %v1468_v10 = vld [vmem:[%s1860_s1 + $0x224] ss:$8 sps:$4 sm:$0xff]   ;;  %v1474_v16 = vld [vmem:[%s1680_s13 + $0x5c] ss:$20 sps:$4 sm:$0xff]  }
  0x20   : > { %886 = vmatpush1.bf16.msra.mxu0 %v1393_v27  ;;  %814 = vmatprep.subr.bf16.mxu1 %v1394_v28  ;;  %v1464_v11 = vld [vmem:[%s1680_s13 + $0x28] ss:$20 sps:$4 sm:$0xff]   ;;  %v1469_v17 = vld [vmem:[%s1860_s1 + $0x230] ss:$8 sps:$4 sm:$0xff]   ;;  %v1480_v18 = vld [vmem:[%s1860_s1 + $0x244] ss:$8 sps:$4 sm:$0xff]  }
  0x21   : > { %887 = vmatprep.subr.bf16.mxu0 %v1396_v29  ;;  %v1466_v13 = vld [vmem:[%s1860_s1 + $0x220] ss:$8 sps:$4 sm:$0xff]   ;;  %v1471_v14 = vld [vmem:[%s1860_s1 + $0x234] ss:$8 sps:$4 sm:$0xff]   ;;  %v1476_v19 = vld [vmem:[%s1680_s13 + $0x50] ss:$20 sps:$4 sm:$0xff]  }
  0x22   : > { %v1472_v15 = vld [vmem:[%s1680_s13 + $0x54] ss:$20 sps:$4 sm:$0xff]   ;;  %v1477_v20 = vld [vmem:[%s1680_s13 + $0x58] ss:$20 sps:$4 sm:$0xff]   ;;  %v1484_v23 = vld [vmem:[%s1680_s13 + $0x7c] ss:$20 sps:$4 sm:$0xff]  }
  0x23   : > { %815 = vmatpush1.bf16.msra.mxu1 %v1398_v30  ;;  %v1478_v21 = vld [vmem:[%s1860_s1 + $0x240] ss:$8 sps:$4 sm:$0xff]   ;;  %v1483_v22 = vld [vmem:[%s1860_s1 + $0x254] ss:$8 sps:$4 sm:$0xff]   ;;  %v1486_v24 = vld [vmem:[%s1680_s13 + $0x84] ss:$20 sps:$4 sm:$0xff]  }
  0x24   : > { %888 = vmatpush1.bf16.msra.mxu0 %v1399_v31  ;;  %816 = vmatprep.subr.bf16.mxu1 %v1400_v32  ;;  %v1481_v25 = vld [vmem:[%s1860_s1 + $0x250] ss:$8 sps:$4 sm:$0xff]   ;;  %v1492_v26 = vld [vmem:[%s1860_s1 + $0x264] ss:$8 sps:$4 sm:$0xff]   ;;  %v1489_v28 = vld [vmem:[%s1680_s13 + $0x80] ss:$20 sps:$4 sm:$0xff]  }
  0x25   : > { %889 = vmatprep.subr.bf16.mxu0 %v1402_v33  ;;  %v1488_v27 = vld [vmem:[%s1680_s13 + $0x78] ss:$20 sps:$4 sm:$0xff]   ;;  %v1490_v29 = vld [vmem:[%s1860_s1 + $0x260] ss:$8 sps:$4 sm:$0xff]   ;;  %v1495_v30 = vld [vmem:[%s1860_s1 + $0x274] ss:$8 sps:$4 sm:$0xff]  }
  0x26   : > { %v1493_v31 = vld [vmem:[%s1860_s1 + $0x270] ss:$8 sps:$4 sm:$0xff]   ;;  %v1508_v32 = vmov 0  }
  0x27   : > { %817 = vmatpush1.bf16.msra.mxu1 %v1404_v34  ;;  %v1496_v33 = vld [vmem:[%s1680_s13 + $0x10] ss:$20 sps:$4 sm:$0xff]   ;;  %v1497_v34 = vld [vmem:[%s1680_s13 + $0x60] ss:$20 sps:$4 sm:$0xff]  }
  0x28   : > { %890 = vmatpush1.bf16.msra.mxu0 %v1405_v35  ;;  %818 = vmatprep.subr.bf16.mxu1 %v1406_v36  ;;  %v1498_v35 = vld [vmem:[%s1680_s13 + $0x38] ss:$20 sps:$4 sm:$0xff]   ;;  %v1499_v36 = vld [vmem:[%s1680_s13 + $0x88] ss:$20 sps:$4 sm:$0xff]   ;;  %s1269_s13 = sshll.u32 %s1864_s24, 3 }
  0x29   : > { %891 = vmatprep.subr.bf16.mxu0 %v1408_v37  ;;  %s1838_s8 = scalar_lea.vmem %s1862_s3, %s1269_s13 }
  0x2b   : > { %819 = vmatpush1.bf16.msra.mxu1 %v1410_v38 }
  0x2c   : > { %892 = vmatpush1.bf16.msra.mxu0 %v1411_v39  ;;  %820 = vmatprep.subr.bf16.mxu1 %v1412_v40  ;;  %v286_v40 = vlaneseq }
  0x2d   : > { %893 = vmatprep.subr.bf16.mxu0 %v1414_v41 }
  0x2f   : > { %821 = vmatpush1.bf16.msra.mxu1 %v1416_v42  ;;  %v287_v42 = vshrl.u32 %v286_v40, 7 }
  0x30   : > { %894 = vmatpush1.bf16.msra.mxu0 %v1417_v43  ;;  %822 = vmatprep.subr.bf16.mxu1 %v1418_v44 }
  0x31   : > { %895 = vmatprep.subr.bf16.mxu0 %v1420_v45  ;;  %v292_v49 = vsub.s32 1, %v287_v42 }
  0x33   : > { %823 = vmatpush1.bf16.msra.mxu1 %v1422_v46  ;;  %v288_v46 = vsub.s32 0, %v287_v42 }
  0x34   : > { %896 = vmatpush1.bf16.msra.mxu0 %v1423_v47  ;;  %824 = vmatprep.subr.bf16.mxu1 %v1424_v48  ;;  %v284_v48 = vld [vmem:[%s1861_s2] sm:$0x3] }
  0x35   : > { %897 = vmatprep.subr.bf16.mxu0 %v1426_v50  ;;  %v1818_v50 = vrot.slane %v284_v48, %v288_v46  ;;  %v1820_v51 = vrot.slane %v284_v48, %v292_v49 }
  0x37   : > { %825 = vmatpush1.bf16.msra.mxu1 %v1428_v52 }
  0x38   : > { %898 = vmatpush1.bf16.msra.mxu0 %v1429_v53  ;;  %826 = vmatprep.subr.bf16.mxu1 %v1430_v54 }
  0x39   : > { %899 = vmatprep.subr.bf16.mxu0 %v1432_v55 }
  0x3b   : > { %827 = vmatpush1.bf16.msra.mxu1 %v1434_v56 }
  0x3c   : > { %900 = vmatpush1.bf16.msra.mxu0 %v1435_v57  ;;  %828 = vmatprep.subr.bf16.mxu1 %v1436_v58 }
  0x3d   : > { %901 = vmatprep.subr.bf16.mxu0 %v1438_v59 }
  0x3f   : > { %829 = vmatpush1.bf16.msra.mxu1 %v1440_v60 }
  0x40   : > { %902 = vmatpush1.bf16.msra.mxu0 %v1441_v61  ;;  %830 = vmatprep.subr.bf16.mxu1 %v1442_v62 }
  0x41   : > { %903 = vmatprep.subr.bf16.mxu0 %v1444_v63 }
  0x43   : > { %831 = vmatpush1.bf16.msra.mxu1 %v1446_v0 }
  0x44   : > { %904 = vmatpush1.bf16.msra.mxu0 %v1447_v1  ;;  %1278 = vmatprep.subr.bf16.mxu1 %v1456_v2 }
  0x45   : > { %946 = vmatprep.subr.bf16.mxu0 %v1456_v2 }
  0x46   : > { %833 = vmatmul.mubr.bf16.vlgmr.msra.gmra.mrb[0].mxu1 %v1448_v3 }
  0x47   : > { %906 = vmatmul.mubr.bf16.vlgmr.msra.gmra.mrb[0].mxu0 %v1451_v4  ;;  %1286 = vmatpush1.bf16.msra.mxu1 %v1454_v5 }
  0x48   : > { %947 = vmatpush1.bf16.msra.mxu0 %v1454_v5  ;;  %1279 = vmatprep.subr.bf16.mxu1 %v1459_v6 }
  0x49   : > { %948 = vmatprep.subr.bf16.mxu0 %v1459_v6  ;;  %842 = vmatprep.mubr.bf16.mxu1 %v1460_v7 }
  0x4a   : > { %915 = vmatprep.mubr.bf16.mxu0 %v1462_v8 }
  0x4b   : > { %1287 = vmatpush1.bf16.msra.mxu1 %v1457_v9 }
  0x4c   : > { %949 = vmatpush1.bf16.msra.mxu0 %v1457_v9  ;;  %1280 = vmatprep.subr.bf16.mxu1 %v1468_v10 }
  0x4d   : > { %950 = vmatprep.subr.bf16.mxu0 %v1468_v10 }
  0x4e   : > { %843 = vmatmul.mubr.bf16.gmra.mrb[4].mxu1 %v1464_v11 }
  0x4f   : > { %916 = vmatmul.mubr.bf16.gmra.mrb[4].mxu0 %v1465_v12  ;;  %1288 = vmatpush1.bf16.msra.mxu1 %v1466_v13 }
  0x50   : > { %951 = vmatpush1.bf16.msra.mxu0 %v1466_v13  ;;  %1281 = vmatprep.subr.bf16.mxu1 %v1471_v14 }
  0x51   : > { %952 = vmatprep.subr.bf16.mxu0 %v1471_v14  ;;  %852 = vmatprep.mubr.bf16.mxu1 %v1472_v15 }
  0x52   : > { %925 = vmatprep.mubr.bf16.mxu0 %v1474_v16 }
  0x53   : > { %1289 = vmatpush1.bf16.msra.mxu1 %v1469_v17 }
  0x54   : > { %953 = vmatpush1.bf16.msra.mxu0 %v1469_v17  ;;  %1282 = vmatprep.subr.bf16.mxu1 %v1480_v18 }
  0x55   : > { %954 = vmatprep.subr.bf16.mxu0 %v1480_v18 }
  0x56   : > { %853 = vmatmul.mubr.bf16.gmra.mrb[8].mxu1 %v1476_v19 }
  0x57   : > { %926 = vmatmul.mubr.bf16.gmra.mrb[8].mxu0 %v1477_v20  ;;  %1290 = vmatpush1.bf16.msra.mxu1 %v1478_v21 }
  0x58   : > { %955 = vmatpush1.bf16.msra.mxu0 %v1478_v21  ;;  %1283 = vmatprep.subr.bf16.mxu1 %v1483_v22 }
  0x59   : > { %956 = vmatprep.subr.bf16.mxu0 %v1483_v22  ;;  %862 = vmatprep.mubr.bf16.mxu1 %v1484_v23 }
  0x5a   : > { %935 = vmatprep.mubr.bf16.mxu0 %v1486_v24 }
  0x5b   : > { %1291 = vmatpush1.bf16.msra.mxu1 %v1481_v25 }
  0x5c   : > { %957 = vmatpush1.bf16.msra.mxu0 %v1481_v25  ;;  %1284 = vmatprep.subr.bf16.mxu1 %v1492_v26 }
  0x5d   : > { %958 = vmatprep.subr.bf16.mxu0 %v1492_v26 }
  0x5e   : > { %863 = vmatmul.mubr.bf16.gmra.mrb[12].mxu1 %v1488_v27 }
  0x5f   : > { %936 = vmatmul.mubr.bf16.gmra.mrb[12].mxu0 %v1489_v28  ;;  %1292 = vmatpush1.bf16.msra.mxu1 %v1490_v29 }
  0x60   : > { %959 = vmatpush1.bf16.msra.mxu0 %v1490_v29  ;;  %1285 = vmatprep.subr.bf16.mxu1 %v1495_v30 }
  0x61   : > { %960 = vmatprep.subr.bf16.mxu0 %v1495_v30  ;;  %978 = vmatprep.mubr.bf16.mxu0 %v1508_v32 }
  0x62   : > { %998 = vmatprep.mubr.bf16.mxu1 %v1508_v32 }
  0x63   : > { %1293 = vmatpush1.bf16.msra.mxu1 %v1493_v31 }
  0x64   : > { %961 = vmatpush1.bf16.msra.mxu0 %v1493_v31 }
  0x66   : > { %999 = vmatmul.mubr.bf16.vlgmr.msra.gmra.mrb[16].mxu1 %v1497_v34 }
  0x67   : > { %979 = vmatmul.mubr.bf16.vlgmr.msra.gmra.mrb[0].mxu0 %v1496_v33  ;;  %1008 = vmatprep.mubr.bf16.mxu1 %v1508_v32 }
  0x68   : > { %988 = vmatprep.mubr.bf16.mxu0 %v1508_v32 }
  0x6e   : > { %1009 = vmatmul.mubr.bf16.gmra.mrb[20].mxu1 %v1499_v36 }
  0x6f   : > { %989 = vmatmul.mubr.bf16.gmra.mrb[4].mxu0 %v1498_v35 }
 0x119   : > { %v834_v37 = vpop.f32.mrb[0].mxu1 }
 0x11a   : > { %v836_v38 = vpop.f32.mrb[1].mxu1  ;;  %v835_v20 = vadd.f32 %v834_v37, %v1818_v50 }
 0x11b   : > { %v838_v39 = vpop.f32.mrb[2].mxu1  ;;  %v837_v21 = vadd.f32 %v836_v38, %v1820_v51 }
 0x11c   : > { %v840_v41 = vpop.f32.mrb[3].mxu1  ;;  %v839_v24 = vadd.f32 %v838_v39, %v1818_v50 }
 0x11d   : > { %v841_v29 = vadd.f32 %v840_v41, %v1820_v51 }
 0x121   : > { %v1807_v43 = vpop.f32.mrb[4].mxu1 }
 0x122   : > { %v1809_v44 = vpop.f32.mrb[5].mxu1 }
 0x123   : > { %v1811_v45 = vpop.f32.mrb[6].mxu1 }
 0x124   : > { %v1813_v47 = vpop.f32.mrb[7].mxu1 }
 0x129   : > { %v854_v52 = vpop.f32.mrb[8].mxu1 }
 0x12a   : > { %v927_v53 = vpop.f32.mrb[8].mxu0  ;;  %v855_v54 = vadd.f32 %v854_v52, %v1818_v50  ;;  %v856_v55 = vpop.f32.mrb[9].mxu1 }
 0x12b   : > { %v929_v56 = vpop.f32.mrb[9].mxu0  ;;  %v857_v57 = vadd.f32 %v856_v55, %v1820_v51  ;;  %v858_v58 = vpop.f32.mrb[10].mxu1 }
 0x12c   : > { %v931_v59 = vpop.f32.mrb[10].mxu0  ;;  %v928_v60 = vadd.f32 %v927_v53, %v855_v54  ;;  %v859_v61 = vadd.f32 %v858_v58, %v1818_v50  ;;  %v860_v62 = vpop.f32.mrb[11].mxu1 }
 0x12d   : > { %v933_v63 = vpop.f32.mrb[11].mxu0  ;;  %v930_v0 = vadd.f32 %v929_v56, %v857_v57  ;;  %v861_v1 = vadd.f32 %v860_v62, %v1820_v51  ;;  %v845_v56 = vadd.f32 %v1807_v43, %v1818_v50  ;;  %v847_v57 = vadd.f32 %v1809_v44, %v1820_v51 }
 0x12e   : > { %v932_v2 = vadd.f32 %v931_v59, %v859_v61  ;;  %v849_v62 = vadd.f32 %v1811_v45, %v1818_v50 }
 0x12f   : > { %v934_v3 = vadd.f32 %v933_v63, %v861_v1 }
 0x131   : > { %v864_v4 = vpop.f32.mrb[12].mxu1 }
 0x132   : > { %v937_v5 = vpop.f32.mrb[12].mxu0  ;;  %v865_v6 = vadd.f32 %v864_v4, %v1818_v50  ;;  %v866_v7 = vpop.f32.mrb[13].mxu1 }
 0x133   : > { %v939_v8 = vpop.f32.mrb[13].mxu0  ;;  %v867_v9 = vadd.f32 %v866_v7, %v1820_v51  ;;  %v868_v10 = vpop.f32.mrb[14].mxu1 }
 0x134   : > { %v941_v11 = vpop.f32.mrb[14].mxu0  ;;  %v938_v12 = vadd.f32 %v937_v5, %v865_v6  ;;  %v869_v13 = vadd.f32 %v868_v10, %v1818_v50  ;;  %v870_v14 = vpop.f32.mrb[15].mxu1 }
 0x135   : > { %v943_v15 = vpop.f32.mrb[15].mxu0  ;;  %v940_v16 = vadd.f32 %v939_v8, %v867_v9  ;;  %v871_v17 = vadd.f32 %v870_v14, %v1820_v51 }
 0x136   : > { %v942_v18 = vadd.f32 %v941_v11, %v869_v13 }
 0x137   : > { %v944_v19 = vadd.f32 %v943_v15, %v871_v17 }
 0x139   : > { %v1000_v23 = vpop.f32.mrb[16].mxu1 }
 0x13a   : > { %v980_v22 = vpop.f32.mrb[0].mxu0  ;;  %v1001_v26 = vadd.f32 %v1000_v23, %v928_v60  ;;  %v1002_v28 = vpop.f32.mrb[17].mxu1 }
 0x13b   : > { %v1295_v25 = vadd.f32 %v980_v22, %v835_v20  ;;  %v982_v27 = vpop.f32.mrb[1].mxu0  ;;  %v1003_v31 = vadd.f32 %v1002_v28, %v930_v0  ;;  %v1004_v33 = vpop.f32.mrb[18].mxu1 }
 0x13c   : > { %v1297_v30 = vadd.f32 %v982_v27, %v837_v21  ;;  %v984_v32 = vpop.f32.mrb[2].mxu0  ;;  %v1027_v35 = vmax.f32 %v1001_v26, 0.0  ;;  %v1005_v37 = vadd.f32 %v1004_v33, %v932_v2  ;;  %v1006_v40 = vpop.f32.mrb[19].mxu1 }
 0x13d   : > { %v1019_v34 = vmax.f32 %v1295_v25, 0.0  ;;  %v1299_v36 = vadd.f32 %v984_v32, %v839_v24  ;;  %v986_v38 = vpop.f32.mrb[3].mxu0  ;;  %v1028_v46 = vmax.f32 %v1003_v31, 0.0  ;;  %v1007_v48 = vadd.f32 %v1006_v40, %v934_v3 }
 0x13e   : > { %v1020_v42 = vmax.f32 %v1297_v30, 0.0  ;;  %v1301_v39 = vadd.f32 %v986_v38, %v841_v29  ;;  %v1029_v49 = vmax.f32 %v1005_v37, 0.0  ;;  %v851_v3 = vadd.f32 %v1813_v47, %v1820_v51 }
 0x13f   : > { %v1021_v41 = vmax.f32 %v1299_v36, 0.0  ;;  %v1274_v53 = vpack.c.bf16 %v1028_v46, %v1027_v35  ;;  %v1030_v55 = vmax.f32 %v1007_v48, 0.0 }
 0x140   : > { %v1270_v52 = vpack.c.bf16 %v1020_v42, %v1019_v34  ;;  %v1022_v54 = vmax.f32 %v1301_v39, 0.0 }
 0x141   : > { %1087 = vst [vmem:[%s1838_s8 + $0x20] sm:$0xff] %v1274_v53  ;;  %v1275_v59 = vpack.c.bf16 %v1030_v55, %v1029_v49  ;;  %v1010_v61 = vpop.f32.mrb[20].mxu1 }
 0x142   : > { %1083 = vst [vmem:[%s1838_s8] sm:$0xff] %v1270_v52  ;;  %v1271_v58 = vpack.c.bf16 %v1022_v54, %v1021_v41  ;;  %v990_v60 = vpop.f32.mrb[4].mxu0  ;;  %v1011_v0 = vadd.f32 %v1010_v61, %v938_v12  ;;  %v1012_v2 = vpop.f32.mrb[21].mxu1 }
 0x143   : > { %v1303_v63 = vadd.f32 %v990_v60, %v845_v56  ;;  %v992_v1 = vpop.f32.mrb[5].mxu0  ;;  %1088 = vst [vmem:[%s1838_s8 + $0x28] sm:$0xff] %v1275_v59  ;;  %v1013_v44 = vadd.f32 %v1012_v2, %v940_v16  ;;  %v1014_v5 = vpop.f32.mrb[22].mxu1 }
 0x144   : > { %1084 = vst [vmem:[%s1838_s8 + $0x8] sm:$0xff] %v1271_v58  ;;  %v1305_v43 = vadd.f32 %v992_v1, %v847_v57  ;;  %v994_v4 = vpop.f32.mrb[6].mxu0  ;;  %v1031_v7 = vmax.f32 %v1011_v0, 0.0  ;;  %v1015_v9 = vadd.f32 %v1014_v5, %v942_v18  ;;  %v1016_v50 = vpop.f32.mrb[23].mxu1 }
 0x145   : > { %v1023_v6 = vmax.f32 %v1303_v63, 0.0  ;;  %v1307_v8 = vadd.f32 %v994_v4, %v849_v62  ;;  %v996_v45 = vpop.f32.mrb[7].mxu0  ;;  %v1032_v11 = vmax.f32 %v1013_v44, 0.0  ;;  %v1017_v47 = vadd.f32 %v1016_v50, %v944_v19 }
 0x146   : > { %v1024_v10 = vmax.f32 %v1305_v43, 0.0  ;;  %v1309_v12 = vadd.f32 %v996_v45, %v851_v3  ;;  %v1033_v13 = vmax.f32 %v1015_v9, 0.0 }
 0x147   : > { %v1025_v51 = vmax.f32 %v1307_v8, 0.0  ;;  %v1276_v15 = vpack.c.bf16 %v1032_v11, %v1031_v7  ;;  %v1034_v17 = vmax.f32 %v1017_v47, 0.0 }
 0x148   : > { %v1272_v14 = vpack.c.bf16 %v1024_v10, %v1023_v6  ;;  %v1026_v16 = vmax.f32 %v1309_v12, 0.0 }
 0x149   : > { %1089 = vst [vmem:[%s1838_s8 + $0x30] sm:$0xff] %v1276_v15  ;;  %v1277_v21 = vpack.c.bf16 %v1034_v17, %v1033_v13 }
 0x14a   : > { %1085 = vst [vmem:[%s1838_s8 + $0x10] sm:$0xff] %v1272_v14  ;;  %v1273_v20 = vpack.c.bf16 %v1026_v16, %v1025_v51 }
 0x14b   : > { %1090 = vst [vmem:[%s1838_s8 + $0x38] sm:$0xff] %v1277_v21 }
 0x14c   : > { %1086 = vst [vmem:[%s1838_s8 + $0x18] sm:$0xff] %v1273_v20 }
 0x14d PF: > { %s13_s12 = sadd.s32 1, %s1506_s12  }
 0x14e   : > { %p10_p4 = scmp.ge.s32.totalorder %s13_s12, 6  }
 0x150   :  { %12 = sbr.rel (!%p10_p4) target bundleno = 1 (0x1), region = 62 }

// kernel: flownet3d_forward.17
= control target key start
LH: loop header
LB: loop body
LE: loop exit
PB: predicated region body
PF: predicated region fallthrough
CT: control target
= control target key end

     0   :  { %s1454_s24 = smov 0   ;;  %s1456_s25 = smov 0   ;;  %s1648_s0 = inlined_call_operand.vmem [shape: bf16[16,256,8], index: 0, kind: input, shape index: {}]   ;;  %s1649_s1 = inlined_call_operand.vmem [shape: bf16[8,32], index: 1, kind: input, shape index: {}]   ;;  %s1650_s2 = inlined_call_operand.vmem [shape: bf16[32,32], index: 2, kind: input, shape index: {}]   ;;  %s1651_s3 = inlined_call_operand.vmem [shape: bf16[32,128], index: 3, kind: input, shape index: {}]   ;;  %s1652_s4 = inlined_call_operand.vmem [shape: f32[1,32], index: 4, kind: input, shape index: {}]   ;;  %s1653_s5 = inlined_call_operand.vmem [shape: f32[1,32], index: 5, kind: input, shape index: {}]   ;;  %s1654_s6 = inlined_call_operand.vmem [shape: f32[1,128], index: 6, kind: input, shape index: {}]   ;;  %s1655_s7 = inlined_call_operand.vmem [shape: bf16[256,128], index: 7, kind: output, shape index: {}]  }
   0x1   :  { %s1458_s26 = smov 0   ;;  %s1460_s27 = smov 0  }
   0x2   :  { %s1462_s28 = smov 0  }
   0x3 LB: > { %s26_s29 = sadd.s32 1, %s1404_s26  ;;  %s29_s30 = sadd.s32 1, %s1408_s27  ;;  %s1412_s28 = sphi %s1462_s28, %s17_s28   ;;  %s1408_s27 = sphi %s1460_s27, %s1659_s27   ;;  %s1404_s26 = sphi %s1458_s26, %s1658_s26   ;;  %s1400_s25 = sphi %s1456_s25, %s1657_s25   ;;  %s1396_s24 = sphi %s1454_s24, %s1656_s24  }
   0x4   : > { %p27_p0 = scmp.ge.s32.totalorder %s26_s29, 16  ;;  %p1102_p1 = scmp.ge.s32.totalorder %s1412_s28, 1 }
   0x5   : > { %p256_p2 = scmp.lt.s32.totalorder %s1412_s28, 33 }
   0x6   : > { %s1661_s29 = smov (%p27_p0, %s26_s29), 0  ;;  %s1663_s30 = smov (!%p27_p0, %s29_s30), %s1408_s27 }
   0x7   : > { %p257_p3 = pnand %p1102_p1, %p256_p2  ;;  %p31_p4 = scmp.ge.s32.totalorder %s1663_s30, 2 }
   0x8   : > { %v325_v0 = vld [vmem:[%s1649_s1] sm:$0xf] (!%p257_p3)  ;;  %vm398_vm0 = vcmask (!%p257_p3), 1043456   ;;  %s1103_s10 = sshll.u32 (!%p257_p3), %s1400_s25, 4  ;;  %p293_p5 = scmp.lt.s32.totalorder (!%p257_p3), %s1396_s24, 15  ;;  %vm373_vm1 = vcmask (!%p257_p3), 64512  }
   0x9   : > { %s1665_s30 = smov (%p31_p4, %s1663_s30), 0  ;;  %260 = sbr.rel (%p257_p3) target bundleno = 736 (0x2e0), region = 48 }
   0xa   : > { %1320 = vmatprep.subr.msk.bf16.mxu0 (!%p257_p3), %vm398_vm0, %v325_v0  ;;  %v400_v1 = vsel (!%p257_p3), %vm398_vm0, %v325_v0, 0  ;;  %p295_p6 = scmp.lt.s32.totalorder (!%p257_p3), %s1103_s10, 31  ;;  %1321 = vmatprep.subr.msk.bf16.mxu1 (!%p257_p3), %vm398_vm0, %v325_v0  ;;  %v1370_v2 = vld [vmem:[%s1650_s2] sm:$0xff] (!%p257_p3)   ;;  %v1371_v11 = vld [vmem:[%s1650_s2 + $0x8] sm:$0xff] (!%p257_p3)   ;;  %vm546_vm2 = vcmask (!%p257_p3), 261120   ;;  %p1147_p7 = scmp.ne.s32.totalorder (!%p257_p3), %s1396_s24, 0 }
   0xb   : > { %1261 = vmatpush3.bf16.msra.mxu0 (!%p257_p3), %v400_v1  ;;  %1319 = vmatpush3.bf16.msra.mxu1 (!%p257_p3), %v400_v1  ;;  %v1372_v12 = vld [vmem:[%s1651_s3] sm:$0xff] (!%p257_p3)  }
   0xc   : > { %1278 = vmatprep.subr.bf16.mxu1 (!%p257_p3), %v1370_v2  ;;  %1298 = vmatprep.subr.bf16.mxu0 (!%p257_p3), %v1372_v12  ;;  %v1108_v13 = vld [vmem:[%s1652_s4] ss:$0 sm:$0xff] (!%p257_p3) }
  0x10   : > { %s294_s11 = scalar_select %p293_p5, %s1396_s24, 15 }
  0x11   : > { %s1667_s10 = smov (!%p295_p6, %s1103_s10), 31 }
  0x12   : > { %s1104_s14 = sshll.u32 %s294_s11, 5  ;;  %s1107_s16 = sshll.u32 %s1667_s10, 2 }
  0x13   : > { %s298_s15 = sadd.s32 %s1104_s14, %s1667_s10  ;;  %s1497_s20 = scalar_lea.vmem %s1655_s7, %s1107_s16 }
  0x14   : > { %s1105_s17 = sshll.u32 %s298_s15, 2 }
  0x15   : > { %s300_s23 = scalar_lea.vmem %s1648_s0, %s1105_s17 }
  0x16   : > { %v1362_v3 = vld [vmem:[%s300_s23] sm:$0xff]   ;;  %v1363_v4 = vld [vmem:[%s300_s23 + $0x8] sm:$0xff]   ;;  %v1364_v5 = vld [vmem:[%s300_s23 + $0x10] sm:$0xff]  }
  0x17   : > { %1262 = vmatprep.mubr.msk.bf16.mxu0 %vm373_vm1, %v1362_v3  ;;  %v1366_v6 = vld [vmem:[%s300_s23 + $0x20] sm:$0xff]   ;;  %v1367_v7 = vld [vmem:[%s300_s23 + $0x28] sm:$0xff]   ;;  %v1368_v8 = vld [vmem:[%s300_s23 + $0x30] sm:$0xff]  }
  0x18   : > { %1263 = vmatmul.mubr.msk.bf16.vlgmr.msra.gmra.mrb[0].mxu0 %vm373_vm1, %v1363_v4  ;;  %1270 = vmatprep.mubr.msk.bf16.mxu1 %vm373_vm1, %v1366_v6  ;;  %v1365_v9 = vld [vmem:[%s300_s23 + $0x18] sm:$0xff]   ;;  %v1373_v6 = vld [vmem:[%s1651_s3 + $0x8] sm:$0xff]  }
  0x19   : > { %1266 = vmatprep.mubr.msk.bf16.mxu0 %vm373_vm1, %v1364_v5  ;;  %1271 = vmatmul.mubr.msk.bf16.vlgmr.msra.gmra.mrb[0].mxu1 %vm373_vm1, %v1367_v7  ;;  %v1369_v10 = vld [vmem:[%s300_s23 + $0x38] sm:$0xff]   ;;  %v1125_v7 = vld [vmem:[%s1653_s5] ss:$0 sm:$0xff] }
  0x1a   : > { %1274 = vmatprep.mubr.msk.bf16.mxu1 %vm373_vm1, %v1368_v8  ;;  %1279 = vmatpush3.bf16.msra.mxu1 %v1370_v2 }
  0x1b   : > { %1280 = vmatprep.subr.bf16.mxu1 %v1371_v11  ;;  %1299 = vmatpush3.bf16.msra.mxu0 %v1372_v12 }
  0x1c   : > { %1300 = vmatprep.subr.bf16.mxu0 %v1373_v6 }
  0x1e   : > { %1281 = vmatpush3.bf16.msra.mxu1 %v1371_v11 }
  0x1f   : > { %1301 = vmatpush3.bf16.msra.mxu0 %v1373_v6 }
  0x20   : > { %1267 = vmatmul.mubr.msk.bf16.gmra.mrb[4].mxu0 %vm373_vm1, %v1365_v9 }
  0x21   : > { %1275 = vmatmul.mubr.msk.bf16.gmra.mrb[4].mxu1 %vm373_vm1, %v1369_v10 }
  0xeb   : > { %v1264_v14 = vpop.f32.mrb[0].mxu0 }
  0xec   : > { %v445_v15 = vadd.f32 %v1264_v14, %v1108_v13  ;;  %v436_v16 = vpop.f32.mrb[1].mxu0  ;;  %v1272_v22 = vpop.f32.mrb[0].mxu1 }
  0xed   : > { %v437_v17 = vadd.f32 %v1108_v13, %v436_v16  ;;  %v1265_v18 = vpop.f32.mrb[2].mxu0  ;;  %v477_v25 = vadd.f32 %v1272_v22, %v1108_v13  ;;  %v468_v26 = vpop.f32.mrb[1].mxu1 }
  0xee   : > { %v448_v19 = vadd.f32 %v1265_v18, %v1108_v13  ;;  %v439_v20 = vpop.f32.mrb[3].mxu0  ;;  %v501_v23 = vmax.f32 %v445_v15, 0.0  ;;  %v469_v29 = vadd.f32 %v1108_v13, %v468_v26  ;;  %v1273_v30 = vpop.f32.mrb[2].mxu1 }
  0xef   : > { %v440_v21 = vadd.f32 %v1108_v13, %v439_v20  ;;  %v499_v27 = vmax.f32 %v437_v17, 0.0  ;;  %v509_v32 = vmax.f32 %v477_v25, 0.0  ;;  %v480_v33 = vadd.f32 %v1273_v30, %v1108_v13  ;;  %v471_v34 = vpop.f32.mrb[3].mxu1 }
  0xf0   : > { %v502_v24 = vmax.f32 %v448_v19, 0.0  ;;  %v507_v37 = vmax.f32 %v469_v29, 0.0  ;;  %v472_v38 = vadd.f32 %v1108_v13, %v471_v34 }
  0xf1   : > { %v500_v28 = vmax.f32 %v440_v21, 0.0  ;;  %v510_v41 = vmax.f32 %v480_v33, 0.0 }
  0xf2   : > { %v516_v31 = vpack.c.bf16 %v502_v24, %v501_v23  ;;  %v508_v44 = vmax.f32 %v472_v38, 0.0 }
  0xf3   : > { %v515_v35 = vpack.c.bf16 %v500_v28, %v499_v27  ;;  %v1268_v36 = vpop.f32.mrb[4].mxu0  ;;  %v520_v47 = vpack.c.bf16 %v510_v41, %v509_v32 }
  0xf4   : > { %v461_v39 = vadd.f32 %v1268_v36, %v1108_v13  ;;  %v452_v40 = vpop.f32.mrb[5].mxu0  ;;  %v519_v49 = vpack.c.bf16 %v508_v44, %v507_v37  ;;  %v1276_v50 = vpop.f32.mrb[4].mxu1 }
  0xf5   : > { %v453_v42 = vadd.f32 %v1108_v13, %v452_v40  ;;  %v1269_v43 = vpop.f32.mrb[6].mxu0  ;;  %1282 = vmatprep.mubr.msk.bf16.mxu1 %vm546_vm2, %v515_v35  ;;  %v493_v53 = vadd.f32 %v1276_v50, %v1108_v13  ;;  %v484_v54 = vpop.f32.mrb[5].mxu1 }
  0xf6   : > { %v464_v45 = vadd.f32 %v1269_v43, %v1108_v13  ;;  %v455_v46 = vpop.f32.mrb[7].mxu0  ;;  %1283 = vmatmul.mubr.msk.bf16.vlgmr.msra.gmra.mrb[8].mxu1 %vm546_vm2, %v516_v31  ;;  %v505_v51 = vmax.f32 %v461_v39, 0.0  ;;  %v485_v57 = vadd.f32 %v1108_v13, %v484_v54  ;;  %v1277_v58 = vpop.f32.mrb[6].mxu1 }
  0xf7   : > { %v456_v48 = vadd.f32 %v1108_v13, %v455_v46  ;;  %v503_v55 = vmax.f32 %v453_v42, 0.0  ;;  %v513_v60 = vmax.f32 %v493_v53, 0.0  ;;  %v496_v61 = vadd.f32 %v1277_v58, %v1108_v13  ;;  %v487_v62 = vpop.f32.mrb[7].mxu1 }
  0xf8   : > { %v506_v52 = vmax.f32 %v464_v45, 0.0  ;;  %v511_v0 = vmax.f32 %v485_v57, 0.0  ;;  %v488_v1 = vadd.f32 %v1108_v13, %v487_v62 }
  0xf9   : > { %v504_v56 = vmax.f32 %v456_v48, 0.0  ;;  %v514_v2 = vmax.f32 %v496_v61, 0.0 }
  0xfa   : > { %v518_v59 = vpack.c.bf16 %v506_v52, %v505_v51  ;;  %v512_v3 = vmax.f32 %v488_v1, 0.0 }
  0xfb   : > { %v517_v63 = vpack.c.bf16 %v504_v56, %v503_v55  ;;  %v522_v4 = vpack.c.bf16 %v514_v2, %v513_v60 }
  0xfc   : > { %v521_v5 = vpack.c.bf16 %v512_v3, %v511_v0  ;;  %v1136_v0 = vld [vmem:[%s1654_s6] ss:$0 sm:$0xff] }
  0xfd   : > { %1286 = vmatprep.mubr.msk.bf16.mxu1 %vm546_vm2, %v517_v63 }
  0xfe   : > { %1287 = vmatmul.mubr.msk.bf16.gmra.mrb[12].mxu1 %vm546_vm2, %v518_v59 }
  0xff   : > { %1290 = vmatprep.mubr.msk.bf16.mxu1 %vm546_vm2, %v519_v49 }
 0x106   : > { %1291 = vmatmul.mubr.msk.bf16.gmra.mrb[16].mxu1 %vm546_vm2, %v520_v47 }
 0x107   : > { %1294 = vmatprep.mubr.msk.bf16.mxu1 %vm546_vm2, %v521_v5 }
 0x10e   : > { %1295 = vmatmul.mubr.msk.bf16.gmra.mrb[20].mxu1 %vm546_vm2, %v522_v4 }
 0x1c9   : > { %v1284_v8 = vpop.f32.mrb[8].mxu1 }
 0x1ca   : > { %v614_v9 = vadd.f32 %v1284_v8, %v1125_v7  ;;  %v605_v10 = vpop.f32.mrb[9].mxu1 }
 0x1cb   : > { %v606_v11 = vadd.f32 %v1125_v7, %v605_v10  ;;  %v1285_v12 = vpop.f32.mrb[10].mxu1 }
 0x1cc   : > { %v617_v13 = vadd.f32 %v1285_v12, %v1125_v7  ;;  %v608_v14 = vpop.f32.mrb[11].mxu1  ;;  %v670_v16 = vmax.f32 %v614_v9, 0.0 }
 0x1cd   : > { %v609_v15 = vadd.f32 %v1125_v7, %v608_v14  ;;  %v668_v18 = vmax.f32 %v606_v11, 0.0 }
 0x1ce   : > { %v671_v17 = vmax.f32 %v617_v13, 0.0 }
 0x1cf   : > { %v669_v19 = vmax.f32 %v609_v15, 0.0 }
 0x1d0   : > { %v685_v20 = vpack.c.bf16 %v671_v17, %v670_v16 }
 0x1d1   : > { %v684_v21 = vpack.c.bf16 %v669_v19, %v668_v18  ;;  %v1288_v22 = vpop.f32.mrb[12].mxu1 }
 0x1d2   : > { %v630_v23 = vadd.f32 %v1288_v22, %v1125_v7  ;;  %v621_v24 = vpop.f32.mrb[13].mxu1 }
 0x1d3   : > { %v622_v25 = vadd.f32 %v1125_v7, %v621_v24  ;;  %v1289_v26 = vpop.f32.mrb[14].mxu1  ;;  %1302 = vmatprep.mubr.msk.bf16.mxu0 %vm546_vm2, %v684_v21 }
 0x1d4   : > { %v633_v27 = vadd.f32 %v1289_v26, %v1125_v7  ;;  %v624_v28 = vpop.f32.mrb[15].mxu1  ;;  %1303 = vmatmul.mubr.msk.bf16.vlgmr.msra.gmra.mrb[8].mxu0 %vm546_vm2, %v685_v20  ;;  %v674_v30 = vmax.f32 %v630_v23, 0.0 }
 0x1d5   : > { %v625_v29 = vadd.f32 %v1125_v7, %v624_v28  ;;  %v672_v32 = vmax.f32 %v622_v25, 0.0 }
 0x1d6   : > { %v675_v31 = vmax.f32 %v633_v27, 0.0 }
 0x1d7   : > { %v673_v33 = vmax.f32 %v625_v29, 0.0 }
 0x1d8   : > { %v687_v34 = vpack.c.bf16 %v675_v31, %v674_v30 }
 0x1d9   : > { %v686_v35 = vpack.c.bf16 %v673_v33, %v672_v32  ;;  %v1292_v36 = vpop.f32.mrb[16].mxu1 }
 0x1da   : > { %v646_v37 = vadd.f32 %v1292_v36, %v1125_v7  ;;  %v637_v38 = vpop.f32.mrb[17].mxu1 }
 0x1db   : > { %v638_v39 = vadd.f32 %v1125_v7, %v637_v38  ;;  %v1293_v40 = vpop.f32.mrb[18].mxu1  ;;  %1306 = vmatprep.mubr.msk.bf16.mxu0 %vm546_vm2, %v686_v35 }
 0x1dc   : > { %v649_v41 = vadd.f32 %v1293_v40, %v1125_v7  ;;  %v640_v42 = vpop.f32.mrb[19].mxu1  ;;  %1307 = vmatmul.mubr.msk.bf16.gmra.mrb[12].mxu0 %vm546_vm2, %v687_v34  ;;  %v678_v44 = vmax.f32 %v646_v37, 0.0 }
 0x1dd   : > { %v641_v43 = vadd.f32 %v1125_v7, %v640_v42  ;;  %v676_v46 = vmax.f32 %v638_v39, 0.0 }
 0x1de   : > { %v679_v45 = vmax.f32 %v649_v41, 0.0 }
 0x1df   : > { %v677_v47 = vmax.f32 %v641_v43, 0.0 }
 0x1e0   : > { %v689_v48 = vpack.c.bf16 %v679_v45, %v678_v44 }
 0x1e1   : > { %v688_v49 = vpack.c.bf16 %v677_v47, %v676_v46  ;;  %v1296_v50 = vpop.f32.mrb[20].mxu1 }
 0x1e2   : > { %v662_v51 = vadd.f32 %v1296_v50, %v1125_v7  ;;  %v653_v52 = vpop.f32.mrb[21].mxu1 }
 0x1e3   : > { %v654_v53 = vadd.f32 %v1125_v7, %v653_v52  ;;  %v1297_v54 = vpop.f32.mrb[22].mxu1  ;;  %1310 = vmatprep.mubr.msk.bf16.mxu0 %vm546_vm2, %v688_v49 }
 0x1e4   : > { %v665_v55 = vadd.f32 %v1297_v54, %v1125_v7  ;;  %v656_v56 = vpop.f32.mrb[23].mxu1  ;;  %1311 = vmatmul.mubr.msk.bf16.gmra.mrb[16].mxu0 %vm546_vm2, %v689_v48  ;;  %v682_v58 = vmax.f32 %v662_v51, 0.0 }
 0x1e5   : > { %v657_v57 = vadd.f32 %v1125_v7, %v656_v56  ;;  %v680_v60 = vmax.f32 %v654_v53, 0.0 }
 0x1e6   : > { %v683_v59 = vmax.f32 %v665_v55, 0.0 }
 0x1e7   : > { %v681_v61 = vmax.f32 %v657_v57, 0.0 }
 0x1e8   : > { %v691_v62 = vpack.c.bf16 %v683_v59, %v682_v58 }
 0x1e9   : > { %v690_v63 = vpack.c.bf16 %v681_v61, %v680_v60 }
 0x1eb   : > { %1314 = vmatprep.mubr.msk.bf16.mxu0 %vm546_vm2, %v690_v63 }
 0x1ec   : > { %1315 = vmatmul.mubr.msk.bf16.gmra.mrb[20].mxu0 %vm546_vm2, %v691_v62 }
 0x2a7   : > { %v1304_v1 = vpop.f32.mrb[8].mxu0 }
 0x2a8   : > { %v1544_v2 = vadd.f32 %v1304_v1, %v1136_v0  ;;  %v773_v3 = vpop.f32.mrb[9].mxu0 }
 0x2a9   : > { %v1546_v4 = vadd.f32 %v1136_v0, %v773_v3  ;;  %v1305_v5 = vpop.f32.mrb[10].mxu0 }
 0x2aa   : > { %v838_v6 = vmax.f32 %v1544_v2, 0.0  ;;  %v1549_v7 = vadd.f32 %v1305_v5, %v1136_v0  ;;  %v776_v8 = vpop.f32.mrb[11].mxu0 }
 0x2ab   : > { %v836_v9 = vmax.f32 %v1546_v4, 0.0  ;;  %v1552_v10 = vadd.f32 %v1136_v0, %v776_v8 }
 0x2ac   : > { %v839_v11 = vmax.f32 %v1549_v7, 0.0  ;;  %858 = vst [vmem:[#allocation2 + $0x10] sm:$0xff] (!%p1147_p7), %v838_v6 }
 0x2ad   : > { %v837_v12 = vmax.f32 %v1552_v10, 0.0  ;;  %856 = vst [vmem:[#allocation2] sm:$0xff] (!%p1147_p7), %v836_v9 }
 0x2ae   : > { %859 = vst [vmem:[#allocation2 + $0x18] sm:$0xff] (!%p1147_p7), %v839_v11 }
 0x2af   : > { %v1308_v13 = vpop.f32.mrb[12].mxu0  ;;  %857 = vst [vmem:[#allocation2 + $0x8] sm:$0xff] (!%p1147_p7), %v837_v12 }
 0x2b0   : > { %v1556_v14 = vadd.f32 %v1308_v13, %v1136_v0  ;;  %v789_v15 = vpop.f32.mrb[13].mxu0 }
 0x2b1   : > { %v1558_v16 = vadd.f32 %v1136_v0, %v789_v15  ;;  %v1309_v17 = vpop.f32.mrb[14].mxu0 }
 0x2b2   : > { %v842_v18 = vmax.f32 %v1556_v14, 0.0  ;;  %v1561_v19 = vadd.f32 %v1309_v17, %v1136_v0  ;;  %v792_v20 = vpop.f32.mrb[15].mxu0 }
 0x2b3   : > { %v840_v21 = vmax.f32 %v1558_v16, 0.0  ;;  %v793_v22 = vadd.f32 %v1136_v0, %v792_v20 }
 0x2b4   : > { %v843_v23 = vmax.f32 %v1561_v19, 0.0  ;;  %862 = vst [vmem:[#allocation2 + $0x30] sm:$0xff] (!%p1147_p7), %v842_v18 }
 0x2b5   : > { %v841_v24 = vmax.f32 %v793_v22, 0.0  ;;  %860 = vst [vmem:[#allocation2 + $0x20] sm:$0xff] (!%p1147_p7), %v840_v21 }
 0x2b6   : > { %863 = vst [vmem:[#allocation2 + $0x38] sm:$0xff] (!%p1147_p7), %v843_v23 }
 0x2b7   : > { %v1312_v25 = vpop.f32.mrb[16].mxu0  ;;  %861 = vst [vmem:[#allocation2 + $0x28] sm:$0xff] (!%p1147_p7), %v841_v24 }
 0x2b8   : > { %v1565_v26 = vadd.f32 %v1312_v25, %v1136_v0  ;;  %v805_v27 = vpop.f32.mrb[17].mxu0 }
 0x2b9   : > { %v1567_v28 = vadd.f32 %v1136_v0, %v805_v27  ;;  %v1313_v29 = vpop.f32.mrb[18].mxu0 }
 0x2ba   : > { %v846_v30 = vmax.f32 %v1565_v26, 0.0  ;;  %v1570_v31 = vadd.f32 %v1313_v29, %v1136_v0  ;;  %v808_v32 = vpop.f32.mrb[19].mxu0 }
 0x2bb   : > { %v844_v33 = vmax.f32 %v1567_v28, 0.0  ;;  %v1573_v34 = vadd.f32 %v1136_v0, %v808_v32 }
 0x2bc   : > { %v847_v35 = vmax.f32 %v1570_v31, 0.0  ;;  %866 = vst [vmem:[#allocation2 + $0x50] sm:$0xff] (!%p1147_p7), %v846_v30 }
 0x2bd   : > { %v845_v36 = vmax.f32 %v1573_v34, 0.0  ;;  %864 = vst [vmem:[#allocation2 + $0x40] sm:$0xff] (!%p1147_p7), %v844_v33 }
 0x2be   : > { %867 = vst [vmem:[#allocation2 + $0x58] sm:$0xff] (!%p1147_p7), %v847_v35 }
 0x2bf   : > { %v1316_v37 = vpop.f32.mrb[20].mxu0  ;;  %855 = sbr.rel (%p1147_p7) target bundleno = 712 (0x2c8), region = 52  ;;  %865 = vst [vmem:[#allocation2 + $0x48] sm:$0xff] (!%p1147_p7), %v845_v36 }
 0x2c0   : > { %v1577_v38 = vadd.f32 %v1316_v37, %v1136_v0  ;;  %v821_v39 = vpop.f32.mrb[21].mxu0 }
 0x2c1   : > { %v1579_v40 = vadd.f32 %v1136_v0, %v821_v39  ;;  %v1317_v41 = vpop.f32.mrb[22].mxu0 }
 0x2c2   : > { %v850_v42 = vmax.f32 %v1577_v38, 0.0  ;;  %v1582_v43 = vadd.f32 %v1317_v41, %v1136_v0  ;;  %v824_v44 = vpop.f32.mrb[23].mxu0 }
 0x2c3   : > { %v848_v45 = vmax.f32 %v1579_v40, 0.0  ;;  %v825_v46 = vadd.f32 %v1136_v0, %v824_v44 }
 0x2c4   : > { %v851_v47 = vmax.f32 %v1582_v43, 0.0  ;;  %870 = vst [vmem:[#allocation2 + $0x70] sm:$0xff] (!%p1147_p7), %v850_v42 }
 0x2c5   : > { %v849_v48 = vmax.f32 %v825_v46, 0.0  ;;  %868 = vst [vmem:[#allocation2 + $0x60] sm:$0xff] (!%p1147_p7), %v848_v45 }
 0x2c6   : > { %871 = vst [vmem:[#allocation2 + $0x78] sm:$0xff] %v851_v47 }
 0x2c7   : > { %869 = vst [vmem:[#allocation2 + $0x68] sm:$0xff] %v849_v48 }
 0x2c8 PF: > { %p1148_p8 = scmp.le.s32.totalorder %s1396_s24, 0 }
 0x2c9   : > { %v876_v49 = vld [vmem:[#allocation2] sm:$0xff] (!%p1148_p8)  ;;  %v877_v50 = vld [vmem:[#allocation2 + $0x8] sm:$0xff] (!%p1148_p8)  ;;  %v878_v51 = vld [vmem:[#allocation2 + $0x10] sm:$0xff] (!%p1148_p8) }
 0x2ca   : > { %875 = sbr.rel (%p1148_p8) target bundleno = 724 (0x2d4), region = 56  ;;  %v892_v52 = vmax.f32 (!%p1148_p8), %v876_v49, %v836_v9  ;;  %v893_v53 = vmax.f32 (!%p1148_p8), %v877_v50, %v837_v12  ;;  %v894_v54 = vmax.f32 (!%p1148_p8), %v878_v51, %v838_v6  ;;  %v879_v55 = vld [vmem:[#allocation2 + $0x18] sm:$0xff] (!%p1148_p8)  ;;  %v880_v56 = vld [vmem:[#allocation2 + $0x20] sm:$0xff] (!%p1148_p8)  ;;  %v881_v57 = vld [vmem:[#allocation2 + $0x28] sm:$0xff] (!%p1148_p8) }
 0x2cb   : > { %v895_v58 = vmax.f32 (!%p1148_p8), %v879_v55, %v839_v11  ;;  %v896_v59 = vmax.f32 (!%p1148_p8), %v880_v56, %v840_v21  ;;  %v897_v60 = vmax.f32 (!%p1148_p8), %v881_v57, %v841_v24  ;;  %v882_v61 = vld [vmem:[#allocation2 + $0x30] sm:$0xff] (!%p1148_p8)  ;;  %v883_v62 = vld [vmem:[#allocation2 + $0x38] sm:$0xff] (!%p1148_p8)  ;;  %v884_v63 = vld [vmem:[#allocation2 + $0x40] sm:$0xff] (!%p1148_p8) }
 0x2cc   : > { %908 = vst [vmem:[#allocation2] sm:$0xff] (!%p1148_p8), %v892_v52  ;;  %909 = vst [vmem:[#allocation2 + $0x8] sm:$0xff] (!%p1148_p8), %v893_v53  ;;  %v898_v0 = vmax.f32 (!%p1148_p8), %v882_v61, %v842_v18  ;;  %v899_v1 = vmax.f32 (!%p1148_p8), %v883_v62, %v843_v23  ;;  %v900_v2 = vmax.f32 (!%p1148_p8), %v884_v63, %v844_v33  ;;  %v885_v3 = vld [vmem:[#allocation2 + $0x48] sm:$0xff] (!%p1148_p8)  ;;  %v886_v4 = vld [vmem:[#allocation2 + $0x50] sm:$0xff] (!%p1148_p8) }
 0x2cd   : > { %910 = vst [vmem:[#allocation2 + $0x10] sm:$0xff] (!%p1148_p8), %v894_v54  ;;  %v887_v5 = vld [vmem:[#allocation2 + $0x58] sm:$0xff] (!%p1148_p8)  ;;  %911 = vst [vmem:[#allocation2 + $0x18] sm:$0xff] (!%p1148_p8), %v895_v58  ;;  %v901_v6 = vmax.f32 (!%p1148_p8), %v885_v3, %v845_v36  ;;  %v902_v7 = vmax.f32 (!%p1148_p8), %v886_v4, %v846_v30  ;;  %v890_v11 = vld [vmem:[#allocation2 + $0x70] sm:$0xff] (!%p1148_p8) }
 0x2ce   : > { %912 = vst [vmem:[#allocation2 + $0x20] sm:$0xff] (!%p1148_p8), %v896_v59  ;;  %913 = vst [vmem:[#allocation2 + $0x28] sm:$0xff] (!%p1148_p8), %v897_v60  ;;  %v903_v8 = vmax.f32 (!%p1148_p8), %v887_v5, %v847_v35  ;;  %v888_v9 = vld [vmem:[#allocation2 + $0x60] sm:$0xff] (!%p1148_p8)  ;;  %v889_v10 = vld [vmem:[#allocation2 + $0x68] sm:$0xff] (!%p1148_p8)  ;;  %v906_v14 = vmax.f32 (!%p1148_p8), %v890_v11, %v850_v42 }
 0x2cf   : > { %914 = vst [vmem:[#allocation2 + $0x30] sm:$0xff] (!%p1148_p8), %v898_v0  ;;  %915 = vst [vmem:[#allocation2 + $0x38] sm:$0xff] (!%p1148_p8), %v899_v1  ;;  %v904_v12 = vmax.f32 (!%p1148_p8), %v888_v9, %v848_v45  ;;  %v905_v13 = vmax.f32 (!%p1148_p8), %v889_v10, %v849_v48  ;;  %v891_v15 = vld [vmem:[#allocation2 + $0x78] sm:$0xff] (!%p1148_p8) }
 0x2d0   : > { %916 = vst [vmem:[#allocation2 + $0x40] sm:$0xff] (!%p1148_p8), %v900_v2  ;;  %917 = vst [vmem:[#allocation2 + $0x48] sm:$0xff] (!%p1148_p8), %v901_v6  ;;  %v907_v16 = vmax.f32 (!%p1148_p8), %v891_v15, %v851_v47 }
 0x2d1   : > { %918 = vst [vmem:[#allocation2 + $0x50] sm:$0xff] %v902_v7  ;;  %919 = vst [vmem:[#allocation2 + $0x58] sm:$0xff] %v903_v8 }
 0x2d2   : > { %920 = vst [vmem:[#allocation2 + $0x60] sm:$0xff] %v904_v12  ;;  %921 = vst [vmem:[#allocation2 + $0x68] sm:$0xff] %v905_v13 }
 0x2d3   : > { %922 = vst [vmem:[#allocation2 + $0x70] sm:$0xff] %v906_v14  ;;  %923 = vst [vmem:[#allocation2 + $0x78] sm:$0xff] %v907_v16 }
 0x2d4 PF: > { %p1149_p9 = scmp.ne.s32.totalorder %s1396_s24, 15 }
 0x2d6   : > { %927 = sbr.rel (%p1149_p9) target bundleno = 736 (0x2e0), region = 60  ;;  %v928_v17 = vld [vmem:[#allocation2] sm:$0xff] (!%p1149_p9)  ;;  %v929_v18 = vld [vmem:[#allocation2 + $0x8] sm:$0xff] (!%p1149_p9) }
 0x2d7   : > { %v930_v19 = vld [vmem:[#allocation2 + $0x10] sm:$0xff] (!%p1149_p9)  ;;  %v1187_v20 = vpack.c.bf16 (!%p1149_p9), %v929_v18, %v928_v17  ;;  %v931_v21 = vld [vmem:[#allocation2 + $0x18] sm:$0xff] (!%p1149_p9) }
 0x2d8   : > { %v932_v22 = vld [vmem:[#allocation2 + $0x20] sm:$0xff] (!%p1149_p9)  ;;  %v933_v23 = vld [vmem:[#allocation2 + $0x28] sm:$0xff] (!%p1149_p9)  ;;  %v1192_v24 = vpack.c.bf16 (!%p1149_p9), %v931_v21, %v930_v19 }
 0x2d9   : > { %v1197_v25 = vpack.c.bf16 (!%p1149_p9), %v933_v23, %v932_v22  ;;  %v934_v26 = vld [vmem:[#allocation2 + $0x30] sm:$0xff] (!%p1149_p9)  ;;  %v935_v27 = vld [vmem:[#allocation2 + $0x38] sm:$0xff] (!%p1149_p9)  ;;  %1188 = vst [vmem:[%s1497_s20] sm:$0xff] (!%p1149_p9), %v1187_v20   ;;  %v940_v35 = vld [vmem:[#allocation2 + $0x60] sm:$0xff] (!%p1149_p9) }
 0x2da   : > { %v936_v28 = vld [vmem:[#allocation2 + $0x40] sm:$0xff] (!%p1149_p9)  ;;  %v1202_v29 = vpack.c.bf16 (!%p1149_p9), %v935_v27, %v934_v26  ;;  %v937_v30 = vld [vmem:[#allocation2 + $0x48] sm:$0xff] (!%p1149_p9)  ;;  %1224 = vst [vmem:[%s1497_s20 + $0x8] sm:$0xff] (!%p1149_p9), %v1192_v24   ;;  %v942_v37 = vld [vmem:[#allocation2 + $0x70] sm:$0xff] (!%p1149_p9) }
 0x2db   : > { %v938_v31 = vld [vmem:[#allocation2 + $0x50] sm:$0xff] (!%p1149_p9)  ;;  %v939_v32 = vld [vmem:[#allocation2 + $0x58] sm:$0xff] (!%p1149_p9)  ;;  %1225 = vst [vmem:[%s1497_s20 + $0x10] sm:$0xff] (!%p1149_p9), %v1197_v25   ;;  %v1207_v33 = vpack.c.bf16 (!%p1149_p9), %v937_v30, %v936_v28  ;;  %v941_v36 = vld [vmem:[#allocation2 + $0x68] sm:$0xff] (!%p1149_p9) }
 0x2dc   : > { %v1212_v34 = vpack.c.bf16 (!%p1149_p9), %v939_v32, %v938_v31  ;;  %1226 = vst [vmem:[%s1497_s20 + $0x18] sm:$0xff] (!%p1149_p9), %v1202_v29   ;;  %v1217_v38 = vpack.c.bf16 (!%p1149_p9), %v941_v36, %v940_v35  ;;  %v943_v39 = vld [vmem:[#allocation2 + $0x78] sm:$0xff] (!%p1149_p9) }
 0x2dd   : > { %1227 = vst [vmem:[%s1497_s20 + $0x20] sm:$0xff] %v1207_v33   ;;  %v1222_v40 = vpack.c.bf16 %v943_v39, %v942_v37 }
 0x2de   : > { %1228 = vst [vmem:[%s1497_s20 + $0x28] sm:$0xff] %v1212_v34   ;;  %1229 = vst [vmem:[%s1497_s20 + $0x30] sm:$0xff] %v1217_v38  }
 0x2df   : > { %1230 = vst [vmem:[%s1497_s20 + $0x38] sm:$0xff] %v1222_v40  }
 0x2e0 PF: > { %s17_s28 = sadd.s32 1, %s1412_s28   ;;  %s1656_s24 = smov %s1404_s26 }
 0x2e1   : > { %p14_p10 = scmp.ge.s32.totalorder %s17_s28, 34   ;;  %s1657_s25 = smov %s1408_s27 }
 0x2e2   : > { %s1658_s26 = smov %s1661_s29  ;;  %s1659_s27 = smov %s1665_s30 }
 0x2e3   :  { %16 = sbr.rel (!%p14_p10) target bundleno = 3 (0x3), region = 90 }

// kernel: flownet3d_forward.29
= control target key start
LH: loop header
LB: loop body
LE: loop exit
PB: predicated region body
PF: predicated region fallthrough
CT: control target
= control target key end

     0   :  { %s1192_s12 = smov 0   ;;  %s1438_s0 = inlined_call_operand.vmem [shape: bf16[256,448], index: 0, kind: input, shape index: {}]   ;;  %s1439_s1 = inlined_call_operand.vmem [shape: bf16[448,256], index: 1, kind: input, shape index: {}]   ;;  %s1440_s2 = inlined_call_operand.vmem [shape: f32[1,256], index: 2, kind: input, shape index: {}]   ;;  %s1441_s3 = inlined_call_operand.vmem [shape: bf16[256,256], index: 3, kind: output, shape index: {}]  }
   0x1 LB: > { %s909_s13 = sadd.s32 4294967295, %s1170_s12   ;;  %p913_p0 = scmp.ge.s32.totalorder %s1170_s12, 1  ;;  %s1170_s12 = sphi %s1192_s12, %s13_s12  }
   0x2   : > { %p139_p1 = scmp.lt.s32.totalorder %s1170_s12, 5 }
   0x4   : > { %p140_p2 = pnand %p913_p0, %p139_p1 }
   0x5   : > { %v1056_v0 = vld [vmem:[%s1439_s1 + $0x4] ss:$8 sps:$4 sm:$0xff] (!%p140_p2)   ;;  %v1058_v1 = vld [vmem:[%s1439_s1] ss:$8 sps:$4 sm:$0xff] (!%p140_p2)   ;;  %v1059_v2 = vld [vmem:[%s1439_s1 + $0x14] ss:$8 sps:$4 sm:$0xff] (!%p140_p2)  }
   0x6   : > { %143 = sbr.rel (%p140_p2) target bundleno = 318 (0x13e), region = 32  ;;  %633 = vmatprep.subr.bf16.mxu1 (!%p140_p2), %v1056_v0  ;;  %v1061_v3 = vld [vmem:[%s1439_s1 + $0x10] ss:$8 sps:$4 sm:$0xff] (!%p140_p2)   ;;  %v1062_v4 = vld [vmem:[%s1439_s1 + $0x24] ss:$8 sps:$4 sm:$0xff] (!%p140_p2)   ;;  %s914_s8 = sshll.u32 (!%p140_p2), %s909_s13, 3 }
   0x7   : > { %634 = vmatpush1.bf16.msra.mxu1 (!%p140_p2), %v1058_v1  ;;  %v1068_v5 = vld [vmem:[%s1439_s1 + $0x104] ss:$8 sps:$4 sm:$0xff] (!%p140_p2)   ;;  %v1064_v6 = vld [vmem:[%s1439_s1 + $0x20] ss:$8 sps:$4 sm:$0xff] (!%p140_p2)   ;;  %v1065_v7 = vld [vmem:[%s1439_s1 + $0x34] ss:$8 sps:$4 sm:$0xff] (!%p140_p2)  }
   0x8   : > { %635 = vmatprep.subr.bf16.mxu1 (!%p140_p2), %v1059_v2  ;;  %v1072_v8 = vld [vmem:[%s1439_s1 + $0x100] ss:$8 sps:$4 sm:$0xff] (!%p140_p2)   ;;  %706 = vmatprep.subr.bf16.mxu0 (!%p140_p2), %v1068_v5  ;;  %v1074_v9 = vld [vmem:[%s1439_s1 + $0x114] ss:$8 sps:$4 sm:$0xff] (!%p140_p2)   ;;  %v1067_v10 = vld [vmem:[%s1439_s1 + $0x30] ss:$8 sps:$4 sm:$0xff] (!%p140_p2)  }
   0x9   : > { %707 = vmatpush1.bf16.msra.mxu0 (!%p140_p2), %v1072_v8  ;;  %v1078_v11 = vld [vmem:[%s1439_s1 + $0x110] ss:$8 sps:$4 sm:$0xff] (!%p140_p2)   ;;  %v1080_v12 = vld [vmem:[%s1439_s1 + $0x124] ss:$8 sps:$4 sm:$0xff] (!%p140_p2)   ;;  %v1084_v14 = vld [vmem:[%s1439_s1 + $0x120] ss:$8 sps:$4 sm:$0xff] (!%p140_p2)   ;;  %v254_v8 = vlaneseq (!%p140_p2) }
   0xa   : > { %708 = vmatprep.subr.bf16.mxu0 (!%p140_p2), %v1074_v9  ;;  %v1070_v13 = vld [vmem:[%s1439_s1 + $0x44] ss:$8 sps:$4 sm:$0xff] (!%p140_p2)   ;;  %v1086_v15 = vld [vmem:[%s1439_s1 + $0x134] ss:$8 sps:$4 sm:$0xff] (!%p140_p2)   ;;  %v1073_v16 = vld [vmem:[%s1439_s1 + $0x40] ss:$8 sps:$4 sm:$0xff] (!%p140_p2)  }
   0xb   : > { %636 = vmatpush1.bf16.msra.mxu1 (!%p140_p2), %v1061_v3  ;;  %v1076_v17 = vld [vmem:[%s1439_s1 + $0x54] ss:$8 sps:$4 sm:$0xff] (!%p140_p2)   ;;  %v1090_v18 = vld [vmem:[%s1439_s1 + $0x130] ss:$8 sps:$4 sm:$0xff] (!%p140_p2)   ;;  %v1092_v19 = vld [vmem:[%s1439_s1 + $0x144] ss:$8 sps:$4 sm:$0xff] (!%p140_p2)  }
   0xc   : > { %637 = vmatprep.subr.bf16.mxu1 (!%p140_p2), %v1062_v4  ;;  %v1079_v20 = vld [vmem:[%s1439_s1 + $0x50] ss:$8 sps:$4 sm:$0xff] (!%p140_p2)   ;;  %v1082_v21 = vld [vmem:[%s1439_s1 + $0x64] ss:$8 sps:$4 sm:$0xff] (!%p140_p2)   ;;  %v1096_v22 = vld [vmem:[%s1439_s1 + $0x140] ss:$8 sps:$4 sm:$0xff] (!%p140_p2)  }
   0xd   : > { %709 = vmatpush1.bf16.msra.mxu0 %v1078_v11  ;;  %v1098_v23 = vld [vmem:[%s1439_s1 + $0x154] ss:$8 sps:$4 sm:$0xff]   ;;  %v1085_v24 = vld [vmem:[%s1439_s1 + $0x60] ss:$8 sps:$4 sm:$0xff]   ;;  %p166_p3 = scmp.lt.s32.totalorder %s914_s8, 31  ;;  %vm620_vm0 = vcmask 523264  }
   0xe   : > { %710 = vmatprep.subr.bf16.mxu0 %v1080_v12  ;;  %v1088_v25 = vld [vmem:[%s1439_s1 + $0x74] ss:$8 sps:$4 sm:$0xff]   ;;  %v1102_v26 = vld [vmem:[%s1439_s1 + $0x150] ss:$8 sps:$4 sm:$0xff]   ;;  %v1104_v27 = vld [vmem:[%s1439_s1 + $0x164] ss:$8 sps:$4 sm:$0xff]  }
   0xf   : > { %638 = vmatpush1.bf16.msra.mxu1 %v1064_v6  ;;  %v1091_v28 = vld [vmem:[%s1439_s1 + $0x70] ss:$8 sps:$4 sm:$0xff]   ;;  %v1094_v29 = vld [vmem:[%s1439_s1 + $0x84] ss:$8 sps:$4 sm:$0xff]   ;;  %s1443_s8 = smov (!%p166_p3, %s914_s8), 31  ;;  %v255_v9 = vshrl.u32 %v254_v8, 7 }
  0x10   : > { %639 = vmatprep.subr.bf16.mxu1 %v1065_v7  ;;  %v1108_v30 = vld [vmem:[%s1439_s1 + $0x160] ss:$8 sps:$4 sm:$0xff]   ;;  %v1110_v31 = vld [vmem:[%s1439_s1 + $0x174] ss:$8 sps:$4 sm:$0xff]   ;;  %s1006_s5 = sshll.u32 %s1443_s8, 4 }
  0x11   : > { %711 = vmatpush1.bf16.msra.mxu0 %v1084_v14  ;;  %v1097_v32 = vld [vmem:[%s1439_s1 + $0x80] ss:$8 sps:$4 sm:$0xff]   ;;  %v1100_v33 = vld [vmem:[%s1439_s1 + $0x94] ss:$8 sps:$4 sm:$0xff]   ;;  %v1114_v34 = vld [vmem:[%s1439_s1 + $0x170] ss:$8 sps:$4 sm:$0xff]   ;;  %s1319_s17 = scalar_lea.vmem %s1438_s0, %s1006_s5 }
  0x12   : > { %712 = vmatprep.subr.bf16.mxu0 %v1086_v15  ;;  %v1116_v35 = vld [vmem:[%s1439_s1 + $0x184] ss:$8 sps:$4 sm:$0xff]   ;;  %v1103_v36 = vld [vmem:[%s1439_s1 + $0x90] ss:$8 sps:$4 sm:$0xff]   ;;  %v1120_v38 = vld [vmem:[%s1439_s1 + $0x180] ss:$8 sps:$4 sm:$0xff]  }
  0x13   : > { %640 = vmatpush1.bf16.msra.mxu1 %v1067_v10  ;;  %v1106_v37 = vld [vmem:[%s1439_s1 + $0xa4] ss:$8 sps:$4 sm:$0xff]   ;;  %v1122_v39 = vld [vmem:[%s1439_s1 + $0x194] ss:$8 sps:$4 sm:$0xff]   ;;  %v1109_v41 = vld [vmem:[%s1439_s1 + $0xa0] ss:$8 sps:$4 sm:$0xff]  }
  0x14   : > { %641 = vmatprep.subr.bf16.mxu1 %v1070_v13  ;;  %v1142_v40 = vld [vmem:[%s1319_s17 + $0xc] ss:$16 sps:$4 sm:$0xff]   ;;  %v1145_v42 = vld [vmem:[%s1319_s17 + $0x4] ss:$16 sps:$4 sm:$0xff]   ;;  %v1126_v44 = vld [vmem:[%s1439_s1 + $0x190] ss:$8 sps:$4 sm:$0xff]  }
  0x15   : > { %713 = vmatpush1.bf16.msra.mxu0 %v1090_v18  ;;  %v1112_v43 = vld [vmem:[%s1439_s1 + $0xb4] ss:$8 sps:$4 sm:$0xff]   ;;  %992 = vmatprep.mubr.msk.bf16.mxu0 %vm620_vm0, %v1142_v40  ;;  %v1128_v45 = vld [vmem:[%s1439_s1 + $0x1a4] ss:$8 sps:$4 sm:$0xff]   ;;  %v1115_v46 = vld [vmem:[%s1439_s1 + $0xb0] ss:$8 sps:$4 sm:$0xff]  }
  0x16   : > { %714 = vmatprep.subr.bf16.mxu0 %v1092_v19  ;;  %665 = vmatprep.mubr.bf16.mxu1 %v1145_v42  ;;  %v1118_v47 = vld [vmem:[%s1439_s1 + $0xc4] ss:$8 sps:$4 sm:$0xff]   ;;  %v1132_v48 = vld [vmem:[%s1439_s1 + $0x1a0] ss:$8 sps:$4 sm:$0xff]   ;;  %v1134_v49 = vld [vmem:[%s1439_s1 + $0x1b4] ss:$8 sps:$4 sm:$0xff]  }
  0x17   : > { %642 = vmatpush1.bf16.msra.mxu1 %v1073_v16  ;;  %v1121_v50 = vld [vmem:[%s1439_s1 + $0xc0] ss:$8 sps:$4 sm:$0xff]   ;;  %v1124_v51 = vld [vmem:[%s1439_s1 + $0xd4] ss:$8 sps:$4 sm:$0xff]   ;;  %v1138_v52 = vld [vmem:[%s1439_s1 + $0x1b0] ss:$8 sps:$4 sm:$0xff]  }
  0x18   : > { %643 = vmatprep.subr.bf16.mxu1 %v1076_v17  ;;  %v1127_v53 = vld [vmem:[%s1439_s1 + $0xd0] ss:$8 sps:$4 sm:$0xff]   ;;  %v1130_v54 = vld [vmem:[%s1439_s1 + $0xe4] ss:$8 sps:$4 sm:$0xff]   ;;  %v1133_v57 = vld [vmem:[%s1439_s1 + $0xe0] ss:$8 sps:$4 sm:$0xff]  }
  0x19   : > { %715 = vmatpush1.bf16.msra.mxu0 %v1096_v22  ;;  %v1140_v55 = vld [vmem:[%s1319_s17 + $0x8] ss:$16 sps:$4 sm:$0xff]   ;;  %v1146_v56 = vld [vmem:[%s1319_s17 + $0x2c] ss:$16 sps:$4 sm:$0xff]   ;;  %v1143_v62 = vld [vmem:[%s1319_s17] ss:$16 sps:$4 sm:$0xff]  }
  0x1a   : > { %716 = vmatprep.subr.bf16.mxu0 %v1098_v23  ;;  %v1136_v58 = vld [vmem:[%s1439_s1 + $0xf4] ss:$8 sps:$4 sm:$0xff]   ;;  %v1139_v59 = vld [vmem:[%s1439_s1 + $0xf0] ss:$8 sps:$4 sm:$0xff]   ;;  %v256_v13 = vsub.s32 0, %v255_v9  ;;  %v260_v16 = vsub.s32 1, %v255_v9 }
  0x1b   : > { %644 = vmatpush1.bf16.msra.mxu1 %v1079_v20  ;;  %v1150_v60 = vld [vmem:[%s1319_s17 + $0x28] ss:$16 sps:$4 sm:$0xff]   ;;  %v1152_v61 = vld [vmem:[%s1319_s17 + $0x4c] ss:$16 sps:$4 sm:$0xff]   ;;  %v1148_v63 = vld [vmem:[%s1319_s17 + $0x24] ss:$16 sps:$4 sm:$0xff]  }
  0x1c   : > { %645 = vmatprep.subr.bf16.mxu1 %v1082_v21  ;;  %v1156_v0 = vld [vmem:[%s1319_s17 + $0x48] ss:$16 sps:$4 sm:$0xff]   ;;  %v1158_v1 = vld [vmem:[%s1319_s17 + $0x6c] ss:$16 sps:$4 sm:$0xff]   ;;  %v1151_v2 = vld [vmem:[%s1319_s17 + $0x20] ss:$16 sps:$4 sm:$0xff]  }
  0x1d   : > { %717 = vmatpush1.bf16.msra.mxu0 %v1102_v26  ;;  %v1154_v3 = vld [vmem:[%s1319_s17 + $0x44] ss:$16 sps:$4 sm:$0xff]   ;;  %v1162_v4 = vld [vmem:[%s1319_s17 + $0x68] ss:$16 sps:$4 sm:$0xff]   ;;  %v1157_v5 = vld [vmem:[%s1319_s17 + $0x40] ss:$16 sps:$4 sm:$0xff]  }
  0x1e   : > { %718 = vmatprep.subr.bf16.mxu0 %v1104_v27  ;;  %v1160_v6 = vld [vmem:[%s1319_s17 + $0x64] ss:$16 sps:$4 sm:$0xff]   ;;  %v1163_v7 = vld [vmem:[%s1319_s17 + $0x60] ss:$16 sps:$4 sm:$0xff]   ;;  %s1007_s17 = sshll.u32 %s1443_s8, 3 }
  0x1f   : > { %646 = vmatpush1.bf16.msra.mxu1 %v1085_v24  ;;  %v252_v15 = vld [vmem:[%s1440_s2] sm:$0x3]  ;;  %s1413_s9 = scalar_lea.vmem %s1441_s3, %s1007_s17 }
  0x20   : > { %647 = vmatprep.subr.bf16.mxu1 %v1088_v25  ;;  %v1401_v17 = vrot.slane %v252_v15, %v256_v13  ;;  %v1403_v18 = vrot.slane %v252_v15, %v260_v16 }
  0x21   : > { %719 = vmatpush1.bf16.msra.mxu0 %v1108_v30 }
  0x22   : > { %720 = vmatprep.subr.bf16.mxu0 %v1110_v31 }
  0x23   : > { %648 = vmatpush1.bf16.msra.mxu1 %v1091_v28 }
  0x24   : > { %649 = vmatprep.subr.bf16.mxu1 %v1094_v29 }
  0x25   : > { %721 = vmatpush1.bf16.msra.mxu0 %v1114_v34 }
  0x26   : > { %722 = vmatprep.subr.bf16.mxu0 %v1116_v35 }
  0x27   : > { %650 = vmatpush1.bf16.msra.mxu1 %v1097_v32 }
  0x28   : > { %651 = vmatprep.subr.bf16.mxu1 %v1100_v33 }
  0x29   : > { %723 = vmatpush1.bf16.msra.mxu0 %v1120_v38 }
  0x2a   : > { %724 = vmatprep.subr.bf16.mxu0 %v1122_v39 }
  0x2b   : > { %652 = vmatpush1.bf16.msra.mxu1 %v1103_v36 }
  0x2c   : > { %653 = vmatprep.subr.bf16.mxu1 %v1106_v37 }
  0x2d   : > { %725 = vmatpush1.bf16.msra.mxu0 %v1126_v44 }
  0x2e   : > { %726 = vmatprep.subr.bf16.mxu0 %v1128_v45 }
  0x2f   : > { %654 = vmatpush1.bf16.msra.mxu1 %v1109_v41 }
  0x30   : > { %655 = vmatprep.subr.bf16.mxu1 %v1112_v43 }
  0x31   : > { %727 = vmatpush1.bf16.msra.mxu0 %v1132_v48 }
  0x32   : > { %728 = vmatprep.subr.bf16.mxu0 %v1134_v49 }
  0x33   : > { %656 = vmatpush1.bf16.msra.mxu1 %v1115_v46 }
  0x34   : > { %657 = vmatprep.subr.bf16.mxu1 %v1118_v47 }
  0x35   : > { %729 = vmatpush1.bf16.msra.mxu0 %v1138_v52 }
  0x37   : > { %658 = vmatpush1.bf16.msra.mxu1 %v1121_v50 }
  0x38   : > { %659 = vmatprep.subr.bf16.mxu1 %v1124_v51  ;;  %739 = vmatmul.mubr.bf16.vlgmr.msra.gmra.mrb[0].mxu0 %v1140_v55 }
  0x39   : > { %993 = vmatprep.mubr.msk.bf16.mxu0 %vm620_vm0, %v1146_v56 }
  0x3b   : > { %660 = vmatpush1.bf16.msra.mxu1 %v1127_v53 }
  0x3c   : > { %661 = vmatprep.subr.bf16.mxu1 %v1130_v54 }
  0x3f   : > { %662 = vmatpush1.bf16.msra.mxu1 %v1133_v57 }
  0x40   : > { %663 = vmatprep.subr.bf16.mxu1 %v1136_v58  ;;  %749 = vmatmul.mubr.bf16.gmra.mrb[4].mxu0 %v1150_v60 }
  0x41   : > { %994 = vmatprep.mubr.msk.bf16.mxu0 %vm620_vm0, %v1152_v61 }
  0x43   : > { %664 = vmatpush1.bf16.msra.mxu1 %v1139_v59 }
  0x46   : > { %666 = vmatmul.mubr.bf16.vlgmr.msra.gmra.mrb[0].mxu1 %v1143_v62 }
  0x47   : > { %675 = vmatprep.mubr.bf16.mxu1 %v1148_v63 }
  0x48   : > { %759 = vmatmul.mubr.bf16.gmra.mrb[8].mxu0 %v1156_v0 }
  0x49   : > { %995 = vmatprep.mubr.msk.bf16.mxu0 %vm620_vm0, %v1158_v1 }
  0x4e   : > { %676 = vmatmul.mubr.bf16.gmra.mrb[4].mxu1 %v1151_v2 }
  0x4f   : > { %685 = vmatprep.mubr.bf16.mxu1 %v1154_v3 }
  0x50   : > { %769 = vmatmul.mubr.bf16.gmra.mrb[12].mxu0 %v1162_v4 }
  0x56   : > { %686 = vmatmul.mubr.bf16.gmra.mrb[8].mxu1 %v1157_v5 }
  0x57   : > { %695 = vmatprep.mubr.bf16.mxu1 %v1160_v6 }
  0x5e   : > { %696 = vmatmul.mubr.bf16.gmra.mrb[12].mxu1 %v1163_v7 }
 0x10b   : > { %v740_v10 = vpop.f32.mrb[0].mxu0 }
 0x10c   : > { %v742_v11 = vpop.f32.mrb[1].mxu0 }
 0x10d   : > { %v744_v12 = vpop.f32.mrb[2].mxu0 }
 0x10e   : > { %v746_v14 = vpop.f32.mrb[3].mxu0 }
 0x113   : > { %v750_v19 = vpop.f32.mrb[4].mxu0 }
 0x114   : > { %v752_v20 = vpop.f32.mrb[5].mxu0 }
 0x115   : > { %v754_v22 = vpop.f32.mrb[6].mxu0 }
 0x116   : > { %v756_v25 = vpop.f32.mrb[7].mxu0 }
 0x119   : > { %v667_v21 = vpop.f32.mrb[0].mxu1 }
 0x11a   : > { %v668_v23 = vadd.f32 %v667_v21, %v1401_v17  ;;  %v669_v24 = vpop.f32.mrb[1].mxu1 }
 0x11b   : > { %v670_v26 = vadd.f32 %v669_v24, %v1403_v18  ;;  %v671_v27 = vpop.f32.mrb[2].mxu1  ;;  %v760_v37 = vpop.f32.mrb[8].mxu0 }
 0x11c   : > { %v741_v28 = vadd.f32 %v740_v10, %v668_v23  ;;  %v672_v29 = vadd.f32 %v671_v27, %v1401_v17  ;;  %v673_v30 = vpop.f32.mrb[3].mxu1  ;;  %v762_v39 = vpop.f32.mrb[9].mxu0 }
 0x11d   : > { %v743_v31 = vadd.f32 %v742_v11, %v670_v26  ;;  %v674_v32 = vadd.f32 %v673_v30, %v1403_v18  ;;  %v764_v43 = vpop.f32.mrb[10].mxu0 }
 0x11e   : > { %v779_v33 = vmax.f32 %v741_v28, 0.0  ;;  %v745_v34 = vadd.f32 %v744_v12, %v672_v29  ;;  %v766_v46 = vpop.f32.mrb[11].mxu0 }
 0x11f   : > { %v780_v35 = vmax.f32 %v743_v31, 0.0  ;;  %v747_v36 = vadd.f32 %v746_v14, %v674_v32 }
 0x120   : > { %v781_v38 = vmax.f32 %v745_v34, 0.0 }
 0x121   : > { %v1008_v40 = vpack.c.bf16 %v780_v35, %v779_v33  ;;  %v782_v41 = vmax.f32 %v747_v36, 0.0  ;;  %v677_v42 = vpop.f32.mrb[4].mxu1 }
 0x122   : > { %v678_v44 = vadd.f32 %v677_v42, %v1401_v17  ;;  %v679_v45 = vpop.f32.mrb[5].mxu1 }
 0x123   : > { %843 = vst [vmem:[%s1413_s9] sm:$0xff] %v1008_v40  ;;  %v1009_v47 = vpack.c.bf16 %v782_v41, %v781_v38  ;;  %v680_v48 = vadd.f32 %v679_v45, %v1403_v18  ;;  %v681_v49 = vpop.f32.mrb[6].mxu1  ;;  %v770_v59 = vpop.f32.mrb[12].mxu0 }
 0x124   : > { %v751_v50 = vadd.f32 %v750_v19, %v678_v44  ;;  %v682_v51 = vadd.f32 %v681_v49, %v1401_v17  ;;  %v683_v52 = vpop.f32.mrb[7].mxu1  ;;  %v772_v61 = vpop.f32.mrb[13].mxu0 }
 0x125   : > { %844 = vst [vmem:[%s1413_s9 + $0x8] sm:$0xff] %v1009_v47  ;;  %v753_v53 = vadd.f32 %v752_v20, %v680_v48  ;;  %v684_v54 = vadd.f32 %v683_v52, %v1403_v18  ;;  %v774_v1 = vpop.f32.mrb[14].mxu0 }
 0x126   : > { %v783_v55 = vmax.f32 %v751_v50, 0.0  ;;  %v755_v56 = vadd.f32 %v754_v22, %v682_v51  ;;  %v776_v4 = vpop.f32.mrb[15].mxu0 }
 0x127   : > { %v784_v57 = vmax.f32 %v753_v53, 0.0  ;;  %v757_v58 = vadd.f32 %v756_v25, %v684_v54 }
 0x128   : > { %v785_v60 = vmax.f32 %v755_v56, 0.0 }
 0x129   : > { %v1010_v62 = vpack.c.bf16 %v784_v57, %v783_v55  ;;  %v786_v63 = vmax.f32 %v757_v58, 0.0  ;;  %v687_v0 = vpop.f32.mrb[8].mxu1 }
 0x12a   : > { %v688_v2 = vadd.f32 %v687_v0, %v1401_v17  ;;  %v689_v3 = vpop.f32.mrb[9].mxu1 }
 0x12b   : > { %845 = vst [vmem:[%s1413_s9 + $0x10] sm:$0xff] %v1010_v62  ;;  %v1011_v5 = vpack.c.bf16 %v786_v63, %v785_v60  ;;  %v690_v6 = vadd.f32 %v689_v3, %v1403_v18  ;;  %v691_v7 = vpop.f32.mrb[10].mxu1 }
 0x12c   : > { %v761_v8 = vadd.f32 %v760_v37, %v688_v2  ;;  %v692_v9 = vadd.f32 %v691_v7, %v1401_v17  ;;  %v693_v10 = vpop.f32.mrb[11].mxu1 }
 0x12d   : > { %846 = vst [vmem:[%s1413_s9 + $0x18] sm:$0xff] %v1011_v5  ;;  %v763_v11 = vadd.f32 %v762_v39, %v690_v6  ;;  %v694_v12 = vadd.f32 %v693_v10, %v1403_v18 }
 0x12e   : > { %v787_v13 = vmax.f32 %v761_v8, 0.0  ;;  %v765_v14 = vadd.f32 %v764_v43, %v692_v9 }
 0x12f   : > { %v788_v15 = vmax.f32 %v763_v11, 0.0  ;;  %v767_v16 = vadd.f32 %v766_v46, %v694_v12 }
 0x130   : > { %v789_v19 = vmax.f32 %v765_v14, 0.0 }
 0x131   : > { %v1012_v20 = vpack.c.bf16 %v788_v15, %v787_v13  ;;  %v790_v21 = vmax.f32 %v767_v16, 0.0  ;;  %v697_v22 = vpop.f32.mrb[12].mxu1 }
 0x132   : > { %v698_v23 = vadd.f32 %v697_v22, %v1401_v17  ;;  %v699_v24 = vpop.f32.mrb[13].mxu1 }
 0x133   : > { %847 = vst [vmem:[%s1413_s9 + $0x20] sm:$0xff] %v1012_v20  ;;  %v1013_v25 = vpack.c.bf16 %v790_v21, %v789_v19  ;;  %v700_v26 = vadd.f32 %v699_v24, %v1403_v18  ;;  %v701_v27 = vpop.f32.mrb[14].mxu1 }
 0x134   : > { %v771_v28 = vadd.f32 %v770_v59, %v698_v23  ;;  %v702_v29 = vadd.f32 %v701_v27, %v1401_v17  ;;  %v703_v30 = vpop.f32.mrb[15].mxu1 }
 0x135   : > { %848 = vst [vmem:[%s1413_s9 + $0x28] sm:$0xff] %v1013_v25  ;;  %v773_v31 = vadd.f32 %v772_v61, %v700_v26  ;;  %v704_v32 = vadd.f32 %v703_v30, %v1403_v18 }
 0x136   : > { %v791_v33 = vmax.f32 %v771_v28, 0.0  ;;  %v775_v34 = vadd.f32 %v774_v1, %v702_v29 }
 0x137   : > { %v792_v35 = vmax.f32 %v773_v31, 0.0  ;;  %v777_v36 = vadd.f32 %v776_v4, %v704_v32 }
 0x138   : > { %v793_v37 = vmax.f32 %v775_v34, 0.0 }
 0x139   : > { %v1014_v38 = vpack.c.bf16 %v792_v35, %v791_v33  ;;  %v794_v39 = vmax.f32 %v777_v36, 0.0 }
 0x13b   : > { %849 = vst [vmem:[%s1413_s9 + $0x30] sm:$0xff] %v1014_v38  ;;  %v1015_v40 = vpack.c.bf16 %v794_v39, %v793_v37 }
 0x13d   : > { %850 = vst [vmem:[%s1413_s9 + $0x38] sm:$0xff] %v1015_v40 }
 0x13e PF: > { %s13_s12 = sadd.s32 1, %s1170_s12  }
 0x13f   : > { %p10_p4 = scmp.ge.s32.totalorder %s13_s12, 6  }
 0x141   :  { %12 = sbr.rel (!%p10_p4) target bundleno = 1 (0x1), region = 62 }

// kernel: flownet3d_forward.31
= control target key start
LH: loop header
LB: loop body
LE: loop exit
PB: predicated region body
PF: predicated region fallthrough
CT: control target
= control target key end

     0   :  { %s1538_s24 = smov 0   ;;  %s1877_s0 = inlined_call_operand.vmem [shape: bf16[256,256], index: 0, kind: input, shape index: {}]   ;;  %s1878_s1 = inlined_call_operand.vmem [shape: bf16[256,256], index: 1, kind: input, shape index: {}]   ;;  %s1879_s2 = inlined_call_operand.vmem [shape: bf16[256,256], index: 2, kind: input, shape index: {}]   ;;  %s1880_s3 = inlined_call_operand.vmem [shape: bf16[256,128], index: 3, kind: input, shape index: {}]   ;;  %s1881_s4 = inlined_call_operand.vmem [shape: f32[1,256], index: 4, kind: input, shape index: {}]   ;;  %s1882_s5 = inlined_call_operand.vmem [shape: f32[1,256], index: 5, kind: input, shape index: {}]   ;;  %s1883_s6 = inlined_call_operand.vmem [shape: f32[1,128], index: 6, kind: input, shape index: {}]   ;;  %s1884_s7 = inlined_call_operand.vmem [shape: f32[256,128], index: 7, kind: output, shape index: {}]  }
   0x1 LB: > { %s1200_s25 = sadd.s32 4294967295, %s1496_s24   ;;  %p1204_p0 = scmp.ge.s32.totalorder %s1496_s24, 1  ;;  %s1496_s24 = sphi %s1538_s24, %s17_s24  }
   0x2   : > { %p239_p1 = scmp.lt.s32.totalorder %s1496_s24, 5 }
   0x4   : > { %p240_p2 = pnand %p1204_p0, %p239_p1 }
   0x5   : > { %v1366_v0 = vld [vmem:[%s1878_s1 + $0x4] ss:$8 sps:$4 sm:$0xff] (!%p240_p2)   ;;  %v1368_v1 = vld [vmem:[%s1878_s1] ss:$8 sps:$4 sm:$0xff] (!%p240_p2)   ;;  %v1369_v2 = vld [vmem:[%s1878_s1 + $0x14] ss:$8 sps:$4 sm:$0xff] (!%p240_p2)  }
   0x6   : > { %243 = sbr.rel (%p240_p2) target bundleno = 758 (0x2f6), region = 48  ;;  %538 = vmatprep.subr.bf16.mxu0 (!%p240_p2), %v1366_v0  ;;  %v1371_v3 = vld [vmem:[%s1878_s1 + $0x10] ss:$8 sps:$4 sm:$0xff] (!%p240_p2)   ;;  %v1372_v4 = vld [vmem:[%s1878_s1 + $0x24] ss:$8 sps:$4 sm:$0xff] (!%p240_p2)   ;;  %s1205_s13 = sshll.u32 (!%p240_p2), %s1200_s25, 3 }
   0x7   : > { %539 = vmatpush1.bf16.msra.mxu0 (!%p240_p2), %v1368_v1  ;;  %v1374_v5 = vld [vmem:[%s1878_s1 + $0x20] ss:$8 sps:$4 sm:$0xff] (!%p240_p2)   ;;  %v1375_v6 = vld [vmem:[%s1878_s1 + $0x34] ss:$8 sps:$4 sm:$0xff] (!%p240_p2)   ;;  %p273_p3 = scmp.lt.s32.totalorder (!%p240_p2), %s1205_s13, 31 }
   0x8   : > { %540 = vmatprep.subr.bf16.mxu0 (!%p240_p2), %v1369_v2  ;;  %v1377_v7 = vld [vmem:[%s1878_s1 + $0x30] ss:$8 sps:$4 sm:$0xff] (!%p240_p2)   ;;  %v1378_v8 = vld [vmem:[%s1878_s1 + $0x44] ss:$8 sps:$4 sm:$0xff] (!%p240_p2)   ;;  %v1380_v9 = vld [vmem:[%s1878_s1 + $0x40] ss:$8 sps:$4 sm:$0xff] (!%p240_p2)  }
   0x9   : > { %v1381_v10 = vld [vmem:[%s1878_s1 + $0x54] ss:$8 sps:$4 sm:$0xff] (!%p240_p2)   ;;  %v1383_v11 = vld [vmem:[%s1878_s1 + $0x50] ss:$8 sps:$4 sm:$0xff] (!%p240_p2)   ;;  %v1384_v12 = vld [vmem:[%s1878_s1 + $0x64] ss:$8 sps:$4 sm:$0xff] (!%p240_p2)  }
   0xa   : > { %v1386_v14 = vld [vmem:[%s1878_s1 + $0x60] ss:$8 sps:$4 sm:$0xff] (!%p240_p2)   ;;  %v1387_v15 = vld [vmem:[%s1878_s1 + $0x74] ss:$8 sps:$4 sm:$0xff] (!%p240_p2)   ;;  %v1389_v16 = vld [vmem:[%s1878_s1 + $0x70] ss:$8 sps:$4 sm:$0xff] (!%p240_p2)  }
   0xb   : > { %541 = vmatpush1.bf16.msra.mxu0 (!%p240_p2), %v1371_v3  ;;  %v1390_v17 = vld [vmem:[%s1878_s1 + $0x84] ss:$8 sps:$4 sm:$0xff] (!%p240_p2)   ;;  %v1428_v19 = vld [vmem:[%s1879_s2] ss:$8 sps:$4 sm:$0xff] (!%p240_p2)   ;;  %v1429_v20 = vld [vmem:[%s1879_s2 + $0x14] ss:$8 sps:$4 sm:$0xff] (!%p240_p2)  }
   0xc   : > { %542 = vmatprep.subr.bf16.mxu0 (!%p240_p2), %v1372_v4  ;;  %v1426_v18 = vld [vmem:[%s1879_s2 + $0x4] ss:$8 sps:$4 sm:$0xff] (!%p240_p2)   ;;  %v1431_v21 = vld [vmem:[%s1879_s2 + $0x10] ss:$8 sps:$4 sm:$0xff] (!%p240_p2)   ;;  %v1392_v22 = vld [vmem:[%s1878_s1 + $0x80] ss:$8 sps:$4 sm:$0xff] (!%p240_p2)  }
   0xd   : > { %s1886_s13 = smov (!%p273_p3, %s1205_s13), 31  ;;  %839 = vmatprep.subr.bf16.mxu1 %v1426_v18  ;;  %v1432_v23 = vld [vmem:[%s1879_s2 + $0x24] ss:$8 sps:$4 sm:$0xff]   ;;  %v1393_v24 = vld [vmem:[%s1878_s1 + $0x94] ss:$8 sps:$4 sm:$0xff]  }
   0xe   : > { %s1301_s27 = sshll.u32 %s1886_s13, 3  ;;  %840 = vmatpush1.bf16.msra.mxu1 %v1428_v19  ;;  %v1434_v25 = vld [vmem:[%s1879_s2 + $0x20] ss:$8 sps:$4 sm:$0xff]   ;;  %v1395_v26 = vld [vmem:[%s1878_s1 + $0x90] ss:$8 sps:$4 sm:$0xff]   ;;  %v328_v19 = vlaneseq }
   0xf   : > { %543 = vmatpush1.bf16.msra.mxu0 %v1374_v5  ;;  %s1590_s9 = scalar_lea.vmem %s1877_s0, %s1301_s27  ;;  %841 = vmatprep.subr.bf16.mxu1 %v1429_v20  ;;  %v1435_v27 = vld [vmem:[%s1879_s2 + $0x34] ss:$8 sps:$4 sm:$0xff]   ;;  %v1396_v28 = vld [vmem:[%s1878_s1 + $0xa4] ss:$8 sps:$4 sm:$0xff]   ;;  %v1437_v29 = vld [vmem:[%s1879_s2 + $0x30] ss:$8 sps:$4 sm:$0xff]   ;;  %s1864_s19 = scalar_lea.vmem %s1884_s7, %s1301_s27 }
  0x10   : > { %544 = vmatprep.subr.bf16.mxu0 %v1375_v6  ;;  %v1416_v13 = vld [vmem:[%s1590_s9 + $0x4] ss:$8 sps:$4 sm:$0xff]   ;;  %v1398_v30 = vld [vmem:[%s1878_s1 + $0xa0] ss:$8 sps:$4 sm:$0xff]   ;;  %v1399_v32 = vld [vmem:[%s1878_s1 + $0xb4] ss:$8 sps:$4 sm:$0xff]  }
  0x11   : > { %570 = vmatprep.mubr.bf16.mxu0 %v1416_v13  ;;  %v1438_v31 = vld [vmem:[%s1879_s2 + $0x44] ss:$8 sps:$4 sm:$0xff]   ;;  %v1401_v33 = vld [vmem:[%s1878_s1 + $0xb0] ss:$8 sps:$4 sm:$0xff]   ;;  %v1440_v34 = vld [vmem:[%s1879_s2 + $0x40] ss:$8 sps:$4 sm:$0xff]  }
  0x12   : > { %842 = vmatpush1.bf16.msra.mxu1 %v1431_v21  ;;  %v1402_v35 = vld [vmem:[%s1878_s1 + $0xc4] ss:$8 sps:$4 sm:$0xff]   ;;  %v1441_v36 = vld [vmem:[%s1879_s2 + $0x54] ss:$8 sps:$4 sm:$0xff]   ;;  %v1443_v37 = vld [vmem:[%s1879_s2 + $0x50] ss:$8 sps:$4 sm:$0xff]  }
  0x13   : > { %545 = vmatpush1.bf16.msra.mxu0 %v1377_v7  ;;  %843 = vmatprep.subr.bf16.mxu1 %v1432_v23  ;;  %v1404_v38 = vld [vmem:[%s1878_s1 + $0xc0] ss:$8 sps:$4 sm:$0xff]   ;;  %v1444_v39 = vld [vmem:[%s1879_s2 + $0x64] ss:$8 sps:$4 sm:$0xff]   ;;  %v1405_v40 = vld [vmem:[%s1878_s1 + $0xd4] ss:$8 sps:$4 sm:$0xff]  }
  0x14   : > { %546 = vmatprep.subr.bf16.mxu0 %v1378_v8  ;;  %v1446_v41 = vld [vmem:[%s1879_s2 + $0x60] ss:$8 sps:$4 sm:$0xff]   ;;  %v1407_v42 = vld [vmem:[%s1878_s1 + $0xd0] ss:$8 sps:$4 sm:$0xff]   ;;  %v1447_v43 = vld [vmem:[%s1879_s2 + $0x74] ss:$8 sps:$4 sm:$0xff]  }
  0x15   : > { %v1408_v44 = vld [vmem:[%s1878_s1 + $0xe4] ss:$8 sps:$4 sm:$0xff]   ;;  %v1449_v45 = vld [vmem:[%s1879_s2 + $0x70] ss:$8 sps:$4 sm:$0xff]   ;;  %v1410_v46 = vld [vmem:[%s1878_s1 + $0xe0] ss:$8 sps:$4 sm:$0xff]  }
  0x16   : > { %844 = vmatpush1.bf16.msra.mxu1 %v1434_v25  ;;  %v1450_v47 = vld [vmem:[%s1879_s2 + $0x84] ss:$8 sps:$4 sm:$0xff]   ;;  %v1411_v48 = vld [vmem:[%s1878_s1 + $0xf4] ss:$8 sps:$4 sm:$0xff]   ;;  %v1452_v49 = vld [vmem:[%s1879_s2 + $0x80] ss:$8 sps:$4 sm:$0xff]  }
  0x17   : > { %547 = vmatpush1.bf16.msra.mxu0 %v1380_v9  ;;  %845 = vmatprep.subr.bf16.mxu1 %v1435_v27  ;;  %v1413_v50 = vld [vmem:[%s1878_s1 + $0xf0] ss:$8 sps:$4 sm:$0xff]   ;;  %v1453_v51 = vld [vmem:[%s1879_s2 + $0x94] ss:$8 sps:$4 sm:$0xff]   ;;  %v1414_v52 = vld [vmem:[%s1590_s9] ss:$8 sps:$4 sm:$0xff]  }
  0x18   : > { %548 = vmatprep.subr.bf16.mxu0 %v1381_v10  ;;  %v1455_v53 = vld [vmem:[%s1879_s2 + $0x90] ss:$8 sps:$4 sm:$0xff]   ;;  %v1417_v54 = vld [vmem:[%s1590_s9 + $0x14] ss:$8 sps:$4 sm:$0xff]   ;;  %v1456_v55 = vld [vmem:[%s1879_s2 + $0xa4] ss:$8 sps:$4 sm:$0xff]  }
  0x19   : > { %v1458_v56 = vld [vmem:[%s1879_s2 + $0xa0] ss:$8 sps:$4 sm:$0xff]   ;;  %v1459_v57 = vld [vmem:[%s1879_s2 + $0xb4] ss:$8 sps:$4 sm:$0xff]   ;;  %v1419_v58 = vld [vmem:[%s1590_s9 + $0x10] ss:$8 sps:$4 sm:$0xff]  }
  0x1a   : > { %846 = vmatpush1.bf16.msra.mxu1 %v1437_v29  ;;  %v1461_v59 = vld [vmem:[%s1879_s2 + $0xb0] ss:$8 sps:$4 sm:$0xff]   ;;  %v1420_v60 = vld [vmem:[%s1590_s9 + $0x24] ss:$8 sps:$4 sm:$0xff]   ;;  %v1464_v62 = vld [vmem:[%s1879_s2 + $0xc0] ss:$8 sps:$4 sm:$0xff]  }
  0x1b   : > { %549 = vmatpush1.bf16.msra.mxu0 %v1383_v11  ;;  %847 = vmatprep.subr.bf16.mxu1 %v1438_v31  ;;  %v1462_v61 = vld [vmem:[%s1879_s2 + $0xc4] ss:$8 sps:$4 sm:$0xff]   ;;  %v1465_v63 = vld [vmem:[%s1879_s2 + $0xd4] ss:$8 sps:$4 sm:$0xff]   ;;  %v1422_v0 = vld [vmem:[%s1590_s9 + $0x20] ss:$8 sps:$4 sm:$0xff]  }
  0x1c   : > { %550 = vmatprep.subr.bf16.mxu0 %v1384_v12  ;;  %v1423_v1 = vld [vmem:[%s1590_s9 + $0x34] ss:$8 sps:$4 sm:$0xff]   ;;  %v1425_v2 = vld [vmem:[%s1590_s9 + $0x30] ss:$8 sps:$4 sm:$0xff]   ;;  %v1468_v4 = vld [vmem:[%s1879_s2 + $0xe4] ss:$8 sps:$4 sm:$0xff]  }
  0x1d   : > { %v1467_v3 = vld [vmem:[%s1879_s2 + $0xd0] ss:$8 sps:$4 sm:$0xff]   ;;  %v1470_v5 = vld [vmem:[%s1879_s2 + $0xe0] ss:$8 sps:$4 sm:$0xff]   ;;  %v1471_v6 = vld [vmem:[%s1879_s2 + $0xf4] ss:$8 sps:$4 sm:$0xff]  }
  0x1e   : > { %848 = vmatpush1.bf16.msra.mxu1 %v1440_v34  ;;  %v1473_v7 = vld [vmem:[%s1879_s2 + $0xf0] ss:$8 sps:$4 sm:$0xff]   ;;  %v1474_v8 = vld [vmem:[%s1880_s3 + $0x40] sm:$0xff]   ;;  %v1476_v10 = vld [vmem:[%s1880_s3 + $0x48] sm:$0xff]   ;;  %v1807_v20 = vshrl.u32 %v328_v19, 7 }
  0x1f   : > { %551 = vmatpush1.bf16.msra.mxu0 %v1386_v14  ;;  %849 = vmatprep.subr.bf16.mxu1 %v1441_v36  ;;  %v1475_v9 = vld [vmem:[%s1880_s3] sm:$0xff]   ;;  %v1477_v11 = vld [vmem:[%s1880_s3 + $0x8] sm:$0xff]   ;;  %v1478_v12 = vld [vmem:[%s1880_s3 + $0x50] sm:$0xff]  }
  0x20   : > { %552 = vmatprep.subr.bf16.mxu0 %v1387_v15  ;;  %v1774_v13 = vld [vmem:[%s1880_s3 + $0x10] sm:$0xff]   ;;  %v1779_v14 = vld [vmem:[%s1880_s3 + $0x58] sm:$0xff]   ;;  %v1803_v18 = vld [vmem:[%s1880_s3 + $0x68] sm:$0xff]   ;;  %v330_v21 = vsub.s32 0, %v1807_v20  ;;  %v334_v23 = vsub.s32 1, %v1807_v20 }
  0x21   : > { %v1785_v15 = vld [vmem:[%s1880_s3 + $0x18] sm:$0xff]  }
  0x22   : > { %850 = vmatpush1.bf16.msra.mxu1 %v1443_v37 }
  0x23   : > { %553 = vmatpush1.bf16.msra.mxu0 %v1389_v16  ;;  %851 = vmatprep.subr.bf16.mxu1 %v1444_v39  ;;  %v1791_v16 = vld [vmem:[%s1880_s3 + $0x60] sm:$0xff]  }
  0x24   : > { %554 = vmatprep.subr.bf16.mxu0 %v1390_v17  ;;  %v1797_v17 = vld [vmem:[%s1880_s3 + $0x20] sm:$0xff]  }
  0x26   : > { %852 = vmatpush1.bf16.msra.mxu1 %v1446_v41 }
  0x27   : > { %555 = vmatpush1.bf16.msra.mxu0 %v1392_v22  ;;  %853 = vmatprep.subr.bf16.mxu1 %v1447_v43  ;;  %v326_v22 = vld [vmem:[%s1881_s4] sm:$0x3] }
  0x28   : > { %556 = vmatprep.subr.bf16.mxu0 %v1393_v24  ;;  %v331_v24 = vrot.slane %v326_v22, %v330_v21  ;;  %v1818_v25 = vrot.slane %v326_v22, %v334_v23 }
  0x2a   : > { %854 = vmatpush1.bf16.msra.mxu1 %v1449_v45 }
  0x2b   : > { %557 = vmatpush1.bf16.msra.mxu0 %v1395_v26  ;;  %855 = vmatprep.subr.bf16.mxu1 %v1450_v47 }
  0x2c   : > { %558 = vmatprep.subr.bf16.mxu0 %v1396_v28 }
  0x2e   : > { %856 = vmatpush1.bf16.msra.mxu1 %v1452_v49 }
  0x2f   : > { %559 = vmatpush1.bf16.msra.mxu0 %v1398_v30  ;;  %857 = vmatprep.subr.bf16.mxu1 %v1453_v51 }
  0x30   : > { %560 = vmatprep.subr.bf16.mxu0 %v1399_v32 }
  0x32   : > { %858 = vmatpush1.bf16.msra.mxu1 %v1455_v53 }
  0x33   : > { %561 = vmatpush1.bf16.msra.mxu0 %v1401_v33  ;;  %859 = vmatprep.subr.bf16.mxu1 %v1456_v55 }
  0x34   : > { %562 = vmatprep.subr.bf16.mxu0 %v1402_v35 }
  0x36   : > { %860 = vmatpush1.bf16.msra.mxu1 %v1458_v56 }
  0x37   : > { %563 = vmatpush1.bf16.msra.mxu0 %v1404_v38  ;;  %861 = vmatprep.subr.bf16.mxu1 %v1459_v57 }
  0x38   : > { %564 = vmatprep.subr.bf16.mxu0 %v1405_v40 }
  0x3a   : > { %862 = vmatpush1.bf16.msra.mxu1 %v1461_v59 }
  0x3b   : > { %565 = vmatpush1.bf16.msra.mxu0 %v1407_v42  ;;  %863 = vmatprep.subr.bf16.mxu1 %v1462_v61 }
  0x3c   : > { %566 = vmatprep.subr.bf16.mxu0 %v1408_v44 }
  0x3e   : > { %864 = vmatpush1.bf16.msra.mxu1 %v1464_v62 }
  0x3f   : > { %567 = vmatpush1.bf16.msra.mxu0 %v1410_v46  ;;  %865 = vmatprep.subr.bf16.mxu1 %v1465_v63 }
  0x40   : > { %568 = vmatprep.subr.bf16.mxu0 %v1411_v48 }
  0x42   : > { %866 = vmatpush1.bf16.msra.mxu1 %v1467_v3 }
  0x43   : > { %569 = vmatpush1.bf16.msra.mxu0 %v1413_v50  ;;  %867 = vmatprep.subr.bf16.mxu1 %v1468_v4 }
  0x44   : > { %1302 = vmatprep.subr.bf16.mxu0 %v1474_v8 }
  0x46   : > { %571 = vmatmul.mubr.bf16.vlgmr.msra.gmra.mrb[0].mxu0 %v1414_v52  ;;  %868 = vmatpush1.bf16.msra.mxu1 %v1470_v5 }
  0x47   : > { %580 = vmatprep.mubr.bf16.mxu0 %v1417_v54  ;;  %869 = vmatprep.subr.bf16.mxu1 %v1471_v6 }
  0x48   : > { %1303 = vmatpush3.bf16.msra.mxu0 %v1475_v9 }
  0x49   : > { %1304 = vmatprep.subr.bf16.mxu0 %v1476_v10 }
  0x4a   : > { %870 = vmatpush1.bf16.msra.mxu1 %v1473_v7 }
  0x4b   : > { %1342 = vmatprep.subr.bf16.mxu1 %v1474_v8 }
  0x4c   : > { %1305 = vmatpush3.bf16.msra.mxu0 %v1477_v11 }
  0x4d   : > { %1306 = vmatprep.subr.bf16.mxu0 %v1478_v12 }
  0x4e   : > { %581 = vmatmul.mubr.bf16.gmra.mrb[4].mxu0 %v1419_v58 }
  0x4f   : > { %590 = vmatprep.mubr.bf16.mxu0 %v1420_v60 }
  0x50   : > { %1307 = vmatpush3.bf16.msra.mxu0 %v1774_v13 }
  0x51   : > { %1308 = vmatprep.subr.bf16.mxu0 %v1779_v14 }
  0x54   : > { %1309 = vmatpush3.bf16.msra.mxu0 %v1785_v15 }
  0x55   : > { %1310 = vmatprep.subr.bf16.mxu0 %v1791_v16 }
  0x56   : > { %591 = vmatmul.mubr.bf16.gmra.mrb[8].mxu0 %v1422_v0 }
  0x57   : > { %600 = vmatprep.mubr.bf16.mxu0 %v1423_v1 }
  0x58   : > { %1311 = vmatpush3.bf16.msra.mxu0 %v1797_v17 }
  0x59   : > { %1312 = vmatprep.subr.bf16.mxu0 %v1803_v18 }
  0x5e   : > { %601 = vmatmul.mubr.bf16.gmra.mrb[12].mxu0 %v1425_v2 }
 0x119   : > { %v572_v26 = vpop.f32.mrb[0].mxu0 }
 0x11a   : > { %v573_v27 = vadd.f32 %v572_v26, %v331_v24  ;;  %v574_v28 = vpop.f32.mrb[1].mxu0  ;;  %v667_v26 = vld [vmem:[%s1882_s5] sm:$0x3] }
 0x11b   : > { %v575_v29 = vadd.f32 %v574_v28, %v1818_v25  ;;  %v576_v30 = vpop.f32.mrb[2].mxu0  ;;  %v676_v28 = vrot.slane %v667_v26, %v334_v23 }
 0x11c   : > { %v577_v31 = vadd.f32 %v576_v30, %v331_v24  ;;  %v578_v32 = vpop.f32.mrb[3].mxu0  ;;  %v611_v34 = vmax.f32 %v573_v27, 0.0  ;;  %v672_v27 = vrot.slane %v667_v26, %v330_v21 }
 0x11d   : > { %v579_v33 = vadd.f32 %v578_v32, %v1818_v25  ;;  %v612_v36 = vmax.f32 %v575_v29, 0.0 }
 0x11e   : > { %v613_v35 = vmax.f32 %v577_v31, 0.0 }
 0x11f   : > { %v614_v37 = vmax.f32 %v579_v33, 0.0 }
 0x120   : > { %v627_v38 = vpack.c.bf16 %v613_v35, %v611_v34 }
 0x121   : > { %v582_v39 = vpop.f32.mrb[4].mxu0  ;;  %v628_v40 = vpack.c.bf16 %v614_v37, %v612_v36 }
 0x122   : > { %v583_v41 = vadd.f32 %v582_v39, %v331_v24  ;;  %v584_v42 = vpop.f32.mrb[5].mxu0 }
 0x123   : > { %v585_v43 = vadd.f32 %v584_v42, %v1818_v25  ;;  %v586_v44 = vpop.f32.mrb[6].mxu0  ;;  %871 = vmatprep.mubr.bf16.mxu1 %v628_v40 }
 0x124   : > { %v587_v45 = vadd.f32 %v586_v44, %v331_v24  ;;  %v588_v46 = vpop.f32.mrb[7].mxu0  ;;  %872 = vmatmul.mubr.bf16.vlgmr.msra.gmra.mrb[0].mxu1 %v627_v38  ;;  %v615_v48 = vmax.f32 %v583_v41, 0.0 }
 0x125   : > { %v589_v47 = vadd.f32 %v588_v46, %v1818_v25  ;;  %1350 = vmatpush3.bf16.msra.mxu1 %v1475_v9  ;;  %v616_v50 = vmax.f32 %v585_v43, 0.0 }
 0x126   : > { %v617_v49 = vmax.f32 %v587_v45, 0.0  ;;  %1343 = vmatprep.subr.bf16.mxu1 %v1476_v10 }
 0x127   : > { %v618_v51 = vmax.f32 %v589_v47, 0.0 }
 0x128   : > { %v629_v52 = vpack.c.bf16 %v617_v49, %v615_v48 }
 0x129   : > { %v630_v53 = vpack.c.bf16 %v618_v51, %v616_v50  ;;  %v592_v54 = vpop.f32.mrb[8].mxu0  ;;  %1351 = vmatpush3.bf16.msra.mxu1 %v1477_v11 }
 0x12a   : > { %v593_v55 = vadd.f32 %v592_v54, %v331_v24  ;;  %v594_v56 = vpop.f32.mrb[9].mxu0  ;;  %1344 = vmatprep.subr.bf16.mxu1 %v1478_v12 }
 0x12b   : > { %v595_v57 = vadd.f32 %v594_v56, %v1818_v25  ;;  %v596_v58 = vpop.f32.mrb[10].mxu0  ;;  %881 = vmatprep.mubr.bf16.mxu1 %v630_v53 }
 0x12c   : > { %v597_v59 = vadd.f32 %v596_v58, %v331_v24  ;;  %v598_v60 = vpop.f32.mrb[11].mxu0  ;;  %882 = vmatmul.mubr.bf16.gmra.mrb[4].mxu1 %v629_v52  ;;  %v619_v62 = vmax.f32 %v593_v55, 0.0 }
 0x12d   : > { %v599_v61 = vadd.f32 %v598_v60, %v1818_v25  ;;  %1352 = vmatpush3.bf16.msra.mxu1 %v1774_v13  ;;  %v620_v0 = vmax.f32 %v595_v57, 0.0 }
 0x12e   : > { %v621_v63 = vmax.f32 %v597_v59, 0.0  ;;  %1345 = vmatprep.subr.bf16.mxu1 %v1779_v14 }
 0x12f   : > { %v622_v1 = vmax.f32 %v599_v61, 0.0 }
 0x130   : > { %v631_v2 = vpack.c.bf16 %v621_v63, %v619_v62 }
 0x131   : > { %v632_v3 = vpack.c.bf16 %v622_v1, %v620_v0  ;;  %v602_v4 = vpop.f32.mrb[12].mxu0  ;;  %1353 = vmatpush3.bf16.msra.mxu1 %v1785_v15 }
 0x132   : > { %v603_v5 = vadd.f32 %v602_v4, %v331_v24  ;;  %v604_v6 = vpop.f32.mrb[13].mxu0  ;;  %1346 = vmatprep.subr.bf16.mxu1 %v1791_v16  ;;  %v1485_v16 = vld [vmem:[%s1880_s3 + $0x28] sm:$0xff]  }
 0x133   : > { %v605_v7 = vadd.f32 %v604_v6, %v1818_v25  ;;  %v606_v8 = vpop.f32.mrb[14].mxu0  ;;  %891 = vmatprep.mubr.bf16.mxu1 %v632_v3  ;;  %1313 = vmatpush3.bf16.msra.mxu0 %v1485_v16 }
 0x134   : > { %v607_v9 = vadd.f32 %v606_v8, %v331_v24  ;;  %v608_v10 = vpop.f32.mrb[15].mxu0  ;;  %892 = vmatmul.mubr.bf16.gmra.mrb[8].mxu1 %v631_v2  ;;  %v623_v12 = vmax.f32 %v603_v5, 0.0  ;;  %v1488_v24 = vld [vmem:[%s1880_s3 + $0x78] sm:$0xff]  }
 0x135   : > { %v609_v11 = vadd.f32 %v608_v10, %v1818_v25  ;;  %1354 = vmatpush3.bf16.msra.mxu1 %v1797_v17  ;;  %v624_v14 = vmax.f32 %v605_v7, 0.0  ;;  %v1486_v17 = vld [vmem:[%s1880_s3 + $0x70] sm:$0xff]   ;;  %v1489_v25 = vld [vmem:[%s1880_s3 + $0x38] sm:$0xff]  }
 0x136   : > { %v625_v13 = vmax.f32 %v607_v9, 0.0  ;;  %1347 = vmatprep.subr.bf16.mxu1 %v1803_v18  ;;  %v1487_v18 = vld [vmem:[%s1880_s3 + $0x30] sm:$0xff]   ;;  %1314 = vmatprep.subr.bf16.mxu0 %v1486_v17 }
 0x137   : > { %v626_v15 = vmax.f32 %v609_v11, 0.0  ;;  %1315 = vmatpush3.bf16.msra.mxu0 %v1487_v18 }
 0x138   : > { %v633_v19 = vpack.c.bf16 %v625_v13, %v623_v12  ;;  %1316 = vmatprep.subr.bf16.mxu0 %v1488_v24 }
 0x139   : > { %v634_v22 = vpack.c.bf16 %v626_v15, %v624_v14  ;;  %1355 = vmatpush3.bf16.msra.mxu1 %v1485_v16 }
 0x13a   : > { %1348 = vmatprep.subr.bf16.mxu1 %v1486_v17  ;;  %v1282_v17 = vld [vmem:[%s1883_s6] ss:$0 sm:$0xff] }
 0x13b   : > { %901 = vmatprep.mubr.bf16.mxu1 %v634_v22  ;;  %1317 = vmatpush3.bf16.msra.mxu0 %v1489_v25 }
 0x13c   : > { %902 = vmatmul.mubr.bf16.gmra.mrb[12].mxu1 %v633_v19 }
 0x13d   : > { %1356 = vmatpush3.bf16.msra.mxu1 %v1487_v18 }
 0x13e   : > { %1349 = vmatprep.subr.bf16.mxu1 %v1488_v24 }
 0x141   : > { %1357 = vmatpush3.bf16.msra.mxu1 %v1489_v25 }
 0x1f7   : > { %v873_v29 = vpop.f32.mrb[0].mxu1 }
 0x1f8   : > { %v874_v30 = vadd.f32 %v873_v29, %v672_v27  ;;  %v875_v31 = vpop.f32.mrb[1].mxu1 }
 0x1f9   : > { %v876_v32 = vadd.f32 %v875_v31, %v676_v28  ;;  %v877_v33 = vpop.f32.mrb[2].mxu1 }
 0x1fa   : > { %v878_v34 = vadd.f32 %v877_v33, %v672_v27  ;;  %v879_v35 = vpop.f32.mrb[3].mxu1  ;;  %v912_v37 = vmax.f32 %v874_v30, 0.0 }
 0x1fb   : > { %v880_v36 = vadd.f32 %v879_v35, %v676_v28  ;;  %v913_v39 = vmax.f32 %v876_v32, 0.0 }
 0x1fc   : > { %v914_v38 = vmax.f32 %v878_v34, 0.0 }
 0x1fd   : > { %v915_v40 = vmax.f32 %v880_v36, 0.0 }
 0x1fe   : > { %v928_v41 = vpack.c.bf16 %v914_v38, %v912_v37 }
 0x1ff   : > { %v929_v42 = vpack.c.bf16 %v915_v40, %v913_v39  ;;  %v883_v43 = vpop.f32.mrb[4].mxu1 }
 0x200   : > { %v884_v44 = vadd.f32 %v883_v43, %v672_v27  ;;  %v885_v21 = vpop.f32.mrb[5].mxu1 }
 0x201   : > { %v886_v45 = vadd.f32 %v885_v21, %v676_v28  ;;  %v887_v20 = vpop.f32.mrb[6].mxu1  ;;  %1103 = vmatprep.mubr.bf16.mxu0 %v929_v42 }
 0x202   : > { %v888_v23 = vadd.f32 %v887_v20, %v672_v27  ;;  %v889_v46 = vpop.f32.mrb[7].mxu1  ;;  %1104 = vmatmul.mubr.bf16.vlgmr.msra.gmra.mrb[16].mxu0 %v928_v41  ;;  %v916_v48 = vmax.f32 %v884_v44, 0.0 }
 0x203   : > { %v890_v47 = vadd.f32 %v889_v46, %v676_v28  ;;  %v917_v50 = vmax.f32 %v886_v45, 0.0 }
 0x204   : > { %v918_v49 = vmax.f32 %v888_v23, 0.0 }
 0x205   : > { %v919_v51 = vmax.f32 %v890_v47, 0.0 }
 0x206   : > { %v930_v52 = vpack.c.bf16 %v918_v49, %v916_v48 }
 0x207   : > { %v931_v53 = vpack.c.bf16 %v919_v51, %v917_v50  ;;  %v893_v54 = vpop.f32.mrb[8].mxu1 }
 0x208   : > { %v894_v55 = vadd.f32 %v893_v54, %v672_v27  ;;  %v895_v56 = vpop.f32.mrb[9].mxu1 }
 0x209   : > { %v896_v57 = vadd.f32 %v895_v56, %v676_v28  ;;  %v897_v58 = vpop.f32.mrb[10].mxu1  ;;  %1111 = vmatprep.mubr.bf16.mxu0 %v931_v53 }
 0x20a   : > { %v898_v59 = vadd.f32 %v897_v58, %v672_v27  ;;  %v899_v60 = vpop.f32.mrb[11].mxu1  ;;  %1112 = vmatmul.mubr.bf16.gmra.mrb[20].mxu0 %v930_v52  ;;  %v920_v62 = vmax.f32 %v894_v55, 0.0 }
 0x20b   : > { %v900_v61 = vadd.f32 %v899_v60, %v676_v28  ;;  %v921_v0 = vmax.f32 %v896_v57, 0.0 }
 0x20c   : > { %v922_v63 = vmax.f32 %v898_v59, 0.0 }
 0x20d   : > { %v923_v1 = vmax.f32 %v900_v61, 0.0 }
 0x20e   : > { %v932_v2 = vpack.c.bf16 %v922_v63, %v920_v62 }
 0x20f   : > { %v933_v3 = vpack.c.bf16 %v923_v1, %v921_v0  ;;  %v903_v4 = vpop.f32.mrb[12].mxu1 }
 0x210   : > { %v904_v5 = vadd.f32 %v903_v4, %v672_v27  ;;  %v905_v6 = vpop.f32.mrb[13].mxu1 }
 0x211   : > { %v906_v7 = vadd.f32 %v905_v6, %v676_v28  ;;  %v907_v8 = vpop.f32.mrb[14].mxu1  ;;  %1119 = vmatprep.mubr.bf16.mxu1 %v933_v3 }
 0x212   : > { %v908_v9 = vadd.f32 %v907_v8, %v672_v27  ;;  %v909_v10 = vpop.f32.mrb[15].mxu1  ;;  %1120 = vmatmul.mubr.bf16.vlgmr.msra.gmra.mrb[16].mxu1 %v932_v2  ;;  %v924_v12 = vmax.f32 %v904_v5, 0.0 }
 0x213   : > { %v910_v11 = vadd.f32 %v909_v10, %v676_v28  ;;  %v925_v14 = vmax.f32 %v906_v7, 0.0 }
 0x214   : > { %v926_v13 = vmax.f32 %v908_v9, 0.0 }
 0x215   : > { %v927_v15 = vmax.f32 %v910_v11, 0.0 }
 0x216   : > { %v934_v19 = vpack.c.bf16 %v926_v13, %v924_v12 }
 0x217   : > { %v935_v22 = vpack.c.bf16 %v927_v15, %v925_v14 }
 0x219   : > { %1127 = vmatprep.mubr.bf16.mxu1 %v935_v22 }
 0x21a   : > { %1128 = vmatmul.mubr.bf16.gmra.mrb[20].mxu1 %v934_v19 }
 0x2d5   : > { %v1318_v16 = vpop.f32.mrb[16].mxu0 }
 0x2d6   : > { %v1319_v18 = vpop.f32.mrb[17].mxu0 }
 0x2d7   : > { %v1320_v24 = vadd.f32 %v1319_v18, %v1318_v16  ;;  %v1321_v25 = vpop.f32.mrb[18].mxu0 }
 0x2d8   : > { %v1322_v26 = vpop.f32.mrb[19].mxu0 }
 0x2d9   : > { %v1106_v27 = vadd.f32 %v1320_v24, %v1282_v17  ;;  %v1323_v28 = vadd.f32 %v1322_v26, %v1321_v25 }
 0x2db   : > { %1136 = vst [vmem:[%s1864_s19] sm:$0xff] %v1106_v27  ;;  %v1109_v29 = vadd.f32 %v1323_v28, %v1282_v17 }
 0x2dd   : > { %1137 = vst [vmem:[%s1864_s19 + $0x8] sm:$0xff] %v1109_v29  ;;  %v1324_v30 = vpop.f32.mrb[20].mxu0 }
 0x2de   : > { %v1325_v31 = vpop.f32.mrb[21].mxu0 }
 0x2df   : > { %v1326_v32 = vadd.f32 %v1325_v31, %v1324_v30  ;;  %v1327_v33 = vpop.f32.mrb[22].mxu0 }
 0x2e0   : > { %v1328_v34 = vpop.f32.mrb[23].mxu0 }
 0x2e1   : > { %v1114_v35 = vadd.f32 %v1326_v32, %v1282_v17  ;;  %v1329_v36 = vadd.f32 %v1328_v34, %v1327_v33 }
 0x2e3   : > { %1138 = vst [vmem:[%s1864_s19 + $0x10] sm:$0xff] %v1114_v35  ;;  %v1117_v37 = vadd.f32 %v1329_v36, %v1282_v17 }
 0x2e5   : > { %1139 = vst [vmem:[%s1864_s19 + $0x18] sm:$0xff] %v1117_v37  ;;  %v1330_v38 = vpop.f32.mrb[16].mxu1 }
 0x2e6   : > { %v1331_v39 = vpop.f32.mrb[17].mxu1 }
 0x2e7   : > { %v1332_v40 = vadd.f32 %v1331_v39, %v1330_v38  ;;  %v1333_v41 = vpop.f32.mrb[18].mxu1 }
 0x2e8   : > { %v1334_v42 = vpop.f32.mrb[19].mxu1 }
 0x2e9   : > { %v1122_v43 = vadd.f32 %v1332_v40, %v1282_v17  ;;  %v1335_v44 = vadd.f32 %v1334_v42, %v1333_v41 }
 0x2eb   : > { %1140 = vst [vmem:[%s1864_s19 + $0x20] sm:$0xff] %v1122_v43  ;;  %v1125_v21 = vadd.f32 %v1335_v44, %v1282_v17 }
 0x2ed   : > { %1141 = vst [vmem:[%s1864_s19 + $0x28] sm:$0xff] %v1125_v21  ;;  %v1336_v45 = vpop.f32.mrb[20].mxu1 }
 0x2ee   : > { %v1337_v20 = vpop.f32.mrb[21].mxu1 }
 0x2ef   : > { %v1338_v23 = vadd.f32 %v1337_v20, %v1336_v45  ;;  %v1339_v46 = vpop.f32.mrb[22].mxu1 }
 0x2f0   : > { %v1340_v47 = vpop.f32.mrb[23].mxu1 }
 0x2f1   : > { %v1130_v48 = vadd.f32 %v1338_v23, %v1282_v17  ;;  %v1341_v49 = vadd.f32 %v1340_v47, %v1339_v46 }
 0x2f3   : > { %1142 = vst [vmem:[%s1864_s19 + $0x30] sm:$0xff] %v1130_v48  ;;  %v1133_v50 = vadd.f32 %v1341_v49, %v1282_v17 }
 0x2f5   : > { %1143 = vst [vmem:[%s1864_s19 + $0x38] sm:$0xff] %v1133_v50 }
 0x2f6 PF: > { %s17_s24 = sadd.s32 1, %s1496_s24  }
 0x2f7   : > { %p14_p4 = scmp.ge.s32.totalorder %s17_s24, 6  }
 0x2f9   :  { %16 = sbr.rel (!%p14_p4) target bundleno = 1 (0x1), region = 78 }

</bundles_post_ra>
